<compile_context>
chip_gen: v6e
topology: v6e:2x2x1
jax: 0.10.0
libtpu: 0.0.40
codegen_flags: <defaults>
</compile_context>

<pallas_src>
import functools

import jax
import jax.numpy as jnp
from jax.experimental import pallas as pl
from jax.experimental.pallas import tpu as pltpu

LANE = 128
SUBLANE = 8


def _round_up(x, m):
    return (x + m - 1) // m * m


def _pad_to(a, shape):
    return jnp.pad(a, [(0, s - d) for d, s in zip(a.shape, shape)])


# ----------------------------------------------------------------------------
# Fused kernel: encoder GRU -> decoder GRU + Luong attention -> projection +
# log_softmax.  Everything stays VMEM-resident (total footprint < 2 MiB).
# ----------------------------------------------------------------------------
def _seq2seq_fused_kernel(S, T, B,
                          x_ref, y_ref, attb_ref,
                          enc_wi_ref, enc_wh_ref, enc_bi_ref, enc_bh_ref,
                          dec_wi_ref, dec_wh_ref, dec_bi_ref, dec_bh_ref,
                          watt_ref, batt_ref, wout_ref, bout_ref,
                          out_ref,
                          gi_enc_scr, gi_dec_scr, enc_scr, ht_scr):
    H = watt_ref.shape[-1]
    H2, H3 = 2 * H, 3 * H

    # Hoisted input projections: one wide GEMM per RNN over all timesteps.
    gi_enc_scr[...] = (jnp.dot(x_ref[...], enc_wi_ref[...],
                               preferred_element_type=jnp.float32)
                       + enc_bi_ref[...])
    gi_dec_scr[...] = (jnp.dot(y_ref[...], dec_wi_ref[...],
                               preferred_element_type=jnp.float32)
                       + dec_bi_ref[...])

    # Bias broadcasts hoisted out of the recurrences (JAX does not CSE them).
    enc_bh = jnp.broadcast_to(enc_bh_ref[...], (B, H3))
    dec_bh = jnp.broadcast_to(dec_bh_ref[...], (B, H3))
    b_att = jnp.broadcast_to(batt_ref[...], (B, H))

    def gru_step(h, gi, gh):
        # r/z/n slices sit at 128-lane (vreg-aligned) offsets -> free.
        r = jax.nn.sigmoid(gi[:, :H] + gh[:, :H])
        z = jax.nn.sigmoid(gi[:, H:H2] + gh[:, H:H2])
        n = jnp.tanh(gi[:, H2:] + r * gh[:, H2:])
        return (1.0 - z) * n + z * h

    # --- Encoder GRU: one fused (B,H)x(H,3H) matmul per serial step ---------
    h = jnp.zeros((B, H), jnp.float32)
    for t in range(S):                          # short fixed trip count
        lo = t * B
        gh = jnp.dot(h, enc_wh_ref[...],
                     preferred_element_type=jnp.float32) + enc_bh
        h = gru_step(h, gi_enc_scr[lo:lo + B, :], gh)
        enc_scr[lo:lo + B, :] = h               # dense time-major (B,H) store

    # --- Decoder GRU + Luong dot attention ----------------------------------
    enc = enc_scr[...]                          # (S*B, H) VMEM-resident
    encT = enc.T                                # (H, S*B) hoisted (invariant)
    att_b = attb_ref[...]                       # block-diag batch-mask bias

    for t in range(T):                          # teacher forced
        lo = t * B
        gh = jnp.dot(h, dec_wh_ref[...],
                     preferred_element_type=jnp.float32) + dec_bh
        h = gru_step(h, gi_dec_scr[lo:lo + B, :], gh)

        # One (B,H)x(H,S*B) matmul over ALL encoder rows; the additive bias
        # keeps only this batch row's own timesteps (others -> -1e30).
        scores = jnp.dot(h, encT, preferred_element_type=jnp.float32) + att_b
        m = jnp.max(scores, axis=-1, keepdims=True)
        e = jnp.exp(scores - m)
        p = e / jnp.sum(e, axis=-1, keepdims=True)        # exact softmax
        ctx = jnp.dot(p, enc, preferred_element_type=jnp.float32)      # (B,H)

        # Attention combine as a single K=2H contraction.
        hc = jnp.concatenate([h, ctx], axis=-1)           # lane-128 concat
        h_tilde = jnp.tanh(jnp.dot(hc, watt_ref[...],
                                   preferred_element_type=jnp.float32) + b_att)
        ht_scr[lo:lo + B, :] = h_tilde

    # --- Epilogue: vocab projection + exact log_softmax ---------------------
    logits = (jnp.dot(ht_scr[...], wout_ref[...],
                      preferred_element_type=jnp.float32) + bout_ref[...])
    m = jnp.max(logits, axis=-1, keepdims=True)
    lse = jnp.log(jnp.sum(jnp.exp(logits - m), axis=-1, keepdims=True)) + m
    out_ref[...] = logits - lse


def fused_seq2seq(x_flat, y_flat, att_bias, pp, S, T, B):
    Hp = pp["dec_w_att"].shape[-1]
    Vp = pp["dec_w_out"].shape[-1]
    H3 = 3 * Hp
    return pl.pallas_call(
        functools.partial(_seq2seq_fused_kernel, S, T, B),
        out_shape=jax.ShapeDtypeStruct((T * B, Vp), jnp.float32),
        scratch_shapes=[
            pltpu.VMEM((S * B, H3), jnp.float32),   # encoder gate inputs
            pltpu.VMEM((T * B, H3), jnp.float32),   # decoder gate inputs
            pltpu.VMEM((S * B, Hp), jnp.float32),   # encoder outputs (time-major)
            pltpu.VMEM((T * B, Hp), jnp.float32),   # h_tilde
        ],
        compiler_params=pltpu.CompilerParams(
            vmem_limit_bytes=32 * 1024 * 1024),
    )(x_flat, y_flat, att_bias,
      pp["enc_w_i"], pp["enc_w_h"], pp["enc_b_i"], pp["enc_b_h"],
      pp["dec_w_i"], pp["dec_w_h"], pp["dec_b_i"], pp["dec_b_h"],
      pp["dec_w_att"], pp["dec_b_att"], pp["dec_w_out"], pp["dec_b_out"])


# ----------------------------------------------------------------------------
# Parameter padding + gate/attention-weight fusion (done once, in the wrapper).
# Zero padding everywhere; -1e30 bias on padded vocab columns keeps the
# softmax denominator exact.
# ----------------------------------------------------------------------------
def _padded_params(p, Hp, Vp):
    out = {
        "word_emb": _pad_to(p["word_emb"], (p["word_emb"].shape[0], Hp)),
        "prog_emb": _pad_to(p["prog_emb"], (p["prog_emb"].shape[0], Hp)),
    }
    for pre in ("enc", "dec"):
        out[f"{pre}_w_i"] = jnp.concatenate(
            [_pad_to(p[f"{pre}_w_i{g}"], (Hp, Hp)) for g in ("r", "z", "n")],
            axis=1)
        out[f"{pre}_w_h"] = jnp.concatenate(
            [_pad_to(p[f"{pre}_w_h{g}"], (Hp, Hp)) for g in ("r", "z", "n")],
            axis=1)
        out[f"{pre}_b_i"] = jnp.concatenate(
            [_pad_to(p[f"{pre}_b_i{g}"], (1, Hp)) for g in ("r", "z", "n")],
            axis=1)
        out[f"{pre}_b_h"] = jnp.concatenate(
            [_pad_to(p[f"{pre}_b_h{g}"], (1, Hp)) for g in ("r", "z", "n")],
            axis=1)
    out["dec_w_att"] = jnp.concatenate(
        [_pad_to(p["dec_w_att_h"], (Hp, Hp)),
         _pad_to(p["dec_w_att_c"], (Hp, Hp))], axis=0)       # (2Hp, Hp)
    out["dec_b_att"] = _pad_to(p["dec_b_att"], (1, Hp))
    out["dec_w_out"] = _pad_to(p["dec_w_out"], (Hp, Vp))
    V = p["dec_b_out"].shape[-1]
    b = _pad_to(p["dec_b_out"], (1, Vp))
    out["dec_b_out"] = jnp.where(jnp.arange(Vp)[None, :] >= V,
                                 jnp.float32(-1e30), b)
    return out


# ----------------------------------------------------------------------------
# Seq2seq forward: embedding gather (time-major directly) + fused kernel.
# ----------------------------------------------------------------------------
def seq2seq_forward(params, x_ids, y_ids):
    """x_ids: (B, S) int32 word ids; y_ids: (B, T) int32 program ids.
    Returns decoder log-probabilities (B, T, program_vocab)."""
    B, S = x_ids.shape
    _, T = y_ids.shape
    V = params["dec_w_out"].shape[-1]

    Bp = _round_up(B, SUBLANE)
    Hp = _round_up(params["word_emb"].shape[-1], LANE)
    Vp = _round_up(V, LANE)

    pp = _padded_params(params, Hp, Vp)

    # Gather embeddings straight into time-major flat layout: only the tiny
    # int32 id matrices are transposed, never the embedded activations.
    x_ids_p = jnp.pad(x_ids, ((0, Bp - B), (0, 0)))
    y_ids_p = jnp.pad(y_ids, ((0, Bp - B), (0, 0)))
    x_flat = jnp.take(pp["word_emb"], x_ids_p.T.reshape(-1), axis=0)  # (S*Bp,Hp)
    y_flat = jnp.take(pp["prog_emb"], y_ids_p.T.reshape(-1), axis=0)  # (T*Bp,Hp)

    # Additive attention bias: row b may only attend to flattened encoder rows
    # s*Bp + b (its own batch lane); everything else gets -1e30.
    rows = jnp.arange(Bp)[:, None]
    cols = jnp.arange(S * Bp)[None, :]
    att_bias = jnp.where((cols % Bp) == rows, 0.0, -1e30).astype(jnp.float32)

    logp_flat = fused_seq2seq(x_flat, y_flat, att_bias, pp, S, T, Bp)  # (T*Bp,Vp)
    logp = logp_flat.reshape(T, Bp, Vp).transpose(1, 0, 2)             # (Bp,T,Vp)
    return logp[:B, :, :V]


# ----------------------------------------------------------------------------
# Deterministic parameter construction (synthetic, no checkpoint).
# ----------------------------------------------------------------------------
def make_params(key, word_vocab, prog_vocab, hidden):
    H = hidden
    shapes = {"word_emb": (word_vocab, H), "prog_emb": (prog_vocab, H)}
    for pre in ("enc", "dec"):
        for g in ("r", "z", "n"):
            shapes[f"{pre}_w_i{g}"] = (H, H)
            shapes[f"{pre}_w_h{g}"] = (H, H)
            shapes[f"{pre}_b_i{g}"] = (1, H)
            shapes[f"{pre}_b_h{g}"] = (1, H)
    shapes["dec_w_att_h"] = (H, H)
    shapes["dec_w_att_c"] = (H, H)
    shapes["dec_b_att"] = (1, H)
    shapes["dec_w_out"] = (H, prog_vocab)
    shapes["dec_b_out"] = (1, prog_vocab)

    keys = jax.random.split(key, len(shapes))
    return {name: jax.random.uniform(k, shp, jnp.float32, -0.1, 0.1)
            for (name, shp), k in zip(shapes.items(), keys)}


if __name__ == "__main__":
    B, S, T = 2, 8, 8          # batch, source length, target length
    H = 32                     # hidden size
    WORD_VOCAB = 48            # encoder embedding entries  (word_entries)
    PROG_VOCAB = 64            # decoder output entries     (program_entries)

    root = jax.random.PRNGKey(0)
    k_par, k_x, k_y = jax.random.split(root, 3)

    params = make_params(k_par, WORD_VOCAB, PROG_VOCAB, H)
    x_ids = jax.random.randint(k_x, (B, S), 0, WORD_VOCAB, dtype=jnp.int32)
    y_ids = jax.random.randint(k_y, (B, T), 0, PROG_VOCAB, dtype=jnp.int32)

    fwd = jax.jit(functools.partial(seq2seq_forward, params))
    out = jax.block_until_ready(fwd(x_ids, y_ids))

    assert out.shape == (B, T, PROG_VOCAB), out.shape
    # log-softmax rows must sum to ~1 in prob space
    row_sums = jnp.sum(jnp.exp(out), axis=-1)
    assert bool(jnp.all(jnp.abs(row_sums - 1.0) < 1e-3)), row_sums
    assert bool(jnp.all(jnp.isfinite(out)))

    print("KERNEL_OK")
</pallas_src>

<mosaic_0001>
module attributes {stable_mosaic.version = 11 : i64} {
  func.func @_seq2seq_fused_kernel(%arg0: memref<64x128xf32, #tpu.memory_space<vmem>>, %arg1: memref<64x128xf32, #tpu.memory_space<vmem>>, %arg2: memref<8x64xf32, #tpu.memory_space<vmem>>, %arg3: memref<128x384xf32, #tpu.memory_space<vmem>>, %arg4: memref<128x384xf32, #tpu.memory_space<vmem>>, %arg5: memref<1x384xf32, #tpu.memory_space<vmem>>, %arg6: memref<1x384xf32, #tpu.memory_space<vmem>>, %arg7: memref<128x384xf32, #tpu.memory_space<vmem>>, %arg8: memref<128x384xf32, #tpu.memory_space<vmem>>, %arg9: memref<1x384xf32, #tpu.memory_space<vmem>>, %arg10: memref<1x384xf32, #tpu.memory_space<vmem>>, %arg11: memref<256x128xf32, #tpu.memory_space<vmem>>, %arg12: memref<1x128xf32, #tpu.memory_space<vmem>>, %arg13: memref<128x128xf32, #tpu.memory_space<vmem>>, %arg14: memref<1x128xf32, #tpu.memory_space<vmem>>, %arg15: memref<64x128xf32, #tpu.memory_space<vmem>>, %arg16: memref<64x384xf32, #tpu.memory_space<vmem>>, %arg17: memref<64x384xf32, #tpu.memory_space<vmem>>, %arg18: memref<64x128xf32, #tpu.memory_space<vmem>>, %arg19: memref<64x128xf32, #tpu.memory_space<vmem>>) attributes {dimension_semantics = [], scalar_prefetch = 0 : i64, scratch_operands = 4 : i64, tpu.core_type = #tpu.core_type<tc>} {
    %c0 = arith.constant 0 : index
    %c0_0 = arith.constant 0 : index
    %0 = vector.load %arg0[%c0, %c0_0] : memref<64x128xf32, #tpu.memory_space<vmem>>, vector<64x128xf32>
    %c0_1 = arith.constant 0 : index
    %c0_2 = arith.constant 0 : index
    %1 = vector.load %arg3[%c0_1, %c0_2] : memref<128x384xf32, #tpu.memory_space<vmem>>, vector<128x384xf32>
    %cst = arith.constant dense<0.000000e+00> : vector<64x384xf32>
    %2 = tpu.matmul %0, %1, %cst {dimension_numbers = #tpu.dot_dimension_numbers<[1], [0], [0], [1], [0, 0, 1, 1], [], []>} : vector<64x128xf32>, vector<128x384xf32>, vector<64x384xf32> -> vector<64x384xf32>
    %c0_3 = arith.constant 0 : index
    %c0_4 = arith.constant 0 : index
    %3 = vector.load %arg5[%c0_3, %c0_4] : memref<1x384xf32, #tpu.memory_space<vmem>>, vector<1x384xf32>
    %4 = vector.broadcast %3 : vector<1x384xf32> to vector<64x384xf32>
    %5 = arith.addf %2, %4 : vector<64x384xf32>
    %c0_5 = arith.constant 0 : index
    %c0_6 = arith.constant 0 : index
    %6 = vector.load %arg16[%c0_5, %c0_6] : memref<64x384xf32, #tpu.memory_space<vmem>>, vector<64x384xf32>
    tpu.vector_store %arg16[%c0_5, %c0_6], %5 {strides = array<i32>} : memref<64x384xf32, #tpu.memory_space<vmem>>, vector<64x384xf32>,
    %c0_7 = arith.constant 0 : index
    %c0_8 = arith.constant 0 : index
    %7 = vector.load %arg1[%c0_7, %c0_8] : memref<64x128xf32, #tpu.memory_space<vmem>>, vector<64x128xf32>
    %c0_9 = arith.constant 0 : index
    %c0_10 = arith.constant 0 : index
    %8 = vector.load %arg7[%c0_9, %c0_10] : memref<128x384xf32, #tpu.memory_space<vmem>>, vector<128x384xf32>
    %cst_11 = arith.constant dense<0.000000e+00> : vector<64x384xf32>
    %9 = tpu.matmul %7, %8, %cst_11 {dimension_numbers = #tpu.dot_dimension_numbers<[1], [0], [0], [1], [0, 0, 1, 1], [], []>} : vector<64x128xf32>, vector<128x384xf32>, vector<64x384xf32> -> vector<64x384xf32>
    %c0_12 = arith.constant 0 : index
    %c0_13 = arith.constant 0 : index
    %10 = vector.load %arg9[%c0_12, %c0_13] : memref<1x384xf32, #tpu.memory_space<vmem>>, vector<1x384xf32>
    %11 = vector.broadcast %10 : vector<1x384xf32> to vector<64x384xf32>
    %12 = arith.addf %9, %11 : vector<64x384xf32>
    %c0_14 = arith.constant 0 : index
    %c0_15 = arith.constant 0 : index
    %13 = vector.load %arg17[%c0_14, %c0_15] : memref<64x384xf32, #tpu.memory_space<vmem>>, vector<64x384xf32>
    tpu.vector_store %arg17[%c0_14, %c0_15], %12 {strides = array<i32>} : memref<64x384xf32, #tpu.memory_space<vmem>>, vector<64x384xf32>,
    %c0_16 = arith.constant 0 : index
    %c0_17 = arith.constant 0 : index
    %14 = vector.load %arg6[%c0_16, %c0_17] : memref<1x384xf32, #tpu.memory_space<vmem>>, vector<1x384xf32>
    %15 = vector.shape_cast %14 : vector<1x384xf32> to vector<1x384xf32>
    %16 = vector.broadcast %15 : vector<1x384xf32> to vector<8x384xf32>
    %c0_18 = arith.constant 0 : index
    %c0_19 = arith.constant 0 : index
    %17 = vector.load %arg10[%c0_18, %c0_19] : memref<1x384xf32, #tpu.memory_space<vmem>>, vector<1x384xf32>
    %18 = vector.shape_cast %17 : vector<1x384xf32> to vector<1x384xf32>
    %19 = vector.broadcast %18 : vector<1x384xf32> to vector<8x384xf32>
    %c0_20 = arith.constant 0 : index
    %c0_21 = arith.constant 0 : index
    %20 = vector.load %arg12[%c0_20, %c0_21] : memref<1x128xf32, #tpu.memory_space<vmem>>, vector<1x128xf32>
    %21 = vector.shape_cast %20 : vector<1x128xf32> to vector<1x128xf32>
    %22 = vector.broadcast %21 : vector<1x128xf32> to vector<8x128xf32>
    %cst_22 = arith.constant 0.000000e+00 : f32
    %23 = vector.broadcast %cst_22 : f32 to vector<8x128xf32>
    %c0_23 = arith.constant 0 : index
    %c0_24 = arith.constant 0 : index
    %24 = vector.load %arg4[%c0_23, %c0_24] : memref<128x384xf32, #tpu.memory_space<vmem>>, vector<128x384xf32>
    %cst_25 = arith.constant dense<0.000000e+00> : vector<8x384xf32>
    %25 = tpu.matmul %23, %24, %cst_25 {dimension_numbers = #tpu.dot_dimension_numbers<[1], [0], [0], [1], [0, 0, 1, 1], [], []>} : vector<8x128xf32>, vector<128x384xf32>, vector<8x384xf32> -> vector<8x384xf32>
    %26 = arith.addf %25, %16 : vector<8x384xf32>
    %c0_26 = arith.constant 0 : index
    %c0_27 = arith.constant 0 : index
    %27 = vector.load %arg16[%c0_26, %c0_27] : memref<64x384xf32, #tpu.memory_space<vmem>>, vector<8x384xf32>
    %28 = vector.extract_strided_slice %27 {offsets = [0, 0], sizes = [8, 128], strides = [1, 1]} : vector<8x384xf32> to vector<8x128xf32>
    %29 = vector.extract_strided_slice %26 {offsets = [0, 0], sizes = [8, 128], strides = [1, 1]} : vector<8x384xf32> to vector<8x128xf32>
    %30 = arith.addf %28, %29 : vector<8x128xf32>
    %31 = arith.negf %30 : vector<8x128xf32>
    %32 = math.exp %31 : vector<8x128xf32>
    %cst_28 = arith.constant 1.000000e+00 : f32
    %33 = vector.broadcast %cst_28 : f32 to vector<8x128xf32>
    %34 = arith.addf %33, %32 : vector<8x128xf32>
    %35 = arith.divf %33, %34 : vector<8x128xf32>
    %36 = vector.extract_strided_slice %27 {offsets = [0, 128], sizes = [8, 128], strides = [1, 1]} : vector<8x384xf32> to vector<8x128xf32>
    %37 = vector.extract_strided_slice %26 {offsets = [0, 128], sizes = [8, 128], strides = [1, 1]} : vector<8x384xf32> to vector<8x128xf32>
    %38 = arith.addf %36, %37 : vector<8x128xf32>
    %39 = arith.negf %38 : vector<8x128xf32>
    %40 = math.exp %39 : vector<8x128xf32>
    %cst_29 = arith.constant 1.000000e+00 : f32
    %41 = vector.broadcast %cst_29 : f32 to vector<8x128xf32>
    %42 = arith.addf %41, %40 : vector<8x128xf32>
    %43 = arith.divf %41, %42 : vector<8x128xf32>
    %44 = vector.extract_strided_slice %27 {offsets = [0, 256], sizes = [8, 128], strides = [1, 1]} : vector<8x384xf32> to vector<8x128xf32>
    %45 = vector.extract_strided_slice %26 {offsets = [0, 256], sizes = [8, 128], strides = [1, 1]} : vector<8x384xf32> to vector<8x128xf32>
    %46 = arith.mulf %35, %45 : vector<8x128xf32>
    %47 = arith.addf %44, %46 : vector<8x128xf32>
    %48 = math.tanh %47 : vector<8x128xf32>
    %cst_30 = arith.constant 1.000000e+00 : f32
    %49 = vector.broadcast %cst_30 : f32 to vector<8x128xf32>
    %50 = arith.subf %49, %43 : vector<8x128xf32>
    %51 = arith.mulf %50, %48 : vector<8x128xf32>
    %52 = arith.mulf %43, %23 : vector<8x128xf32>
    %53 = arith.addf %51, %52 : vector<8x128xf32>
    %c0_31 = arith.constant 0 : index
    %c0_32 = arith.constant 0 : index
    %54 = vector.load %arg18[%c0_31, %c0_32] : memref<64x128xf32, #tpu.memory_space<vmem>>, vector<8x128xf32>
    tpu.vector_store %arg18[%c0_31, %c0_32], %53 {strides = array<i32>} : memref<64x128xf32, #tpu.memory_space<vmem>>, vector<8x128xf32>,
    %c0_33 = arith.constant 0 : index
    %c0_34 = arith.constant 0 : index
    %55 = vector.load %arg4[%c0_33, %c0_34] : memref<128x384xf32, #tpu.memory_space<vmem>>, vector<128x384xf32>
    %cst_35 = arith.constant dense<0.000000e+00> : vector<8x384xf32>
    %56 = tpu.matmul %53, %55, %cst_35 {dimension_numbers = #tpu.dot_dimension_numbers<[1], [0], [0], [1], [0, 0, 1, 1], [], []>} : vector<8x128xf32>, vector<128x384xf32>, vector<8x384xf32> -> vector<8x384xf32>
    %57 = arith.addf %56, %16 : vector<8x384xf32>
    %c8 = arith.constant 8 : index
    %c0_36 = arith.constant 0 : index
    %58 = vector.load %arg16[%c8, %c0_36] : memref<64x384xf32, #tpu.memory_space<vmem>>, vector<8x384xf32>
    %59 = vector.extract_strided_slice %58 {offsets = [0, 0], sizes = [8, 128], strides = [1, 1]} : vector<8x384xf32> to vector<8x128xf32>
    %60 = vector.extract_strided_slice %57 {offsets = [0, 0], sizes = [8, 128], strides = [1, 1]} : vector<8x384xf32> to vector<8x128xf32>
    %61 = arith.addf %59, %60 : vector<8x128xf32>
    %62 = arith.negf %61 : vector<8x128xf32>
    %63 = math.exp %62 : vector<8x128xf32>
    %cst_37 = arith.constant 1.000000e+00 : f32
    %64 = vector.broadcast %cst_37 : f32 to vector<8x128xf32>
    %65 = arith.addf %64, %63 : vector<8x128xf32>
    %66 = arith.divf %64, %65 : vector<8x128xf32>
    %67 = vector.extract_strided_slice %58 {offsets = [0, 128], sizes = [8, 128], strides = [1, 1]} : vector<8x384xf32> to vector<8x128xf32>
    %68 = vector.extract_strided_slice %57 {offsets = [0, 128], sizes = [8, 128], strides = [1, 1]} : vector<8x384xf32> to vector<8x128xf32>
    %69 = arith.addf %67, %68 : vector<8x128xf32>
    %70 = arith.negf %69 : vector<8x128xf32>
    %71 = math.exp %70 : vector<8x128xf32>
    %cst_38 = arith.constant 1.000000e+00 : f32
    %72 = vector.broadcast %cst_38 : f32 to vector<8x128xf32>
    %73 = arith.addf %72, %71 : vector<8x128xf32>
    %74 = arith.divf %72, %73 : vector<8x128xf32>
    %75 = vector.extract_strided_slice %58 {offsets = [0, 256], sizes = [8, 128], strides = [1, 1]} : vector<8x384xf32> to vector<8x128xf32>
    %76 = vector.extract_strided_slice %57 {offsets = [0, 256], sizes = [8, 128], strides = [1, 1]} : vector<8x384xf32> to vector<8x128xf32>
    %77 = arith.mulf %66, %76 : vector<8x128xf32>
    %78 = arith.addf %75, %77 : vector<8x128xf32>
    %79 = math.tanh %78 : vector<8x128xf32>
    %cst_39 = arith.constant 1.000000e+00 : f32
    %80 = vector.broadcast %cst_39 : f32 to vector<8x128xf32>
    %81 = arith.subf %80, %74 : vector<8x128xf32>
    %82 = arith.mulf %81, %79 : vector<8x128xf32>
    %83 = arith.mulf %74, %53 : vector<8x128xf32>
    %84 = arith.addf %82, %83 : vector<8x128xf32>
    %c8_40 = arith.constant 8 : index
    %c0_41 = arith.constant 0 : index
    %85 = vector.load %arg18[%c8_40, %c0_41] : memref<64x128xf32, #tpu.memory_space<vmem>>, vector<8x128xf32>
    tpu.vector_store %arg18[%c8_40, %c0_41], %84 {strides = array<i32>} : memref<64x128xf32, #tpu.memory_space<vmem>>, vector<8x128xf32>,
    %c0_42 = arith.constant 0 : index
    %c0_43 = arith.constant 0 : index
    %86 = vector.load %arg4[%c0_42, %c0_43] : memref<128x384xf32, #tpu.memory_space<vmem>>, vector<128x384xf32>
    %cst_44 = arith.constant dense<0.000000e+00> : vector<8x384xf32>
    %87 = tpu.matmul %84, %86, %cst_44 {dimension_numbers = #tpu.dot_dimension_numbers<[1], [0], [0], [1], [0, 0, 1, 1], [], []>} : vector<8x128xf32>, vector<128x384xf32>, vector<8x384xf32> -> vector<8x384xf32>
    %88 = arith.addf %87, %16 : vector<8x384xf32>
    %c16 = arith.constant 16 : index
    %c0_45 = arith.constant 0 : index
    %89 = vector.load %arg16[%c16, %c0_45] : memref<64x384xf32, #tpu.memory_space<vmem>>, vector<8x384xf32>
    %90 = vector.extract_strided_slice %89 {offsets = [0, 0], sizes = [8, 128], strides = [1, 1]} : vector<8x384xf32> to vector<8x128xf32>
    %91 = vector.extract_strided_slice %88 {offsets = [0, 0], sizes = [8, 128], strides = [1, 1]} : vector<8x384xf32> to vector<8x128xf32>
    %92 = arith.addf %90, %91 : vector<8x128xf32>
    %93 = arith.negf %92 : vector<8x128xf32>
    %94 = math.exp %93 : vector<8x128xf32>
    %cst_46 = arith.constant 1.000000e+00 : f32
    %95 = vector.broadcast %cst_46 : f32 to vector<8x128xf32>
    %96 = arith.addf %95, %94 : vector<8x128xf32>
    %97 = arith.divf %95, %96 : vector<8x128xf32>
    %98 = vector.extract_strided_slice %89 {offsets = [0, 128], sizes = [8, 128], strides = [1, 1]} : vector<8x384xf32> to vector<8x128xf32>
    %99 = vector.extract_strided_slice %88 {offsets = [0, 128], sizes = [8, 128], strides = [1, 1]} : vector<8x384xf32> to vector<8x128xf32>
    %100 = arith.addf %98, %99 : vector<8x128xf32>
    %101 = arith.negf %100 : vector<8x128xf32>
    %102 = math.exp %101 : vector<8x128xf32>
    %cst_47 = arith.constant 1.000000e+00 : f32
    %103 = vector.broadcast %cst_47 : f32 to vector<8x128xf32>
    %104 = arith.addf %103, %102 : vector<8x128xf32>
    %105 = arith.divf %103, %104 : vector<8x128xf32>
    %106 = vector.extract_strided_slice %89 {offsets = [0, 256], sizes = [8, 128], strides = [1, 1]} : vector<8x384xf32> to vector<8x128xf32>
    %107 = vector.extract_strided_slice %88 {offsets = [0, 256], sizes = [8, 128], strides = [1, 1]} : vector<8x384xf32> to vector<8x128xf32>
    %108 = arith.mulf %97, %107 : vector<8x128xf32>
    %109 = arith.addf %106, %108 : vector<8x128xf32>
    %110 = math.tanh %109 : vector<8x128xf32>
    %cst_48 = arith.constant 1.000000e+00 : f32
    %111 = vector.broadcast %cst_48 : f32 to vector<8x128xf32>
    %112 = arith.subf %111, %105 : vector<8x128xf32>
    %113 = arith.mulf %112, %110 : vector<8x128xf32>
    %114 = arith.mulf %105, %84 : vector<8x128xf32>
    %115 = arith.addf %113, %114 : vector<8x128xf32>
    %c16_49 = arith.constant 16 : index
    %c0_50 = arith.constant 0 : index
    %116 = vector.load %arg18[%c16_49, %c0_50] : memref<64x128xf32, #tpu.memory_space<vmem>>, vector<8x128xf32>
    tpu.vector_store %arg18[%c16_49, %c0_50], %115 {strides = array<i32>} : memref<64x128xf32, #tpu.memory_space<vmem>>, vector<8x128xf32>,
    %c0_51 = arith.constant 0 : index
    %c0_52 = arith.constant 0 : index
    %117 = vector.load %arg4[%c0_51, %c0_52] : memref<128x384xf32, #tpu.memory_space<vmem>>, vector<128x384xf32>
    %cst_53 = arith.constant dense<0.000000e+00> : vector<8x384xf32>
    %118 = tpu.matmul %115, %117, %cst_53 {dimension_numbers = #tpu.dot_dimension_numbers<[1], [0], [0], [1], [0, 0, 1, 1], [], []>} : vector<8x128xf32>, vector<128x384xf32>, vector<8x384xf32> -> vector<8x384xf32>
    %119 = arith.addf %118, %16 : vector<8x384xf32>
    %c24 = arith.constant 24 : index
    %c0_54 = arith.constant 0 : index
    %120 = vector.load %arg16[%c24, %c0_54] : memref<64x384xf32, #tpu.memory_space<vmem>>, vector<8x384xf32>
    %121 = vector.extract_strided_slice %120 {offsets = [0, 0], sizes = [8, 128], strides = [1, 1]} : vector<8x384xf32> to vector<8x128xf32>
    %122 = vector.extract_strided_slice %119 {offsets = [0, 0], sizes = [8, 128], strides = [1, 1]} : vector<8x384xf32> to vector<8x128xf32>
    %123 = arith.addf %121, %122 : vector<8x128xf32>
    %124 = arith.negf %123 : vector<8x128xf32>
    %125 = math.exp %124 : vector<8x128xf32>
    %cst_55 = arith.constant 1.000000e+00 : f32
    %126 = vector.broadcast %cst_55 : f32 to vector<8x128xf32>
    %127 = arith.addf %126, %125 : vector<8x128xf32>
    %128 = arith.divf %126, %127 : vector<8x128xf32>
    %129 = vector.extract_strided_slice %120 {offsets = [0, 128], sizes = [8, 128], strides = [1, 1]} : vector<8x384xf32> to vector<8x128xf32>
    %130 = vector.extract_strided_slice %119 {offsets = [0, 128], sizes = [8, 128], strides = [1, 1]} : vector<8x384xf32> to vector<8x128xf32>
    %131 = arith.addf %129, %130 : vector<8x128xf32>
    %132 = arith.negf %131 : vector<8x128xf32>
    %133 = math.exp %132 : vector<8x128xf32>
    %cst_56 = arith.constant 1.000000e+00 : f32
    %134 = vector.broadcast %cst_56 : f32 to vector<8x128xf32>
    %135 = arith.addf %134, %133 : vector<8x128xf32>
    %136 = arith.divf %134, %135 : vector<8x128xf32>
    %137 = vector.extract_strided_slice %120 {offsets = [0, 256], sizes = [8, 128], strides = [1, 1]} : vector<8x384xf32> to vector<8x128xf32>
    %138 = vector.extract_strided_slice %119 {offsets = [0, 256], sizes = [8, 128], strides = [1, 1]} : vector<8x384xf32> to vector<8x128xf32>
    %139 = arith.mulf %128, %138 : vector<8x128xf32>
    %140 = arith.addf %137, %139 : vector<8x128xf32>
    %141 = math.tanh %140 : vector<8x128xf32>
    %cst_57 = arith.constant 1.000000e+00 : f32
    %142 = vector.broadcast %cst_57 : f32 to vector<8x128xf32>
    %143 = arith.subf %142, %136 : vector<8x128xf32>
    %144 = arith.mulf %143, %141 : vector<8x128xf32>
    %145 = arith.mulf %136, %115 : vector<8x128xf32>
    %146 = arith.addf %144, %145 : vector<8x128xf32>
    %c24_58 = arith.constant 24 : index
    %c0_59 = arith.constant 0 : index
    %147 = vector.load %arg18[%c24_58, %c0_59] : memref<64x128xf32, #tpu.memory_space<vmem>>, vector<8x128xf32>
    tpu.vector_store %arg18[%c24_58, %c0_59], %146 {strides = array<i32>} : memref<64x128xf32, #tpu.memory_space<vmem>>, vector<8x128xf32>,
    %c0_60 = arith.constant 0 : index
    %c0_61 = arith.constant 0 : index
    %148 = vector.load %arg4[%c0_60, %c0_61] : memref<128x384xf32, #tpu.memory_space<vmem>>, vector<128x384xf32>
    %cst_62 = arith.constant dense<0.000000e+00> : vector<8x384xf32>
    %149 = tpu.matmul %146, %148, %cst_62 {dimension_numbers = #tpu.dot_dimension_numbers<[1], [0], [0], [1], [0, 0, 1, 1], [], []>} : vector<8x128xf32>, vector<128x384xf32>, vector<8x384xf32> -> vector<8x384xf32>
    %150 = arith.addf %149, %16 : vector<8x384xf32>
    %c32 = arith.constant 32 : index
    %c0_63 = arith.constant 0 : index
    %151 = vector.load %arg16[%c32, %c0_63] : memref<64x384xf32, #tpu.memory_space<vmem>>, vector<8x384xf32>
    %152 = vector.extract_strided_slice %151 {offsets = [0, 0], sizes = [8, 128], strides = [1, 1]} : vector<8x384xf32> to vector<8x128xf32>
    %153 = vector.extract_strided_slice %150 {offsets = [0, 0], sizes = [8, 128], strides = [1, 1]} : vector<8x384xf32> to vector<8x128xf32>
    %154 = arith.addf %152, %153 : vector<8x128xf32>
    %155 = arith.negf %154 : vector<8x128xf32>
    %156 = math.exp %155 : vector<8x128xf32>
    %cst_64 = arith.constant 1.000000e+00 : f32
    %157 = vector.broadcast %cst_64 : f32 to vector<8x128xf32>
    %158 = arith.addf %157, %156 : vector<8x128xf32>
    %159 = arith.divf %157, %158 : vector<8x128xf32>
    %160 = vector.extract_strided_slice %151 {offsets = [0, 128], sizes = [8, 128], strides = [1, 1]} : vector<8x384xf32> to vector<8x128xf32>
    %161 = vector.extract_strided_slice %150 {offsets = [0, 128], sizes = [8, 128], strides = [1, 1]} : vector<8x384xf32> to vector<8x128xf32>
    %162 = arith.addf %160, %161 : vector<8x128xf32>
    %163 = arith.negf %162 : vector<8x128xf32>
    %164 = math.exp %163 : vector<8x128xf32>
    %cst_65 = arith.constant 1.000000e+00 : f32
    %165 = vector.broadcast %cst_65 : f32 to vector<8x128xf32>
    %166 = arith.addf %165, %164 : vector<8x128xf32>
    %167 = arith.divf %165, %166 : vector<8x128xf32>
    %168 = vector.extract_strided_slice %151 {offsets = [0, 256], sizes = [8, 128], strides = [1, 1]} : vector<8x384xf32> to vector<8x128xf32>
    %169 = vector.extract_strided_slice %150 {offsets = [0, 256], sizes = [8, 128], strides = [1, 1]} : vector<8x384xf32> to vector<8x128xf32>
    %170 = arith.mulf %159, %169 : vector<8x128xf32>
    %171 = arith.addf %168, %170 : vector<8x128xf32>
    %172 = math.tanh %171 : vector<8x128xf32>
    %cst_66 = arith.constant 1.000000e+00 : f32
    %173 = vector.broadcast %cst_66 : f32 to vector<8x128xf32>
    %174 = arith.subf %173, %167 : vector<8x128xf32>
    %175 = arith.mulf %174, %172 : vector<8x128xf32>
    %176 = arith.mulf %167, %146 : vector<8x128xf32>
    %177 = arith.addf %175, %176 : vector<8x128xf32>
    %c32_67 = arith.constant 32 : index
    %c0_68 = arith.constant 0 : index
    %178 = vector.load %arg18[%c32_67, %c0_68] : memref<64x128xf32, #tpu.memory_space<vmem>>, vector<8x128xf32>
    tpu.vector_store %arg18[%c32_67, %c0_68], %177 {strides = array<i32>} : memref<64x128xf32, #tpu.memory_space<vmem>>, vector<8x128xf32>,
    %c0_69 = arith.constant 0 : index
    %c0_70 = arith.constant 0 : index
    %179 = vector.load %arg4[%c0_69, %c0_70] : memref<128x384xf32, #tpu.memory_space<vmem>>, vector<128x384xf32>
    %cst_71 = arith.constant dense<0.000000e+00> : vector<8x384xf32>
    %180 = tpu.matmul %177, %179, %cst_71 {dimension_numbers = #tpu.dot_dimension_numbers<[1], [0], [0], [1], [0, 0, 1, 1], [], []>} : vector<8x128xf32>, vector<128x384xf32>, vector<8x384xf32> -> vector<8x384xf32>
    %181 = arith.addf %180, %16 : vector<8x384xf32>
    %c40 = arith.constant 40 : index
    %c0_72 = arith.constant 0 : index
    %182 = vector.load %arg16[%c40, %c0_72] : memref<64x384xf32, #tpu.memory_space<vmem>>, vector<8x384xf32>
    %183 = vector.extract_strided_slice %182 {offsets = [0, 0], sizes = [8, 128], strides = [1, 1]} : vector<8x384xf32> to vector<8x128xf32>
    %184 = vector.extract_strided_slice %181 {offsets = [0, 0], sizes = [8, 128], strides = [1, 1]} : vector<8x384xf32> to vector<8x128xf32>
    %185 = arith.addf %183, %184 : vector<8x128xf32>
    %186 = arith.negf %185 : vector<8x128xf32>
    %187 = math.exp %186 : vector<8x128xf32>
    %cst_73 = arith.constant 1.000000e+00 : f32
    %188 = vector.broadcast %cst_73 : f32 to vector<8x128xf32>
    %189 = arith.addf %188, %187 : vector<8x128xf32>
    %190 = arith.divf %188, %189 : vector<8x128xf32>
    %191 = vector.extract_strided_slice %182 {offsets = [0, 128], sizes = [8, 128], strides = [1, 1]} : vector<8x384xf32> to vector<8x128xf32>
    %192 = vector.extract_strided_slice %181 {offsets = [0, 128], sizes = [8, 128], strides = [1, 1]} : vector<8x384xf32> to vector<8x128xf32>
    %193 = arith.addf %191, %192 : vector<8x128xf32>
    %194 = arith.negf %193 : vector<8x128xf32>
    %195 = math.exp %194 : vector<8x128xf32>
    %cst_74 = arith.constant 1.000000e+00 : f32
    %196 = vector.broadcast %cst_74 : f32 to vector<8x128xf32>
    %197 = arith.addf %196, %195 : vector<8x128xf32>
    %198 = arith.divf %196, %197 : vector<8x128xf32>
    %199 = vector.extract_strided_slice %182 {offsets = [0, 256], sizes = [8, 128], strides = [1, 1]} : vector<8x384xf32> to vector<8x128xf32>
    %200 = vector.extract_strided_slice %181 {offsets = [0, 256], sizes = [8, 128], strides = [1, 1]} : vector<8x384xf32> to vector<8x128xf32>
    %201 = arith.mulf %190, %200 : vector<8x128xf32>
    %202 = arith.addf %199, %201 : vector<8x128xf32>
    %203 = math.tanh %202 : vector<8x128xf32>
    %cst_75 = arith.constant 1.000000e+00 : f32
    %204 = vector.broadcast %cst_75 : f32 to vector<8x128xf32>
    %205 = arith.subf %204, %198 : vector<8x128xf32>
    %206 = arith.mulf %205, %203 : vector<8x128xf32>
    %207 = arith.mulf %198, %177 : vector<8x128xf32>
    %208 = arith.addf %206, %207 : vector<8x128xf32>
    %c40_76 = arith.constant 40 : index
    %c0_77 = arith.constant 0 : index
    %209 = vector.load %arg18[%c40_76, %c0_77] : memref<64x128xf32, #tpu.memory_space<vmem>>, vector<8x128xf32>
    tpu.vector_store %arg18[%c40_76, %c0_77], %208 {strides = array<i32>} : memref<64x128xf32, #tpu.memory_space<vmem>>, vector<8x128xf32>,
    %c0_78 = arith.constant 0 : index
    %c0_79 = arith.constant 0 : index
    %210 = vector.load %arg4[%c0_78, %c0_79] : memref<128x384xf32, #tpu.memory_space<vmem>>, vector<128x384xf32>
    %cst_80 = arith.constant dense<0.000000e+00> : vector<8x384xf32>
    %211 = tpu.matmul %208, %210, %cst_80 {dimension_numbers = #tpu.dot_dimension_numbers<[1], [0], [0], [1], [0, 0, 1, 1], [], []>} : vector<8x128xf32>, vector<128x384xf32>, vector<8x384xf32> -> vector<8x384xf32>
    %212 = arith.addf %211, %16 : vector<8x384xf32>
    %c48 = arith.constant 48 : index
    %c0_81 = arith.constant 0 : index
    %213 = vector.load %arg16[%c48, %c0_81] : memref<64x384xf32, #tpu.memory_space<vmem>>, vector<8x384xf32>
    %214 = vector.extract_strided_slice %213 {offsets = [0, 0], sizes = [8, 128], strides = [1, 1]} : vector<8x384xf32> to vector<8x128xf32>
    %215 = vector.extract_strided_slice %212 {offsets = [0, 0], sizes = [8, 128], strides = [1, 1]} : vector<8x384xf32> to vector<8x128xf32>
    %216 = arith.addf %214, %215 : vector<8x128xf32>
    %217 = arith.negf %216 : vector<8x128xf32>
    %218 = math.exp %217 : vector<8x128xf32>
    %cst_82 = arith.constant 1.000000e+00 : f32
    %219 = vector.broadcast %cst_82 : f32 to vector<8x128xf32>
    %220 = arith.addf %219, %218 : vector<8x128xf32>
    %221 = arith.divf %219, %220 : vector<8x128xf32>
    %222 = vector.extract_strided_slice %213 {offsets = [0, 128], sizes = [8, 128], strides = [1, 1]} : vector<8x384xf32> to vector<8x128xf32>
    %223 = vector.extract_strided_slice %212 {offsets = [0, 128], sizes = [8, 128], strides = [1, 1]} : vector<8x384xf32> to vector<8x128xf32>
    %224 = arith.addf %222, %223 : vector<8x128xf32>
    %225 = arith.negf %224 : vector<8x128xf32>
    %226 = math.exp %225 : vector<8x128xf32>
    %cst_83 = arith.constant 1.000000e+00 : f32
    %227 = vector.broadcast %cst_83 : f32 to vector<8x128xf32>
    %228 = arith.addf %227, %226 : vector<8x128xf32>
    %229 = arith.divf %227, %228 : vector<8x128xf32>
    %230 = vector.extract_strided_slice %213 {offsets = [0, 256], sizes = [8, 128], strides = [1, 1]} : vector<8x384xf32> to vector<8x128xf32>
    %231 = vector.extract_strided_slice %212 {offsets = [0, 256], sizes = [8, 128], strides = [1, 1]} : vector<8x384xf32> to vector<8x128xf32>
    %232 = arith.mulf %221, %231 : vector<8x128xf32>
    %233 = arith.addf %230, %232 : vector<8x128xf32>
    %234 = math.tanh %233 : vector<8x128xf32>
    %cst_84 = arith.constant 1.000000e+00 : f32
    %235 = vector.broadcast %cst_84 : f32 to vector<8x128xf32>
    %236 = arith.subf %235, %229 : vector<8x128xf32>
    %237 = arith.mulf %236, %234 : vector<8x128xf32>
    %238 = arith.mulf %229, %208 : vector<8x128xf32>
    %239 = arith.addf %237, %238 : vector<8x128xf32>
    %c48_85 = arith.constant 48 : index
    %c0_86 = arith.constant 0 : index
    %240 = vector.load %arg18[%c48_85, %c0_86] : memref<64x128xf32, #tpu.memory_space<vmem>>, vector<8x128xf32>
    tpu.vector_store %arg18[%c48_85, %c0_86], %239 {strides = array<i32>} : memref<64x128xf32, #tpu.memory_space<vmem>>, vector<8x128xf32>,
    %c0_87 = arith.constant 0 : index
    %c0_88 = arith.constant 0 : index
    %241 = vector.load %arg4[%c0_87, %c0_88] : memref<128x384xf32, #tpu.memory_space<vmem>>, vector<128x384xf32>
    %cst_89 = arith.constant dense<0.000000e+00> : vector<8x384xf32>
    %242 = tpu.matmul %239, %241, %cst_89 {dimension_numbers = #tpu.dot_dimension_numbers<[1], [0], [0], [1], [0, 0, 1, 1], [], []>} : vector<8x128xf32>, vector<128x384xf32>, vector<8x384xf32> -> vector<8x384xf32>
    %243 = arith.addf %242, %16 : vector<8x384xf32>
    %c56 = arith.constant 56 : index
    %c0_90 = arith.constant 0 : index
    %244 = vector.load %arg16[%c56, %c0_90] : memref<64x384xf32, #tpu.memory_space<vmem>>, vector<8x384xf32>
    %245 = vector.extract_strided_slice %244 {offsets = [0, 0], sizes = [8, 128], strides = [1, 1]} : vector<8x384xf32> to vector<8x128xf32>
    %246 = vector.extract_strided_slice %243 {offsets = [0, 0], sizes = [8, 128], strides = [1, 1]} : vector<8x384xf32> to vector<8x128xf32>
    %247 = arith.addf %245, %246 : vector<8x128xf32>
    %248 = arith.negf %247 : vector<8x128xf32>
    %249 = math.exp %248 : vector<8x128xf32>
    %cst_91 = arith.constant 1.000000e+00 : f32
    %250 = vector.broadcast %cst_91 : f32 to vector<8x128xf32>
    %251 = arith.addf %250, %249 : vector<8x128xf32>
    %252 = arith.divf %250, %251 : vector<8x128xf32>
    %253 = vector.extract_strided_slice %244 {offsets = [0, 128], sizes = [8, 128], strides = [1, 1]} : vector<8x384xf32> to vector<8x128xf32>
    %254 = vector.extract_strided_slice %243 {offsets = [0, 128], sizes = [8, 128], strides = [1, 1]} : vector<8x384xf32> to vector<8x128xf32>
    %255 = arith.addf %253, %254 : vector<8x128xf32>
    %256 = arith.negf %255 : vector<8x128xf32>
    %257 = math.exp %256 : vector<8x128xf32>
    %cst_92 = arith.constant 1.000000e+00 : f32
    %258 = vector.broadcast %cst_92 : f32 to vector<8x128xf32>
    %259 = arith.addf %258, %257 : vector<8x128xf32>
    %260 = arith.divf %258, %259 : vector<8x128xf32>
    %261 = vector.extract_strided_slice %244 {offsets = [0, 256], sizes = [8, 128], strides = [1, 1]} : vector<8x384xf32> to vector<8x128xf32>
    %262 = vector.extract_strided_slice %243 {offsets = [0, 256], sizes = [8, 128], strides = [1, 1]} : vector<8x384xf32> to vector<8x128xf32>
    %263 = arith.mulf %252, %262 : vector<8x128xf32>
    %264 = arith.addf %261, %263 : vector<8x128xf32>
    %265 = math.tanh %264 : vector<8x128xf32>
    %cst_93 = arith.constant 1.000000e+00 : f32
    %266 = vector.broadcast %cst_93 : f32 to vector<8x128xf32>
    %267 = arith.subf %266, %260 : vector<8x128xf32>
    %268 = arith.mulf %267, %265 : vector<8x128xf32>
    %269 = arith.mulf %260, %239 : vector<8x128xf32>
    %270 = arith.addf %268, %269 : vector<8x128xf32>
    %c56_94 = arith.constant 56 : index
    %c0_95 = arith.constant 0 : index
    %271 = vector.load %arg18[%c56_94, %c0_95] : memref<64x128xf32, #tpu.memory_space<vmem>>, vector<8x128xf32>
    tpu.vector_store %arg18[%c56_94, %c0_95], %270 {strides = array<i32>} : memref<64x128xf32, #tpu.memory_space<vmem>>, vector<8x128xf32>,
    %c0_96 = arith.constant 0 : index
    %c0_97 = arith.constant 0 : index
    %272 = vector.load %arg18[%c0_96, %c0_97] : memref<64x128xf32, #tpu.memory_space<vmem>>, vector<64x128xf32>
    %273 = tpu.transpose %272, [1, 0] : vector<64x128xf32> -> vector<128x64xf32>
    %c0_98 = arith.constant 0 : index
    %c0_99 = arith.constant 0 : index
    %274 = vector.load %arg2[%c0_98, %c0_99] : memref<8x64xf32, #tpu.memory_space<vmem>>, vector<8x64xf32>
    %c0_100 = arith.constant 0 : index
    %c0_101 = arith.constant 0 : index
    %275 = vector.load %arg8[%c0_100, %c0_101] : memref<128x384xf32, #tpu.memory_space<vmem>>, vector<128x384xf32>
    %cst_102 = arith.constant dense<0.000000e+00> : vector<8x384xf32>
    %276 = tpu.matmul %270, %275, %cst_102 {dimension_numbers = #tpu.dot_dimension_numbers<[1], [0], [0], [1], [0, 0, 1, 1], [], []>} : vector<8x128xf32>, vector<128x384xf32>, vector<8x384xf32> -> vector<8x384xf32>
    %277 = arith.addf %276, %19 : vector<8x384xf32>
    %c0_103 = arith.constant 0 : index
    %c0_104 = arith.constant 0 : index
    %278 = vector.load %arg17[%c0_103, %c0_104] : memref<64x384xf32, #tpu.memory_space<vmem>>, vector<8x384xf32>
    %279 = vector.extract_strided_slice %278 {offsets = [0, 0], sizes = [8, 128], strides = [1, 1]} : vector<8x384xf32> to vector<8x128xf32>
    %280 = vector.extract_strided_slice %277 {offsets = [0, 0], sizes = [8, 128], strides = [1, 1]} : vector<8x384xf32> to vector<8x128xf32>
    %281 = arith.addf %279, %280 : vector<8x128xf32>
    %282 = arith.negf %281 : vector<8x128xf32>
    %283 = math.exp %282 : vector<8x128xf32>
    %cst_105 = arith.constant 1.000000e+00 : f32
    %284 = vector.broadcast %cst_105 : f32 to vector<8x128xf32>
    %285 = arith.addf %284, %283 : vector<8x128xf32>
    %286 = arith.divf %284, %285 : vector<8x128xf32>
    %287 = vector.extract_strided_slice %278 {offsets = [0, 128], sizes = [8, 128], strides = [1, 1]} : vector<8x384xf32> to vector<8x128xf32>
    %288 = vector.extract_strided_slice %277 {offsets = [0, 128], sizes = [8, 128], strides = [1, 1]} : vector<8x384xf32> to vector<8x128xf32>
    %289 = arith.addf %287, %288 : vector<8x128xf32>
    %290 = arith.negf %289 : vector<8x128xf32>
    %291 = math.exp %290 : vector<8x128xf32>
    %cst_106 = arith.constant 1.000000e+00 : f32
    %292 = vector.broadcast %cst_106 : f32 to vector<8x128xf32>
    %293 = arith.addf %292, %291 : vector<8x128xf32>
    %294 = arith.divf %292, %293 : vector<8x128xf32>
    %295 = vector.extract_strided_slice %278 {offsets = [0, 256], sizes = [8, 128], strides = [1, 1]} : vector<8x384xf32> to vector<8x128xf32>
    %296 = vector.extract_strided_slice %277 {offsets = [0, 256], sizes = [8, 128], strides = [1, 1]} : vector<8x384xf32> to vector<8x128xf32>
    %297 = arith.mulf %286, %296 : vector<8x128xf32>
    %298 = arith.addf %295, %297 : vector<8x128xf32>
    %299 = math.tanh %298 : vector<8x128xf32>
    %cst_107 = arith.constant 1.000000e+00 : f32
    %300 = vector.broadcast %cst_107 : f32 to vector<8x128xf32>
    %301 = arith.subf %300, %294 : vector<8x128xf32>
    %302 = arith.mulf %301, %299 : vector<8x128xf32>
    %303 = arith.mulf %294, %270 : vector<8x128xf32>
    %304 = arith.addf %302, %303 : vector<8x128xf32>
    %cst_108 = arith.constant dense<0.000000e+00> : vector<8x64xf32>
    %305 = tpu.matmul %304, %273, %cst_108 {dimension_numbers = #tpu.dot_dimension_numbers<[1], [0], [0], [1], [0, 0, 1, 1], [], []>} : vector<8x128xf32>, vector<128x64xf32>, vector<8x64xf32> -> vector<8x64xf32>
    %306 = arith.addf %305, %274 : vector<8x64xf32>
    %cst_109 = arith.constant dense<0xFF800000> : vector<8xf32>
    %307 = vector.multi_reduction <maximumf>, %306, %cst_109 [1] : vector<8x64xf32> to vector<8xf32>
    %308 = vector.shape_cast %307 : vector<8xf32> to vector<8x1xf32>
    %309 = vector.broadcast %308 : vector<8x1xf32> to vector<8x64xf32>
    %310 = arith.subf %306, %309 : vector<8x64xf32>
    %311 = math.exp %310 : vector<8x64xf32>
    %cst_110 = arith.constant dense<0.000000e+00> : vector<8xf32>
    %312 = vector.multi_reduction <add>, %311, %cst_110 [1] : vector<8x64xf32> to vector<8xf32>
    %313 = vector.shape_cast %312 : vector<8xf32> to vector<8x1xf32>
    %314 = vector.broadcast %313 : vector<8x1xf32> to vector<8x64xf32>
    %315 = arith.divf %311, %314 : vector<8x64xf32>
    %cst_111 = arith.constant dense<0.000000e+00> : vector<8x128xf32>
    %316 = tpu.matmul %315, %272, %cst_111 {dimension_numbers = #tpu.dot_dimension_numbers<[1], [0], [0], [1], [0, 0, 1, 1], [], []>} : vector<8x64xf32>, vector<64x128xf32>, vector<8x128xf32> -> vector<8x128xf32>
    %317 = tpu.concatenate %304, %316 in 1 : vector<8x128xf32>, vector<8x128xf32> -> vector<8x256xf32>
    %c0_112 = arith.constant 0 : index
    %c0_113 = arith.constant 0 : index
    %318 = vector.load %arg11[%c0_112, %c0_113] : memref<256x128xf32, #tpu.memory_space<vmem>>, vector<256x128xf32>
    %cst_114 = arith.constant dense<0.000000e+00> : vector<8x128xf32>
    %319 = tpu.matmul %317, %318, %cst_114 {dimension_numbers = #tpu.dot_dimension_numbers<[1], [0], [0], [1], [0, 0, 1, 1], [], []>} : vector<8x256xf32>, vector<256x128xf32>, vector<8x128xf32> -> vector<8x128xf32>
    %320 = arith.addf %319, %22 : vector<8x128xf32>
    %321 = math.tanh %320 : vector<8x128xf32>
    %c0_115 = arith.constant 0 : index
    %c0_116 = arith.constant 0 : index
    %322 = vector.load %arg19[%c0_115, %c0_116] : memref<64x128xf32, #tpu.memory_space<vmem>>, vector<8x128xf32>
    tpu.vector_store %arg19[%c0_115, %c0_116], %321 {strides = array<i32>} : memref<64x128xf32, #tpu.memory_space<vmem>>, vector<8x128xf32>,
    %c0_117 = arith.constant 0 : index
    %c0_118 = arith.constant 0 : index
    %323 = vector.load %arg8[%c0_117, %c0_118] : memref<128x384xf32, #tpu.memory_space<vmem>>, vector<128x384xf32>
    %cst_119 = arith.constant dense<0.000000e+00> : vector<8x384xf32>
    %324 = tpu.matmul %304, %323, %cst_119 {dimension_numbers = #tpu.dot_dimension_numbers<[1], [0], [0], [1], [0, 0, 1, 1], [], []>} : vector<8x128xf32>, vector<128x384xf32>, vector<8x384xf32> -> vector<8x384xf32>
    %325 = arith.addf %324, %19 : vector<8x384xf32>
    %c8_120 = arith.constant 8 : index
    %c0_121 = arith.constant 0 : index
    %326 = vector.load %arg17[%c8_120, %c0_121] : memref<64x384xf32, #tpu.memory_space<vmem>>, vector<8x384xf32>
    %327 = vector.extract_strided_slice %326 {offsets = [0, 0], sizes = [8, 128], strides = [1, 1]} : vector<8x384xf32> to vector<8x128xf32>
    %328 = vector.extract_strided_slice %325 {offsets = [0, 0], sizes = [8, 128], strides = [1, 1]} : vector<8x384xf32> to vector<8x128xf32>
    %329 = arith.addf %327, %328 : vector<8x128xf32>
    %330 = arith.negf %329 : vector<8x128xf32>
    %331 = math.exp %330 : vector<8x128xf32>
    %cst_122 = arith.constant 1.000000e+00 : f32
    %332 = vector.broadcast %cst_122 : f32 to vector<8x128xf32>
    %333 = arith.addf %332, %331 : vector<8x128xf32>
    %334 = arith.divf %332, %333 : vector<8x128xf32>
    %335 = vector.extract_strided_slice %326 {offsets = [0, 128], sizes = [8, 128], strides = [1, 1]} : vector<8x384xf32> to vector<8x128xf32>
    %336 = vector.extract_strided_slice %325 {offsets = [0, 128], sizes = [8, 128], strides = [1, 1]} : vector<8x384xf32> to vector<8x128xf32>
    %337 = arith.addf %335, %336 : vector<8x128xf32>
    %338 = arith.negf %337 : vector<8x128xf32>
    %339 = math.exp %338 : vector<8x128xf32>
    %cst_123 = arith.constant 1.000000e+00 : f32
    %340 = vector.broadcast %cst_123 : f32 to vector<8x128xf32>
    %341 = arith.addf %340, %339 : vector<8x128xf32>
    %342 = arith.divf %340, %341 : vector<8x128xf32>
    %343 = vector.extract_strided_slice %326 {offsets = [0, 256], sizes = [8, 128], strides = [1, 1]} : vector<8x384xf32> to vector<8x128xf32>
    %344 = vector.extract_strided_slice %325 {offsets = [0, 256], sizes = [8, 128], strides = [1, 1]} : vector<8x384xf32> to vector<8x128xf32>
    %345 = arith.mulf %334, %344 : vector<8x128xf32>
    %346 = arith.addf %343, %345 : vector<8x128xf32>
    %347 = math.tanh %346 : vector<8x128xf32>
    %cst_124 = arith.constant 1.000000e+00 : f32
    %348 = vector.broadcast %cst_124 : f32 to vector<8x128xf32>
    %349 = arith.subf %348, %342 : vector<8x128xf32>
    %350 = arith.mulf %349, %347 : vector<8x128xf32>
    %351 = arith.mulf %342, %304 : vector<8x128xf32>
    %352 = arith.addf %350, %351 : vector<8x128xf32>
    %cst_125 = arith.constant dense<0.000000e+00> : vector<8x64xf32>
    %353 = tpu.matmul %352, %273, %cst_125 {dimension_numbers = #tpu.dot_dimension_numbers<[1], [0], [0], [1], [0, 0, 1, 1], [], []>} : vector<8x128xf32>, vector<128x64xf32>, vector<8x64xf32> -> vector<8x64xf32>
    %354 = arith.addf %353, %274 : vector<8x64xf32>
    %cst_126 = arith.constant dense<0xFF800000> : vector<8xf32>
    %355 = vector.multi_reduction <maximumf>, %354, %cst_126 [1] : vector<8x64xf32> to vector<8xf32>
    %356 = vector.shape_cast %355 : vector<8xf32> to vector<8x1xf32>
    %357 = vector.broadcast %356 : vector<8x1xf32> to vector<8x64xf32>
    %358 = arith.subf %354, %357 : vector<8x64xf32>
    %359 = math.exp %358 : vector<8x64xf32>
    %cst_127 = arith.constant dense<0.000000e+00> : vector<8xf32>
    %360 = vector.multi_reduction <add>, %359, %cst_127 [1] : vector<8x64xf32> to vector<8xf32>
    %361 = vector.shape_cast %360 : vector<8xf32> to vector<8x1xf32>
    %362 = vector.broadcast %361 : vector<8x1xf32> to vector<8x64xf32>
    %363 = arith.divf %359, %362 : vector<8x64xf32>
    %cst_128 = arith.constant dense<0.000000e+00> : vector<8x128xf32>
    %364 = tpu.matmul %363, %272, %cst_128 {dimension_numbers = #tpu.dot_dimension_numbers<[1], [0], [0], [1], [0, 0, 1, 1], [], []>} : vector<8x64xf32>, vector<64x128xf32>, vector<8x128xf32> -> vector<8x128xf32>
    %365 = tpu.concatenate %352, %364 in 1 : vector<8x128xf32>, vector<8x128xf32> -> vector<8x256xf32>
    %c0_129 = arith.constant 0 : index
    %c0_130 = arith.constant 0 : index
    %366 = vector.load %arg11[%c0_129, %c0_130] : memref<256x128xf32, #tpu.memory_space<vmem>>, vector<256x128xf32>
    %cst_131 = arith.constant dense<0.000000e+00> : vector<8x128xf32>
    %367 = tpu.matmul %365, %366, %cst_131 {dimension_numbers = #tpu.dot_dimension_numbers<[1], [0], [0], [1], [0, 0, 1, 1], [], []>} : vector<8x256xf32>, vector<256x128xf32>, vector<8x128xf32> -> vector<8x128xf32>
    %368 = arith.addf %367, %22 : vector<8x128xf32>
    %369 = math.tanh %368 : vector<8x128xf32>
    %c8_132 = arith.constant 8 : index
    %c0_133 = arith.constant 0 : index
    %370 = vector.load %arg19[%c8_132, %c0_133] : memref<64x128xf32, #tpu.memory_space<vmem>>, vector<8x128xf32>
    tpu.vector_store %arg19[%c8_132, %c0_133], %369 {strides = array<i32>} : memref<64x128xf32, #tpu.memory_space<vmem>>, vector<8x128xf32>,
    %c0_134 = arith.constant 0 : index
    %c0_135 = arith.constant 0 : index
    %371 = vector.load %arg8[%c0_134, %c0_135] : memref<128x384xf32, #tpu.memory_space<vmem>>, vector<128x384xf32>
    %cst_136 = arith.constant dense<0.000000e+00> : vector<8x384xf32>
    %372 = tpu.matmul %352, %371, %cst_136 {dimension_numbers = #tpu.dot_dimension_numbers<[1], [0], [0], [1], [0, 0, 1, 1], [], []>} : vector<8x128xf32>, vector<128x384xf32>, vector<8x384xf32> -> vector<8x384xf32>
    %373 = arith.addf %372, %19 : vector<8x384xf32>
    %c16_137 = arith.constant 16 : index
    %c0_138 = arith.constant 0 : index
    %374 = vector.load %arg17[%c16_137, %c0_138] : memref<64x384xf32, #tpu.memory_space<vmem>>, vector<8x384xf32>
    %375 = vector.extract_strided_slice %374 {offsets = [0, 0], sizes = [8, 128], strides = [1, 1]} : vector<8x384xf32> to vector<8x128xf32>
    %376 = vector.extract_strided_slice %373 {offsets = [0, 0], sizes = [8, 128], strides = [1, 1]} : vector<8x384xf32> to vector<8x128xf32>
    %377 = arith.addf %375, %376 : vector<8x128xf32>
    %378 = arith.negf %377 : vector<8x128xf32>
    %379 = math.exp %378 : vector<8x128xf32>
    %cst_139 = arith.constant 1.000000e+00 : f32
    %380 = vector.broadcast %cst_139 : f32 to vector<8x128xf32>
    %381 = arith.addf %380, %379 : vector<8x128xf32>
    %382 = arith.divf %380, %381 : vector<8x128xf32>
    %383 = vector.extract_strided_slice %374 {offsets = [0, 128], sizes = [8, 128], strides = [1, 1]} : vector<8x384xf32> to vector<8x128xf32>
    %384 = vector.extract_strided_slice %373 {offsets = [0, 128], sizes = [8, 128], strides = [1, 1]} : vector<8x384xf32> to vector<8x128xf32>
    %385 = arith.addf %383, %384 : vector<8x128xf32>
    %386 = arith.negf %385 : vector<8x128xf32>
    %387 = math.exp %386 : vector<8x128xf32>
    %cst_140 = arith.constant 1.000000e+00 : f32
    %388 = vector.broadcast %cst_140 : f32 to vector<8x128xf32>
    %389 = arith.addf %388, %387 : vector<8x128xf32>
    %390 = arith.divf %388, %389 : vector<8x128xf32>
    %391 = vector.extract_strided_slice %374 {offsets = [0, 256], sizes = [8, 128], strides = [1, 1]} : vector<8x384xf32> to vector<8x128xf32>
    %392 = vector.extract_strided_slice %373 {offsets = [0, 256], sizes = [8, 128], strides = [1, 1]} : vector<8x384xf32> to vector<8x128xf32>
    %393 = arith.mulf %382, %392 : vector<8x128xf32>
    %394 = arith.addf %391, %393 : vector<8x128xf32>
    %395 = math.tanh %394 : vector<8x128xf32>
    %cst_141 = arith.constant 1.000000e+00 : f32
    %396 = vector.broadcast %cst_141 : f32 to vector<8x128xf32>
    %397 = arith.subf %396, %390 : vector<8x128xf32>
    %398 = arith.mulf %397, %395 : vector<8x128xf32>
    %399 = arith.mulf %390, %352 : vector<8x128xf32>
    %400 = arith.addf %398, %399 : vector<8x128xf32>
    %cst_142 = arith.constant dense<0.000000e+00> : vector<8x64xf32>
    %401 = tpu.matmul %400, %273, %cst_142 {dimension_numbers = #tpu.dot_dimension_numbers<[1], [0], [0], [1], [0, 0, 1, 1], [], []>} : vector<8x128xf32>, vector<128x64xf32>, vector<8x64xf32> -> vector<8x64xf32>
    %402 = arith.addf %401, %274 : vector<8x64xf32>
    %cst_143 = arith.constant dense<0xFF800000> : vector<8xf32>
    %403 = vector.multi_reduction <maximumf>, %402, %cst_143 [1] : vector<8x64xf32> to vector<8xf32>
    %404 = vector.shape_cast %403 : vector<8xf32> to vector<8x1xf32>
    %405 = vector.broadcast %404 : vector<8x1xf32> to vector<8x64xf32>
    %406 = arith.subf %402, %405 : vector<8x64xf32>
    %407 = math.exp %406 : vector<8x64xf32>
    %cst_144 = arith.constant dense<0.000000e+00> : vector<8xf32>
    %408 = vector.multi_reduction <add>, %407, %cst_144 [1] : vector<8x64xf32> to vector<8xf32>
    %409 = vector.shape_cast %408 : vector<8xf32> to vector<8x1xf32>
    %410 = vector.broadcast %409 : vector<8x1xf32> to vector<8x64xf32>
    %411 = arith.divf %407, %410 : vector<8x64xf32>
    %cst_145 = arith.constant dense<0.000000e+00> : vector<8x128xf32>
    %412 = tpu.matmul %411, %272, %cst_145 {dimension_numbers = #tpu.dot_dimension_numbers<[1], [0], [0], [1], [0, 0, 1, 1], [], []>} : vector<8x64xf32>, vector<64x128xf32>, vector<8x128xf32> -> vector<8x128xf32>
    %413 = tpu.concatenate %400, %412 in 1 : vector<8x128xf32>, vector<8x128xf32> -> vector<8x256xf32>
    %c0_146 = arith.constant 0 : index
    %c0_147 = arith.constant 0 : index
    %414 = vector.load %arg11[%c0_146, %c0_147] : memref<256x128xf32, #tpu.memory_space<vmem>>, vector<256x128xf32>
    %cst_148 = arith.constant dense<0.000000e+00> : vector<8x128xf32>
    %415 = tpu.matmul %413, %414, %cst_148 {dimension_numbers = #tpu.dot_dimension_numbers<[1], [0], [0], [1], [0, 0, 1, 1], [], []>} : vector<8x256xf32>, vector<256x128xf32>, vector<8x128xf32> -> vector<8x128xf32>
    %416 = arith.addf %415, %22 : vector<8x128xf32>
    %417 = math.tanh %416 : vector<8x128xf32>
    %c16_149 = arith.constant 16 : index
    %c0_150 = arith.constant 0 : index
    %418 = vector.load %arg19[%c16_149, %c0_150] : memref<64x128xf32, #tpu.memory_space<vmem>>, vector<8x128xf32>
    tpu.vector_store %arg19[%c16_149, %c0_150], %417 {strides = array<i32>} : memref<64x128xf32, #tpu.memory_space<vmem>>, vector<8x128xf32>,
    %c0_151 = arith.constant 0 : index
    %c0_152 = arith.constant 0 : index
    %419 = vector.load %arg8[%c0_151, %c0_152] : memref<128x384xf32, #tpu.memory_space<vmem>>, vector<128x384xf32>
    %cst_153 = arith.constant dense<0.000000e+00> : vector<8x384xf32>
    %420 = tpu.matmul %400, %419, %cst_153 {dimension_numbers = #tpu.dot_dimension_numbers<[1], [0], [0], [1], [0, 0, 1, 1], [], []>} : vector<8x128xf32>, vector<128x384xf32>, vector<8x384xf32> -> vector<8x384xf32>
    %421 = arith.addf %420, %19 : vector<8x384xf32>
    %c24_154 = arith.constant 24 : index
    %c0_155 = arith.constant 0 : index
    %422 = vector.load %arg17[%c24_154, %c0_155] : memref<64x384xf32, #tpu.memory_space<vmem>>, vector<8x384xf32>
    %423 = vector.extract_strided_slice %422 {offsets = [0, 0], sizes = [8, 128], strides = [1, 1]} : vector<8x384xf32> to vector<8x128xf32>
    %424 = vector.extract_strided_slice %421 {offsets = [0, 0], sizes = [8, 128], strides = [1, 1]} : vector<8x384xf32> to vector<8x128xf32>
    %425 = arith.addf %423, %424 : vector<8x128xf32>
    %426 = arith.negf %425 : vector<8x128xf32>
    %427 = math.exp %426 : vector<8x128xf32>
    %cst_156 = arith.constant 1.000000e+00 : f32
    %428 = vector.broadcast %cst_156 : f32 to vector<8x128xf32>
    %429 = arith.addf %428, %427 : vector<8x128xf32>
    %430 = arith.divf %428, %429 : vector<8x128xf32>
    %431 = vector.extract_strided_slice %422 {offsets = [0, 128], sizes = [8, 128], strides = [1, 1]} : vector<8x384xf32> to vector<8x128xf32>
    %432 = vector.extract_strided_slice %421 {offsets = [0, 128], sizes = [8, 128], strides = [1, 1]} : vector<8x384xf32> to vector<8x128xf32>
    %433 = arith.addf %431, %432 : vector<8x128xf32>
    %434 = arith.negf %433 : vector<8x128xf32>
    %435 = math.exp %434 : vector<8x128xf32>
    %cst_157 = arith.constant 1.000000e+00 : f32
    %436 = vector.broadcast %cst_157 : f32 to vector<8x128xf32>
    %437 = arith.addf %436, %435 : vector<8x128xf32>
    %438 = arith.divf %436, %437 : vector<8x128xf32>
    %439 = vector.extract_strided_slice %422 {offsets = [0, 256], sizes = [8, 128], strides = [1, 1]} : vector<8x384xf32> to vector<8x128xf32>
    %440 = vector.extract_strided_slice %421 {offsets = [0, 256], sizes = [8, 128], strides = [1, 1]} : vector<8x384xf32> to vector<8x128xf32>
    %441 = arith.mulf %430, %440 : vector<8x128xf32>
    %442 = arith.addf %439, %441 : vector<8x128xf32>
    %443 = math.tanh %442 : vector<8x128xf32>
    %cst_158 = arith.constant 1.000000e+00 : f32
    %444 = vector.broadcast %cst_158 : f32 to vector<8x128xf32>
    %445 = arith.subf %444, %438 : vector<8x128xf32>
    %446 = arith.mulf %445, %443 : vector<8x128xf32>
    %447 = arith.mulf %438, %400 : vector<8x128xf32>
    %448 = arith.addf %446, %447 : vector<8x128xf32>
    %cst_159 = arith.constant dense<0.000000e+00> : vector<8x64xf32>
    %449 = tpu.matmul %448, %273, %cst_159 {dimension_numbers = #tpu.dot_dimension_numbers<[1], [0], [0], [1], [0, 0, 1, 1], [], []>} : vector<8x128xf32>, vector<128x64xf32>, vector<8x64xf32> -> vector<8x64xf32>
    %450 = arith.addf %449, %274 : vector<8x64xf32>
    %cst_160 = arith.constant dense<0xFF800000> : vector<8xf32>
    %451 = vector.multi_reduction <maximumf>, %450, %cst_160 [1] : vector<8x64xf32> to vector<8xf32>
    %452 = vector.shape_cast %451 : vector<8xf32> to vector<8x1xf32>
    %453 = vector.broadcast %452 : vector<8x1xf32> to vector<8x64xf32>
    %454 = arith.subf %450, %453 : vector<8x64xf32>
    %455 = math.exp %454 : vector<8x64xf32>
    %cst_161 = arith.constant dense<0.000000e+00> : vector<8xf32>
    %456 = vector.multi_reduction <add>, %455, %cst_161 [1] : vector<8x64xf32> to vector<8xf32>
    %457 = vector.shape_cast %456 : vector<8xf32> to vector<8x1xf32>
    %458 = vector.broadcast %457 : vector<8x1xf32> to vector<8x64xf32>
    %459 = arith.divf %455, %458 : vector<8x64xf32>
    %cst_162 = arith.constant dense<0.000000e+00> : vector<8x128xf32>
    %460 = tpu.matmul %459, %272, %cst_162 {dimension_numbers = #tpu.dot_dimension_numbers<[1], [0], [0], [1], [0, 0, 1, 1], [], []>} : vector<8x64xf32>, vector<64x128xf32>, vector<8x128xf32> -> vector<8x128xf32>
    %461 = tpu.concatenate %448, %460 in 1 : vector<8x128xf32>, vector<8x128xf32> -> vector<8x256xf32>
    %c0_163 = arith.constant 0 : index
    %c0_164 = arith.constant 0 : index
    %462 = vector.load %arg11[%c0_163, %c0_164] : memref<256x128xf32, #tpu.memory_space<vmem>>, vector<256x128xf32>
    %cst_165 = arith.constant dense<0.000000e+00> : vector<8x128xf32>
    %463 = tpu.matmul %461, %462, %cst_165 {dimension_numbers = #tpu.dot_dimension_numbers<[1], [0], [0], [1], [0, 0, 1, 1], [], []>} : vector<8x256xf32>, vector<256x128xf32>, vector<8x128xf32> -> vector<8x128xf32>
    %464 = arith.addf %463, %22 : vector<8x128xf32>
    %465 = math.tanh %464 : vector<8x128xf32>
    %c24_166 = arith.constant 24 : index
    %c0_167 = arith.constant 0 : index
    %466 = vector.load %arg19[%c24_166, %c0_167] : memref<64x128xf32, #tpu.memory_space<vmem>>, vector<8x128xf32>
    tpu.vector_store %arg19[%c24_166, %c0_167], %465 {strides = array<i32>} : memref<64x128xf32, #tpu.memory_space<vmem>>, vector<8x128xf32>,
    %c0_168 = arith.constant 0 : index
    %c0_169 = arith.constant 0 : index
    %467 = vector.load %arg8[%c0_168, %c0_169] : memref<128x384xf32, #tpu.memory_space<vmem>>, vector<128x384xf32>
    %cst_170 = arith.constant dense<0.000000e+00> : vector<8x384xf32>
    %468 = tpu.matmul %448, %467, %cst_170 {dimension_numbers = #tpu.dot_dimension_numbers<[1], [0], [0], [1], [0, 0, 1, 1], [], []>} : vector<8x128xf32>, vector<128x384xf32>, vector<8x384xf32> -> vector<8x384xf32>
    %469 = arith.addf %468, %19 : vector<8x384xf32>
    %c32_171 = arith.constant 32 : index
    %c0_172 = arith.constant 0 : index
    %470 = vector.load %arg17[%c32_171, %c0_172] : memref<64x384xf32, #tpu.memory_space<vmem>>, vector<8x384xf32>
    %471 = vector.extract_strided_slice %470 {offsets = [0, 0], sizes = [8, 128], strides = [1, 1]} : vector<8x384xf32> to vector<8x128xf32>
    %472 = vector.extract_strided_slice %469 {offsets = [0, 0], sizes = [8, 128], strides = [1, 1]} : vector<8x384xf32> to vector<8x128xf32>
    %473 = arith.addf %471, %472 : vector<8x128xf32>
    %474 = arith.negf %473 : vector<8x128xf32>
    %475 = math.exp %474 : vector<8x128xf32>
    %cst_173 = arith.constant 1.000000e+00 : f32
    %476 = vector.broadcast %cst_173 : f32 to vector<8x128xf32>
    %477 = arith.addf %476, %475 : vector<8x128xf32>
    %478 = arith.divf %476, %477 : vector<8x128xf32>
    %479 = vector.extract_strided_slice %470 {offsets = [0, 128], sizes = [8, 128], strides = [1, 1]} : vector<8x384xf32> to vector<8x128xf32>
    %480 = vector.extract_strided_slice %469 {offsets = [0, 128], sizes = [8, 128], strides = [1, 1]} : vector<8x384xf32> to vector<8x128xf32>
    %481 = arith.addf %479, %480 : vector<8x128xf32>
    %482 = arith.negf %481 : vector<8x128xf32>
    %483 = math.exp %482 : vector<8x128xf32>
    %cst_174 = arith.constant 1.000000e+00 : f32
    %484 = vector.broadcast %cst_174 : f32 to vector<8x128xf32>
    %485 = arith.addf %484, %483 : vector<8x128xf32>
    %486 = arith.divf %484, %485 : vector<8x128xf32>
    %487 = vector.extract_strided_slice %470 {offsets = [0, 256], sizes = [8, 128], strides = [1, 1]} : vector<8x384xf32> to vector<8x128xf32>
    %488 = vector.extract_strided_slice %469 {offsets = [0, 256], sizes = [8, 128], strides = [1, 1]} : vector<8x384xf32> to vector<8x128xf32>
    %489 = arith.mulf %478, %488 : vector<8x128xf32>
    %490 = arith.addf %487, %489 : vector<8x128xf32>
    %491 = math.tanh %490 : vector<8x128xf32>
    %cst_175 = arith.constant 1.000000e+00 : f32
    %492 = vector.broadcast %cst_175 : f32 to vector<8x128xf32>
    %493 = arith.subf %492, %486 : vector<8x128xf32>
    %494 = arith.mulf %493, %491 : vector<8x128xf32>
    %495 = arith.mulf %486, %448 : vector<8x128xf32>
    %496 = arith.addf %494, %495 : vector<8x128xf32>
    %cst_176 = arith.constant dense<0.000000e+00> : vector<8x64xf32>
    %497 = tpu.matmul %496, %273, %cst_176 {dimension_numbers = #tpu.dot_dimension_numbers<[1], [0], [0], [1], [0, 0, 1, 1], [], []>} : vector<8x128xf32>, vector<128x64xf32>, vector<8x64xf32> -> vector<8x64xf32>
    %498 = arith.addf %497, %274 : vector<8x64xf32>
    %cst_177 = arith.constant dense<0xFF800000> : vector<8xf32>
    %499 = vector.multi_reduction <maximumf>, %498, %cst_177 [1] : vector<8x64xf32> to vector<8xf32>
    %500 = vector.shape_cast %499 : vector<8xf32> to vector<8x1xf32>
    %501 = vector.broadcast %500 : vector<8x1xf32> to vector<8x64xf32>
    %502 = arith.subf %498, %501 : vector<8x64xf32>
    %503 = math.exp %502 : vector<8x64xf32>
    %cst_178 = arith.constant dense<0.000000e+00> : vector<8xf32>
    %504 = vector.multi_reduction <add>, %503, %cst_178 [1] : vector<8x64xf32> to vector<8xf32>
    %505 = vector.shape_cast %504 : vector<8xf32> to vector<8x1xf32>
    %506 = vector.broadcast %505 : vector<8x1xf32> to vector<8x64xf32>
    %507 = arith.divf %503, %506 : vector<8x64xf32>
    %cst_179 = arith.constant dense<0.000000e+00> : vector<8x128xf32>
    %508 = tpu.matmul %507, %272, %cst_179 {dimension_numbers = #tpu.dot_dimension_numbers<[1], [0], [0], [1], [0, 0, 1, 1], [], []>} : vector<8x64xf32>, vector<64x128xf32>, vector<8x128xf32> -> vector<8x128xf32>
    %509 = tpu.concatenate %496, %508 in 1 : vector<8x128xf32>, vector<8x128xf32> -> vector<8x256xf32>
    %c0_180 = arith.constant 0 : index
    %c0_181 = arith.constant 0 : index
    %510 = vector.load %arg11[%c0_180, %c0_181] : memref<256x128xf32, #tpu.memory_space<vmem>>, vector<256x128xf32>
    %cst_182 = arith.constant dense<0.000000e+00> : vector<8x128xf32>
    %511 = tpu.matmul %509, %510, %cst_182 {dimension_numbers = #tpu.dot_dimension_numbers<[1], [0], [0], [1], [0, 0, 1, 1], [], []>} : vector<8x256xf32>, vector<256x128xf32>, vector<8x128xf32> -> vector<8x128xf32>
    %512 = arith.addf %511, %22 : vector<8x128xf32>
    %513 = math.tanh %512 : vector<8x128xf32>
    %c32_183 = arith.constant 32 : index
    %c0_184 = arith.constant 0 : index
    %514 = vector.load %arg19[%c32_183, %c0_184] : memref<64x128xf32, #tpu.memory_space<vmem>>, vector<8x128xf32>
    tpu.vector_store %arg19[%c32_183, %c0_184], %513 {strides = array<i32>} : memref<64x128xf32, #tpu.memory_space<vmem>>, vector<8x128xf32>,
    %c0_185 = arith.constant 0 : index
    %c0_186 = arith.constant 0 : index
    %515 = vector.load %arg8[%c0_185, %c0_186] : memref<128x384xf32, #tpu.memory_space<vmem>>, vector<128x384xf32>
    %cst_187 = arith.constant dense<0.000000e+00> : vector<8x384xf32>
    %516 = tpu.matmul %496, %515, %cst_187 {dimension_numbers = #tpu.dot_dimension_numbers<[1], [0], [0], [1], [0, 0, 1, 1], [], []>} : vector<8x128xf32>, vector<128x384xf32>, vector<8x384xf32> -> vector<8x384xf32>
    %517 = arith.addf %516, %19 : vector<8x384xf32>
    %c40_188 = arith.constant 40 : index
    %c0_189 = arith.constant 0 : index
    %518 = vector.load %arg17[%c40_188, %c0_189] : memref<64x384xf32, #tpu.memory_space<vmem>>, vector<8x384xf32>
    %519 = vector.extract_strided_slice %518 {offsets = [0, 0], sizes = [8, 128], strides = [1, 1]} : vector<8x384xf32> to vector<8x128xf32>
    %520 = vector.extract_strided_slice %517 {offsets = [0, 0], sizes = [8, 128], strides = [1, 1]} : vector<8x384xf32> to vector<8x128xf32>
    %521 = arith.addf %519, %520 : vector<8x128xf32>
    %522 = arith.negf %521 : vector<8x128xf32>
    %523 = math.exp %522 : vector<8x128xf32>
    %cst_190 = arith.constant 1.000000e+00 : f32
    %524 = vector.broadcast %cst_190 : f32 to vector<8x128xf32>
    %525 = arith.addf %524, %523 : vector<8x128xf32>
    %526 = arith.divf %524, %525 : vector<8x128xf32>
    %527 = vector.extract_strided_slice %518 {offsets = [0, 128], sizes = [8, 128], strides = [1, 1]} : vector<8x384xf32> to vector<8x128xf32>
    %528 = vector.extract_strided_slice %517 {offsets = [0, 128], sizes = [8, 128], strides = [1, 1]} : vector<8x384xf32> to vector<8x128xf32>
    %529 = arith.addf %527, %528 : vector<8x128xf32>
    %530 = arith.negf %529 : vector<8x128xf32>
    %531 = math.exp %530 : vector<8x128xf32>
    %cst_191 = arith.constant 1.000000e+00 : f32
    %532 = vector.broadcast %cst_191 : f32 to vector<8x128xf32>
    %533 = arith.addf %532, %531 : vector<8x128xf32>
    %534 = arith.divf %532, %533 : vector<8x128xf32>
    %535 = vector.extract_strided_slice %518 {offsets = [0, 256], sizes = [8, 128], strides = [1, 1]} : vector<8x384xf32> to vector<8x128xf32>
    %536 = vector.extract_strided_slice %517 {offsets = [0, 256], sizes = [8, 128], strides = [1, 1]} : vector<8x384xf32> to vector<8x128xf32>
    %537 = arith.mulf %526, %536 : vector<8x128xf32>
    %538 = arith.addf %535, %537 : vector<8x128xf32>
    %539 = math.tanh %538 : vector<8x128xf32>
    %cst_192 = arith.constant 1.000000e+00 : f32
    %540 = vector.broadcast %cst_192 : f32 to vector<8x128xf32>
    %541 = arith.subf %540, %534 : vector<8x128xf32>
    %542 = arith.mulf %541, %539 : vector<8x128xf32>
    %543 = arith.mulf %534, %496 : vector<8x128xf32>
    %544 = arith.addf %542, %543 : vector<8x128xf32>
    %cst_193 = arith.constant dense<0.000000e+00> : vector<8x64xf32>
    %545 = tpu.matmul %544, %273, %cst_193 {dimension_numbers = #tpu.dot_dimension_numbers<[1], [0], [0], [1], [0, 0, 1, 1], [], []>} : vector<8x128xf32>, vector<128x64xf32>, vector<8x64xf32> -> vector<8x64xf32>
    %546 = arith.addf %545, %274 : vector<8x64xf32>
    %cst_194 = arith.constant dense<0xFF800000> : vector<8xf32>
    %547 = vector.multi_reduction <maximumf>, %546, %cst_194 [1] : vector<8x64xf32> to vector<8xf32>
    %548 = vector.shape_cast %547 : vector<8xf32> to vector<8x1xf32>
    %549 = vector.broadcast %548 : vector<8x1xf32> to vector<8x64xf32>
    %550 = arith.subf %546, %549 : vector<8x64xf32>
    %551 = math.exp %550 : vector<8x64xf32>
    %cst_195 = arith.constant dense<0.000000e+00> : vector<8xf32>
    %552 = vector.multi_reduction <add>, %551, %cst_195 [1] : vector<8x64xf32> to vector<8xf32>
    %553 = vector.shape_cast %552 : vector<8xf32> to vector<8x1xf32>
    %554 = vector.broadcast %553 : vector<8x1xf32> to vector<8x64xf32>
    %555 = arith.divf %551, %554 : vector<8x64xf32>
    %cst_196 = arith.constant dense<0.000000e+00> : vector<8x128xf32>
    %556 = tpu.matmul %555, %272, %cst_196 {dimension_numbers = #tpu.dot_dimension_numbers<[1], [0], [0], [1], [0, 0, 1, 1], [], []>} : vector<8x64xf32>, vector<64x128xf32>, vector<8x128xf32> -> vector<8x128xf32>
    %557 = tpu.concatenate %544, %556 in 1 : vector<8x128xf32>, vector<8x128xf32> -> vector<8x256xf32>
    %c0_197 = arith.constant 0 : index
    %c0_198 = arith.constant 0 : index
    %558 = vector.load %arg11[%c0_197, %c0_198] : memref<256x128xf32, #tpu.memory_space<vmem>>, vector<256x128xf32>
    %cst_199 = arith.constant dense<0.000000e+00> : vector<8x128xf32>
    %559 = tpu.matmul %557, %558, %cst_199 {dimension_numbers = #tpu.dot_dimension_numbers<[1], [0], [0], [1], [0, 0, 1, 1], [], []>} : vector<8x256xf32>, vector<256x128xf32>, vector<8x128xf32> -> vector<8x128xf32>
    %560 = arith.addf %559, %22 : vector<8x128xf32>
    %561 = math.tanh %560 : vector<8x128xf32>
    %c40_200 = arith.constant 40 : index
    %c0_201 = arith.constant 0 : index
    %562 = vector.load %arg19[%c40_200, %c0_201] : memref<64x128xf32, #tpu.memory_space<vmem>>, vector<8x128xf32>
    tpu.vector_store %arg19[%c40_200, %c0_201], %561 {strides = array<i32>} : memref<64x128xf32, #tpu.memory_space<vmem>>, vector<8x128xf32>,
    %c0_202 = arith.constant 0 : index
    %c0_203 = arith.constant 0 : index
    %563 = vector.load %arg8[%c0_202, %c0_203] : memref<128x384xf32, #tpu.memory_space<vmem>>, vector<128x384xf32>
    %cst_204 = arith.constant dense<0.000000e+00> : vector<8x384xf32>
    %564 = tpu.matmul %544, %563, %cst_204 {dimension_numbers = #tpu.dot_dimension_numbers<[1], [0], [0], [1], [0, 0, 1, 1], [], []>} : vector<8x128xf32>, vector<128x384xf32>, vector<8x384xf32> -> vector<8x384xf32>
    %565 = arith.addf %564, %19 : vector<8x384xf32>
    %c48_205 = arith.constant 48 : index
    %c0_206 = arith.constant 0 : index
    %566 = vector.load %arg17[%c48_205, %c0_206] : memref<64x384xf32, #tpu.memory_space<vmem>>, vector<8x384xf32>
    %567 = vector.extract_strided_slice %566 {offsets = [0, 0], sizes = [8, 128], strides = [1, 1]} : vector<8x384xf32> to vector<8x128xf32>
    %568 = vector.extract_strided_slice %565 {offsets = [0, 0], sizes = [8, 128], strides = [1, 1]} : vector<8x384xf32> to vector<8x128xf32>
    %569 = arith.addf %567, %568 : vector<8x128xf32>
    %570 = arith.negf %569 : vector<8x128xf32>
    %571 = math.exp %570 : vector<8x128xf32>
    %cst_207 = arith.constant 1.000000e+00 : f32
    %572 = vector.broadcast %cst_207 : f32 to vector<8x128xf32>
    %573 = arith.addf %572, %571 : vector<8x128xf32>
    %574 = arith.divf %572, %573 : vector<8x128xf32>
    %575 = vector.extract_strided_slice %566 {offsets = [0, 128], sizes = [8, 128], strides = [1, 1]} : vector<8x384xf32> to vector<8x128xf32>
    %576 = vector.extract_strided_slice %565 {offsets = [0, 128], sizes = [8, 128], strides = [1, 1]} : vector<8x384xf32> to vector<8x128xf32>
    %577 = arith.addf %575, %576 : vector<8x128xf32>
    %578 = arith.negf %577 : vector<8x128xf32>
    %579 = math.exp %578 : vector<8x128xf32>
    %cst_208 = arith.constant 1.000000e+00 : f32
    %580 = vector.broadcast %cst_208 : f32 to vector<8x128xf32>
    %581 = arith.addf %580, %579 : vector<8x128xf32>
    %582 = arith.divf %580, %581 : vector<8x128xf32>
    %583 = vector.extract_strided_slice %566 {offsets = [0, 256], sizes = [8, 128], strides = [1, 1]} : vector<8x384xf32> to vector<8x128xf32>
    %584 = vector.extract_strided_slice %565 {offsets = [0, 256], sizes = [8, 128], strides = [1, 1]} : vector<8x384xf32> to vector<8x128xf32>
    %585 = arith.mulf %574, %584 : vector<8x128xf32>
    %586 = arith.addf %583, %585 : vector<8x128xf32>
    %587 = math.tanh %586 : vector<8x128xf32>
    %cst_209 = arith.constant 1.000000e+00 : f32
    %588 = vector.broadcast %cst_209 : f32 to vector<8x128xf32>
    %589 = arith.subf %588, %582 : vector<8x128xf32>
    %590 = arith.mulf %589, %587 : vector<8x128xf32>
    %591 = arith.mulf %582, %544 : vector<8x128xf32>
    %592 = arith.addf %590, %591 : vector<8x128xf32>
    %cst_210 = arith.constant dense<0.000000e+00> : vector<8x64xf32>
    %593 = tpu.matmul %592, %273, %cst_210 {dimension_numbers = #tpu.dot_dimension_numbers<[1], [0], [0], [1], [0, 0, 1, 1], [], []>} : vector<8x128xf32>, vector<128x64xf32>, vector<8x64xf32> -> vector<8x64xf32>
    %594 = arith.addf %593, %274 : vector<8x64xf32>
    %cst_211 = arith.constant dense<0xFF800000> : vector<8xf32>
    %595 = vector.multi_reduction <maximumf>, %594, %cst_211 [1] : vector<8x64xf32> to vector<8xf32>
    %596 = vector.shape_cast %595 : vector<8xf32> to vector<8x1xf32>
    %597 = vector.broadcast %596 : vector<8x1xf32> to vector<8x64xf32>
    %598 = arith.subf %594, %597 : vector<8x64xf32>
    %599 = math.exp %598 : vector<8x64xf32>
    %cst_212 = arith.constant dense<0.000000e+00> : vector<8xf32>
    %600 = vector.multi_reduction <add>, %599, %cst_212 [1] : vector<8x64xf32> to vector<8xf32>
    %601 = vector.shape_cast %600 : vector<8xf32> to vector<8x1xf32>
    %602 = vector.broadcast %601 : vector<8x1xf32> to vector<8x64xf32>
    %603 = arith.divf %599, %602 : vector<8x64xf32>
    %cst_213 = arith.constant dense<0.000000e+00> : vector<8x128xf32>
    %604 = tpu.matmul %603, %272, %cst_213 {dimension_numbers = #tpu.dot_dimension_numbers<[1], [0], [0], [1], [0, 0, 1, 1], [], []>} : vector<8x64xf32>, vector<64x128xf32>, vector<8x128xf32> -> vector<8x128xf32>
    %605 = tpu.concatenate %592, %604 in 1 : vector<8x128xf32>, vector<8x128xf32> -> vector<8x256xf32>
    %c0_214 = arith.constant 0 : index
    %c0_215 = arith.constant 0 : index
    %606 = vector.load %arg11[%c0_214, %c0_215] : memref<256x128xf32, #tpu.memory_space<vmem>>, vector<256x128xf32>
    %cst_216 = arith.constant dense<0.000000e+00> : vector<8x128xf32>
    %607 = tpu.matmul %605, %606, %cst_216 {dimension_numbers = #tpu.dot_dimension_numbers<[1], [0], [0], [1], [0, 0, 1, 1], [], []>} : vector<8x256xf32>, vector<256x128xf32>, vector<8x128xf32> -> vector<8x128xf32>
    %608 = arith.addf %607, %22 : vector<8x128xf32>
    %609 = math.tanh %608 : vector<8x128xf32>
    %c48_217 = arith.constant 48 : index
    %c0_218 = arith.constant 0 : index
    %610 = vector.load %arg19[%c48_217, %c0_218] : memref<64x128xf32, #tpu.memory_space<vmem>>, vector<8x128xf32>
    tpu.vector_store %arg19[%c48_217, %c0_218], %609 {strides = array<i32>} : memref<64x128xf32, #tpu.memory_space<vmem>>, vector<8x128xf32>,
    %c0_219 = arith.constant 0 : index
    %c0_220 = arith.constant 0 : index
    %611 = vector.load %arg8[%c0_219, %c0_220] : memref<128x384xf32, #tpu.memory_space<vmem>>, vector<128x384xf32>
    %cst_221 = arith.constant dense<0.000000e+00> : vector<8x384xf32>
    %612 = tpu.matmul %592, %611, %cst_221 {dimension_numbers = #tpu.dot_dimension_numbers<[1], [0], [0], [1], [0, 0, 1, 1], [], []>} : vector<8x128xf32>, vector<128x384xf32>, vector<8x384xf32> -> vector<8x384xf32>
    %613 = arith.addf %612, %19 : vector<8x384xf32>
    %c56_222 = arith.constant 56 : index
    %c0_223 = arith.constant 0 : index
    %614 = vector.load %arg17[%c56_222, %c0_223] : memref<64x384xf32, #tpu.memory_space<vmem>>, vector<8x384xf32>
    %615 = vector.extract_strided_slice %614 {offsets = [0, 0], sizes = [8, 128], strides = [1, 1]} : vector<8x384xf32> to vector<8x128xf32>
    %616 = vector.extract_strided_slice %613 {offsets = [0, 0], sizes = [8, 128], strides = [1, 1]} : vector<8x384xf32> to vector<8x128xf32>
    %617 = arith.addf %615, %616 : vector<8x128xf32>
    %618 = arith.negf %617 : vector<8x128xf32>
    %619 = math.exp %618 : vector<8x128xf32>
    %cst_224 = arith.constant 1.000000e+00 : f32
    %620 = vector.broadcast %cst_224 : f32 to vector<8x128xf32>
    %621 = arith.addf %620, %619 : vector<8x128xf32>
    %622 = arith.divf %620, %621 : vector<8x128xf32>
    %623 = vector.extract_strided_slice %614 {offsets = [0, 128], sizes = [8, 128], strides = [1, 1]} : vector<8x384xf32> to vector<8x128xf32>
    %624 = vector.extract_strided_slice %613 {offsets = [0, 128], sizes = [8, 128], strides = [1, 1]} : vector<8x384xf32> to vector<8x128xf32>
    %625 = arith.addf %623, %624 : vector<8x128xf32>
    %626 = arith.negf %625 : vector<8x128xf32>
    %627 = math.exp %626 : vector<8x128xf32>
    %cst_225 = arith.constant 1.000000e+00 : f32
    %628 = vector.broadcast %cst_225 : f32 to vector<8x128xf32>
    %629 = arith.addf %628, %627 : vector<8x128xf32>
    %630 = arith.divf %628, %629 : vector<8x128xf32>
    %631 = vector.extract_strided_slice %614 {offsets = [0, 256], sizes = [8, 128], strides = [1, 1]} : vector<8x384xf32> to vector<8x128xf32>
    %632 = vector.extract_strided_slice %613 {offsets = [0, 256], sizes = [8, 128], strides = [1, 1]} : vector<8x384xf32> to vector<8x128xf32>
    %633 = arith.mulf %622, %632 : vector<8x128xf32>
    %634 = arith.addf %631, %633 : vector<8x128xf32>
    %635 = math.tanh %634 : vector<8x128xf32>
    %cst_226 = arith.constant 1.000000e+00 : f32
    %636 = vector.broadcast %cst_226 : f32 to vector<8x128xf32>
    %637 = arith.subf %636, %630 : vector<8x128xf32>
    %638 = arith.mulf %637, %635 : vector<8x128xf32>
    %639 = arith.mulf %630, %592 : vector<8x128xf32>
    %640 = arith.addf %638, %639 : vector<8x128xf32>
    %cst_227 = arith.constant dense<0.000000e+00> : vector<8x64xf32>
    %641 = tpu.matmul %640, %273, %cst_227 {dimension_numbers = #tpu.dot_dimension_numbers<[1], [0], [0], [1], [0, 0, 1, 1], [], []>} : vector<8x128xf32>, vector<128x64xf32>, vector<8x64xf32> -> vector<8x64xf32>
    %642 = arith.addf %641, %274 : vector<8x64xf32>
    %cst_228 = arith.constant dense<0xFF800000> : vector<8xf32>
    %643 = vector.multi_reduction <maximumf>, %642, %cst_228 [1] : vector<8x64xf32> to vector<8xf32>
    %644 = vector.shape_cast %643 : vector<8xf32> to vector<8x1xf32>
    %645 = vector.broadcast %644 : vector<8x1xf32> to vector<8x64xf32>
    %646 = arith.subf %642, %645 : vector<8x64xf32>
    %647 = math.exp %646 : vector<8x64xf32>
    %cst_229 = arith.constant dense<0.000000e+00> : vector<8xf32>
    %648 = vector.multi_reduction <add>, %647, %cst_229 [1] : vector<8x64xf32> to vector<8xf32>
    %649 = vector.shape_cast %648 : vector<8xf32> to vector<8x1xf32>
    %650 = vector.broadcast %649 : vector<8x1xf32> to vector<8x64xf32>
    %651 = arith.divf %647, %650 : vector<8x64xf32>
    %cst_230 = arith.constant dense<0.000000e+00> : vector<8x128xf32>
    %652 = tpu.matmul %651, %272, %cst_230 {dimension_numbers = #tpu.dot_dimension_numbers<[1], [0], [0], [1], [0, 0, 1, 1], [], []>} : vector<8x64xf32>, vector<64x128xf32>, vector<8x128xf32> -> vector<8x128xf32>
    %653 = tpu.concatenate %640, %652 in 1 : vector<8x128xf32>, vector<8x128xf32> -> vector<8x256xf32>
    %c0_231 = arith.constant 0 : index
    %c0_232 = arith.constant 0 : index
    %654 = vector.load %arg11[%c0_231, %c0_232] : memref<256x128xf32, #tpu.memory_space<vmem>>, vector<256x128xf32>
    %cst_233 = arith.constant dense<0.000000e+00> : vector<8x128xf32>
    %655 = tpu.matmul %653, %654, %cst_233 {dimension_numbers = #tpu.dot_dimension_numbers<[1], [0], [0], [1], [0, 0, 1, 1], [], []>} : vector<8x256xf32>, vector<256x128xf32>, vector<8x128xf32> -> vector<8x128xf32>
    %656 = arith.addf %655, %22 : vector<8x128xf32>
    %657 = math.tanh %656 : vector<8x128xf32>
    %c56_234 = arith.constant 56 : index
    %c0_235 = arith.constant 0 : index
    %658 = vector.load %arg19[%c56_234, %c0_235] : memref<64x128xf32, #tpu.memory_space<vmem>>, vector<8x128xf32>
    tpu.vector_store %arg19[%c56_234, %c0_235], %657 {strides = array<i32>} : memref<64x128xf32, #tpu.memory_space<vmem>>, vector<8x128xf32>,
    %c0_236 = arith.constant 0 : index
    %c0_237 = arith.constant 0 : index
    %659 = vector.load %arg19[%c0_236, %c0_237] : memref<64x128xf32, #tpu.memory_space<vmem>>, vector<64x128xf32>
    %c0_238 = arith.constant 0 : index
    %c0_239 = arith.constant 0 : index
    %660 = vector.load %arg13[%c0_238, %c0_239] : memref<128x128xf32, #tpu.memory_space<vmem>>, vector<128x128xf32>
    %cst_240 = arith.constant dense<0.000000e+00> : vector<64x128xf32>
    %661 = tpu.matmul %659, %660, %cst_240 {dimension_numbers = #tpu.dot_dimension_numbers<[1], [0], [0], [1], [0, 0, 1, 1], [], []>} : vector<64x128xf32>, vector<128x128xf32>, vector<64x128xf32> -> vector<64x128xf32>
    %c0_241 = arith.constant 0 : index
    %c0_242 = arith.constant 0 : index
    %662 = vector.load %arg14[%c0_241, %c0_242] : memref<1x128xf32, #tpu.memory_space<vmem>>, vector<1x128xf32>
    %663 = vector.broadcast %662 : vector<1x128xf32> to vector<64x128xf32>
    %664 = arith.addf %661, %663 : vector<64x128xf32>
    %cst_243 = arith.constant dense<0xFF800000> : vector<64xf32>
    %665 = vector.multi_reduction <maximumf>, %664, %cst_243 [1] : vector<64x128xf32> to vector<64xf32>
    %666 = vector.shape_cast %665 : vector<64xf32> to vector<64x1xf32>
    %667 = vector.broadcast %666 : vector<64x1xf32> to vector<64x128xf32>
    %668 = arith.subf %664, %667 : vector<64x128xf32>
    %669 = math.exp %668 : vector<64x128xf32>
    %cst_244 = arith.constant dense<0.000000e+00> : vector<64xf32>
    %670 = vector.multi_reduction <add>, %669, %cst_244 [1] : vector<64x128xf32> to vector<64xf32>
    %671 = vector.shape_cast %670 : vector<64xf32> to vector<64x1xf32>
    %672 = math.log %671 : vector<64x1xf32>
    %673 = arith.addf %672, %666 : vector<64x1xf32>
    %674 = vector.broadcast %673 : vector<64x1xf32> to vector<64x128xf32>
    %675 = arith.subf %664, %674 : vector<64x128xf32>
    %c0_245 = arith.constant 0 : index
    %c0_246 = arith.constant 0 : index
    %676 = vector.load %arg15[%c0_245, %c0_246] : memref<64x128xf32, #tpu.memory_space<vmem>>, vector<64x128xf32>
    tpu.vector_store %arg15[%c0_245, %c0_246], %675 {strides = array<i32>} : memref<64x128xf32, #tpu.memory_space<vmem>>, vector<64x128xf32>,
    return
  }
}

</mosaic_0001>

<bundles_post_ra>
// kernel: seq2seq_forward.1
= control target key start
LH: loop header
LB: loop body
LE: loop exit
PB: predicated region body
PF: predicated region fallthrough
CT: control target
= control target key end

     0   :  { %20 = vsyncpa [#allocation7], 0  ;;  %s12754_s0 = inlined_call_operand.vmem [shape: f32[64,128], index: 0, kind: input, shape index: {}]   ;;  %s12755_s1 = inlined_call_operand.vmem [shape: f32[64,128], index: 1, kind: input, shape index: {}]   ;;  %s12756_s2 = inlined_call_operand.vmem [shape: f32[8,64], index: 2, kind: input, shape index: {}]   ;;  %s12757_s3 = inlined_call_operand.vmem [shape: f32[128,384], index: 3, kind: input, shape index: {}]   ;;  %s12758_s4 = inlined_call_operand.vmem [shape: f32[128,384], index: 4, kind: input, shape index: {}]   ;;  %s12759_s5 = inlined_call_operand.vmem [shape: f32[1,384], index: 5, kind: input, shape index: {}]   ;;  %s12760_s6 = inlined_call_operand.vmem [shape: f32[1,384], index: 6, kind: input, shape index: {}]   ;;  %s12761_s7 = inlined_call_operand.vmem [shape: f32[128,384], index: 7, kind: input, shape index: {}]   ;;  %s12762_s8 = inlined_call_operand.hbm [shape: f32[128,384], index: 8, kind: input, shape index: {}]   ;;  %s12763_s9 = inlined_call_operand.vmem [shape: f32[1,384], index: 9, kind: input, shape index: {}]   ;;  %s12764_s10 = inlined_call_operand.vmem [shape: f32[1,384], index: 10, kind: input, shape index: {}]   ;;  %s12765_s11 = inlined_call_operand.vmem [shape: f32[256,128], index: 11, kind: input, shape index: {}]   ;;  %s12766_s12 = inlined_call_operand.vmem [shape: f32[1,128], index: 12, kind: input, shape index: {}]   ;;  %s12767_s13 = inlined_call_operand.hbm [shape: f32[128,128], index: 13, kind: input, shape index: {}]   ;;  %s12768_s14 = inlined_call_operand.vmem [shape: f32[1,128], index: 14, kind: input, shape index: {}]   ;;  %s12769_s15 = inlined_call_operand.vmem [shape: f32[64,128], index: 15, kind: output, shape index: {}]  }
   0x1   :  { %21 = vsyncpa [#allocation9], 0  ;;  %s8577_s18 = smov [#allocation6]  }
   0x2   :  { %s43_s19 = sshll.u32 %s8577_s18, 4  ;;  %s44_s19 = int_to_ptr.vmem [resolvable:$true] %s43_s19 }
   0x3   :  { %s8541_s20 = scalar_lea.vmem %s44_s19, 6144  ;;  %p8546_p1 = scmp.lt.s32.totalorder %s44_s19, %s44_s19 }
   0x4   :  { %p8542_p0 = scmp.ne.s32.totalorder %s44_s19, %s8541_s20  ;;  %p8547_p2 = scmp.lt.s32.totalorder %s8541_s20, %s8541_s20 }
   0x6   :  { %p8548_p3 = por %p8547_p2, %p8546_p1 }
   0x8   :  { %p8549_p4 = pnand %p8548_p3, %p8542_p0 }
   0xa   :  { %8552 = shalt.err (!%p8549_p4)
}
   0xb   :  { %s8578_s21 = smov 384   ;;  %s8579_s22 = smov 24  }
   0xc   :  { %49 = dma.hbm_to_vmem [thread:$0]  %s12762_s8, 6144, %s44_s19, [#allocation7], %s8578_s21, %s8578_s21, %s8579_s22  }
   0xd   :  { %s8580_s25 = smov [#allocation8]  }
   0xe   :  { %s63_s26 = sshll.u32 %s8580_s25, 4  ;;  %s64_s26 = int_to_ptr.vmem [resolvable:$true] %s63_s26 }
   0xf   :  { %s8561_s27 = scalar_lea.vmem %s64_s26, 2048  ;;  %p8566_p6 = scmp.lt.s32.totalorder %s64_s26, %s64_s26 }
  0x10   :  { %p8562_p5 = scmp.ne.s32.totalorder %s64_s26, %s8561_s27  ;;  %p8567_p7 = scmp.lt.s32.totalorder %s8561_s27, %s8561_s27 }
  0x12   :  { %p8568_p8 = por %p8567_p7, %p8566_p6 }
  0x14   :  { %p8569_p9 = pnand %p8568_p8, %p8562_p5 }
  0x16   :  { %8572 = shalt.err (!%p8569_p9)
}
  0x17   :  { %s8581_s28 = smov 128   ;;  %s8582_s29 = smov 8  }
  0x18   :  { %69 = dma.hbm_to_vmem [thread:$0]  %s12767_s13, 2048, %s64_s26, [#allocation9], %s8581_s28, %s8581_s28, %s8582_s29  }
  0x19   :  { %8573 = dma.done.wait [#allocation7], 6144  }
  0x1a   :  { %8574 = vsyncadd [#allocation7], 4294961152 }
  0x1b   :  { %8575 = dma.done.wait [#allocation9], 2048  }
  0x1c   :  { %8576 = vsyncadd [#allocation9], 4294965248  ;;  %v12770_v0 = vmov 0.0   ;;  %v132_v1 = vld [vmem:[%s12757_s3 + $0x170] sm:$0xff]  ;;  %v131_v2 = vld [vmem:[%s12757_s3 + $0x168] sm:$0xff]  ;;  %vm8584_vm0 = vmmov 0  }
  0x1d   :  { %215 = vmatprep.mubr.f32.mxu0 %v12770_v0  ;;  %v129_v3 = vld [vmem:[%s12757_s3 + $0x158] sm:$0xff]  ;;  %151 = vmatprep.subr.mxu0 %v132_v1  ;;  %v128_v4 = vld [vmem:[%s12757_s3 + $0x150] sm:$0xff]  ;;  %v126_v5 = vld [vmem:[%s12757_s3 + $0x140] sm:$0xff]  ;;  %vm2753_vm1 = vcmask 523264  }
  0x1e   :  { %152 = vmatpush1.msra.mxu0 %v131_v2  ;;  %v125_v6 = vld [vmem:[%s12757_s3 + $0x138] sm:$0xff]  ;;  %v123_v7 = vld [vmem:[%s12757_s3 + $0x128] sm:$0xff]  ;;  %v122_v8 = vld [vmem:[%s12757_s3 + $0x120] sm:$0xff] }
  0x1f   :  { %153 = vmatprep.subr.mxu0 %v129_v3  ;;  %v120_v9 = vld [vmem:[%s12757_s3 + $0x110] sm:$0xff]  ;;  %v119_v10 = vld [vmem:[%s12757_s3 + $0x108] sm:$0xff]  ;;  %v117_v11 = vld [vmem:[%s12757_s3 + $0xf8] sm:$0xff] }
  0x20   :  { %154 = vmatpush1.msra.mxu0 %v128_v4  ;;  %v116_v12 = vld [vmem:[%s12757_s3 + $0xf0] sm:$0xff]  ;;  %v114_v13 = vld [vmem:[%s12757_s3 + $0xe0] sm:$0xff]  ;;  %v113_v15 = vld [vmem:[%s12757_s3 + $0xd8] sm:$0xff] }
  0x21   :  { %155 = vmatprep.subr.mxu0 %v126_v5  ;;  %v8714_v14 = vld [vmem:[%s12754_s0] sm:$0xff]  ;;  %v133_v16 = vld [vmem:[%s12757_s3 + $0x178] sm:$0xff]  ;;  %v111_v17 = vld [vmem:[%s12757_s3 + $0xc8] sm:$0xff] }
  0x22   :  { %156 = vmatpush1.msra.mxu0 %v125_v6  ;;  %7319 = vmatprep.mubr.f32.mxu1 %v8714_v14  ;;  %v130_v18 = vld [vmem:[%s12757_s3 + $0x160] sm:$0xff]  ;;  %v127_v20 = vld [vmem:[%s12757_s3 + $0x148] sm:$0xff]  ;;  %v108_v21 = vld [vmem:[%s12757_s3 + $0xb0] sm:$0xff] }
  0x23   :  { %157 = vmatprep.subr.mxu0 %v123_v7  ;;  %7287 = vmatprep.subr.mxu1 %v133_v16  ;;  %v110_v19 = vld [vmem:[%s12757_s3 + $0xc0] sm:$0xff]  ;;  %v107_v22 = vld [vmem:[%s12757_s3 + $0xa8] sm:$0xff]  ;;  %v124_v23 = vld [vmem:[%s12757_s3 + $0x130] sm:$0xff] }
  0x24   :  { %158 = vmatpush1.msra.mxu0 %v122_v8  ;;  %7288 = vmatpush3.msra.mxu1 %v133_v16  ;;  %v105_v24 = vld [vmem:[%s12757_s3 + $0x98] sm:$0xff]  ;;  %v104_v25 = vld [vmem:[%s12757_s3 + $0x90] sm:$0xff]  ;;  %v102_v27 = vld [vmem:[%s12757_s3 + $0x80] sm:$0xff] }
  0x25   :  { %159 = vmatprep.subr.mxu0 %v120_v9  ;;  %7289 = vmatprep.subr.mxu1 %v130_v18  ;;  %v121_v26 = vld [vmem:[%s12757_s3 + $0x118] sm:$0xff]  ;;  %v118_v29 = vld [vmem:[%s12757_s3 + $0x100] sm:$0xff]  ;;  %v99_v30 = vld [vmem:[%s12757_s3 + $0x68] sm:$0xff] }
  0x26   :  { %160 = vmatpush1.msra.mxu0 %v119_v10  ;;  %7290 = vmatpush3.msra.mxu1 %v130_v18  ;;  %v101_v28 = vld [vmem:[%s12757_s3 + $0x78] sm:$0xff]  ;;  %v98_v31 = vld [vmem:[%s12757_s3 + $0x60] sm:$0xff]  ;;  %v115_v32 = vld [vmem:[%s12757_s3 + $0xe8] sm:$0xff] }
  0x27   :  { %161 = vmatprep.subr.mxu0 %v117_v11  ;;  %7291 = vmatprep.subr.mxu1 %v127_v20  ;;  %v96_v33 = vld [vmem:[%s12757_s3 + $0x50] sm:$0xff]  ;;  %v95_v34 = vld [vmem:[%s12757_s3 + $0x48] sm:$0xff]  ;;  %v93_v36 = vld [vmem:[%s12757_s3 + $0x38] sm:$0xff] }
  0x28   :  { %162 = vmatpush1.msra.mxu0 %v116_v12  ;;  %7292 = vmatpush3.msra.mxu1 %v127_v20  ;;  %v112_v35 = vld [vmem:[%s12757_s3 + $0xd0] sm:$0xff]  ;;  %v109_v38 = vld [vmem:[%s12757_s3 + $0xb8] sm:$0xff]  ;;  %v90_v39 = vld [vmem:[%s12757_s3 + $0x20] sm:$0xff] }
  0x29   :  { %163 = vmatprep.subr.mxu0 %v114_v13  ;;  %7293 = vmatprep.subr.mxu1 %v124_v23  ;;  %v92_v37 = vld [vmem:[%s12757_s3 + $0x30] sm:$0xff]  ;;  %v89_v40 = vld [vmem:[%s12757_s3 + $0x18] sm:$0xff]  ;;  %v106_v41 = vld [vmem:[%s12757_s3 + $0xa0] sm:$0xff] }
  0x2a   :  { %164 = vmatpush1.msra.mxu0 %v113_v15  ;;  %7294 = vmatpush3.msra.mxu1 %v124_v23  ;;  %v87_v42 = vld [vmem:[%s12757_s3 + $0x8] sm:$0xff]  ;;  %v86_v43 = vld [vmem:[%s12757_s3] sm:$0xff]  ;;  %v447_v45 = vld [vmem:[%s12761_s7 + $0x170] sm:$0xff] }
  0x2b   :  { %165 = vmatprep.subr.mxu0 %v111_v17  ;;  %7295 = vmatprep.subr.mxu1 %v121_v26  ;;  %v103_v44 = vld [vmem:[%s12757_s3 + $0x88] sm:$0xff]  ;;  %v444_v47 = vld [vmem:[%s12761_s7 + $0x158] sm:$0xff]  ;;  %v443_v48 = vld [vmem:[%s12761_s7 + $0x150] sm:$0xff] }
  0x2c   :  { %166 = vmatpush1.msra.mxu0 %v110_v19  ;;  %7296 = vmatpush3.msra.mxu1 %v121_v26  ;;  %v446_v46 = vld [vmem:[%s12761_s7 + $0x168] sm:$0xff]  ;;  %v100_v49 = vld [vmem:[%s12757_s3 + $0x70] sm:$0xff]  ;;  %v441_v51 = vld [vmem:[%s12761_s7 + $0x140] sm:$0xff] }
  0x2d   :  { %167 = vmatprep.subr.mxu0 %v108_v21  ;;  %7297 = vmatprep.subr.mxu1 %v118_v29  ;;  %v8827_v50 = vld [vmem:[%s12754_s0 + $0x8] sm:$0xff]  ;;  %v440_v52 = vld [vmem:[%s12761_s7 + $0x138] sm:$0xff]  ;;  %v437_v54 = vld [vmem:[%s12761_s7 + $0x120] sm:$0xff] }
  0x2e   :  { %168 = vmatpush1.msra.mxu0 %v107_v22  ;;  %7298 = vmatpush3.msra.mxu1 %v118_v29  ;;  %v438_v53 = vld [vmem:[%s12761_s7 + $0x128] sm:$0xff]  ;;  %v97_v55 = vld [vmem:[%s12757_s3 + $0x58] sm:$0xff]  ;;  %v8849_v56 = vld [vmem:[%s12754_s0 + $0x10] sm:$0xff] }
  0x2f   :  { %169 = vmatprep.subr.mxu0 %v105_v24  ;;  %7299 = vmatprep.subr.mxu1 %v115_v32  ;;  %v435_v57 = vld [vmem:[%s12761_s7 + $0x110] sm:$0xff]  ;;  %v434_v58 = vld [vmem:[%s12761_s7 + $0x108] sm:$0xff]  ;;  %v432_v59 = vld [vmem:[%s12761_s7 + $0xf8] sm:$0xff] }
  0x30   :  { %170 = vmatpush1.msra.mxu0 %v104_v25  ;;  %7300 = vmatpush3.msra.mxu1 %v115_v32  ;;  %v431_v60 = vld [vmem:[%s12761_s7 + $0xf0] sm:$0xff]  ;;  %v94_v61 = vld [vmem:[%s12757_s3 + $0x40] sm:$0xff]  ;;  %v8871_v62 = vld [vmem:[%s12754_s0 + $0x18] sm:$0xff] }
  0x31   :  { %171 = vmatprep.subr.mxu0 %v102_v27  ;;  %7301 = vmatprep.subr.mxu1 %v112_v35  ;;  %v429_v63 = vld [vmem:[%s12761_s7 + $0xe0] sm:$0xff]  ;;  %v428_v1 = vld [vmem:[%s12761_s7 + $0xd8] sm:$0xff]  ;;  %v426_v2 = vld [vmem:[%s12761_s7 + $0xc8] sm:$0xff] }
  0x32   :  { %172 = vmatpush1.msra.mxu0 %v101_v28  ;;  %7302 = vmatpush3.msra.mxu1 %v112_v35  ;;  %v425_v3 = vld [vmem:[%s12761_s7 + $0xc0] sm:$0xff]  ;;  %v91_v4 = vld [vmem:[%s12757_s3 + $0x28] sm:$0xff]  ;;  %v423_v6 = vld [vmem:[%s12761_s7 + $0xb0] sm:$0xff] }
  0x33   :  { %173 = vmatprep.subr.mxu0 %v99_v30  ;;  %7303 = vmatprep.subr.mxu1 %v109_v38  ;;  %v8893_v5 = vld [vmem:[%s12754_s0 + $0x20] sm:$0xff]  ;;  %v422_v7 = vld [vmem:[%s12761_s7 + $0xa8] sm:$0xff]  ;;  %v420_v8 = vld [vmem:[%s12761_s7 + $0x98] sm:$0xff] }
  0x34   :  { %174 = vmatpush1.msra.mxu0 %v98_v31  ;;  %7304 = vmatpush3.msra.mxu1 %v109_v38  ;;  %v419_v9 = vld [vmem:[%s12761_s7 + $0x90] sm:$0xff]  ;;  %v8915_v11 = vld [vmem:[%s12754_s0 + $0x28] sm:$0xff]  ;;  %v417_v12 = vld [vmem:[%s12761_s7 + $0x80] sm:$0xff] }
  0x35   :  { %175 = vmatprep.subr.mxu0 %v96_v33  ;;  %7305 = vmatprep.subr.mxu1 %v106_v41  ;;  %v88_v10 = vld [vmem:[%s12757_s3 + $0x10] sm:$0xff]  ;;  %v416_v13 = vld [vmem:[%s12761_s7 + $0x78] sm:$0xff]  ;;  %v413_v15 = vld [vmem:[%s12761_s7 + $0x60] sm:$0xff] }
  0x36   :  { %176 = vmatpush1.msra.mxu0 %v95_v34  ;;  %7306 = vmatpush3.msra.mxu1 %v106_v41  ;;  %v448_v16 = vld [vmem:[%s12761_s7 + $0x178] sm:$0xff]  ;;  %v8937_v17 = vld [vmem:[%s12754_s0 + $0x30] sm:$0xff]  ;;  %v410_v19 = vld [vmem:[%s12761_s7 + $0x48] sm:$0xff] }
  0x37   :  { %177 = vmatprep.subr.mxu0 %v93_v36  ;;  %7307 = vmatprep.subr.mxu1 %v103_v44  ;;  %v411_v18 = vld [vmem:[%s12761_s7 + $0x50] sm:$0xff]  ;;  %v408_v20 = vld [vmem:[%s12761_s7 + $0x38] sm:$0xff]  ;;  %v405_v23 = vld [vmem:[%s12761_s7 + $0x20] sm:$0xff] }
  0x38   :  { %178 = vmatpush1.msra.mxu0 %v92_v37  ;;  %7308 = vmatpush3.msra.mxu1 %v103_v44  ;;  %v407_v21 = vld [vmem:[%s12761_s7 + $0x30] sm:$0xff]  ;;  %v8956_v22 = vld [vmem:[%s12754_s0 + $0x38] sm:$0xff]  ;;  %v402_v25 = vld [vmem:[%s12761_s7 + $0x8] sm:$0xff] }
  0x39   :  { %179 = vmatprep.subr.mxu0 %v90_v39  ;;  %7309 = vmatprep.subr.mxu1 %v100_v49  ;;  %v404_v24 = vld [vmem:[%s12761_s7 + $0x18] sm:$0xff]  ;;  %v445_v26 = vld [vmem:[%s12761_s7 + $0x160] sm:$0xff]  ;;  %v8984_v29 = vld [vmem:[%s12758_s4 + $0x170] sm:$0xff] }
  0x3a   :  { %180 = vmatpush1.msra.mxu0 %v89_v40  ;;  %7310 = vmatpush3.msra.mxu1 %v100_v49  ;;  %v401_v27 = vld [vmem:[%s12761_s7] sm:$0xff]  ;;  %v8989_v30 = vld [vmem:[%s12758_s4 + $0x168] sm:$0xff]  ;;  %v8994_v31 = vld [vmem:[%s12758_s4 + $0x158] sm:$0xff] }
  0x3b   :  { %181 = vmatprep.subr.mxu0 %v87_v42  ;;  %7311 = vmatprep.subr.mxu1 %v97_v55  ;;  %v8979_v28 = vld [vmem:[%s12755_s1] sm:$0xff]  ;;  %v442_v32 = vld [vmem:[%s12761_s7 + $0x148] sm:$0xff]  ;;  %v9004_v33 = vld [vmem:[%s12758_s4 + $0x150] sm:$0xff] }
  0x3c   :  { %182 = vmatpush1.msra.mxu0 %v86_v43  ;;  %7312 = vmatpush3.msra.mxu1 %v97_v55  ;;  %v9011_v34 = vld [vmem:[%s12755_s1 + $0x8] sm:$0xff]  ;;  %v9016_v35 = vld [vmem:[%s12758_s4 + $0x140] sm:$0xff]  ;;  %v9022_v36 = vld [vmem:[%s12758_s4 + $0x138] sm:$0xff] }
  0x3d   :  { %216 = vmatmul.mubr.f32.vlgmr.msra.gmra.mxu0 %v8714_v14  ;;  %466 = vmatprep.subr.mxu0 %v447_v45  ;;  %v414_v14 = vld [vmem:[%s12761_s7 + $0x68] sm:$0xff]  ;;  %v439_v38 = vld [vmem:[%s12761_s7 + $0x130] sm:$0xff]  ;;  %v9038_v39 = vld [vmem:[%s12758_s4 + $0x120] sm:$0xff] }
  0x3e   :  { %467 = vmatpush1.msra.mxu0 %v446_v46  ;;  %221 = vmatprep.mubr.f32.mxu0 %v12770_v0  ;;  %v9028_v37 = vld [vmem:[%s12758_s4 + $0x128] sm:$0xff]  ;;  %v9045_v40 = vld [vmem:[%s12755_s1 + $0x10] sm:$0xff]  ;;  %v436_v42 = vld [vmem:[%s12761_s7 + $0x118] sm:$0xff] }
  0x3f   :  { %468 = vmatprep.subr.mxu0 %v444_v47  ;;  %7313 = vmatprep.subr.mxu1 %v94_v61  ;;  %v9050_v41 = vld [vmem:[%s12758_s4 + $0x110] sm:$0xff]  ;;  %v9059_v43 = vld [vmem:[%s12758_s4 + $0x108] sm:$0xff]  ;;  %v9065_v44 = vld [vmem:[%s12758_s4 + $0xf8] sm:$0xff] }
  0x40   :  { %469 = vmatpush1.msra.mxu0 %v443_v48  ;;  %7314 = vmatpush3.msra.mxu1 %v94_v61  ;;  %v433_v45 = vld [vmem:[%s12761_s7 + $0x100] sm:$0xff]  ;;  %v9076_v46 = vld [vmem:[%s12758_s4 + $0xf0] sm:$0xff]  ;;  %v9082_v47 = vld [vmem:[%s12755_s1 + $0x18] sm:$0xff] }
  0x41   :  { %222 = vmatmul.mubr.f32.gmra.mxu0 %v8827_v50  ;;  %470 = vmatprep.subr.mxu0 %v441_v51  ;;  %v9087_v48 = vld [vmem:[%s12758_s4 + $0xe0] sm:$0xff]  ;;  %v430_v49 = vld [vmem:[%s12761_s7 + $0xe8] sm:$0xff]  ;;  %v9124_v55 = vld [vmem:[%s12758_s4 + $0xb0] sm:$0xff] }
  0x42   :  { %471 = vmatpush1.msra.mxu0 %v440_v52  ;;  %227 = vmatprep.mubr.f32.mxu0 %v12770_v0  ;;  %v9102_v51 = vld [vmem:[%s12758_s4 + $0xc8] sm:$0xff]  ;;  %v427_v52 = vld [vmem:[%s12761_s7 + $0xd0] sm:$0xff] }
  0x43   :  { %472 = vmatprep.subr.mxu0 %v438_v53  ;;  %7315 = vmatprep.subr.mxu1 %v91_v4  ;;  %v9113_v53 = vld [vmem:[%s12758_s4 + $0xc0] sm:$0xff]  ;;  %v9150_v61 = vld [vmem:[%s12758_s4 + $0x90] sm:$0xff] }
  0x44   :  { %473 = vmatpush1.msra.mxu0 %v437_v54  ;;  %7316 = vmatpush3.msra.mxu1 %v91_v4  ;;  %v9119_v54 = vld [vmem:[%s12755_s1 + $0x20] sm:$0xff]  ;;  %v9178_v4 = vld [vmem:[%s12758_s4 + $0x68] sm:$0xff] }
  0x45   :  { %228 = vmatmul.mubr.f32.gmra.mxu0 %v8849_v56  ;;  %474 = vmatprep.subr.mxu0 %v435_v57  ;;  %v424_v57 = vld [vmem:[%s12761_s7 + $0xb8] sm:$0xff] }
  0x46   :  { %475 = vmatpush1.msra.mxu0 %v434_v58  ;;  %233 = vmatprep.mubr.f32.mxu0 %v12770_v0  ;;  %v9133_v58 = vld [vmem:[%s12758_s4 + $0xa8] sm:$0xff] }
  0x47   :  { %476 = vmatprep.subr.mxu0 %v432_v59  ;;  %7317 = vmatprep.subr.mxu1 %v88_v10  ;;  %v9139_v59 = vld [vmem:[%s12758_s4 + $0x98] sm:$0xff] }
  0x48   :  { %477 = vmatpush1.msra.mxu0 %v431_v60  ;;  %7318 = vmatpush3.msra.mxu1 %v88_v10  ;;  %v421_v60 = vld [vmem:[%s12761_s7 + $0xa0] sm:$0xff]  ;;  %v9217_v10 = vld [vmem:[%s12758_s4 + $0x38] sm:$0xff] }
  0x49   :  { %234 = vmatmul.mubr.f32.gmra.mxu0 %v8871_v62  ;;  %478 = vmatprep.subr.mxu0 %v429_v63  ;;  %v9156_v63 = vld [vmem:[%s12755_s1 + $0x28] sm:$0xff] }
  0x4a   :  { %479 = vmatpush1.msra.mxu0 %v428_v1  ;;  %239 = vmatprep.mubr.f32.mxu0 %v12770_v0  ;;  %v9161_v1 = vld [vmem:[%s12758_s4 + $0x80] sm:$0xff] }
  0x4b   :  { %480 = vmatprep.subr.mxu0 %v426_v2  ;;  %7331 = vmatprep.subr.mxu1 %v448_v16  ;;  %v418_v2 = vld [vmem:[%s12761_s7 + $0x88] sm:$0xff] }
  0x4c   :  { %481 = vmatpush1.msra.mxu0 %v425_v3  ;;  %7320 = vmatmul.mubr.f32.vlgmr.msra.gmra.mxu1 %v8827_v50  ;;  %v9096_v50 = vld [vmem:[%s12758_s4 + $0xd8] sm:$0xff] }
  0x4d   :  { %240 = vmatmul.mubr.f32.gmra.mxu0 %v8893_v5  ;;  %482 = vmatprep.subr.mxu0 %v423_v6  ;;  %v9171_v3 = vld [vmem:[%s12758_s4 + $0x78] sm:$0xff]  ;;  %v415_v6 = vld [vmem:[%s12761_s7 + $0x70] sm:$0xff] }
  0x4e   :  { %483 = vmatpush1.msra.mxu0 %v422_v7  ;;  %245 = vmatprep.mubr.f32.mxu0 %v12770_v0  ;;  %v9189_v7 = vld [vmem:[%s12758_s4 + $0x60] sm:$0xff] }
  0x4f   :  { %484 = vmatprep.subr.mxu0 %v420_v8  ;;  %7332 = vmatpush3.msra.mxu1 %v448_v16  ;;  %v9200_v8 = vld [vmem:[%s12758_s4 + $0x50] sm:$0xff]  ;;  %v9253_v16 = vld [vmem:[%s12758_s4 + $0x8] sm:$0xff] }
  0x50   :  { %485 = vmatpush1.msra.mxu0 %v419_v9  ;;  %7333 = vmatprep.subr.mxu1 %v445_v26  ;;  %v9210_v9 = vld [vmem:[%s12758_s4 + $0x48] sm:$0xff]  ;;  %12931 = vst [vmem:[#allocation14_spill] sm:$0xff] %v9253_v16 }
  0x51   :  { %246 = vmatmul.mubr.f32.gmra.mxu0 %v8915_v11  ;;  %486 = vmatprep.subr.mxu0 %v417_v12  ;;  %v409_v12 = vld [vmem:[%s12761_s7 + $0x40] sm:$0xff] }
  0x52   :  { %487 = vmatpush1.msra.mxu0 %v416_v13  ;;  %251 = vmatprep.mubr.f32.mxu0 %v12770_v0  ;;  %v9228_v13 = vld [vmem:[%s12758_s4 + $0x30] sm:$0xff] }
  0x53   :  { %488 = vmatprep.subr.mxu0 %v414_v14  ;;  %7334 = vmatpush3.msra.mxu1 %v445_v26  ;;  %v9237_v14 = vld [vmem:[%s12758_s4 + $0x20] sm:$0xff]  ;;  %v9334_v26 = vld [vmem:[%s12758_s4 + $0xd0] sm:$0xff] }
  0x54   :  { %489 = vmatpush1.msra.mxu0 %v413_v15  ;;  %7335 = vmatprep.subr.mxu1 %v442_v32  ;;  %12929 = vst [vmem:[#allocation12_spill] sm:$0xff] %v9237_v14  ;;  %v9247_v15 = vld [vmem:[%s12758_s4 + $0x18] sm:$0xff] }
  0x55   :  { %252 = vmatmul.mubr.f32.gmra.mxu0 %v8937_v17  ;;  %490 = vmatprep.subr.mxu0 %v411_v18  ;;  %12930 = vst [vmem:[#allocation13_spill] sm:$0xff] %v9247_v15  ;;  %v403_v18 = vld [vmem:[%s12761_s7 + $0x10] sm:$0xff] }
  0x56   :  { %491 = vmatpush1.msra.mxu0 %v410_v19  ;;  %257 = vmatprep.mubr.f32.mxu0 %v12770_v0  ;;  %v9262_v19 = vld [vmem:[%s12758_s4] sm:$0xff] }
  0x57   :  { %492 = vmatprep.subr.mxu0 %v408_v20  ;;  %7336 = vmatpush3.msra.mxu1 %v442_v32  ;;  %12932 = vst [vmem:[#allocation15_spill] sm:$0xff] %v9262_v19  ;;  %v9281_v20 = vld [vmem:[%s12758_s4 + $0x160] sm:$0xff]  ;;  %v9361_v32 = vld [vmem:[%s12758_s4 + $0x88] sm:$0xff] }
  0x58   :  { %493 = vmatpush1.msra.mxu0 %v407_v21  ;;  %7337 = vmatprep.subr.mxu1 %v439_v38  ;;  %v9289_v21 = vld [vmem:[%s12758_s4 + $0x148] sm:$0xff] }
  0x59   :  { %258 = vmatmul.mubr.f32.gmra.mxu0 %v8956_v22  ;;  %494 = vmatprep.subr.mxu0 %v405_v23  ;;  %v9307_v23 = vld [vmem:[%s12758_s4 + $0x118] sm:$0xff] }
  0x5a   :  { %495 = vmatpush1.msra.mxu0 %v404_v24  ;;  %530 = vmatprep.mubr.f32.mxu0 %v12770_v0  ;;  %v9316_v24 = vld [vmem:[%s12758_s4 + $0x100] sm:$0xff] }
  0x5b   :  { %496 = vmatprep.subr.mxu0 %v402_v25  ;;  %7338 = vmatpush3.msra.mxu1 %v439_v38  ;;  %v9325_v25 = vld [vmem:[%s12758_s4 + $0xe8] sm:$0xff]  ;;  %v9379_v38 = vld [vmem:[%s12758_s4 + $0x58] sm:$0xff] }
  0x5c   :  { %497 = vmatpush1.msra.mxu0 %v401_v27  ;;  %7339 = vmatprep.subr.mxu1 %v436_v42  ;;  %v9343_v27 = vld [vmem:[%s12758_s4 + $0xb8] sm:$0xff] }
  0x5d   :  { %531 = vmatmul.mubr.f32.vlgmr.msra.gmra.mxu0 %v8979_v28  ;;  %797 = vmatprep.subr.mxu0 %v8984_v29 }
  0x5e   :  { %798 = vmatpush1.msra.mxu0 %v8989_v30  ;;  %536 = vmatprep.mubr.f32.mxu0 %v12770_v0 }
  0x5f   :  { %799 = vmatprep.subr.mxu0 %v8994_v31  ;;  %7340 = vmatpush3.msra.mxu1 %v436_v42  ;;  %v9397_v42 = vld [vmem:[%s12758_s4 + $0x28] sm:$0xff] }
  0x60   :  { %800 = vmatpush1.msra.mxu0 %v9004_v33  ;;  %7341 = vmatprep.subr.mxu1 %v433_v45  ;;  %12934 = vst [vmem:[#allocation17_spill] sm:$0xff] %v9397_v42 }
  0x61   :  { %537 = vmatmul.mubr.f32.gmra.mxu0 %v9011_v34  ;;  %801 = vmatprep.subr.mxu0 %v9016_v35 }
  0x62   :  { %802 = vmatpush1.msra.mxu0 %v9022_v36  ;;  %542 = vmatprep.mubr.f32.mxu0 %v12770_v0 }
  0x63   :  { %803 = vmatprep.subr.mxu0 %v9028_v37  ;;  %7342 = vmatpush3.msra.mxu1 %v433_v45  ;;  %v9406_v45 = vld [vmem:[%s12758_s4 + $0x10] sm:$0xff] }
  0x64   :  { %804 = vmatpush1.msra.mxu0 %v9038_v39  ;;  %7343 = vmatprep.subr.mxu1 %v430_v49  ;;  %12935 = vst [vmem:[#allocation18_spill] sm:$0xff] %v9406_v45 }
  0x65   :  { %543 = vmatmul.mubr.f32.gmra.mxu0 %v9045_v40  ;;  %805 = vmatprep.subr.mxu0 %v9050_v41 }
  0x66   :  { %806 = vmatpush1.msra.mxu0 %v9059_v43  ;;  %548 = vmatprep.mubr.f32.mxu0 %v12770_v0 }
  0x67   :  { %807 = vmatprep.subr.mxu0 %v9065_v44  ;;  %7344 = vmatpush3.msra.mxu1 %v430_v49 }
  0x68   :  { %808 = vmatpush1.msra.mxu0 %v9076_v46  ;;  %7345 = vmatprep.subr.mxu1 %v427_v52 }
  0x69   :  { %549 = vmatmul.mubr.f32.gmra.mxu0 %v9082_v47  ;;  %809 = vmatprep.subr.mxu0 %v9087_v48 }
  0x6a   :  { %810 = vmatpush1.msra.mxu0 %v9096_v50  ;;  %554 = vmatprep.mubr.f32.mxu0 %v12770_v0 }
  0x6b   :  { %811 = vmatprep.subr.mxu0 %v9102_v51  ;;  %7346 = vmatpush3.msra.mxu1 %v427_v52  ;;  %v134_v52 = vld [vmem:[%s12759_s5] sm:$0x7] }
  0x6c   :  { %812 = vmatpush1.msra.mxu0 %v9113_v53  ;;  %7347 = vmatprep.subr.mxu1 %v424_v57 }
  0x6d   :  { %555 = vmatmul.mubr.f32.gmra.mxu0 %v9119_v54  ;;  %813 = vmatprep.subr.mxu0 %v9124_v55 }
  0x6e   :  { %814 = vmatpush1.msra.mxu0 %v9133_v58  ;;  %7348 = vmatpush3.msra.mxu1 %v424_v57 }
  0x6f   :  { %815 = vmatprep.subr.mxu0 %v9139_v59  ;;  %560 = vmatprep.mubr.f32.mxu0 %v12770_v0 }
  0x70   :  { %7349 = vmatprep.subr.mxu1 %v421_v60  ;;  %816 = vmatpush1.msra.mxu0 %v9150_v61 }
  0x71   :  { %7350 = vmatpush3.msra.mxu1 %v421_v60  ;;  %561 = vmatmul.mubr.f32.gmra.mxu0 %v9156_v63 }
  0x72   :  { %817 = vmatprep.subr.mxu0 %v9161_v1  ;;  %7322 = vmatprep.mubr.f32.mxu1 %v8849_v56  ;;  %v9195_v56 = vld [vmem:[%s12755_s1 + $0x30] sm:$0xff] }
  0x73   :  { %7351 = vmatprep.subr.mxu1 %v418_v2  ;;  %818 = vmatpush1.msra.mxu0 %v9171_v3 }
  0x74   :  { %7323 = vmatmul.mubr.f32.gmra.mxu1 %v8871_v62  ;;  %819 = vmatprep.subr.mxu0 %v9178_v4  ;;  %v412_v62 = vld [vmem:[%s12761_s7 + $0x58] sm:$0xff] }
  0x75   :  { %7352 = vmatpush3.msra.mxu1 %v418_v2  ;;  %566 = vmatprep.mubr.f32.mxu0 %v12770_v0 }
  0x76   :  { %7353 = vmatprep.subr.mxu1 %v415_v6  ;;  %820 = vmatpush1.msra.mxu0 %v9189_v7 }
  0x77   :  { %7354 = vmatpush3.msra.mxu1 %v415_v6  ;;  %567 = vmatmul.mubr.f32.gmra.mxu0 %v9195_v56 }
  0x78   :  { %821 = vmatprep.subr.mxu0 %v9200_v8  ;;  %7325 = vmatprep.mubr.f32.mxu1 %v8893_v5  ;;  %v400_v5 = vld [vmem:[%s12755_s1 + $0x38] sm:$0xff] }
  0x79   :  { %7355 = vmatprep.subr.mxu1 %v412_v62  ;;  %822 = vmatpush1.msra.mxu0 %v9210_v9 }
  0x7a   :  { %7326 = vmatmul.mubr.f32.gmra.mxu1 %v8915_v11  ;;  %823 = vmatprep.subr.mxu0 %v9217_v10  ;;  %v406_v11 = vld [vmem:[%s12761_s7 + $0x28] sm:$0xff] }
  0x7b   :  { %7356 = vmatpush3.msra.mxu1 %v412_v62  ;;  %572 = vmatprep.mubr.f32.mxu0 %v12770_v0 }
  0x7c   :  { %7357 = vmatprep.subr.mxu1 %v409_v12  ;;  %824 = vmatpush1.msra.mxu0 %v9228_v13 }
  0x7d   :  { %7358 = vmatpush3.msra.mxu1 %v409_v12  ;;  %573 = vmatmul.mubr.f32.gmra.mxu0 %v400_v5 }
  0x7e   :  { %825 = vmatprep.subr.mxu0 %v9237_v14  ;;  %7328 = vmatprep.mubr.f32.mxu1 %v8937_v17  ;;  %v9272_v17 = vld [vmem:[%s12758_s4 + $0x178] sm:$0xff] }
  0x7f   :  { %7359 = vmatprep.subr.mxu1 %v406_v11  ;;  %826 = vmatpush1.msra.mxu0 %v9247_v15 }
  0x80   :  { %7329 = vmatmul.mubr.f32.gmra.mxu1 %v8956_v22  ;;  %827 = vmatprep.subr.mxu0 %v9253_v16  ;;  %v9298_v22 = vld [vmem:[%s12758_s4 + $0x130] sm:$0xff] }
  0x81   :  { %7360 = vmatpush3.msra.mxu1 %v406_v11  ;;  %828 = vmatpush1.msra.mxu0 %v9262_v19 }
  0x82   :  { %7361 = vmatprep.subr.mxu1 %v403_v18  ;;  %861 = vmatprep.mubr.f32.mxu0 %v12770_v0 }
  0x83   :  { %7362 = vmatpush3.msra.mxu1 %v403_v18  ;;  %862 = vmatmul.mubr.f32.vlgmr.msra.gmra.mxu0 %v12770_v0 }
  0x84   :  { %7363 = vmatprep.mubr.f32.mxu1 %v8979_v28  ;;  %7375 = vmatprep.subr.mxu1 %v12770_v0  ;;  %v9352_v28 = vld [vmem:[%s12758_s4 + $0xa0] sm:$0xff] }
  0x85   :  { %7364 = vmatmul.mubr.f32.vlgmr.msra.gmra.mxu1 %v9011_v34  ;;  %1011 = vmatprep.subr.mxu0 %v8984_v29  ;;  %v9370_v34 = vld [vmem:[%s12758_s4 + $0x70] sm:$0xff] }
  0x86   :  { %7376 = vmatpush3.msra.mxu1 %v9272_v17  ;;  %7366 = vmatprep.mubr.f32.mxu1 %v9045_v40  ;;  %v9388_v40 = vld [vmem:[%s12758_s4 + $0x40] sm:$0xff] }
  0x87   :  { %7377 = vmatprep.subr.mxu1 %v12770_v0  ;;  %1012 = vmatpush1.msra.mxu0 %v8989_v30  ;;  %12933 = vst [vmem:[#allocation16_spill] sm:$0xff] %v9388_v40 }
  0x88   :  { %7378 = vmatpush3.msra.mxu1 %v9281_v20  ;;  %1013 = vmatprep.subr.mxu0 %v8994_v31 }
  0x89   :  { %7379 = vmatprep.subr.mxu1 %v12770_v0  ;;  %7367 = vmatmul.mubr.f32.gmra.mxu1 %v9082_v47 }
  0x8a   :  { %7380 = vmatpush3.msra.mxu1 %v9289_v21  ;;  %7369 = vmatprep.mubr.f32.mxu1 %v9119_v54 }
  0x8b   :  { %7381 = vmatprep.subr.mxu1 %v12770_v0  ;;  %1014 = vmatpush1.msra.mxu0 %v9004_v33 }
  0x8c   :  { %7382 = vmatpush3.msra.mxu1 %v9298_v22  ;;  %1015 = vmatprep.subr.mxu0 %v9016_v35 }
  0x8d   :  { %7383 = vmatprep.subr.mxu1 %v12770_v0  ;;  %7370 = vmatmul.mubr.f32.gmra.mxu1 %v9156_v63 }
  0x8e   :  { %7384 = vmatpush3.msra.mxu1 %v9307_v23  ;;  %7372 = vmatprep.mubr.f32.mxu1 %v9195_v56 }
  0x8f   :  { %7385 = vmatprep.subr.mxu1 %v12770_v0  ;;  %1016 = vmatpush1.msra.mxu0 %v9022_v36 }
  0x90   :  { %7386 = vmatpush3.msra.mxu1 %v9316_v24  ;;  %1017 = vmatprep.subr.mxu0 %v9028_v37 }
  0x91   :  { %7387 = vmatprep.subr.mxu1 %v12770_v0  ;;  %7373 = vmatmul.mubr.f32.gmra.mxu1 %v400_v5 }
  0x92   :  { %7388 = vmatpush3.msra.mxu1 %v9325_v25  ;;  %7407 = vmatprep.mubr.msk.f32.mxu1 %vm8584_vm0, %v12770_v0 }
  0x93   :  { %7389 = vmatprep.subr.mxu1 %v12770_v0  ;;  %1018 = vmatpush1.msra.mxu0 %v9038_v39 }
  0x94   :  { %7390 = vmatpush3.msra.mxu1 %v9334_v26  ;;  %1019 = vmatprep.subr.mxu0 %v9050_v41 }
  0x95   :  { %7391 = vmatprep.subr.mxu1 %v12770_v0  ;;  %1020 = vmatpush1.msra.mxu0 %v9059_v43 }
  0x96   :  { %7392 = vmatpush3.msra.mxu1 %v9343_v27  ;;  %1021 = vmatprep.subr.mxu0 %v9065_v44 }
  0x97   :  { %7393 = vmatprep.subr.mxu1 %v12770_v0  ;;  %1022 = vmatpush1.msra.mxu0 %v9076_v46 }
  0x98   :  { %7394 = vmatpush3.msra.mxu1 %v9352_v28  ;;  %1023 = vmatprep.subr.mxu0 %v9087_v48 }
  0x99   :  { %7395 = vmatprep.subr.mxu1 %v12770_v0  ;;  %1024 = vmatpush1.msra.mxu0 %v9096_v50 }
  0x9a   :  { %7396 = vmatpush3.msra.mxu1 %v9361_v32  ;;  %1025 = vmatprep.subr.mxu0 %v9102_v51 }
  0x9b   :  { %7397 = vmatprep.subr.mxu1 %v12770_v0  ;;  %1026 = vmatpush1.msra.mxu0 %v9113_v53 }
  0x9c   :  { %7398 = vmatpush3.msra.mxu1 %v9370_v34  ;;  %1027 = vmatprep.subr.mxu0 %v9124_v55 }
  0x9d   :  { %7399 = vmatprep.subr.mxu1 %v12770_v0  ;;  %1028 = vmatpush1.msra.mxu0 %v9133_v58 }
  0x9e   :  { %7400 = vmatpush3.msra.mxu1 %v9379_v38  ;;  %1029 = vmatprep.subr.mxu0 %v9139_v59 }
  0x9f   :  { %7401 = vmatprep.subr.mxu1 %v12770_v0  ;;  %1030 = vmatpush1.msra.mxu0 %v9150_v61 }
  0xa0   :  { %7402 = vmatpush3.msra.mxu1 %v9388_v40  ;;  %1031 = vmatprep.subr.mxu0 %v9161_v1 }
  0xa1   :  { %7403 = vmatprep.subr.mxu1 %v12770_v0  ;;  %1032 = vmatpush1.msra.mxu0 %v9171_v3 }
  0xa2   :  { %7404 = vmatpush3.msra.mxu1 %v9397_v42  ;;  %1033 = vmatprep.subr.mxu0 %v9178_v4 }
  0xa3   :  { %7405 = vmatprep.subr.mxu1 %v12770_v0  ;;  %1034 = vmatpush1.msra.mxu0 %v9189_v7 }
  0xa4   :  { %7406 = vmatpush3.msra.mxu1 %v9406_v45  ;;  %1035 = vmatprep.subr.mxu0 %v9200_v8 }
  0xa5   :  { %7408 = vmatmul.mubr.f32.vlgmr.msra.gmra.mxu1 %v12770_v0  ;;  %7410 = vmatprep.subr.mxu1 %v12770_v0 }
  0xa6   :  { %7411 = vmatpush3.msra.mxu1 %v9272_v17  ;;  %1036 = vmatpush1.msra.mxu0 %v9210_v9 }
  0xa7   :  { %7412 = vmatprep.subr.mxu1 %v12770_v0  ;;  %1037 = vmatprep.subr.mxu0 %v9217_v10 }
  0xa8   :  { %7413 = vmatpush3.msra.mxu1 %v9281_v20  ;;  %1038 = vmatpush1.msra.mxu0 %v9228_v13 }
  0xa9   :  { %7414 = vmatprep.subr.mxu1 %v12770_v0  ;;  %1039 = vmatprep.subr.mxu0 %v9237_v14 }
  0xaa   :  { %7415 = vmatpush3.msra.mxu1 %v9289_v21  ;;  %1040 = vmatpush1.msra.mxu0 %v9247_v15 }
  0xab   :  { %7416 = vmatprep.subr.mxu1 %v12770_v0  ;;  %1041 = vmatprep.subr.mxu0 %v9253_v16 }
  0xac   :  { %7417 = vmatpush3.msra.mxu1 %v9298_v22  ;;  %1042 = vmatpush1.msra.mxu0 %v9262_v19 }
  0xad   :  { %7418 = vmatprep.subr.mxu1 %v12770_v0  ;;  %1075 = vmatprep.mubr.f32.mxu0 %v12770_v0 }
  0xae   :  { %7419 = vmatpush3.msra.mxu1 %v9307_v23  ;;  %7442 = vmatprep.mubr.msk.f32.mxu1 %vm8584_vm0, %v12770_v0 }
  0xaf   :  { %7420 = vmatprep.subr.mxu1 %v12770_v0  ;;  %1225 = vmatprep.subr.mxu0 %v8984_v29  ;;  %v136_v29 = vlaneseq }
  0xb0   :  { %7421 = vmatpush3.msra.mxu1 %v9316_v24 }
  0xb1   :  { %7422 = vmatprep.subr.mxu1 %v12770_v0  ;;  %v137_v47 = vshrl.u32 %v136_v29, 7 }
  0xb2   :  { %7423 = vmatpush3.msra.mxu1 %v9325_v25 }
  0xb3   :  { %7424 = vmatprep.subr.mxu1 %v12770_v0  ;;  %v9461_v49 = vsub.s32 0, %v137_v47  ;;  %v9468_v57 = vsub.s32 1, %v137_v47 }
  0xb4   :  { %7425 = vmatpush3.msra.mxu1 %v9334_v26 }
  0xb5   :  { %7426 = vmatprep.subr.mxu1 %v12770_v0  ;;  %12936 = vst [vmem:[#allocation19_spill] sm:$0xff] %v9461_v49  ;;  %12937 = vst [vmem:[#allocation20_spill] sm:$0xff] %v9468_v57  ;;  %v9473_v63 = vrot.slane %v134_v52, %v9461_v49  ;;  %v9476_v6 = vrot.slane %v134_v52, %v9468_v57 }
  0xb6   :  { %7427 = vmatpush3.msra.mxu1 %v9343_v27 }
  0xb7   :  { %7428 = vmatprep.subr.mxu1 %v12770_v0 }
  0xb8   :  { %7429 = vmatpush3.msra.mxu1 %v9352_v28 }
  0xb9   :  { %7430 = vmatprep.subr.mxu1 %v12770_v0 }
  0xba   :  { %7431 = vmatpush3.msra.mxu1 %v9361_v32 }
  0xbb   :  { %7432 = vmatprep.subr.mxu1 %v12770_v0 }
  0xbc   :  { %7433 = vmatpush3.msra.mxu1 %v9370_v34 }
  0xbd   :  { %7434 = vmatprep.subr.mxu1 %v12770_v0 }
  0xbe   :  { %7435 = vmatpush3.msra.mxu1 %v9379_v38 }
  0xbf   :  { %7436 = vmatprep.subr.mxu1 %v12770_v0 }
  0xc0   :  { %7437 = vmatpush3.msra.mxu1 %v9388_v40 }
  0xc1   :  { %7438 = vmatprep.subr.mxu1 %v12770_v0 }
  0xc2   :  { %7439 = vmatpush3.msra.mxu1 %v9397_v42 }
  0xc3   :  { %7440 = vmatprep.subr.mxu1 %v12770_v0 }
  0xc4   :  { %7441 = vmatpush3.msra.mxu1 %v9406_v45 }
  0xc5   :  { %7445 = vmatprep.subr.mxu1 %v12770_v0 }
  0xfd   :  { %v9466_v54 = vpop.f32.mrf.mxu0 }
  0xff   :  { %v9470_v60 = vpop.f32.mrf.mxu0 }
 0x101   :  { %v223_v2 = vpop.f32.mrf.mxu0 }
 0x102   :  { %v9479_v56 = vadd.f32 %v223_v2, %v9473_v63 }
 0x103   :  { %v225_v62 = vpop.f32.mrf.mxu0 }
 0x104   :  { %12938 = vst [vmem:[#allocation21_spill] sm:$0xff] %v9479_v56  ;;  %v9482_v12 = vadd.f32 %v225_v62, %v9476_v6 }
 0x105   :  { %v229_v5 = vpop.f32.mrf.mxu0 }
 0x106   :  { %12939 = vst [vmem:[#allocation22_spill] sm:$0xff] %v9482_v12  ;;  %v9485_v11 = vadd.f32 %v229_v5, %v9473_v63 }
 0x107   :  { %v231_v18 = vpop.f32.mrf.mxu0 }
 0x108   :  { %12940 = vst [vmem:[#allocation23_spill] sm:$0xff] %v9485_v11  ;;  %v9488_v29 = vadd.f32 %v231_v18, %v9476_v6  ;;  %v9502_v11 = vsub.s32 2, %v137_v47 }
 0x109   :  { %v235_v0 = vpop.f32.mrf.mxu0 }
 0x10a   :  { %12941 = vst [vmem:[#allocation24_spill] sm:$0xff] %v9488_v29  ;;  %v9491_v45 = vadd.f32 %v235_v0, %v9473_v63  ;;  %12946 = vst [vmem:[#allocation29_spill] sm:$0xff] %v9502_v11 }
 0x10b   :  { %v237_v19 = vpop.f32.mrf.mxu0 }
 0x10c   :  { %12942 = vst [vmem:[#allocation25_spill] sm:$0xff] %v9491_v45  ;;  %v9494_v2 = vadd.f32 %v237_v19, %v9476_v6  ;;  %v9511_v19 = vrot.slane %v134_v52, %v9502_v11 }
 0x10d   :  { %v241_v56 = vpop.f32.mrf.mxu0 }
 0x10e   :  { %12943 = vst [vmem:[#allocation26_spill] sm:$0xff] %v9494_v2  ;;  %v9497_v62 = vadd.f32 %v241_v56, %v9473_v63 }
 0x10f   :  { %v243_v12 = vpop.f32.mrf.mxu0 }
 0x110   :  { %12944 = vst [vmem:[#allocation27_spill] sm:$0xff] %v9497_v62  ;;  %v9500_v5 = vadd.f32 %v243_v12, %v9476_v6  ;;  %v7321_v12 = vpop.f32.mrf.mxu1 }
 0x111   :  { %v247_v18 = vpop.f32.mrf.mxu0 }
 0x112   :  { %12945 = vst [vmem:[#allocation28_spill] sm:$0xff] %v9500_v5  ;;  %v9505_v29 = vadd.f32 %v247_v18, %v9473_v63  ;;  %v9520_v5 = vadd.f32 %v7321_v12, %v9511_v19 }
 0x113   :  { %v249_v0 = vpop.f32.mrf.mxu0 }
 0x114   :  { %12947 = vst [vmem:[#allocation30_spill] sm:$0xff] %v9505_v29  ;;  %v9508_v45 = vadd.f32 %v249_v0, %v9476_v6  ;;  %12951 = vst [vmem:[#allocation34_spill] sm:$0xff] %v9520_v5 }
 0x115   :  { %v253_v2 = vpop.f32.mrf.mxu0 }
 0x116   :  { %12948 = vst [vmem:[#allocation31_spill] sm:$0xff] %v9508_v45  ;;  %v9514_v56 = vadd.f32 %v253_v2, %v9473_v63  ;;  %v449_v2 = vld [vmem:[%s12763_s9] sm:$0x7] }
 0x117   :  { %v255_v62 = vpop.f32.mrf.mxu0 }
 0x118   :  { %12949 = vst [vmem:[#allocation32_spill] sm:$0xff] %v9514_v56  ;;  %v9517_v47 = vadd.f32 %v255_v62, %v9476_v6  ;;  %v9536_v62 = vrot.slane %v449_v2, %v9461_v49 }
 0x119   :  { %v259_v18 = vpop.f32.mrf.mxu0 }
 0x11a   :  { %12950 = vst [vmem:[#allocation33_spill] sm:$0xff] %v9517_v47  ;;  %v9523_v29 = vadd.f32 %v259_v18, %v9473_v63  ;;  %12956 = vst [vmem:[#allocation39_spill] sm:$0xff] %v9536_v62  ;;  %v9539_v47 = vrot.slane %v449_v2, %v9468_v57 }
 0x11b   :  { %v261_v0 = vpop.f32.mrf.mxu0 }
 0x11c   :  { %12952 = vst [vmem:[#allocation35_spill] sm:$0xff] %v9523_v29  ;;  %v9526_v52 = vadd.f32 %v261_v0, %v9476_v6  ;;  %12957 = vst [vmem:[#allocation40_spill] sm:$0xff] %v9539_v47 }
 0x11d   :  { %v9531_v56 = vpop.f32.mrf.mxu0 }
 0x11e   :  { %12953 = vst [vmem:[#allocation36_spill] sm:$0xff] %v9526_v52  ;;  %12954 = vst [vmem:[#allocation37_spill] sm:$0xff] %v9531_v56 }
 0x11f   :  { %v9533_v45 = vpop.f32.mrf.mxu0 }
 0x120   :  { %12955 = vst [vmem:[#allocation38_spill] sm:$0xff] %v9533_v45 }
 0x121   :  { %v538_v12 = vpop.f32.mrf.mxu0 }
 0x122   :  { %v9542_v18 = vadd.f32 %v538_v12, %v9536_v62 }
 0x123   :  { %v540_v0 = vpop.f32.mrf.mxu0 }
 0x124   :  { %12958 = vst [vmem:[#allocation41_spill] sm:$0xff] %v9542_v18  ;;  %v9545_v52 = vadd.f32 %v540_v0, %v9539_v47 }
 0x125   :  { %v544_v29 = vpop.f32.mrf.mxu0 }
 0x126   :  { %12959 = vst [vmem:[#allocation42_spill] sm:$0xff] %v9545_v52  ;;  %v9548_v5 = vadd.f32 %v544_v29, %v9536_v62 }
 0x127   :  { %v546_v56 = vpop.f32.mrf.mxu0 }
 0x128   :  { %12960 = vst [vmem:[#allocation43_spill] sm:$0xff] %v9548_v5  ;;  %v9551_v45 = vadd.f32 %v546_v56, %v9539_v47  ;;  %v9565_v5 = vpop.f32.mrf.mxu1 }
 0x129   :  { %v550_v16 = vpop.f32.mrf.mxu0 }
 0x12a   :  { %12961 = vst [vmem:[#allocation44_spill] sm:$0xff] %v9551_v45  ;;  %v9554_v42 = vadd.f32 %v550_v16, %v9536_v62 }
 0x12b   :  { %v552_v15 = vpop.f32.mrf.mxu0 }
 0x12c   :  { %12962 = vst [vmem:[#allocation45_spill] sm:$0xff] %v9554_v42  ;;  %v9557_v12 = vadd.f32 %v552_v15, %v9539_v47 }
 0x12d   :  { %v556_v18 = vpop.f32.mrf.mxu0 }
 0x12e   :  { %12963 = vst [vmem:[#allocation46_spill] sm:$0xff] %v9557_v12  ;;  %v9560_v0 = vadd.f32 %v556_v18, %v9536_v62 }
 0x12f   :  { %v558_v52 = vpop.f32.mrf.mxu0 }
 0x130   :  { %12964 = vst [vmem:[#allocation47_spill] sm:$0xff] %v9560_v0  ;;  %v9563_v29 = vadd.f32 %v558_v52, %v9539_v47 }
 0x131   :  { %v562_v56 = vpop.f32.mrf.mxu0 }
 0x132   :  { %12965 = vst [vmem:[#allocation48_spill] sm:$0xff] %v9563_v29  ;;  %v9568_v45 = vadd.f32 %v562_v56, %v9536_v62 }
 0x133   :  { %v564_v42 = vpop.f32.mrf.mxu0 }
 0x134   :  { %12966 = vst [vmem:[#allocation49_spill] sm:$0xff] %v9568_v45  ;;  %v7324_v16 = vpop.f32.mrf.mxu1  ;;  %v9574_v15 = vadd.f32 %v564_v42, %v9539_v47 }
 0x135   :  { %v9571_v14 = vadd.f32 %v7324_v16, %v9511_v19 }
 0x136   :  { %12968 = vst [vmem:[#allocation51_spill] sm:$0xff] %v9574_v15  ;;  %v340_v18 = vpop.f32.mrf.mxu1 }
 0x137   :  { %12967 = vst [vmem:[#allocation50_spill] sm:$0xff] %v9571_v14  ;;  %v9577_v0 = vadd.f32 %v340_v18, %v9511_v19  ;;  %v568_v52 = vpop.f32.mrf.mxu0  ;;  %v708_v18 = vld [vmem:[%s12760_s6] sm:$0x7] }
 0x138   :  { %v9580_v29 = vadd.f32 %v568_v52, %v9536_v62 }
 0x139   :  { %12969 = vst [vmem:[#allocation52_spill] sm:$0xff] %v9577_v0  ;;  %v570_v40 = vpop.f32.mrf.mxu0 }
 0x13a   :  { %12970 = vst [vmem:[#allocation53_spill] sm:$0xff] %v9580_v29  ;;  %v7327_v12 = vpop.f32.mrf.mxu1  ;;  %v9586_v45 = vadd.f32 %v570_v40, %v9539_v47 }
 0x13b   :  { %v9583_v56 = vadd.f32 %v7327_v12, %v9511_v19 }
 0x13c   :  { %12972 = vst [vmem:[#allocation55_spill] sm:$0xff] %v9586_v45  ;;  %v350_v16 = vpop.f32.mrf.mxu1  ;;  %v9604_v45 = vrot.slane %v708_v18, %v9461_v49 }
 0x13d   :  { %12971 = vst [vmem:[#allocation54_spill] sm:$0xff] %v9583_v56  ;;  %v9589_v42 = vadd.f32 %v350_v16, %v9511_v19  ;;  %v574_v15 = vpop.f32.mrf.mxu0  ;;  %v9607_v56 = vrot.slane %v449_v2, %v9502_v11 }
 0x13e   :  { %v9595_v52 = vadd.f32 %v574_v15, %v9536_v62  ;;  %12977 = vst [vmem:[#allocation60_spill] sm:$0xff] %v9604_v45 }
 0x13f   :  { %12973 = vst [vmem:[#allocation56_spill] sm:$0xff] %v9589_v42  ;;  %v576_v14 = vpop.f32.mrf.mxu0  ;;  %12978 = vst [vmem:[#allocation61_spill] sm:$0xff] %v9607_v56 }
 0x140   :  { %12974 = vst [vmem:[#allocation57_spill] sm:$0xff] %v9595_v52  ;;  %v7330_v29 = vpop.f32.mrf.mxu1  ;;  %v9601_v40 = vadd.f32 %v576_v14, %v9539_v47  ;;  %v218_v52 = vadd.f32 %v9466_v54, %v9473_v63  ;;  %v9616_v14 = vrot.slane %v708_v18, %v9468_v57  ;;  %v220_v54 = vadd.f32 %v9470_v60, %v9476_v6 }
 0x141   :  { %v9598_v12 = vadd.f32 %v7330_v29, %v9511_v19 }
 0x142   :  { %12976 = vst [vmem:[#allocation59_spill] sm:$0xff] %v9601_v40  ;;  %v360_v16 = vpop.f32.mrf.mxu1 }
 0x143   :  { %12975 = vst [vmem:[#allocation58_spill] sm:$0xff] %v9598_v12  ;;  %v9610_v42 = vadd.f32 %v360_v16, %v9511_v19  ;;  %v863_v15 = vpop.f32.mrf.mxu0 }
 0x144   :  { %v864_v29 = vadd.f32 %v863_v15, %v9604_v45 }
 0x145   :  { %12979 = vst [vmem:[#allocation62_spill] sm:$0xff] %v9610_v42  ;;  %v7365_v62 = vpop.f32.mrf.mxu1  ;;  %v865_v47 = vpop.f32.mrf.mxu0 }
 0x146   :  { %v9619_v40 = vadd.f32 %v7365_v62, %v9607_v56  ;;  %v941_v49 = vadd.f32 %v864_v29, %v218_v52  ;;  %v866_v16 = vadd.f32 %v865_v47, %v9616_v14 }
 0x147   :  { %v9621_v2 = vpop.f32.mrf.mxu1 }
 0x148   :  { %12980 = vst [vmem:[#allocation63_spill] sm:$0xff] %v9619_v40  ;;  %12981 = vst [vmem:[#allocation64_spill] sm:$0xff] %v9621_v2  ;;  %v6478_v12 = vmul.f32 -1.442695, %v941_v49  ;;  %v948_v62 = vadd.f32 %v866_v16, %v220_v54 }
 0x149   :  { %v7368_v42 = vpop.f32.mrf.mxu1 }
 0x14a   :  { %v9625_v0 = vadd.f32 %v7368_v42, %v9607_v56  ;;  %8291 = vpow2.f32 %v6478_v12  ;;  %v6479_v29 = vmul.f32 -1.442695, %v948_v62 }
 0x14b   :  { %v655_v63 = vpop.f32.mrf.mxu1 }
 0x14c   :  { %12982 = vst [vmem:[#allocation65_spill] sm:$0xff] %v9625_v0  ;;  %v9630_v15 = vadd.f32 %v655_v63, %v9607_v56  ;;  %8293 = vpow2.f32 %v6479_v29 }
 0x14d   :  { %v7371_v40 = vpop.f32.mrf.mxu1 }
 0x14e   :  { %12983 = vst [vmem:[#allocation66_spill] sm:$0xff] %v9630_v15  ;;  %v9633_v52 = vadd.f32 %v7371_v40, %v9607_v56  ;;  %v9645_v40 = vrot.slane %v708_v18, %v9502_v11 }
 0x14f   :  { %v665_v49 = vpop.f32.mrf.mxu1 }
 0x150   :  { %12984 = vst [vmem:[#allocation67_spill] sm:$0xff] %v9633_v52  ;;  %v9636_v47 = vadd.f32 %v665_v49, %v9607_v56 }
 0x151   :  { %v7374_v42 = vpop.f32.mrf.mxu1 }
 0x152   :  { %12985 = vst [vmem:[#allocation68_spill] sm:$0xff] %v9636_v47  ;;  %v9639_v0 = vadd.f32 %v7374_v42, %v9607_v56  ;;  %v331_v42 = vadd.f32 %v9565_v5, %v9511_v19  ;;  %v12989_v5 = vmov 0.0  }
 0x153   :  { %v675_v60 = vpop.f32.mrf.mxu1 }
 0x154   :  { %12986 = vst [vmem:[#allocation69_spill] sm:$0xff] %v9639_v0  ;;  %v9642_v6 = vadd.f32 %v675_v60, %v9607_v56 }
 0x156   :  { %12987 = vst [vmem:[#allocation70_spill] sm:$0xff] %v9642_v6 }
 0x157   :  { %v8292_v12 = vpop.eup %8291 }
 0x158   :  { %v945_v16 = vadd.f32 1.0, %v8292_v12 }
 0x159   :  { %v8294_v54 = vpop.eup %8293 }
 0x15a   :  { %8295 = vrcp.f32 %v945_v16  ;;  %v952_v63 = vadd.f32 1.0, %v8294_v54  ;;  %v9827_v54 = vld [vmem:[%s12758_s4 + $0xe0] sm:$0xff] }
 0x15c   :  { %8297 = vrcp.f32 %v952_v63  ;;  %v9833_v63 = vld [vmem:[%s12758_s4 + $0xd8] sm:$0xff] }
 0x165   :  { %v934_v49 = vpop.f32.mrf.mxu1 }
 0x166   :  { %v935_v62 = vadd.f32 %v934_v49, %v9645_v40  ;;  %v9839_v49 = vld [vmem:[%s12758_s4 + $0xc8] sm:$0xff] }
 0x167   :  { %v7409_v52 = vpop.f32.mrf.mxu1  ;;  %v8296_v47 = vpop.eup %8295 }
 0x168   :  { %v955_v60 = vmul.f32 %v8296_v47, %v935_v62  ;;  %v9809_v52 = vld [vmem:[%s12758_s4 + $0x108] sm:$0xff]  ;;  %v9815_v47 = vld [vmem:[%s12758_s4 + $0xf8] sm:$0xff]  ;;  %v9845_v62 = vld [vmem:[%s12758_s4 + $0xc0] sm:$0xff] }
 0x169   :  { %v8298_v29 = vpop.eup %8297 }
 0x16a   :  { %v956_v0 = vadd.f32 %v955_v60, %v331_v42  ;;  %v958_v12 = vsub.f32 1.0, %v8298_v29  ;;  %v960_v6 = vmul.f32 0.0, %v8298_v29  ;;  %v9851_v42 = vld [vmem:[%s12758_s4 + $0xb0] sm:$0xff]  ;;  %v9857_v60 = vld [vmem:[%s12758_s4 + $0xa8] sm:$0xff]  ;;  %v9863_v29 = vld [vmem:[%s12758_s4 + $0x98] sm:$0xff] }
 0x16c   :  { %8299 = vtanh.f32 %v956_v0 }
 0x179   :  { %v8300_v16 = vpop.eup %8299 }
 0x17a   :  { %v959_v15 = vmul.f32 %v8300_v16, %v958_v12  ;;  %v9869_v12 = vld [vmem:[%s12758_s4 + $0x90] sm:$0xff]  ;;  %v9874_v16 = vld [vmem:[%s12758_s4 + $0xa0] sm:$0xff] }
 0x17c   :  { %v9650_v18 = vadd.f32 %v960_v6, %v959_v15  ;;  %v9821_v6 = vld [vmem:[%s12758_s4 + $0xf0] sm:$0xff] }
 0x17e   :  { %12988 = vst [vmem:[#allocation71_spill] sm:$0xff] %v9650_v18  ;;  %1076 = vmatmul.mubr.f32.vlgmr.msra.gmra.mxu0 %v9650_v18  ;;  %7443 = vmatmul.mubr.f32.vlgmr.msra.gmra.mxu1 %v9650_v18 }
 0x17f   :  { %1226 = vmatpush1.msra.mxu0 %v8989_v30  ;;  %7446 = vmatpush3.msra.mxu1 %v9272_v17  ;;  %v12990_v30 = vld [vmem:[#allocation16_spill] sm:$0xff] }
 0x180   :  { %1227 = vmatprep.subr.mxu0 %v8994_v31  ;;  %7447 = vmatprep.subr.mxu1 %v12989_v5  ;;  %v12991_v31 = vld [vmem:[#allocation12_spill] sm:$0xff] }
 0x181   :  { %1228 = vmatpush1.msra.mxu0 %v9004_v33  ;;  %7448 = vmatpush3.msra.mxu1 %v9281_v20  ;;  %v12992_v33 = vld [vmem:[#allocation13_spill] sm:$0xff] }
 0x182   :  { %1229 = vmatprep.subr.mxu0 %v9016_v35  ;;  %7449 = vmatprep.subr.mxu1 %v12989_v5  ;;  %v12993_v35 = vld [vmem:[#allocation17_spill] sm:$0xff] }
 0x183   :  { %1230 = vmatpush1.msra.mxu0 %v9022_v36  ;;  %7450 = vmatpush3.msra.mxu1 %v9289_v21  ;;  %v12994_v36 = vld [vmem:[#allocation14_spill] sm:$0xff] }
 0x184   :  { %1231 = vmatprep.subr.mxu0 %v9028_v37  ;;  %7451 = vmatprep.subr.mxu1 %v12989_v5  ;;  %v12995_v37 = vld [vmem:[#allocation15_spill] sm:$0xff] }
 0x185   :  { %1232 = vmatpush1.msra.mxu0 %v9038_v39  ;;  %7452 = vmatpush3.msra.mxu1 %v9298_v22  ;;  %v12996_v39 = vld [vmem:[#allocation18_spill] sm:$0xff] }
 0x186   :  { %1233 = vmatprep.subr.mxu0 %v9050_v41  ;;  %7453 = vmatprep.subr.mxu1 %v12989_v5 }
 0x187   :  { %1234 = vmatpush1.msra.mxu0 %v9059_v43  ;;  %7454 = vmatpush3.msra.mxu1 %v9307_v23 }
 0x188   :  { %1235 = vmatprep.subr.mxu0 %v9065_v44  ;;  %7455 = vmatprep.subr.mxu1 %v12989_v5 }
 0x189   :  { %1236 = vmatpush1.msra.mxu0 %v9076_v46  ;;  %7456 = vmatpush3.msra.mxu1 %v9316_v24 }
 0x18a   :  { %1237 = vmatprep.subr.mxu0 %v9087_v48  ;;  %7457 = vmatprep.subr.mxu1 %v12989_v5 }
 0x18b   :  { %1238 = vmatpush1.msra.mxu0 %v9096_v50  ;;  %7458 = vmatpush3.msra.mxu1 %v9325_v25  ;;  %v12997_v50 = vld [vmem:[#allocation21_spill] sm:$0xff] }
 0x18c   :  { %1239 = vmatprep.subr.mxu0 %v9102_v51  ;;  %7459 = vmatprep.subr.mxu1 %v12989_v5 }
 0x18d   :  { %1240 = vmatpush1.msra.mxu0 %v9113_v53  ;;  %7460 = vmatpush3.msra.mxu1 %v9334_v26 }
 0x18e   :  { %1241 = vmatprep.subr.mxu0 %v9124_v55  ;;  %7461 = vmatprep.subr.mxu1 %v12989_v5 }
 0x18f   :  { %1242 = vmatpush1.msra.mxu0 %v9133_v58  ;;  %7462 = vmatpush3.msra.mxu1 %v9343_v27  ;;  %v12998_v58 = vld [vmem:[#allocation22_spill] sm:$0xff] }
 0x190   :  { %1243 = vmatprep.subr.mxu0 %v9139_v59  ;;  %7463 = vmatprep.subr.mxu1 %v12989_v5 }
 0x191   :  { %1244 = vmatpush1.msra.mxu0 %v9150_v61  ;;  %7464 = vmatpush3.msra.mxu1 %v9352_v28 }
 0x192   :  { %1245 = vmatprep.subr.mxu0 %v9161_v1  ;;  %7465 = vmatprep.subr.mxu1 %v12989_v5 }
 0x193   :  { %1246 = vmatpush1.msra.mxu0 %v9171_v3  ;;  %7466 = vmatpush3.msra.mxu1 %v9361_v32 }
 0x194   :  { %1247 = vmatprep.subr.mxu0 %v9178_v4  ;;  %7467 = vmatprep.subr.mxu1 %v12989_v5 }
 0x195   :  { %1248 = vmatpush1.msra.mxu0 %v9189_v7  ;;  %7468 = vmatpush3.msra.mxu1 %v9370_v34 }
 0x196   :  { %1249 = vmatprep.subr.mxu0 %v9200_v8  ;;  %7469 = vmatprep.subr.mxu1 %v12989_v5 }
 0x197   :  { %1250 = vmatpush1.msra.mxu0 %v9210_v9  ;;  %7470 = vmatpush3.msra.mxu1 %v9379_v38 }
 0x198   :  { %1251 = vmatprep.subr.mxu0 %v9217_v10  ;;  %7471 = vmatprep.subr.mxu1 %v12989_v5 }
 0x199   :  { %1252 = vmatpush1.msra.mxu0 %v9228_v13  ;;  %7472 = vmatpush3.msra.mxu1 %v12990_v30  ;;  %v12999_v13 = vld [vmem:[#allocation34_spill] sm:$0xff]  ;;  %v9881_v30 = vld [vmem:[%s12758_s4 + $0x80] sm:$0xff] }
 0x19a   :  { %1253 = vmatprep.subr.mxu0 %v12991_v31  ;;  %7473 = vmatprep.subr.mxu1 %v12989_v5  ;;  %v9888_v31 = vld [vmem:[%s12758_s4 + $0x78] sm:$0xff] }
 0x19b   :  { %1254 = vmatpush1.msra.mxu0 %v12992_v33  ;;  %7474 = vmatpush3.msra.mxu1 %v12993_v35  ;;  %v9893_v33 = vld [vmem:[%s12758_s4 + $0x88] sm:$0xff] }
 0x19c   :  { %1255 = vmatprep.subr.mxu0 %v12994_v36  ;;  %7475 = vmatprep.subr.mxu1 %v12989_v5  ;;  %v9900_v35 = vld [vmem:[%s12758_s4 + $0x68] sm:$0xff]  ;;  %v9907_v36 = vld [vmem:[%s12758_s4 + $0x60] sm:$0xff] }
 0x19d   :  { %1256 = vmatpush1.msra.mxu0 %v12995_v37  ;;  %1289 = vmatprep.mubr.f32.mxu0 %v12989_v5  ;;  %v9912_v37 = vld [vmem:[%s12758_s4 + $0x70] sm:$0xff] }
 0x19e   :  { %7476 = vmatpush3.msra.mxu1 %v12996_v39  ;;  %7477 = vmatprep.mubr.msk.f32.mxu1 %vm8584_vm0, %v12989_v5  ;;  %v9919_v39 = vld [vmem:[%s12758_s4 + $0x50] sm:$0xff] }
 0x19f   :  { %7480 = vmatprep.subr.mxu1 %v12989_v5 }
 0x23e   :  { %v1077_v41 = vpop.f32.mrf.mxu0  ;;  %v1148_v43 = vpop.f32.mrf.mxu1 }
 0x23f   :  { %v1078_v44 = vadd.f32 %v1077_v41, %v9604_v45  ;;  %v1149_v8 = vadd.f32 %v1148_v43, %v9645_v40  ;;  %v9926_v41 = vld [vmem:[%s12758_s4 + $0x48] sm:$0xff]  ;;  %v9931_v43 = vld [vmem:[%s12758_s4 + $0x58] sm:$0xff] }
 0x240   :  { %v1079_v46 = vpop.f32.mrf.mxu0  ;;  %v7444_v48 = vpop.f32.mrf.mxu1 }
 0x241   :  { %v1155_v51 = vadd.f32 %v1078_v44, %v12997_v50  ;;  %v1080_v55 = vadd.f32 %v1079_v46, %v9616_v14  ;;  %v9938_v44 = vld [vmem:[%s12758_s4 + $0x38] sm:$0xff]  ;;  %v9945_v46 = vld [vmem:[%s12758_s4 + $0x30] sm:$0xff]  ;;  %v9950_v48 = vld [vmem:[%s12758_s4 + $0x40] sm:$0xff] }
 0x242   :  { %v9957_v50 = vld [vmem:[%s12758_s4 + $0x20] sm:$0xff] }
 0x243   :  { %v6480_v53 = vmul.f32 -1.442695, %v1155_v51  ;;  %v1162_v59 = vadd.f32 %v1080_v55, %v12998_v58  ;;  %v9964_v51 = vld [vmem:[%s12758_s4 + $0x18] sm:$0xff]  ;;  %v9976_v55 = vld [vmem:[%s12758_s4 + $0x8] sm:$0xff]  ;;  %v9981_v58 = vld [vmem:[%s12758_s4] sm:$0xff] }
 0x244   :  { %13002 = vst [vmem:[#allocation13_spill] sm:$0xff] %v9964_v51  ;;  %13004 = vst [vmem:[#allocation14_spill] sm:$0xff] %v9976_v55 }
 0x245   :  { %8301 = vpow2.f32 %v6480_v53  ;;  %v6481_v61 = vmul.f32 -1.442695, %v1162_v59  ;;  %v9969_v53 = vld [vmem:[%s12758_s4 + $0x28] sm:$0xff]  ;;  %13005 = vst [vmem:[#allocation15_spill] sm:$0xff] %v9981_v58  ;;  %v9986_v59 = vld [vmem:[%s12758_s4 + $0x10] sm:$0xff] }
 0x246   :  { %13003 = vst [vmem:[#allocation17_spill] sm:$0xff] %v9969_v53  ;;  %13006 = vst [vmem:[#allocation18_spill] sm:$0xff] %v9986_v59 }
 0x247   :  { %8303 = vpow2.f32 %v6481_v61 }
 0x252   :  { %v8302_v1 = vpop.eup %8301 }
 0x253   :  { %v1159_v3 = vadd.f32 1.0, %v8302_v1 }
 0x254   :  { %v8304_v4 = vpop.eup %8303 }
 0x255   :  { %8305 = vrcp.f32 %v1159_v3  ;;  %v1166_v7 = vadd.f32 1.0, %v8304_v4 }
 0x257   :  { %8307 = vrcp.f32 %v1166_v7 }
 0x262   :  { %v8306_v9 = vpop.eup %8305 }
 0x263   :  { %v1169_v10 = vmul.f32 %v8306_v9, %v1149_v8  ;;  %v13007_v8 = vld [vmem:[#allocation23_spill] sm:$0xff] }
 0x264   :  { %v8308_v32 = vpop.eup %8307 }
 0x265   :  { %v1170_v28 = vadd.f32 %v1169_v10, %v12999_v13  ;;  %v1172_v34 = vsub.f32 1.0, %v8308_v32  ;;  %v1174_v0 = vmul.f32 %v8308_v32, %v9650_v18  ;;  %v13012_v18 = vld [vmem:[#allocation26_spill] sm:$0xff] }
 0x267   :  { %8309 = vtanh.f32 %v1170_v28  ;;  %v13008_v28 = vld [vmem:[#allocation24_spill] sm:$0xff] }
 0x274   :  { %v8310_v38 = vpop.eup %8309 }
 0x275   :  { %v1173_v19 = vmul.f32 %v8310_v38, %v1172_v34 }
 0x277   :  { %v9727_v15 = vadd.f32 %v1174_v0, %v1173_v19 }
 0x279   :  { %13000 = vst [vmem:[#allocation16_spill] sm:$0xff] %v9727_v15  ;;  %1290 = vmatmul.mubr.f32.vlgmr.msra.gmra.mxu0 %v9727_v15  ;;  %7478 = vmatmul.mubr.f32.vlgmr.msra.gmra.mxu1 %v9727_v15 }
 0x27a   :  { %7481 = vmatpush3.msra.mxu1 %v9272_v17  ;;  %1503 = vmatprep.mubr.f32.mxu0 %v12989_v5  ;;  %v9755_v17 = vld [vmem:[%s12758_s4 + $0x170] sm:$0xff] }
 0x27b   :  { %7482 = vmatprep.subr.mxu1 %v12989_v5  ;;  %7512 = vmatprep.mubr.msk.f32.mxu1 %vm8584_vm0, %v12989_v5  ;;  %13001 = vst [vmem:[#allocation12_spill] sm:$0xff] %v9755_v17 }
 0x27c   :  { %7483 = vmatpush3.msra.mxu1 %v9281_v20  ;;  %1439 = vmatprep.subr.mxu0 %v9755_v17  ;;  %v9761_v20 = vld [vmem:[%s12758_s4 + $0x168] sm:$0xff] }
 0x27d   :  { %7484 = vmatprep.subr.mxu1 %v12989_v5  ;;  %1440 = vmatpush1.msra.mxu0 %v9761_v20 }
 0x27e   :  { %7485 = vmatpush3.msra.mxu1 %v9289_v21  ;;  %v9767_v21 = vld [vmem:[%s12758_s4 + $0x158] sm:$0xff] }
 0x27f   :  { %7486 = vmatprep.subr.mxu1 %v12989_v5  ;;  %1441 = vmatprep.subr.mxu0 %v9767_v21 }
 0x280   :  { %7487 = vmatpush3.msra.mxu1 %v9298_v22  ;;  %v9773_v22 = vld [vmem:[%s12758_s4 + $0x150] sm:$0xff] }
 0x281   :  { %7488 = vmatprep.subr.mxu1 %v12989_v5  ;;  %1442 = vmatpush1.msra.mxu0 %v9773_v22 }
 0x282   :  { %7489 = vmatpush3.msra.mxu1 %v9307_v23  ;;  %v9779_v23 = vld [vmem:[%s12758_s4 + $0x140] sm:$0xff] }
 0x283   :  { %7490 = vmatprep.subr.mxu1 %v12989_v5  ;;  %1443 = vmatprep.subr.mxu0 %v9779_v23 }
 0x284   :  { %7491 = vmatpush3.msra.mxu1 %v9316_v24  ;;  %v9785_v24 = vld [vmem:[%s12758_s4 + $0x138] sm:$0xff] }
 0x285   :  { %7492 = vmatprep.subr.mxu1 %v12989_v5  ;;  %1444 = vmatpush1.msra.mxu0 %v9785_v24 }
 0x286   :  { %7493 = vmatpush3.msra.mxu1 %v9325_v25  ;;  %v9791_v25 = vld [vmem:[%s12758_s4 + $0x128] sm:$0xff] }
 0x287   :  { %7494 = vmatprep.subr.mxu1 %v12989_v5  ;;  %1445 = vmatprep.subr.mxu0 %v9791_v25 }
 0x288   :  { %7495 = vmatpush3.msra.mxu1 %v9334_v26  ;;  %v9797_v26 = vld [vmem:[%s12758_s4 + $0x120] sm:$0xff] }
 0x289   :  { %7496 = vmatprep.subr.mxu1 %v12989_v5  ;;  %1446 = vmatpush1.msra.mxu0 %v9797_v26 }
 0x28a   :  { %7497 = vmatpush3.msra.mxu1 %v9343_v27  ;;  %v9803_v27 = vld [vmem:[%s12758_s4 + $0x110] sm:$0xff] }
 0x28b   :  { %7498 = vmatprep.subr.mxu1 %v12989_v5  ;;  %1447 = vmatprep.subr.mxu0 %v9803_v27 }
 0x28c   :  { %1448 = vmatpush1.msra.mxu0 %v9809_v52  ;;  %7499 = vmatpush3.msra.mxu1 %v9874_v16 }
 0x28d   :  { %1449 = vmatprep.subr.mxu0 %v9815_v47  ;;  %7500 = vmatprep.subr.mxu1 %v12989_v5 }
 0x28e   :  { %1450 = vmatpush1.msra.mxu0 %v9821_v6  ;;  %7501 = vmatpush3.msra.mxu1 %v9893_v33 }
 0x28f   :  { %1451 = vmatprep.subr.mxu0 %v9827_v54  ;;  %7502 = vmatprep.subr.mxu1 %v12989_v5 }
 0x290   :  { %1452 = vmatpush1.msra.mxu0 %v9833_v63  ;;  %7503 = vmatpush3.msra.mxu1 %v9912_v37 }
 0x291   :  { %1453 = vmatprep.subr.mxu0 %v9839_v49  ;;  %7504 = vmatprep.subr.mxu1 %v12989_v5 }
 0x292   :  { %1454 = vmatpush1.msra.mxu0 %v9845_v62  ;;  %7505 = vmatpush3.msra.mxu1 %v9931_v43 }
 0x293   :  { %1455 = vmatprep.subr.mxu0 %v9851_v42  ;;  %7506 = vmatprep.subr.mxu1 %v12989_v5 }
 0x294   :  { %1456 = vmatpush1.msra.mxu0 %v9857_v60  ;;  %7507 = vmatpush3.msra.mxu1 %v9950_v48 }
 0x295   :  { %1457 = vmatprep.subr.mxu0 %v9863_v29  ;;  %7508 = vmatprep.subr.mxu1 %v12989_v5 }
 0x296   :  { %1458 = vmatpush1.msra.mxu0 %v9869_v12  ;;  %7509 = vmatpush3.msra.mxu1 %v9969_v53 }
 0x297   :  { %1459 = vmatprep.subr.mxu0 %v9881_v30  ;;  %7510 = vmatprep.subr.mxu1 %v12989_v5 }
 0x298   :  { %1460 = vmatpush1.msra.mxu0 %v9888_v31  ;;  %7511 = vmatpush3.msra.mxu1 %v9986_v59 }
 0x299   :  { %1461 = vmatprep.subr.mxu0 %v9900_v35  ;;  %7515 = vmatprep.subr.mxu1 %v12989_v5 }
 0x29a   :  { %1462 = vmatpush1.msra.mxu0 %v9907_v36 }
 0x29b   :  { %1463 = vmatprep.subr.mxu0 %v9919_v39 }
 0x29c   :  { %1464 = vmatpush1.msra.mxu0 %v9926_v41 }
 0x29d   :  { %1465 = vmatprep.subr.mxu0 %v9938_v44 }
 0x29e   :  { %1466 = vmatpush1.msra.mxu0 %v9945_v46 }
 0x29f   :  { %1467 = vmatprep.subr.mxu0 %v9957_v50 }
 0x2a0   :  { %1468 = vmatpush1.msra.mxu0 %v9964_v51 }
 0x2a1   :  { %1469 = vmatprep.subr.mxu0 %v9976_v55 }
 0x2a2   :  { %1470 = vmatpush1.msra.mxu0 %v9981_v58 }
 0x2a3   :  { %1653 = vmatprep.subr.mxu0 %v9755_v17 }
 0x339   :  { %v1291_v61 = vpop.f32.mrf.mxu0  ;;  %v1362_v1 = vpop.f32.mrf.mxu1 }
 0x33a   :  { %v1292_v3 = vadd.f32 %v1291_v61, %v9604_v45  ;;  %v1363_v56 = vadd.f32 %v1362_v1, %v9645_v40  ;;  %v10064_v1 = vld [vmem:[%s12758_s4 + $0x130] sm:$0xff] }
 0x33b   :  { %v1293_v4 = vpop.f32.mrf.mxu0  ;;  %v7479_v7 = vpop.f32.mrf.mxu1 }
 0x33c   :  { %v1369_v9 = vadd.f32 %v1292_v3, %v13007_v8  ;;  %v1294_v13 = vadd.f32 %v1293_v4, %v9616_v14  ;;  %v13009_v7 = vld [vmem:[#allocation52_spill] sm:$0xff] }
 0x33e   :  { %v6482_v10 = vmul.f32 -1.442695, %v1369_v9  ;;  %v1376_v32 = vadd.f32 %v1294_v13, %v13008_v28 }
 0x340   :  { %8311 = vpow2.f32 %v6482_v10  ;;  %v6483_v34 = vmul.f32 -1.442695, %v1376_v32  ;;  %v10071_v32 = vld [vmem:[%s12758_s4 + $0x118] sm:$0xff] }
 0x342   :  { %8313 = vpow2.f32 %v6483_v34  ;;  %v10078_v34 = vld [vmem:[%s12758_s4 + $0x100] sm:$0xff] }
 0x34d   :  { %v8312_v38 = vpop.eup %8311 }
 0x34e   :  { %v1373_v19 = vadd.f32 1.0, %v8312_v38  ;;  %v10085_v38 = vld [vmem:[%s12758_s4 + $0xe8] sm:$0xff] }
 0x34f   :  { %v8314_v0 = vpop.eup %8313 }
 0x350   :  { %8315 = vrcp.f32 %v1373_v19  ;;  %v1380_v2 = vadd.f32 1.0, %v8314_v0  ;;  %v10092_v19 = vld [vmem:[%s12758_s4 + $0xd0] sm:$0xff]  ;;  %v10099_v0 = vld [vmem:[%s12758_s4 + $0xb8] sm:$0xff] }
 0x352   :  { %8317 = vrcp.f32 %v1380_v2  ;;  %v10057_v2 = vld [vmem:[%s12758_s4 + $0x148] sm:$0xff] }
 0x35d   :  { %v8316_v61 = vpop.eup %8315 }
 0x35e   :  { %v1383_v11 = vmul.f32 %v8316_v61, %v1363_v56  ;;  %v10050_v56 = vld [vmem:[%s12758_s4 + $0x160] sm:$0xff] }
 0x35f   :  { %v8318_v8 = vpop.eup %8317 }
 0x360   :  { %v1384_v3 = vadd.f32 %v1383_v11, %v13009_v7  ;;  %v1386_v4 = vsub.f32 1.0, %v8318_v8  ;;  %v1388_v13 = vmul.f32 %v8318_v8, %v9727_v15  ;;  %v10043_v11 = vld [vmem:[%s12758_s4 + $0x178] sm:$0xff] }
 0x362   :  { %8319 = vtanh.f32 %v1384_v3 }
 0x36f   :  { %v8320_v9 = vpop.eup %8319 }
 0x370   :  { %v1387_v10 = vmul.f32 %v8320_v9, %v1386_v4  ;;  %v13011_v9 = vld [vmem:[#allocation25_spill] sm:$0xff] }
 0x372   :  { %v10001_v28 = vadd.f32 %v1388_v13, %v1387_v10 }
 0x374   :  { %13010 = vst [vmem:[#allocation21_spill] sm:$0xff] %v10001_v28  ;;  %1504 = vmatmul.mubr.f32.vlgmr.msra.gmra.mxu0 %v10001_v28  ;;  %7513 = vmatmul.mubr.f32.vlgmr.msra.gmra.mxu1 %v10001_v28 }
 0x375   :  { %1654 = vmatpush1.msra.mxu0 %v9761_v20  ;;  %1717 = vmatprep.mubr.f32.mxu0 %v12989_v5 }
 0x376   :  { %1655 = vmatprep.subr.mxu0 %v9767_v21  ;;  %7547 = vmatprep.mubr.msk.f32.mxu1 %vm8584_vm0, %v12989_v5 }
 0x377   :  { %1656 = vmatpush1.msra.mxu0 %v9773_v22  ;;  %7516 = vmatpush3.msra.mxu1 %v10043_v11 }
 0x378   :  { %1657 = vmatprep.subr.mxu0 %v9779_v23  ;;  %7517 = vmatprep.subr.mxu1 %v12989_v5 }
 0x379   :  { %1658 = vmatpush1.msra.mxu0 %v9785_v24  ;;  %7518 = vmatpush3.msra.mxu1 %v10050_v56 }
 0x37a   :  { %1659 = vmatprep.subr.mxu0 %v9791_v25  ;;  %7519 = vmatprep.subr.mxu1 %v12989_v5 }
 0x37b   :  { %1660 = vmatpush1.msra.mxu0 %v9797_v26  ;;  %7520 = vmatpush3.msra.mxu1 %v10057_v2 }
 0x37c   :  { %1661 = vmatprep.subr.mxu0 %v9803_v27  ;;  %7521 = vmatprep.subr.mxu1 %v12989_v5 }
 0x37d   :  { %1662 = vmatpush1.msra.mxu0 %v9809_v52  ;;  %7522 = vmatpush3.msra.mxu1 %v10064_v1 }
 0x37e   :  { %1663 = vmatprep.subr.mxu0 %v9815_v47  ;;  %7523 = vmatprep.subr.mxu1 %v12989_v5 }
 0x37f   :  { %1664 = vmatpush1.msra.mxu0 %v9821_v6  ;;  %7524 = vmatpush3.msra.mxu1 %v10071_v32 }
 0x380   :  { %1665 = vmatprep.subr.mxu0 %v9827_v54  ;;  %7525 = vmatprep.subr.mxu1 %v12989_v5 }
 0x381   :  { %1666 = vmatpush1.msra.mxu0 %v9833_v63  ;;  %7526 = vmatpush3.msra.mxu1 %v10078_v34 }
 0x382   :  { %1667 = vmatprep.subr.mxu0 %v9839_v49  ;;  %7527 = vmatprep.subr.mxu1 %v12989_v5 }
 0x383   :  { %1668 = vmatpush1.msra.mxu0 %v9845_v62  ;;  %7528 = vmatpush3.msra.mxu1 %v10085_v38 }
 0x384   :  { %1669 = vmatprep.subr.mxu0 %v9851_v42  ;;  %7529 = vmatprep.subr.mxu1 %v12989_v5 }
 0x385   :  { %1670 = vmatpush1.msra.mxu0 %v9857_v60  ;;  %7530 = vmatpush3.msra.mxu1 %v10092_v19 }
 0x386   :  { %1671 = vmatprep.subr.mxu0 %v9863_v29  ;;  %7531 = vmatprep.subr.mxu1 %v12989_v5 }
 0x387   :  { %1672 = vmatpush1.msra.mxu0 %v9869_v12  ;;  %7532 = vmatpush3.msra.mxu1 %v10099_v0 }
 0x388   :  { %1673 = vmatprep.subr.mxu0 %v9881_v30  ;;  %7533 = vmatprep.subr.mxu1 %v12989_v5 }
 0x389   :  { %1674 = vmatpush1.msra.mxu0 %v9888_v31  ;;  %7534 = vmatpush3.msra.mxu1 %v9874_v16 }
 0x38a   :  { %1675 = vmatprep.subr.mxu0 %v9900_v35  ;;  %7535 = vmatprep.subr.mxu1 %v12989_v5 }
 0x38b   :  { %1676 = vmatpush1.msra.mxu0 %v9907_v36  ;;  %7536 = vmatpush3.msra.mxu1 %v9893_v33 }
 0x38c   :  { %1677 = vmatprep.subr.mxu0 %v9919_v39  ;;  %7537 = vmatprep.subr.mxu1 %v12989_v5 }
 0x38d   :  { %1678 = vmatpush1.msra.mxu0 %v9926_v41  ;;  %7538 = vmatpush3.msra.mxu1 %v9912_v37 }
 0x38e   :  { %1679 = vmatprep.subr.mxu0 %v9938_v44  ;;  %7539 = vmatprep.subr.mxu1 %v12989_v5 }
 0x38f   :  { %1680 = vmatpush1.msra.mxu0 %v9945_v46  ;;  %7540 = vmatpush3.msra.mxu1 %v9931_v43 }
 0x390   :  { %1681 = vmatprep.subr.mxu0 %v9957_v50  ;;  %7541 = vmatprep.subr.mxu1 %v12989_v5 }
 0x391   :  { %1682 = vmatpush1.msra.mxu0 %v9964_v51  ;;  %7542 = vmatpush3.msra.mxu1 %v9950_v48 }
 0x392   :  { %1683 = vmatprep.subr.mxu0 %v9976_v55  ;;  %7543 = vmatprep.subr.mxu1 %v12989_v5 }
 0x393   :  { %1684 = vmatpush1.msra.mxu0 %v9981_v58  ;;  %7544 = vmatpush3.msra.mxu1 %v9969_v53 }
 0x394   :  { %1867 = vmatprep.subr.mxu0 %v9755_v17  ;;  %7545 = vmatprep.subr.mxu1 %v12989_v5 }
 0x395   :  { %7546 = vmatpush3.msra.mxu1 %v9986_v59 }
 0x396   :  { %7550 = vmatprep.subr.mxu1 %v12989_v5 }
 0x434   :  { %v1505_v61 = vpop.f32.mrf.mxu0  ;;  %v1576_v7 = vpop.f32.mrf.mxu1 }
 0x435   :  { %v1506_v3 = vadd.f32 %v1505_v61, %v9604_v45  ;;  %v1577_v51 = vadd.f32 %v1576_v7, %v9645_v40  ;;  %v13021_v7 = vld [vmem:[#allocation60_spill] sm:$0xff] }
 0x436   :  { %v1507_v8 = vpop.f32.mrf.mxu0  ;;  %v7514_v4 = vpop.f32.mrf.mxu1 }
 0x437   :  { %v1583_v10 = vadd.f32 %v1506_v3, %v13011_v9  ;;  %v1508_v57 = vadd.f32 %v1507_v8, %v9616_v14  ;;  %v13013_v4 = vld [vmem:[#allocation50_spill] sm:$0xff] }
 0x439   :  { %v6484_v13 = vmul.f32 -1.442695, %v1583_v10  ;;  %v1590_v15 = vadd.f32 %v1508_v57, %v13012_v18 }
 0x43b   :  { %8321 = vpow2.f32 %v6484_v13  ;;  %v6485_v17 = vmul.f32 -1.442695, %v1590_v15  ;;  %v13016_v15 = vld [vmem:[#allocation17_spill] sm:$0xff] }
 0x43d   :  { %8323 = vpow2.f32 %v6485_v17  ;;  %v13017_v17 = vld [vmem:[#allocation14_spill] sm:$0xff] }
 0x448   :  { %v8322_v58 = vpop.eup %8321 }
 0x449   :  { %v1587_v59 = vadd.f32 1.0, %v8322_v58 }
 0x44a   :  { %v8324_v55 = vpop.eup %8323 }
 0x44b   :  { %8325 = vrcp.f32 %v1587_v59  ;;  %v1594_v53 = vadd.f32 1.0, %v8324_v55  ;;  %v13020_v55 = vld [vmem:[#allocation12_spill] sm:$0xff] }
 0x44d   :  { %8327 = vrcp.f32 %v1594_v53  ;;  %v13019_v53 = vld [vmem:[#allocation18_spill] sm:$0xff] }
 0x458   :  { %v8326_v61 = vpop.eup %8325 }
 0x459   :  { %v1597_v45 = vmul.f32 %v8326_v61, %v1577_v51  ;;  %v13018_v51 = vld [vmem:[#allocation15_spill] sm:$0xff] }
 0x45a   :  { %v8328_v9 = vpop.eup %8327 }
 0x45b   :  { %v1598_v3 = vadd.f32 %v1597_v45, %v13013_v4  ;;  %v1600_v8 = vsub.f32 1.0, %v8328_v9  ;;  %v1602_v57 = vmul.f32 %v8328_v9, %v10001_v28  ;;  %v13015_v45 = vld [vmem:[#allocation13_spill] sm:$0xff]  ;;  %v13022_v9 = vld [vmem:[#allocation27_spill] sm:$0xff] }
 0x45d   :  { %8329 = vtanh.f32 %v1598_v3 }
 0x46a   :  { %v8330_v10 = vpop.eup %8329 }
 0x46b   :  { %v1601_v13 = vmul.f32 %v8330_v10, %v1600_v8 }
 0x46d   :  { %v10124_v18 = vadd.f32 %v1602_v57, %v1601_v13  ;;  %v13023_v57 = vld [vmem:[#allocation28_spill] sm:$0xff] }
 0x46f   :  { %13014 = vst [vmem:[#allocation22_spill] sm:$0xff] %v10124_v18  ;;  %1718 = vmatmul.mubr.f32.vlgmr.msra.gmra.mxu0 %v10124_v18  ;;  %7548 = vmatmul.mubr.f32.vlgmr.msra.gmra.mxu1 %v10124_v18 }
 0x470   :  { %1868 = vmatpush1.msra.mxu0 %v9761_v20  ;;  %7551 = vmatpush3.msra.mxu1 %v10043_v11 }
 0x471   :  { %1869 = vmatprep.subr.mxu0 %v9767_v21  ;;  %7552 = vmatprep.subr.mxu1 %v12989_v5 }
 0x472   :  { %1870 = vmatpush1.msra.mxu0 %v9773_v22  ;;  %7553 = vmatpush3.msra.mxu1 %v10050_v56 }
 0x473   :  { %1871 = vmatprep.subr.mxu0 %v9779_v23  ;;  %7554 = vmatprep.subr.mxu1 %v12989_v5 }
 0x474   :  { %1872 = vmatpush1.msra.mxu0 %v9785_v24  ;;  %7555 = vmatpush3.msra.mxu1 %v10057_v2 }
 0x475   :  { %1873 = vmatprep.subr.mxu0 %v9791_v25  ;;  %7556 = vmatprep.subr.mxu1 %v12989_v5 }
 0x476   :  { %1874 = vmatpush1.msra.mxu0 %v9797_v26  ;;  %7557 = vmatpush3.msra.mxu1 %v10064_v1 }
 0x477   :  { %1875 = vmatprep.subr.mxu0 %v9803_v27  ;;  %7558 = vmatprep.subr.mxu1 %v12989_v5 }
 0x478   :  { %1876 = vmatpush1.msra.mxu0 %v9809_v52  ;;  %7559 = vmatpush3.msra.mxu1 %v10071_v32 }
 0x479   :  { %1877 = vmatprep.subr.mxu0 %v9815_v47  ;;  %7560 = vmatprep.subr.mxu1 %v12989_v5 }
 0x47a   :  { %1878 = vmatpush1.msra.mxu0 %v9821_v6  ;;  %7561 = vmatpush3.msra.mxu1 %v10078_v34 }
 0x47b   :  { %1879 = vmatprep.subr.mxu0 %v9827_v54  ;;  %7562 = vmatprep.subr.mxu1 %v12989_v5 }
 0x47c   :  { %1880 = vmatpush1.msra.mxu0 %v9833_v63  ;;  %7563 = vmatpush3.msra.mxu1 %v10085_v38 }
 0x47d   :  { %1881 = vmatprep.subr.mxu0 %v9839_v49  ;;  %7564 = vmatprep.subr.mxu1 %v12989_v5 }
 0x47e   :  { %1882 = vmatpush1.msra.mxu0 %v9845_v62  ;;  %7565 = vmatpush3.msra.mxu1 %v10092_v19 }
 0x47f   :  { %1883 = vmatprep.subr.mxu0 %v9851_v42  ;;  %7566 = vmatprep.subr.mxu1 %v12989_v5 }
 0x480   :  { %1884 = vmatpush1.msra.mxu0 %v9857_v60  ;;  %7567 = vmatpush3.msra.mxu1 %v10099_v0 }
 0x481   :  { %1885 = vmatprep.subr.mxu0 %v9863_v29  ;;  %7568 = vmatprep.subr.mxu1 %v12989_v5 }
 0x482   :  { %1886 = vmatpush1.msra.mxu0 %v9869_v12  ;;  %7569 = vmatpush3.msra.mxu1 %v9874_v16 }
 0x483   :  { %1887 = vmatprep.subr.mxu0 %v9881_v30  ;;  %7570 = vmatprep.subr.mxu1 %v12989_v5 }
 0x484   :  { %1888 = vmatpush1.msra.mxu0 %v9888_v31  ;;  %7571 = vmatpush3.msra.mxu1 %v9893_v33 }
 0x485   :  { %1889 = vmatprep.subr.mxu0 %v9900_v35  ;;  %7572 = vmatprep.subr.mxu1 %v12989_v5 }
 0x486   :  { %1890 = vmatpush1.msra.mxu0 %v9907_v36  ;;  %7573 = vmatpush3.msra.mxu1 %v9912_v37 }
 0x487   :  { %1891 = vmatprep.subr.mxu0 %v9919_v39  ;;  %7574 = vmatprep.subr.mxu1 %v12989_v5 }
 0x488   :  { %1892 = vmatpush1.msra.mxu0 %v9926_v41  ;;  %7575 = vmatpush3.msra.mxu1 %v9931_v43 }
 0x489   :  { %1893 = vmatprep.subr.mxu0 %v9938_v44  ;;  %7576 = vmatprep.subr.mxu1 %v12989_v5 }
 0x48a   :  { %1894 = vmatpush1.msra.mxu0 %v9945_v46  ;;  %7577 = vmatpush3.msra.mxu1 %v9950_v48 }
 0x48b   :  { %1895 = vmatprep.subr.mxu0 %v9957_v50  ;;  %7578 = vmatprep.subr.mxu1 %v12989_v5 }
 0x48c   :  { %1896 = vmatpush1.msra.mxu0 %v13015_v45  ;;  %7579 = vmatpush3.msra.mxu1 %v13016_v15 }
 0x48d   :  { %1897 = vmatprep.subr.mxu0 %v13017_v17  ;;  %7580 = vmatprep.subr.mxu1 %v12989_v5 }
 0x48e   :  { %1898 = vmatpush1.msra.mxu0 %v13018_v51  ;;  %1931 = vmatprep.mubr.f32.mxu0 %v12989_v5 }
 0x48f   :  { %7581 = vmatpush3.msra.mxu1 %v13019_v53  ;;  %7582 = vmatprep.mubr.msk.f32.mxu1 %vm8584_vm0, %v12989_v5 }
 0x490   :  { %2081 = vmatprep.subr.mxu0 %v13020_v55  ;;  %7585 = vmatprep.subr.mxu1 %v12989_v5 }
 0x52f   :  { %v1719_v58 = vpop.f32.mrf.mxu0  ;;  %v1790_v59 = vpop.f32.mrf.mxu1 }
 0x530   :  { %v1720_v61 = vadd.f32 %v1719_v58, %v13021_v7  ;;  %v1791_v45 = vadd.f32 %v1790_v59, %v9645_v40  ;;  %v2274_v59 = vld [vmem:[%s12758_s4 + $0xd8] sm:$0xff] }
 0x531   :  { %v1721_v4 = vpop.f32.mrf.mxu0  ;;  %v7549_v3 = vpop.f32.mrf.mxu1 }
 0x532   :  { %v1797_v8 = vadd.f32 %v1720_v61, %v13022_v9  ;;  %v1722_v13 = vadd.f32 %v1721_v4, %v9616_v14  ;;  %v13024_v3 = vld [vmem:[#allocation56_spill] sm:$0xff] }
 0x534   :  { %v6486_v10 = vmul.f32 -1.442695, %v1797_v8  ;;  %v1804_v28 = vadd.f32 %v1722_v13, %v13023_v57  ;;  %v2271_v13 = vld [vmem:[%s12758_s4 + $0xc0] sm:$0xff]  ;;  %v2269_v57 = vld [vmem:[%s12758_s4 + $0xb0] sm:$0xff] }
 0x536   :  { %8331 = vpow2.f32 %v6486_v10  ;;  %v6487_v53 = vmul.f32 -1.442695, %v1804_v28 }
 0x538   :  { %8333 = vpow2.f32 %v6487_v53 }
 0x543   :  { %v8332_v51 = vpop.eup %8331 }
 0x544   :  { %v1801_v55 = vadd.f32 1.0, %v8332_v51  ;;  %v2275_v51 = vld [vmem:[%s12758_s4 + $0xe0] sm:$0xff] }
 0x545   :  { %v8334_v17 = vpop.eup %8333 }
 0x546   :  { %8335 = vrcp.f32 %v1801_v55  ;;  %v1808_v15 = vadd.f32 1.0, %v8334_v17  ;;  %v2277_v17 = vld [vmem:[%s12758_s4 + $0xf0] sm:$0xff]  ;;  %v2268_v55 = vld [vmem:[%s12758_s4 + $0xa8] sm:$0xff] }
 0x548   :  { %8337 = vrcp.f32 %v1808_v15  ;;  %v2278_v15 = vld [vmem:[%s12758_s4 + $0xf8] sm:$0xff] }
 0x553   :  { %v8336_v58 = vpop.eup %8335 }
 0x554   :  { %v1811_v7 = vmul.f32 %v8336_v58, %v1791_v45  ;;  %v2280_v45 = vld [vmem:[%s12758_s4 + $0x108] sm:$0xff]  ;;  %v2266_v58 = vld [vmem:[%s12758_s4 + $0x98] sm:$0xff] }
 0x555   :  { %v8338_v9 = vpop.eup %8337 }
 0x556   :  { %v1812_v61 = vadd.f32 %v1811_v7, %v13024_v3  ;;  %v1814_v4 = vsub.f32 1.0, %v8338_v9  ;;  %v1816_v28 = vmul.f32 %v8338_v9, %v10124_v18  ;;  %v2272_v7 = vld [vmem:[%s12758_s4 + $0xc8] sm:$0xff]  ;;  %v2265_v3 = vld [vmem:[%s12758_s4 + $0x90] sm:$0xff]  ;;  %v2263_v9 = vld [vmem:[%s12758_s4 + $0x80] sm:$0xff] }
 0x558   :  { %8339 = vtanh.f32 %v1812_v61  ;;  %v2267_v61 = vld [vmem:[%s12758_s4 + $0xa0] sm:$0xff] }
 0x565   :  { %v8340_v8 = vpop.eup %8339 }
 0x566   :  { %v1815_v10 = vmul.f32 %v8340_v8, %v1814_v4  ;;  %v2262_v4 = vld [vmem:[%s12758_s4 + $0x78] sm:$0xff]  ;;  %v2264_v8 = vld [vmem:[%s12758_s4 + $0x88] sm:$0xff] }
 0x568   :  { %v10202_v53 = vadd.f32 %v1816_v28, %v1815_v10  ;;  %v2260_v10 = vld [vmem:[%s12758_s4 + $0x68] sm:$0xff]  ;;  %v2259_v28 = vld [vmem:[%s12758_s4 + $0x60] sm:$0xff] }
 0x56a   :  { %13025 = vst [vmem:[#allocation34_spill] sm:$0xff] %v10202_v53  ;;  %1932 = vmatmul.mubr.f32.vlgmr.msra.gmra.mxu0 %v10202_v53  ;;  %7583 = vmatmul.mubr.f32.vlgmr.msra.gmra.mxu1 %v10202_v53 }
 0x56b   :  { %2082 = vmatpush1.msra.mxu0 %v9761_v20  ;;  %7586 = vmatpush3.msra.mxu1 %v10043_v11  ;;  %v13026_v20 = vld [vmem:[#allocation13_spill] sm:$0xff] }
 0x56c   :  { %2083 = vmatprep.subr.mxu0 %v9767_v21  ;;  %7587 = vmatprep.subr.mxu1 %v12989_v5  ;;  %v13027_v21 = vld [vmem:[#allocation17_spill] sm:$0xff] }
 0x56d   :  { %2084 = vmatpush1.msra.mxu0 %v9773_v22  ;;  %7588 = vmatpush3.msra.mxu1 %v10050_v56  ;;  %v13028_v22 = vld [vmem:[#allocation14_spill] sm:$0xff] }
 0x56e   :  { %2085 = vmatprep.subr.mxu0 %v9779_v23  ;;  %7589 = vmatprep.subr.mxu1 %v12989_v5  ;;  %v13029_v23 = vld [vmem:[#allocation15_spill] sm:$0xff] }
 0x56f   :  { %2086 = vmatpush1.msra.mxu0 %v9785_v24  ;;  %7590 = vmatpush3.msra.mxu1 %v10057_v2  ;;  %v13030_v24 = vld [vmem:[#allocation18_spill] sm:$0xff] }
 0x570   :  { %2087 = vmatprep.subr.mxu0 %v9791_v25  ;;  %7591 = vmatprep.subr.mxu1 %v12989_v5 }
 0x571   :  { %2088 = vmatpush1.msra.mxu0 %v9797_v26  ;;  %7592 = vmatpush3.msra.mxu1 %v10064_v1 }
 0x572   :  { %2089 = vmatprep.subr.mxu0 %v9803_v27  ;;  %7593 = vmatprep.subr.mxu1 %v12989_v5  ;;  %v13031_v27 = vld [vmem:[#allocation60_spill] sm:$0xff] }
 0x573   :  { %2090 = vmatpush1.msra.mxu0 %v9809_v52  ;;  %7594 = vmatpush3.msra.mxu1 %v10071_v32 }
 0x574   :  { %2091 = vmatprep.subr.mxu0 %v9815_v47  ;;  %7595 = vmatprep.subr.mxu1 %v12989_v5 }
 0x575   :  { %2092 = vmatpush1.msra.mxu0 %v9821_v6  ;;  %7596 = vmatpush3.msra.mxu1 %v10078_v34 }
 0x576   :  { %2093 = vmatprep.subr.mxu0 %v9827_v54  ;;  %7597 = vmatprep.subr.mxu1 %v12989_v5  ;;  %v13032_v54 = vld [vmem:[#allocation30_spill] sm:$0xff] }
 0x577   :  { %2094 = vmatpush1.msra.mxu0 %v9833_v63  ;;  %7598 = vmatpush3.msra.mxu1 %v10085_v38 }
 0x578   :  { %2095 = vmatprep.subr.mxu0 %v9839_v49  ;;  %7599 = vmatprep.subr.mxu1 %v12989_v5 }
 0x579   :  { %2096 = vmatpush1.msra.mxu0 %v9845_v62  ;;  %7600 = vmatpush3.msra.mxu1 %v10092_v19 }
 0x57a   :  { %2097 = vmatprep.subr.mxu0 %v9851_v42  ;;  %7601 = vmatprep.subr.mxu1 %v12989_v5  ;;  %v13033_v42 = vld [vmem:[#allocation31_spill] sm:$0xff] }
 0x57b   :  { %2098 = vmatpush1.msra.mxu0 %v9857_v60  ;;  %7602 = vmatpush3.msra.mxu1 %v10099_v0 }
 0x57c   :  { %2099 = vmatprep.subr.mxu0 %v9863_v29  ;;  %7603 = vmatprep.subr.mxu1 %v12989_v5 }
 0x57d   :  { %2100 = vmatpush1.msra.mxu0 %v9869_v12  ;;  %7604 = vmatpush3.msra.mxu1 %v9874_v16 }
 0x57e   :  { %2101 = vmatprep.subr.mxu0 %v9881_v30  ;;  %7605 = vmatprep.subr.mxu1 %v12989_v5 }
 0x57f   :  { %2102 = vmatpush1.msra.mxu0 %v9888_v31  ;;  %7606 = vmatpush3.msra.mxu1 %v9893_v33 }
 0x580   :  { %2103 = vmatprep.subr.mxu0 %v9900_v35  ;;  %7607 = vmatprep.subr.mxu1 %v12989_v5 }
 0x581   :  { %2104 = vmatpush1.msra.mxu0 %v9907_v36  ;;  %7608 = vmatpush3.msra.mxu1 %v9912_v37  ;;  %v13034_v37 = vld [vmem:[#allocation54_spill] sm:$0xff] }
 0x582   :  { %2105 = vmatprep.subr.mxu0 %v9919_v39  ;;  %7609 = vmatprep.subr.mxu1 %v12989_v5 }
 0x583   :  { %2106 = vmatpush1.msra.mxu0 %v9926_v41  ;;  %7610 = vmatpush3.msra.mxu1 %v9931_v43 }
 0x584   :  { %2107 = vmatprep.subr.mxu0 %v9938_v44  ;;  %7611 = vmatprep.subr.mxu1 %v12989_v5 }
 0x585   :  { %2108 = vmatpush1.msra.mxu0 %v9945_v46  ;;  %7612 = vmatpush3.msra.mxu1 %v9950_v48 }
 0x586   :  { %2109 = vmatprep.subr.mxu0 %v9957_v50  ;;  %7613 = vmatprep.subr.mxu1 %v12989_v5 }
 0x587   :  { %2110 = vmatpush1.msra.mxu0 %v13026_v20  ;;  %7614 = vmatpush3.msra.mxu1 %v13027_v21  ;;  %v2261_v20 = vld [vmem:[%s12758_s4 + $0x70] sm:$0xff] }
 0x588   :  { %2111 = vmatprep.subr.mxu0 %v13028_v22  ;;  %7615 = vmatprep.subr.mxu1 %v12989_v5  ;;  %v2257_v21 = vld [vmem:[%s12758_s4 + $0x50] sm:$0xff]  ;;  %v2256_v22 = vld [vmem:[%s12758_s4 + $0x48] sm:$0xff] }
 0x589   :  { %2112 = vmatpush1.msra.mxu0 %v13029_v23  ;;  %2145 = vmatprep.mubr.f32.mxu0 %v12989_v5  ;;  %v2258_v23 = vld [vmem:[%s12758_s4 + $0x58] sm:$0xff] }
 0x58a   :  { %7616 = vmatpush3.msra.mxu1 %v13030_v24  ;;  %7617 = vmatprep.mubr.msk.f32.mxu1 %vm8584_vm0, %v12989_v5  ;;  %v2254_v24 = vld [vmem:[%s12758_s4 + $0x38] sm:$0xff] }
 0x58b   :  { %7620 = vmatprep.subr.mxu1 %v12989_v5 }
 0x62a   :  { %v1933_v25 = vpop.f32.mrf.mxu0  ;;  %v2004_v26 = vpop.f32.mrf.mxu1 }
 0x62b   :  { %v1934_v52 = vadd.f32 %v1933_v25, %v13031_v27  ;;  %v2005_v33 = vadd.f32 %v2004_v26, %v9645_v40  ;;  %v2253_v25 = vld [vmem:[%s12758_s4 + $0x30] sm:$0xff]  ;;  %v2255_v26 = vld [vmem:[%s12758_s4 + $0x40] sm:$0xff] }
 0x62c   :  { %v1935_v47 = vpop.f32.mrf.mxu0  ;;  %v7584_v6 = vpop.f32.mrf.mxu1 }
 0x62d   :  { %v2011_v63 = vadd.f32 %v1934_v52, %v13032_v54  ;;  %v1936_v62 = vadd.f32 %v1935_v47, %v9616_v14  ;;  %v2251_v52 = vld [vmem:[%s12758_s4 + $0x20] sm:$0xff]  ;;  %v2250_v47 = vld [vmem:[%s12758_s4 + $0x18] sm:$0xff]  ;;  %v2252_v6 = vld [vmem:[%s12758_s4 + $0x28] sm:$0xff] }
 0x62e   :  { %v2248_v54 = vld [vmem:[%s12758_s4 + $0x8] sm:$0xff] }
 0x62f   :  { %v6488_v49 = vmul.f32 -1.442695, %v2011_v63  ;;  %v2018_v60 = vadd.f32 %v1936_v62, %v13033_v42  ;;  %v2247_v63 = vld [vmem:[%s12758_s4] sm:$0xff] }
 0x631   :  { %8341 = vpow2.f32 %v6488_v49  ;;  %v6489_v29 = vmul.f32 -1.442695, %v2018_v60  ;;  %v2249_v49 = vld [vmem:[%s12758_s4 + $0x10] sm:$0xff] }
 0x633   :  { %8343 = vpow2.f32 %v6489_v29 }
 0x63e   :  { %v8342_v12 = vpop.eup %8341 }
 0x63f   :  { %v2015_v16 = vadd.f32 1.0, %v8342_v12 }
 0x640   :  { %v8344_v30 = vpop.eup %8343 }
 0x641   :  { %8345 = vrcp.f32 %v2015_v16  ;;  %v2022_v31 = vadd.f32 1.0, %v8344_v30  ;;  %v13036_v16 = vld [vmem:[#allocation32_spill] sm:$0xff] }
 0x643   :  { %8347 = vrcp.f32 %v2022_v31 }
 0x64e   :  { %v8346_v35 = vpop.eup %8345 }
 0x64f   :  { %v2025_v36 = vmul.f32 %v8346_v35, %v2005_v33  ;;  %v13037_v35 = vld [vmem:[#allocation33_spill] sm:$0xff] }
 0x650   :  { %v8348_v41 = vpop.eup %8347 }
 0x651   :  { %v2026_v39 = vadd.f32 %v2025_v36, %v13034_v37  ;;  %v2028_v43 = vsub.f32 1.0, %v8348_v41  ;;  %v2030_v48 = vmul.f32 %v8348_v41, %v10202_v53 }
 0x653   :  { %8349 = vtanh.f32 %v2026_v39 }
 0x660   :  { %v8350_v44 = vpop.eup %8349 }
 0x661   :  { %v2029_v46 = vmul.f32 %v8350_v44, %v2028_v43 }
 0x663   :  { %v10279_v50 = vadd.f32 %v2030_v48, %v2029_v46 }
 0x665   :  { %13035 = vst [vmem:[#allocation23_spill] sm:$0xff] %v10279_v50  ;;  %2146 = vmatmul.mubr.f32.vlgmr.msra.gmra.mxu0 %v10279_v50  ;;  %7618 = vmatmul.mubr.f32.vlgmr.msra.gmra.mxu1 %v10279_v50 }
 0x666   :  { %7621 = vmatpush3.msra.mxu1 %v10043_v11  ;;  %2359 = vmatprep.mubr.f32.mxu0 %v12989_v5  ;;  %v2293_v11 = vld [vmem:[%s12758_s4 + $0x170] sm:$0xff] }
 0x667   :  { %7622 = vmatprep.subr.mxu1 %v12989_v5  ;;  %7652 = vmatprep.mubr.msk.f32.mxu1 %vm8584_vm0, %v12989_v5 }
 0x668   :  { %7623 = vmatpush3.msra.mxu1 %v10050_v56  ;;  %2295 = vmatprep.subr.mxu0 %v2293_v11  ;;  %v2292_v56 = vld [vmem:[%s12758_s4 + $0x168] sm:$0xff] }
 0x669   :  { %7624 = vmatprep.subr.mxu1 %v12989_v5  ;;  %2296 = vmatpush1.msra.mxu0 %v2292_v56  ;;  %v13038_v56 = vld [vmem:[#allocation62_spill] sm:$0xff] }
 0x66a   :  { %7625 = vmatpush3.msra.mxu1 %v10057_v2  ;;  %v2290_v2 = vld [vmem:[%s12758_s4 + $0x158] sm:$0xff] }
 0x66b   :  { %7626 = vmatprep.subr.mxu1 %v12989_v5  ;;  %2297 = vmatprep.subr.mxu0 %v2290_v2 }
 0x66c   :  { %7627 = vmatpush3.msra.mxu1 %v10064_v1  ;;  %v2289_v1 = vld [vmem:[%s12758_s4 + $0x150] sm:$0xff] }
 0x66d   :  { %7628 = vmatprep.subr.mxu1 %v12989_v5  ;;  %2298 = vmatpush1.msra.mxu0 %v2289_v1 }
 0x66e   :  { %7629 = vmatpush3.msra.mxu1 %v10071_v32  ;;  %v2287_v32 = vld [vmem:[%s12758_s4 + $0x140] sm:$0xff] }
 0x66f   :  { %7630 = vmatprep.subr.mxu1 %v12989_v5  ;;  %2299 = vmatprep.subr.mxu0 %v2287_v32 }
 0x670   :  { %7631 = vmatpush3.msra.mxu1 %v10078_v34  ;;  %v2286_v34 = vld [vmem:[%s12758_s4 + $0x138] sm:$0xff] }
 0x671   :  { %7632 = vmatprep.subr.mxu1 %v12989_v5  ;;  %2300 = vmatpush1.msra.mxu0 %v2286_v34 }
 0x672   :  { %7633 = vmatpush3.msra.mxu1 %v10085_v38  ;;  %v2284_v38 = vld [vmem:[%s12758_s4 + $0x128] sm:$0xff] }
 0x673   :  { %7634 = vmatprep.subr.mxu1 %v12989_v5  ;;  %2301 = vmatprep.subr.mxu0 %v2284_v38 }
 0x674   :  { %7635 = vmatpush3.msra.mxu1 %v10092_v19  ;;  %v2283_v19 = vld [vmem:[%s12758_s4 + $0x120] sm:$0xff] }
 0x675   :  { %7636 = vmatprep.subr.mxu1 %v12989_v5  ;;  %2302 = vmatpush1.msra.mxu0 %v2283_v19 }
 0x676   :  { %7637 = vmatpush3.msra.mxu1 %v10099_v0  ;;  %v2281_v0 = vld [vmem:[%s12758_s4 + $0x110] sm:$0xff] }
 0x677   :  { %7638 = vmatprep.subr.mxu1 %v12989_v5  ;;  %2303 = vmatprep.subr.mxu0 %v2281_v0 }
 0x678   :  { %2304 = vmatpush1.msra.mxu0 %v2280_v45  ;;  %7639 = vmatpush3.msra.mxu1 %v2267_v61  ;;  %v10442_v45 = vld [vmem:[#allocation6 + $0x170] sm:$0xff] }
 0x679   :  { %2305 = vmatprep.subr.mxu0 %v2278_v15  ;;  %7640 = vmatprep.subr.mxu1 %v12989_v5  ;;  %13040 = vst [vmem:[#allocation52_spill] sm:$0xff] %v10442_v45  ;;  %v10445_v15 = vld [vmem:[#allocation6 + $0x168] sm:$0xff]  ;;  %v10477_v61 = vld [vmem:[#allocation6 + $0x130] sm:$0xff] }
 0x67a   :  { %2306 = vmatpush1.msra.mxu0 %v2277_v17  ;;  %7641 = vmatpush3.msra.mxu1 %v2264_v8  ;;  %v10447_v17 = vld [vmem:[#allocation6 + $0x178] sm:$0xff]  ;;  %13041 = vst [vmem:[#allocation25_spill] sm:$0xff] %v10477_v61 }
 0x67b   :  { %2307 = vmatprep.subr.mxu0 %v2275_v51  ;;  %7642 = vmatprep.subr.mxu1 %v12989_v5  ;;  %v10451_v51 = vld [vmem:[#allocation6 + $0x158] sm:$0xff] }
 0x67c   :  { %2308 = vmatpush1.msra.mxu0 %v2274_v59  ;;  %7643 = vmatpush3.msra.mxu1 %v2261_v20  ;;  %v10455_v59 = vld [vmem:[#allocation6 + $0x150] sm:$0xff]  ;;  %v10487_v8 = vld [vmem:[#allocation6 + $0x118] sm:$0xff]  ;;  %v10497_v20 = vld [vmem:[#allocation6 + $0x100] sm:$0xff] }
 0x67d   :  { %2309 = vmatprep.subr.mxu0 %v2272_v7  ;;  %7644 = vmatprep.subr.mxu1 %v12989_v5  ;;  %v10457_v7 = vld [vmem:[#allocation6 + $0x160] sm:$0xff]  ;;  %13042 = vst [vmem:[#allocation26_spill] sm:$0xff] %v10487_v8  ;;  %13044 = vst [vmem:[#allocation12_spill] sm:$0xff] %v10497_v20 }
 0x67e   :  { %2310 = vmatpush1.msra.mxu0 %v2271_v13  ;;  %7645 = vmatpush3.msra.mxu1 %v2258_v23  ;;  %v10461_v13 = vld [vmem:[#allocation6 + $0x140] sm:$0xff]  ;;  %v10507_v23 = vld [vmem:[#allocation6 + $0xe8] sm:$0xff] }
 0x67f   :  { %2311 = vmatprep.subr.mxu0 %v2269_v57  ;;  %7646 = vmatprep.subr.mxu1 %v12989_v5  ;;  %v10465_v57 = vld [vmem:[#allocation6 + $0x138] sm:$0xff]  ;;  %13047 = vst [vmem:[#allocation56_spill] sm:$0xff] %v10507_v23 }
 0x680   :  { %2312 = vmatpush1.msra.mxu0 %v2268_v55  ;;  %7647 = vmatpush3.msra.mxu1 %v2255_v26  ;;  %v10467_v55 = vld [vmem:[#allocation6 + $0x148] sm:$0xff]  ;;  %v10517_v26 = vld [vmem:[#allocation6 + $0xd0] sm:$0xff] }
 0x681   :  { %2313 = vmatprep.subr.mxu0 %v2266_v58  ;;  %7648 = vmatprep.subr.mxu1 %v12989_v5  ;;  %v10471_v58 = vld [vmem:[#allocation6 + $0x128] sm:$0xff]  ;;  %13050 = vst [vmem:[#allocation14_spill] sm:$0xff] %v10517_v26 }
 0x682   :  { %2314 = vmatpush1.msra.mxu0 %v2265_v3  ;;  %7649 = vmatpush3.msra.mxu1 %v2252_v6  ;;  %v10475_v3 = vld [vmem:[#allocation6 + $0x120] sm:$0xff]  ;;  %v10527_v6 = vld [vmem:[#allocation6 + $0xb8] sm:$0xff] }
 0x683   :  { %2315 = vmatprep.subr.mxu0 %v2263_v9  ;;  %7650 = vmatprep.subr.mxu1 %v12989_v5  ;;  %v10481_v9 = vld [vmem:[#allocation6 + $0x110] sm:$0xff]  ;;  %13053 = vst [vmem:[#allocation60_spill] sm:$0xff] %v10527_v6 }
 0x684   :  { %2316 = vmatpush1.msra.mxu0 %v2262_v4  ;;  %7651 = vmatpush3.msra.mxu1 %v2249_v49  ;;  %v10485_v4 = vld [vmem:[#allocation6 + $0x108] sm:$0xff]  ;;  %v10537_v49 = vld [vmem:[#allocation6 + $0xa0] sm:$0xff] }
 0x685   :  { %2317 = vmatprep.subr.mxu0 %v2260_v10  ;;  %7655 = vmatprep.subr.mxu1 %v12989_v5  ;;  %v10491_v10 = vld [vmem:[#allocation6 + $0xf8] sm:$0xff]  ;;  %13056 = vst [vmem:[#allocation54_spill] sm:$0xff] %v10537_v49 }
 0x686   :  { %2318 = vmatpush1.msra.mxu0 %v2259_v28  ;;  %v10495_v28 = vld [vmem:[#allocation6 + $0xf0] sm:$0xff] }
 0x687   :  { %2319 = vmatprep.subr.mxu0 %v2257_v21  ;;  %13043 = vst [vmem:[#allocation50_spill] sm:$0xff] %v10495_v28  ;;  %v10501_v21 = vld [vmem:[#allocation6 + $0xe0] sm:$0xff] }
 0x688   :  { %2320 = vmatpush1.msra.mxu0 %v2256_v22  ;;  %13045 = vst [vmem:[#allocation27_spill] sm:$0xff] %v10501_v21  ;;  %v10505_v22 = vld [vmem:[#allocation6 + $0xd8] sm:$0xff] }
 0x689   :  { %2321 = vmatprep.subr.mxu0 %v2254_v24  ;;  %13046 = vst [vmem:[#allocation28_spill] sm:$0xff] %v10505_v22  ;;  %v10511_v24 = vld [vmem:[#allocation6 + $0xc8] sm:$0xff] }
 0x68a   :  { %2322 = vmatpush1.msra.mxu0 %v2253_v25  ;;  %13048 = vst [vmem:[#allocation13_spill] sm:$0xff] %v10511_v24  ;;  %v10515_v25 = vld [vmem:[#allocation6 + $0xc0] sm:$0xff] }
 0x68b   :  { %2323 = vmatprep.subr.mxu0 %v2251_v52  ;;  %13049 = vst [vmem:[#allocation17_spill] sm:$0xff] %v10515_v25  ;;  %v10521_v52 = vld [vmem:[#allocation6 + $0xb0] sm:$0xff] }
 0x68c   :  { %2324 = vmatpush1.msra.mxu0 %v2250_v47  ;;  %13051 = vst [vmem:[#allocation15_spill] sm:$0xff] %v10521_v52  ;;  %v10525_v47 = vld [vmem:[#allocation6 + $0xa8] sm:$0xff] }
 0x68d   :  { %2325 = vmatprep.subr.mxu0 %v2248_v54  ;;  %13052 = vst [vmem:[#allocation18_spill] sm:$0xff] %v10525_v47  ;;  %v10531_v54 = vld [vmem:[#allocation6 + $0x98] sm:$0xff] }
 0x68e   :  { %2326 = vmatpush1.msra.mxu0 %v2247_v63  ;;  %13054 = vst [vmem:[#allocation30_spill] sm:$0xff] %v10531_v54  ;;  %v10535_v63 = vld [vmem:[#allocation6 + $0x90] sm:$0xff] }
 0x68f   :  { %2518 = vmatprep.subr.mxu0 %v10442_v45  ;;  %13055 = vst [vmem:[#allocation31_spill] sm:$0xff] %v10535_v63 }
 0x725   :  { %v2147_v62 = vpop.f32.mrf.mxu0  ;;  %v2218_v42 = vpop.f32.mrf.mxu1 }
 0x726   :  { %v2148_v60 = vadd.f32 %v2147_v62, %v13031_v27  ;;  %v2219_v46 = vadd.f32 %v2218_v42, %v9645_v40  ;;  %v10541_v62 = vld [vmem:[#allocation6 + $0x80] sm:$0xff]  ;;  %v10545_v42 = vld [vmem:[#allocation6 + $0x78] sm:$0xff] }
 0x727   :  { %v2149_v29 = vpop.f32.mrf.mxu0  ;;  %v7619_v12 = vpop.f32.mrf.mxu1  ;;  %13057 = vst [vmem:[#allocation32_spill] sm:$0xff] %v10541_v62  ;;  %13058 = vst [vmem:[#allocation33_spill] sm:$0xff] %v10545_v42 }
 0x728   :  { %v2225_v30 = vadd.f32 %v2148_v60, %v13036_v16  ;;  %v2150_v33 = vadd.f32 %v2149_v29, %v9616_v14  ;;  %v10547_v60 = vld [vmem:[#allocation6 + $0x88] sm:$0xff]  ;;  %v10555_v12 = vld [vmem:[#allocation6 + $0x60] sm:$0xff]  ;;  %v10557_v16 = vld [vmem:[#allocation6 + $0x70] sm:$0xff] }
 0x729   :  { %13059 = vst [vmem:[#allocation62_spill] sm:$0xff] %v10547_v60  ;;  %v10551_v29 = vld [vmem:[#allocation6 + $0x68] sm:$0xff]  ;;  %13061 = vst [vmem:[#allocation73_spill] sm:$0xff] %v10555_v12 }
 0x72a   :  { %v6490_v31 = vmul.f32 -1.442695, %v2225_v30  ;;  %v2232_v36 = vadd.f32 %v2150_v33, %v13037_v35  ;;  %13060 = vst [vmem:[#allocation72_spill] sm:$0xff] %v10551_v29  ;;  %13062 = vst [vmem:[#allocation74_spill] sm:$0xff] %v10557_v16  ;;  %v10561_v30 = vld [vmem:[#allocation6 + $0x50] sm:$0xff]  ;;  %v10567_v33 = vld [vmem:[#allocation6 + $0x58] sm:$0xff] }
 0x72b   :  { %13063 = vst [vmem:[#allocation75_spill] sm:$0xff] %v10561_v30  ;;  %13065 = vst [vmem:[#allocation77_spill] sm:$0xff] %v10567_v33  ;;  %v10571_v35 = vld [vmem:[#allocation6 + $0x38] sm:$0xff] }
 0x72c   :  { %8351 = vpow2.f32 %v6490_v31  ;;  %v6491_v37 = vmul.f32 -1.442695, %v2232_v36  ;;  %v10565_v31 = vld [vmem:[#allocation6 + $0x48] sm:$0xff]  ;;  %13066 = vst [vmem:[#allocation78_spill] sm:$0xff] %v10571_v35  ;;  %v10575_v36 = vld [vmem:[#allocation6 + $0x30] sm:$0xff] }
 0x72d   :  { %13064 = vst [vmem:[#allocation76_spill] sm:$0xff] %v10565_v31  ;;  %13067 = vst [vmem:[#allocation79_spill] sm:$0xff] %v10575_v36 }
 0x72e   :  { %8353 = vpow2.f32 %v6491_v37  ;;  %v10577_v37 = vld [vmem:[#allocation6 + $0x40] sm:$0xff] }
 0x72f   :  { %13068 = vst [vmem:[#allocation80_spill] sm:$0xff] %v10577_v37 }
 0x739   :  { %v8352_v39 = vpop.eup %8351 }
 0x73a   :  { %v2229_v41 = vadd.f32 1.0, %v8352_v39  ;;  %v10581_v39 = vld [vmem:[#allocation6 + $0x20] sm:$0xff] }
 0x73b   :  { %v8354_v43 = vpop.eup %8353  ;;  %13069 = vst [vmem:[#allocation81_spill] sm:$0xff] %v10581_v39 }
 0x73c   :  { %8355 = vrcp.f32 %v2229_v41  ;;  %v2236_v44 = vadd.f32 1.0, %v8354_v43  ;;  %v10585_v41 = vld [vmem:[#allocation6 + $0x18] sm:$0xff]  ;;  %v10587_v43 = vld [vmem:[#allocation6 + $0x28] sm:$0xff] }
 0x73d   :  { %13070 = vst [vmem:[#allocation82_spill] sm:$0xff] %v10585_v41  ;;  %13071 = vst [vmem:[#allocation83_spill] sm:$0xff] %v10587_v43 }
 0x73e   :  { %8357 = vrcp.f32 %v2236_v44  ;;  %v10591_v44 = vld [vmem:[#allocation6 + $0x8] sm:$0xff] }
 0x73f   :  { %13072 = vst [vmem:[#allocation84_spill] sm:$0xff] %v10591_v44 }
 0x749   :  { %v8356_v48 = vpop.eup %8355 }
 0x74a   :  { %v2239_v11 = vmul.f32 %v8356_v48, %v2219_v46  ;;  %v10595_v46 = vld [vmem:[#allocation6] sm:$0xff]  ;;  %v10597_v48 = vld [vmem:[#allocation6 + $0x10] sm:$0xff] }
 0x74b   :  { %v8358_v1 = vpop.eup %8357  ;;  %13073 = vst [vmem:[#allocation85_spill] sm:$0xff] %v10595_v46  ;;  %13074 = vst [vmem:[#allocation86_spill] sm:$0xff] %v10597_v48 }
 0x74c   :  { %v2240_v2 = vadd.f32 %v2239_v11, %v13038_v56  ;;  %v2242_v32 = vsub.f32 1.0, %v8358_v1  ;;  %v2244_v19 = vmul.f32 %v8358_v1, %v10279_v50 }
 0x74e   :  { %8359 = vtanh.f32 %v2240_v2 }
 0x75b   :  { %v8360_v34 = vpop.eup %8359 }
 0x75c   :  { %v2243_v38 = vmul.f32 %v8360_v34, %v2242_v32  ;;  %v13075_v34 = vld [vmem:[#allocation35_spill] sm:$0xff] }
 0x75e   :  { %v10435_v0 = vadd.f32 %v2244_v19, %v2243_v38 }
 0x760   :  { %13039 = vst [vmem:[#allocation24_spill] sm:$0xff] %v10435_v0  ;;  %2360 = vmatmul.mubr.f32.vlgmr.msra.gmra.mxu0 %v10435_v0  ;;  %7653 = vmatmul.mubr.f32.vlgmr.msra.gmra.mxu1 %v10435_v0 }
 0x761   :  { %2582 = vmatprep.mubr.f32.mxu0 %v12989_v5  ;;  %7687 = vmatprep.mubr.msk.f32.mxu1 %vm8584_vm0, %v12989_v5 }
 0x762   :  { %2519 = vmatpush1.msra.mxu0 %v10445_v15  ;;  %7656 = vmatpush3.msra.mxu1 %v10447_v17 }
 0x763   :  { %2520 = vmatprep.subr.mxu0 %v10451_v51  ;;  %7657 = vmatprep.subr.mxu1 %v12989_v5 }
 0x764   :  { %2521 = vmatpush1.msra.mxu0 %v10455_v59  ;;  %7658 = vmatpush3.msra.mxu1 %v10457_v7 }
 0x765   :  { %2522 = vmatprep.subr.mxu0 %v10461_v13  ;;  %7659 = vmatprep.subr.mxu1 %v12989_v5 }
 0x766   :  { %2523 = vmatpush1.msra.mxu0 %v10465_v57  ;;  %7660 = vmatpush3.msra.mxu1 %v10467_v55 }
 0x767   :  { %2524 = vmatprep.subr.mxu0 %v10471_v58  ;;  %7661 = vmatprep.subr.mxu1 %v12989_v5 }
 0x768   :  { %2525 = vmatpush1.msra.mxu0 %v10475_v3  ;;  %7662 = vmatpush3.msra.mxu1 %v10477_v61 }
 0x769   :  { %2526 = vmatprep.subr.mxu0 %v10481_v9  ;;  %7663 = vmatprep.subr.mxu1 %v12989_v5 }
 0x76a   :  { %2527 = vmatpush1.msra.mxu0 %v10485_v4  ;;  %7664 = vmatpush3.msra.mxu1 %v10487_v8 }
 0x76b   :  { %2528 = vmatprep.subr.mxu0 %v10491_v10  ;;  %7665 = vmatprep.subr.mxu1 %v12989_v5 }
 0x76c   :  { %2529 = vmatpush1.msra.mxu0 %v10495_v28  ;;  %7666 = vmatpush3.msra.mxu1 %v10497_v20 }
 0x76d   :  { %2530 = vmatprep.subr.mxu0 %v10501_v21  ;;  %7667 = vmatprep.subr.mxu1 %v12989_v5 }
 0x76e   :  { %2531 = vmatpush1.msra.mxu0 %v10505_v22  ;;  %7668 = vmatpush3.msra.mxu1 %v10507_v23  ;;  %v13089_v23 = vld [vmem:[#allocation38_spill] sm:$0xff] }
 0x76f   :  { %2532 = vmatprep.subr.mxu0 %v10511_v24  ;;  %7669 = vmatprep.subr.mxu1 %v12989_v5 }
 0x770   :  { %2533 = vmatpush1.msra.mxu0 %v10515_v25  ;;  %7670 = vmatpush3.msra.mxu1 %v10517_v26 }
 0x771   :  { %2534 = vmatprep.subr.mxu0 %v10521_v52  ;;  %7671 = vmatprep.subr.mxu1 %v12989_v5 }
 0x772   :  { %2535 = vmatpush1.msra.mxu0 %v10525_v47  ;;  %7672 = vmatpush3.msra.mxu1 %v10527_v6 }
 0x773   :  { %2536 = vmatprep.subr.mxu0 %v10531_v54  ;;  %7673 = vmatprep.subr.mxu1 %v12989_v5 }
 0x774   :  { %2537 = vmatpush1.msra.mxu0 %v10535_v63  ;;  %7674 = vmatpush3.msra.mxu1 %v10537_v49 }
 0x775   :  { %2538 = vmatprep.subr.mxu0 %v10541_v62  ;;  %7675 = vmatprep.subr.mxu1 %v12989_v5 }
 0x776   :  { %2539 = vmatpush1.msra.mxu0 %v10545_v42  ;;  %7676 = vmatpush3.msra.mxu1 %v10547_v60 }
 0x777   :  { %2540 = vmatprep.subr.mxu0 %v10551_v29  ;;  %7677 = vmatprep.subr.mxu1 %v12989_v5 }
 0x778   :  { %2541 = vmatpush1.msra.mxu0 %v10555_v12  ;;  %7678 = vmatpush3.msra.mxu1 %v10557_v16 }
 0x779   :  { %2542 = vmatprep.subr.mxu0 %v10561_v30  ;;  %7679 = vmatprep.subr.mxu1 %v12989_v5 }
 0x77a   :  { %2543 = vmatpush1.msra.mxu0 %v10565_v31  ;;  %7680 = vmatpush3.msra.mxu1 %v10567_v33 }
 0x77b   :  { %2544 = vmatprep.subr.mxu0 %v10571_v35  ;;  %7681 = vmatprep.subr.mxu1 %v12989_v5 }
 0x77c   :  { %2545 = vmatpush1.msra.mxu0 %v10575_v36  ;;  %7682 = vmatpush3.msra.mxu1 %v10577_v37  ;;  %v13076_v37 = vld [vmem:[#allocation36_spill] sm:$0xff] }
 0x77d   :  { %2546 = vmatprep.subr.mxu0 %v10581_v39  ;;  %7683 = vmatprep.subr.mxu1 %v12989_v5 }
 0x77e   :  { %2547 = vmatpush1.msra.mxu0 %v10585_v41  ;;  %7684 = vmatpush3.msra.mxu1 %v10587_v43 }
 0x77f   :  { %2548 = vmatprep.subr.mxu0 %v10591_v44  ;;  %7685 = vmatprep.subr.mxu1 %v12989_v5 }
 0x780   :  { %2549 = vmatpush1.msra.mxu0 %v10595_v46  ;;  %7686 = vmatpush3.msra.mxu1 %v10597_v48 }
 0x781   :  { %7690 = vmatprep.subr.mxu0 %v12989_v5  ;;  %7709 = vmatprep.subr.mxu1 %v12989_v5 }
 0x820   :  { %v2361_v11 = vpop.f32.mrf.mxu0  ;;  %v2432_v56 = vpop.f32.mrf.mxu1 }
 0x821   :  { %v2362_v2 = vadd.f32 %v2361_v11, %v13031_v27  ;;  %v2433_v26 = vadd.f32 %v2432_v56, %v9645_v40  ;;  %v13079_v40 = vld [vmem:[#allocation21_spill] sm:$0xff]  ;;  %v13084_v56 = vld [vmem:[#allocation39_spill] sm:$0xff] }
 0x822   :  { %v2363_v1 = vpop.f32.mrf.mxu0  ;;  %v7654_v32 = vpop.f32.mrf.mxu1 }
 0x823   :  { %v2439_v38 = vadd.f32 %v2362_v2, %v13075_v34  ;;  %v2364_v43 = vadd.f32 %v2363_v1, %v9616_v14  ;;  %v13077_v32 = vld [vmem:[#allocation58_spill] sm:$0xff] }
 0x825   :  { %v6492_v19 = vmul.f32 -1.442695, %v2439_v38  ;;  %v2446_v33 = vadd.f32 %v2364_v43, %v13076_v37 }
 0x827   :  { %8361 = vpow2.f32 %v6492_v19  ;;  %v6493_v16 = vmul.f32 -1.442695, %v2446_v33  ;;  %v13085_v19 = vld [vmem:[#allocation37_spill] sm:$0xff] }
 0x829   :  { %8363 = vpow2.f32 %v6493_v16 }
 0x834   :  { %v8362_v48 = vpop.eup %8361 }
 0x835   :  { %v2443_v60 = vadd.f32 1.0, %v8362_v48 }
 0x836   :  { %v8364_v49 = vpop.eup %8363 }
 0x837   :  { %8365 = vrcp.f32 %v2443_v60  ;;  %v2450_v6 = vadd.f32 1.0, %v8364_v49  ;;  %v725_v49 = vld [vmem:[%s12764_s10] sm:$0x7]  ;;  %v13082_v60 = vld [vmem:[#allocation19_spill] sm:$0xff] }
 0x838   :  { %v10653_v37 = vrot.slane %v725_v49, %v13082_v60 }
 0x839   :  { %8367 = vrcp.f32 %v2450_v6  ;;  %v13081_v6 = vld [vmem:[#allocation71_spill] sm:$0xff] }
 0x83a   :  { %13083 = vst [vmem:[#allocation36_spill] sm:$0xff] %v10653_v37 }
 0x844   :  { %v8366_v27 = vpop.eup %8365 }
 0x845   :  { %v2453_v11 = vmul.f32 %v8366_v27, %v2433_v26  ;;  %v13080_v26 = vld [vmem:[#allocation16_spill] sm:$0xff]  ;;  %v533_v27 = vadd.f32 %v13085_v19, %v13084_v56  ;;  %v13090_v19 = vld [vmem:[#allocation29_spill] sm:$0xff] }
 0x846   :  { %v8368_v34 = vpop.eup %8367 }
 0x847   :  { %v2454_v2 = vadd.f32 %v2453_v11, %v13077_v32  ;;  %v2456_v14 = vsub.f32 1.0, %v8368_v34  ;;  %v2458_v33 = vmul.f32 %v8368_v34, %v10435_v0  ;;  %v13086_v32 = vld [vmem:[#allocation20_spill] sm:$0xff] }
 0x849   :  { %8369 = vtanh.f32 %v2454_v2  ;;  %v10659_v2 = vrot.slane %v725_v49, %v13086_v32  ;;  %v10665_v32 = vrot.slane %v725_v49, %v13090_v19  ;;  %v10728_v49 = vld [vmem:[%s12756_s2] sm:$0xff] }
 0x84b   :  { %13087 = vst [vmem:[#allocation58_spill] sm:$0xff] %v10659_v2 }
 0x856   :  { %v8370_v1 = vpop.eup %8369 }
 0x857   :  { %v2457_v38 = vmul.f32 %v8370_v1, %v2456_v14 }
 0x859   :  { %v10610_v16 = vadd.f32 %v2458_v33, %v2457_v38 }
 0x85b   :  { %13078 = vst [vmem:[#allocation35_spill] sm:$0xff] %v10610_v16  ;;  %2583 = vmatmul.mubr.f32.vlgmr.msra.gmra.mxu0 %v10610_v16  ;;  %7688 = vmatmul.mubr.f32.vlgmr.msra.gmra.mxu1 %v10610_v16 }
 0x85c   :  { %7691 = vmatpush3.xpose.msra.mxu0 %v10610_v16  ;;  %7710 = vmatpush3.msra.mxu1 %v10610_v16 }
 0x85d   :  { %7711 = vmatprep.subr.mxu1 %v12989_v5  ;;  %7692 = vmatprep.subr.mxu0 %v12989_v5 }
 0x85e   :  { %7712 = vmatpush3.msra.mxu1 %v10435_v0  ;;  %7706 = vmatprep.mubr.msk.f32.mxu0 %vm8584_vm0, %v12989_v5 }
 0x85f   :  { %7713 = vmatprep.subr.mxu1 %v12989_v5  ;;  %7725 = vmatprep.mubr.msk.f32.mxu1 %vm8584_vm0, %v12989_v5 }
 0x860   :  { %7693 = vmatpush3.xpose.msra.mxu0 %v10435_v0  ;;  %7714 = vmatpush3.msra.mxu1 %v10279_v50 }
 0x861   :  { %7715 = vmatprep.subr.mxu1 %v12989_v5  ;;  %7694 = vmatprep.subr.mxu0 %v12989_v5 }
 0x862   :  { %7716 = vmatpush3.msra.mxu1 %v10202_v53 }
 0x863   :  { %7717 = vmatprep.subr.mxu1 %v12989_v5 }
 0x864   :  { %7695 = vmatpush3.xpose.msra.mxu0 %v10279_v50  ;;  %7718 = vmatpush3.msra.mxu1 %v10124_v18 }
 0x865   :  { %7719 = vmatprep.subr.mxu1 %v12989_v5  ;;  %7696 = vmatprep.subr.mxu0 %v12989_v5 }
 0x866   :  { %7720 = vmatpush3.msra.mxu1 %v13079_v40 }
 0x867   :  { %7721 = vmatprep.subr.mxu1 %v12989_v5 }
 0x868   :  { %7697 = vmatpush3.xpose.msra.mxu0 %v10202_v53  ;;  %7722 = vmatpush3.msra.mxu1 %v13080_v26 }
 0x869   :  { %7723 = vmatprep.subr.mxu1 %v12989_v5  ;;  %7698 = vmatprep.subr.mxu0 %v12989_v5 }
 0x86a   :  { %7724 = vmatpush3.msra.mxu1 %v13081_v6 }
 0x86c   :  { %7699 = vmatpush3.xpose.msra.mxu0 %v10124_v18 }
 0x86d   :  { %7700 = vmatprep.subr.mxu0 %v12989_v5 }
 0x870   :  { %7701 = vmatpush3.xpose.msra.mxu0 %v13079_v40 }
 0x871   :  { %7702 = vmatprep.subr.mxu0 %v12989_v5 }
 0x874   :  { %7703 = vmatpush3.xpose.msra.mxu0 %v13080_v26 }
 0x875   :  { %7704 = vmatprep.subr.mxu0 %v12989_v5 }
 0x878   :  { %7705 = vmatpush3.xpose.msra.mxu0 %v13081_v6 }
 0x879   :  { %2990 = vmatprep.subr.mxu0 %v10442_v45  ;;  %v13088_v45 = vld [vmem:[#allocation40_spill] sm:$0xff] }
 0x87a   :  { %v535_v60 = vadd.f32 %v13089_v23, %v13088_v45 }
 0x91b   :  { %v2584_v43 = vpop.f32.mrf.mxu0  ;;  %v2655_v48 = vpop.f32.mrf.mxu1 }
 0x91c   :  { %v2585_v11 = vadd.f32 %v2584_v43, %v10653_v37 }
 0x91d   :  { %v2586_v34 = vpop.f32.mrf.mxu0  ;;  %v7689_v14 = vpop.f32.mrf.mxu1 }
 0x91e   :  { %v2662_v1 = vadd.f32 %v2585_v11, %v533_v27  ;;  %v2587_v33 = vadd.f32 %v2586_v34, %v10659_v2  ;;  %v2656_v27 = vadd.f32 %v2655_v48, %v10665_v32  ;;  %v13091_v14 = vld [vmem:[#allocation61_spill] sm:$0xff]  ;;  %v13092_v34 = vld [vmem:[#allocation64_spill] sm:$0xff] }
 0x920   :  { %v6494_v38 = vmul.f32 -1.442695, %v2662_v1  ;;  %v2669_v20 = vadd.f32 %v2587_v33, %v535_v60  ;;  %v646_v1 = vadd.f32 %v13092_v34, %v13091_v14  ;;  %v2869_v14 = vld [vmem:[%s12765_s11 + $0xf8] sm:$0xff] }
 0x921   :  { %6738 = vmatprep.subr.mxu1 %v2869_v14 }
 0x922   :  { %8371 = vpow2.f32 %v6494_v38  ;;  %v6495_v8 = vmul.f32 -1.442695, %v2669_v20 }
 0x924   :  { %8373 = vpow2.f32 %v6495_v8 }
 0x92f   :  { %v8372_v61 = vpop.eup %8371 }
 0x930   :  { %v2666_v56 = vadd.f32 1.0, %v8372_v61 }
 0x931   :  { %v8374_v43 = vpop.eup %8373 }
 0x932   :  { %8375 = vrcp.f32 %v2666_v56  ;;  %v2673_v37 = vadd.f32 1.0, %v8374_v43 }
 0x934   :  { %8377 = vrcp.f32 %v2673_v37 }
 0x93f   :  { %v8376_v11 = vpop.eup %8375 }
 0x940   :  { %v2676_v2 = vmul.f32 %v8376_v11, %v2656_v27 }
 0x941   :  { %v8378_v20 = vpop.eup %8377 }
 0x942   :  { %v2677_v45 = vadd.f32 %v2676_v2, %v646_v1  ;;  %v2679_v8 = vsub.f32 1.0, %v8378_v20  ;;  %v2681_v38 = vmul.f32 %v8378_v20, %v10610_v16  ;;  %v10739_v20 = vld [vmem:[%s12765_s11 + $0x78] sm:$0xff] }
 0x944   :  { %8379 = vtanh.f32 %v2677_v45 }
 0x951   :  { %v8380_v23 = vpop.eup %8379 }
 0x952   :  { %v2680_v61 = vmul.f32 %v8380_v23, %v2679_v8  ;;  %v10744_v8 = vld [vmem:[%s12765_s11 + $0xf0] sm:$0xff] }
 0x953   :  { %v10750_v23 = vld [vmem:[%s12765_s11 + $0x70] sm:$0xff] }
 0x954   :  { %v10671_v33 = vadd.f32 %v2681_v38, %v2680_v61  ;;  %v10756_v61 = vld [vmem:[%s12765_s11 + $0xe8] sm:$0xff] }
 0x955   :  { %v10762_v38 = vld [vmem:[%s12765_s11 + $0x68] sm:$0xff] }
 0x956   :  { %7707 = vmatmul.mubr.f32.vlgmr.msra.gmra.mxu0 %v10671_v33 }
 0x957   :  { %2991 = vmatpush1.msra.mxu0 %v10445_v15  ;;  %3054 = vmatprep.mubr.f32.mxu0 %v12989_v5 }
 0x958   :  { %2992 = vmatprep.subr.mxu0 %v10451_v51 }
 0x959   :  { %2993 = vmatpush1.msra.mxu0 %v10455_v59 }
 0x95a   :  { %2994 = vmatprep.subr.mxu0 %v10461_v13 }
 0x95b   :  { %2995 = vmatpush1.msra.mxu0 %v10465_v57 }
 0x95c   :  { %2996 = vmatprep.subr.mxu0 %v10471_v58 }
 0x95d   :  { %2997 = vmatpush1.msra.mxu0 %v10475_v3 }
 0x95e   :  { %2998 = vmatprep.subr.mxu0 %v10481_v9 }
 0x95f   :  { %2999 = vmatpush1.msra.mxu0 %v10485_v4 }
 0x960   :  { %3000 = vmatprep.subr.mxu0 %v10491_v10 }
 0x961   :  { %3001 = vmatpush1.msra.mxu0 %v10495_v28  ;;  %v13112_v28 = vld [vmem:[#allocation63_spill] sm:$0xff] }
 0x962   :  { %3002 = vmatprep.subr.mxu0 %v10501_v21 }
 0x963   :  { %3003 = vmatpush1.msra.mxu0 %v10505_v22 }
 0x964   :  { %3004 = vmatprep.subr.mxu0 %v10511_v24 }
 0x965   :  { %3005 = vmatpush1.msra.mxu0 %v10515_v25 }
 0x966   :  { %3006 = vmatprep.subr.mxu0 %v10521_v52  ;;  %v13093_v52 = vld [vmem:[#allocation25_spill] sm:$0xff] }
 0x967   :  { %3007 = vmatpush1.msra.mxu0 %v10525_v47 }
 0x968   :  { %3008 = vmatprep.subr.mxu0 %v10531_v54 }
 0x969   :  { %3009 = vmatpush1.msra.mxu0 %v10535_v63  ;;  %v10920_v63 = vld [vmem:[%s12765_s11] sm:$0xff] }
 0x96a   :  { %3010 = vmatprep.subr.mxu0 %v10541_v62  ;;  %v10912_v62 = vld [vmem:[%s12765_s11 + $0x80] sm:$0xff] }
 0x96b   :  { %3011 = vmatpush1.msra.mxu0 %v10545_v42  ;;  %v10906_v42 = vld [vmem:[%s12765_s11 + $0x8] sm:$0xff] }
 0x96c   :  { %3012 = vmatprep.subr.mxu0 %v10551_v29  ;;  %v10900_v29 = vld [vmem:[%s12765_s11 + $0x88] sm:$0xff] }
 0x96d   :  { %3013 = vmatpush1.msra.mxu0 %v10555_v12  ;;  %v10894_v12 = vld [vmem:[%s12765_s11 + $0x10] sm:$0xff] }
 0x96e   :  { %3014 = vmatprep.subr.mxu0 %v10561_v30  ;;  %v10888_v30 = vld [vmem:[%s12765_s11 + $0x90] sm:$0xff] }
 0x96f   :  { %3015 = vmatpush1.msra.mxu0 %v10565_v31  ;;  %v10882_v31 = vld [vmem:[%s12765_s11 + $0x18] sm:$0xff] }
 0x970   :  { %3016 = vmatprep.subr.mxu0 %v10571_v35  ;;  %v10876_v35 = vld [vmem:[%s12765_s11 + $0x98] sm:$0xff] }
 0x971   :  { %3017 = vmatpush1.msra.mxu0 %v10575_v36  ;;  %v10870_v36 = vld [vmem:[%s12765_s11 + $0x20] sm:$0xff] }
 0x972   :  { %3018 = vmatprep.subr.mxu0 %v10581_v39  ;;  %v10864_v39 = vld [vmem:[%s12765_s11 + $0xa0] sm:$0xff] }
 0x973   :  { %3019 = vmatpush1.msra.mxu0 %v10585_v41  ;;  %v10858_v41 = vld [vmem:[%s12765_s11 + $0x28] sm:$0xff] }
 0x974   :  { %3020 = vmatprep.subr.mxu0 %v10591_v44  ;;  %v10852_v44 = vld [vmem:[%s12765_s11 + $0xa8] sm:$0xff] }
 0x975   :  { %3021 = vmatpush1.msra.mxu0 %v10595_v46  ;;  %v10846_v46 = vld [vmem:[%s12765_s11 + $0x30] sm:$0xff] }
 0x976   :  { %3055 = vmatmul.mubr.f32.vlgmr.msra.gmra.mxu0 %v10671_v33  ;;  %7763 = vmatprep.subr.mxu0 %v12989_v5 }
 0x977   :  { %7764 = vmatpush3.xpose.msra.mxu0 %v10610_v16  ;;  %7779 = vmatprep.mubr.msk.f32.mxu0 %vm8584_vm0, %v12989_v5 }
 0x978   :  { %7765 = vmatprep.subr.mxu0 %v12989_v5 }
 0x97b   :  { %7766 = vmatpush3.xpose.msra.mxu0 %v10435_v0 }
 0x97c   :  { %7767 = vmatprep.subr.mxu0 %v12989_v5 }
 0x97f   :  { %7768 = vmatpush3.xpose.msra.mxu0 %v10279_v50 }
 0x980   :  { %7769 = vmatprep.subr.mxu0 %v12989_v5 }
 0x983   :  { %7770 = vmatpush3.xpose.msra.mxu0 %v10202_v53 }
 0x984   :  { %7771 = vmatprep.subr.mxu0 %v12989_v5 }
 0x987   :  { %7772 = vmatpush3.xpose.msra.mxu0 %v10124_v18 }
 0x988   :  { %7773 = vmatprep.subr.mxu0 %v12989_v5 }
 0x98b   :  { %7774 = vmatpush3.xpose.msra.mxu0 %v13079_v40 }
 0x98c   :  { %7775 = vmatprep.subr.mxu0 %v12989_v5 }
 0x98f   :  { %7776 = vmatpush3.xpose.msra.mxu0 %v13080_v26 }
 0x990   :  { %7777 = vmatprep.subr.mxu0 %v12989_v5 }
 0x993   :  { %7778 = vmatpush3.xpose.msra.mxu0 %v13081_v6 }
 0x994   :  { %6808 = vmatprep.subr.mxu0 %v2869_v14  ;;  %v10822_v14 = vld [vmem:[%s12765_s11 + $0x40] sm:$0xff] }
 0xa16   :  { %v2749_v37 = vpop.f32.mrf.mxu0 }
 0xa17   :  { %v2750_v48 = vadd.f32 %v2749_v37, %v10728_v49  ;;  %v10768_v37 = vld [vmem:[%s12765_s11 + $0xe0] sm:$0xff] }
 0xa18   :  { %v7708_v2 = vpop.f32.mrf.mxu0 }
 0xa19   :  { %v2754_v60 = vsel %vm2753_vm1, %v2750_v48, -inf  ;;  %v10780_v2 = vld [vmem:[%s12765_s11 + $0xd8] sm:$0xff] }
 0xa1a   :  { %2755 = vmax.xlane.f32.xlu0 %v2754_v60  ;;  %v10786_v60 = vld [vmem:[%s12765_s11 + $0x58] sm:$0xff] }
 0xaa3   :  { %v2756_v56 = vpop.xlane.xlu0 %2755 }
 0xaa4   :  { %v2757_v43 = vsub.f32 %v2750_v48, %v2756_v56  ;;  %v10774_v48 = vld [vmem:[%s12765_s11 + $0x60] sm:$0xff]  ;;  %v10792_v56 = vld [vmem:[%s12765_s11 + $0xd0] sm:$0xff] }
 0xaa6   :  { %v2758_v19 = vmul.f32 1.442695, %v2757_v43  ;;  %v10798_v43 = vld [vmem:[%s12765_s11 + $0x50] sm:$0xff] }
 0xaa8   :  { %8381 = vpow2.f32 %v2758_v19  ;;  %v10804_v19 = vld [vmem:[%s12765_s11 + $0xc8] sm:$0xff] }
 0xab5   :  { %v8382_v27 = vpop.eup %8381 }
 0xab6   :  { %v2760_v11 = vsel %vm2753_vm1, %v8382_v27, 0.0 }
 0xab7   :  { %2761 = vadd.xlane.f32.xlu0 %v2760_v11  ;;  %v10816_v11 = vld [vmem:[%s12765_s11 + $0xc0] sm:$0xff] }
 0xb40   :  { %v2762_v34 = vpop.xlane.xlu0 %2761 }
 0xb41   :  { %8383 = vrcp.f32 %v2762_v34  ;;  %v10828_v34 = vld [vmem:[%s12765_s11 + $0xb8] sm:$0xff] }
 0xb4e   :  { %v8384_v1 = vpop.eup %8383 }
 0xb4f   :  { %v2764_v45 = vmul.f32 %v8384_v1, %v8382_v27  ;;  %v10810_v27 = vld [vmem:[%s12765_s11 + $0x48] sm:$0xff]  ;;  %v10834_v1 = vld [vmem:[%s12765_s11 + $0x38] sm:$0xff] }
 0xb51   :  { %7726 = vmatmul.mubr.msk.f32.vlgmr.msra.gmra.mxu1 %vm2753_vm1, %v2764_v45  ;;  %v10840_v45 = vld [vmem:[%s12765_s11 + $0xb0] sm:$0xff] }
 0xb52   :  { %6739 = vmatpush3.msra.mxu1 %v10739_v20 }
 0xb53   :  { %6740 = vmatprep.subr.mxu1 %v10744_v8 }
 0xb54   :  { %6741 = vmatpush3.msra.mxu1 %v10750_v23 }
 0xb55   :  { %6742 = vmatprep.subr.mxu1 %v10756_v61 }
 0xb56   :  { %6743 = vmatpush3.msra.mxu1 %v10762_v38 }
 0xb57   :  { %6744 = vmatprep.subr.mxu1 %v10768_v37 }
 0xb58   :  { %6745 = vmatpush3.msra.mxu1 %v10774_v48 }
 0xb59   :  { %6746 = vmatprep.subr.mxu1 %v10780_v2 }
 0xb5a   :  { %6747 = vmatpush3.msra.mxu1 %v10786_v60 }
 0xb5b   :  { %6748 = vmatprep.subr.mxu1 %v10792_v56 }
 0xb5c   :  { %6749 = vmatpush3.msra.mxu1 %v10798_v43 }
 0xb5d   :  { %6750 = vmatprep.subr.mxu1 %v10804_v19 }
 0xb5e   :  { %6751 = vmatpush3.msra.mxu1 %v10810_v27 }
 0xb5f   :  { %6752 = vmatprep.subr.mxu1 %v10816_v11 }
 0xb60   :  { %6753 = vmatpush3.msra.mxu1 %v10822_v14 }
 0xb61   :  { %6754 = vmatprep.subr.mxu1 %v10828_v34 }
 0xb62   :  { %6755 = vmatpush3.msra.mxu1 %v10834_v1 }
 0xb63   :  { %6756 = vmatprep.subr.mxu1 %v10840_v45 }
 0xb64   :  { %6757 = vmatpush3.msra.mxu1 %v10846_v46 }
 0xb65   :  { %6758 = vmatprep.subr.mxu1 %v10852_v44 }
 0xb66   :  { %6759 = vmatpush3.msra.mxu1 %v10858_v41 }
 0xb67   :  { %6760 = vmatprep.subr.mxu1 %v10864_v39 }
 0xb68   :  { %6761 = vmatpush3.msra.mxu1 %v10870_v36 }
 0xb69   :  { %6762 = vmatprep.subr.mxu1 %v10876_v35 }
 0xb6a   :  { %6763 = vmatpush3.msra.mxu1 %v10882_v31 }
 0xb6b   :  { %6764 = vmatprep.subr.mxu1 %v10888_v30 }
 0xb6c   :  { %6765 = vmatpush3.msra.mxu1 %v10894_v12 }
 0xb6d   :  { %6766 = vmatprep.subr.mxu1 %v10900_v29 }
 0xb6e   :  { %6767 = vmatpush3.msra.mxu1 %v10906_v42 }
 0xb6f   :  { %6768 = vmatprep.subr.mxu1 %v10912_v62 }
 0xb70   :  { %6769 = vmatpush3.msra.mxu1 %v10920_v63 }
 0xb71   :  { %7728 = vmatprep.subr.mxu1 %v12989_v5 }
 0xc11   :  { %v2834_v54 = vpop.f32.mrf.mxu1 }
 0xc12   :  { %2934 = vmatprep.mubr.f32.mxu1 %v2834_v54  ;;  %v13096_v54 = vld [vmem:[#allocation56_spill] sm:$0xff] }
 0xc13   :  { %v7727_v47 = vpop.f32.mrf.mxu1  ;;  %2935 = vmatmul.mubr.f32.vlgmr.msra.gmra.mxu1 %v10671_v33 }
 0xc14   :  { %7729 = vmatpush3.msra.mxu1 %v10447_v17  ;;  %7760 = vmatprep.mubr.msk.f32.mxu1 %vm8584_vm0, %v12989_v5  ;;  %v13094_v47 = vld [vmem:[#allocation26_spill] sm:$0xff]  ;;  %v13095_v17 = vld [vmem:[#allocation12_spill] sm:$0xff] }
 0xc15   :  { %7730 = vmatprep.subr.mxu1 %v12989_v5 }
 0xc16   :  { %7731 = vmatpush3.msra.mxu1 %v10457_v7  ;;  %v13097_v7 = vld [vmem:[#allocation14_spill] sm:$0xff] }
 0xc17   :  { %7732 = vmatprep.subr.mxu1 %v12989_v5 }
 0xc18   :  { %7733 = vmatpush3.msra.mxu1 %v10467_v55  ;;  %v13098_v55 = vld [vmem:[#allocation60_spill] sm:$0xff] }
 0xc19   :  { %7734 = vmatprep.subr.mxu1 %v12989_v5 }
 0xc1a   :  { %7735 = vmatpush3.msra.mxu1 %v13093_v52  ;;  %v13099_v52 = vld [vmem:[#allocation54_spill] sm:$0xff] }
 0xc1b   :  { %7736 = vmatprep.subr.mxu1 %v12989_v5 }
 0xc1c   :  { %7737 = vmatpush3.msra.mxu1 %v13094_v47  ;;  %v13100_v47 = vld [vmem:[#allocation62_spill] sm:$0xff] }
 0xc1d   :  { %7738 = vmatprep.subr.mxu1 %v12989_v5 }
 0xc1e   :  { %7739 = vmatpush3.msra.mxu1 %v13095_v17  ;;  %v13101_v17 = vld [vmem:[#allocation74_spill] sm:$0xff] }
 0xc1f   :  { %7740 = vmatprep.subr.mxu1 %v12989_v5 }
 0xc20   :  { %7741 = vmatpush3.msra.mxu1 %v13096_v54  ;;  %v13102_v54 = vld [vmem:[#allocation77_spill] sm:$0xff] }
 0xc21   :  { %7742 = vmatprep.subr.mxu1 %v12989_v5 }
 0xc22   :  { %7743 = vmatpush3.msra.mxu1 %v13097_v7  ;;  %v13103_v7 = vld [vmem:[#allocation80_spill] sm:$0xff] }
 0xc23   :  { %7744 = vmatprep.subr.mxu1 %v12989_v5 }
 0xc24   :  { %7745 = vmatpush3.msra.mxu1 %v13098_v55  ;;  %v13104_v55 = vld [vmem:[#allocation83_spill] sm:$0xff] }
 0xc25   :  { %7746 = vmatprep.subr.mxu1 %v12989_v5 }
 0xc26   :  { %7747 = vmatpush3.msra.mxu1 %v13099_v52  ;;  %v13105_v52 = vld [vmem:[#allocation86_spill] sm:$0xff] }
 0xc27   :  { %7748 = vmatprep.subr.mxu1 %v12989_v5 }
 0xc28   :  { %7749 = vmatpush3.msra.mxu1 %v13100_v47  ;;  %v13106_v47 = vld [vmem:[#allocation52_spill] sm:$0xff] }
 0xc29   :  { %7750 = vmatprep.subr.mxu1 %v12989_v5 }
 0xc2a   :  { %7751 = vmatpush3.msra.mxu1 %v13101_v17  ;;  %v3056_v17 = vpop.f32.mrf.mxu0 }
 0xc2b   :  { %7752 = vmatprep.subr.mxu1 %v12989_v5 }
 0xc2c   :  { %7753 = vmatpush3.msra.mxu1 %v13102_v54  ;;  %v13107_v54 = vld [vmem:[#allocation36_spill] sm:$0xff] }
 0xc2d   :  { %7754 = vmatprep.subr.mxu1 %v12989_v5 }
 0xc2e   :  { %7755 = vmatpush3.msra.mxu1 %v13103_v7  ;;  %v3057_v7 = vadd.f32 %v3056_v17, %v13107_v54 }
 0xc2f   :  { %7756 = vmatprep.subr.mxu1 %v12989_v5 }
 0xc30   :  { %7757 = vmatpush3.msra.mxu1 %v13104_v55  ;;  %v13108_v55 = vld [vmem:[#allocation41_spill] sm:$0xff] }
 0xc31   :  { %7758 = vmatprep.subr.mxu1 %v12989_v5 }
 0xc32   :  { %7759 = vmatpush3.msra.mxu1 %v13105_v52  ;;  %v3134_v52 = vadd.f32 %v3057_v7, %v13108_v55 }
 0xc33   :  { %7761 = vmatmul.mubr.f32.vlgmr.msra.gmra.mxu1 %v10671_v33  ;;  %7782 = vmatprep.subr.mxu1 %v12989_v5 }
 0xc34   :  { %7783 = vmatpush3.msra.mxu1 %v10610_v16  ;;  %7798 = vmatprep.mubr.msk.f32.mxu1 %vm8584_vm0, %v12989_v5 }
 0xc35   :  { %7784 = vmatprep.subr.mxu1 %v12989_v5 }
 0xc36   :  { %7785 = vmatpush3.msra.mxu1 %v10435_v0  ;;  %v13109_v0 = vld [vmem:[#allocation58_spill] sm:$0xff] }
 0xc37   :  { %7786 = vmatprep.subr.mxu1 %v12989_v5 }
 0xc38   :  { %7787 = vmatpush3.msra.mxu1 %v10279_v50 }
 0xc39   :  { %7788 = vmatprep.subr.mxu1 %v12989_v5 }
 0xc3a   :  { %7789 = vmatpush3.msra.mxu1 %v10202_v53  ;;  %v3058_v53 = vpop.f32.mrf.mxu0 }
 0xc3b   :  { %7790 = vmatprep.subr.mxu1 %v12989_v5  ;;  %v3059_v16 = vadd.f32 %v3058_v53, %v13109_v0 }
 0xc3c   :  { %7791 = vmatpush3.msra.mxu1 %v10124_v18  ;;  %v6497_v18 = vmul.f32 -1.442695, %v3134_v52 }
 0xc3d   :  { %7792 = vmatprep.subr.mxu1 %v12989_v5 }
 0xc3e   :  { %7793 = vmatpush3.msra.mxu1 %v13079_v40  ;;  %8385 = vpow2.f32 %v6497_v18 }
 0xc3f   :  { %7794 = vmatprep.subr.mxu1 %v12989_v5 }
 0xc40   :  { %7795 = vmatpush3.msra.mxu1 %v13080_v26  ;;  %v13111_v26 = vld [vmem:[#allocation42_spill] sm:$0xff] }
 0xc41   :  { %7796 = vmatprep.subr.mxu1 %v12989_v5  ;;  %v3141_v24 = vadd.f32 %v3059_v16, %v13111_v26 }
 0xc42   :  { %7797 = vmatpush3.msra.mxu1 %v13081_v6 }
 0xc43   :  { %3461 = vmatprep.subr.mxu1 %v13106_v47  ;;  %v6498_v22 = vmul.f32 -1.442695, %v3141_v24 }
 0xc45   :  { %8387 = vpow2.f32 %v6498_v22 }
 0xc4b   :  { %v8386_v6 = vpop.eup %8385 }
 0xc4c   :  { %v3138_v47 = vadd.f32 1.0, %v8386_v6  ;;  %v13126_v6 = vld [vmem:[#allocation75_spill] sm:$0xff] }
 0xc4e   :  { %8389 = vrcp.f32 %v3138_v47  ;;  %v11090_v47 = vld [vmem:[#allocation6 + $0x130] sm:$0xff] }
 0xc52   :  { %v8388_v21 = vpop.eup %8387 }
 0xc53   :  { %v3145_v17 = vadd.f32 1.0, %v8388_v21 }
 0xc55   :  { %8391 = vrcp.f32 %v3145_v17  ;;  %v11094_v17 = vld [vmem:[#allocation6 + $0x118] sm:$0xff] }
 0xc5b   :  { %v8390_v55 = vpop.eup %8389 }
 0xcd3   :  { %v6770_v50 = vpop.f32.mrf.mxu1 }
 0xcd5   :  { %v6771_v40 = vpop.f32.mrf.mxu1 }
 0xcd6   :  { %v10981_v25 = vadd.f32 %v6771_v40, %v6770_v50  ;;  %v8392_v50 = vpop.eup %8391 }
 0xcd7   :  { %v3151_v40 = vsub.f32 1.0, %v8392_v50  ;;  %v3153_v22 = vmul.f32 %v8392_v50, %v10671_v33  ;;  %v13127_v33 = vld [vmem:[#allocation76_spill] sm:$0xff]  ;;  %v11118_v50 = vld [vmem:[#allocation6 + $0x88] sm:$0xff] }
 0xcd8   :  { %13110 = vst [vmem:[#allocation19_spill] sm:$0xff] %v10981_v25 }
 0xcf3   :  { %v3127_v54 = vpop.f32.mrf.mxu1 }
 0xcf4   :  { %v3128_v7 = vadd.f32 %v3127_v54, %v10665_v32  ;;  %v11086_v54 = vld [vmem:[#allocation6 + $0x148] sm:$0xff] }
 0xcf5   :  { %v7762_v52 = vpop.f32.mrf.mxu1 }
 0xcf6   :  { %v3148_v18 = vmul.f32 %v8390_v55, %v3128_v7  ;;  %v11098_v7 = vld [vmem:[#allocation6 + $0x100] sm:$0xff]  ;;  %v11102_v55 = vld [vmem:[#allocation6 + $0xe8] sm:$0xff]  ;;  %v11106_v52 = vld [vmem:[#allocation6 + $0xd0] sm:$0xff] }
 0xcf8   :  { %v3149_v53 = vadd.f32 %v3148_v18, %v13112_v28  ;;  %v11110_v18 = vld [vmem:[#allocation6 + $0xb8] sm:$0xff] }
 0xcfa   :  { %8393 = vtanh.f32 %v3149_v53  ;;  %v11114_v53 = vld [vmem:[#allocation6 + $0xa0] sm:$0xff] }
 0xd07   :  { %v8394_v16 = vpop.eup %8393 }
 0xd08   :  { %v3152_v24 = vmul.f32 %v8394_v16, %v3151_v40  ;;  %v11122_v40 = vld [vmem:[#allocation6 + $0x70] sm:$0xff]  ;;  %v11126_v16 = vld [vmem:[#allocation6 + $0x58] sm:$0xff] }
 0xd0a   :  { %v10987_v26 = vadd.f32 %v3153_v22, %v3152_v24  ;;  %v11130_v24 = vld [vmem:[#allocation6 + $0x40] sm:$0xff]  ;;  %v11134_v22 = vld [vmem:[#allocation6 + $0x28] sm:$0xff] }
 0xd0c   :  { %7780 = vmatmul.mubr.f32.vlgmr.msra.gmra.mxu0 %v10987_v26 }
 0xd0d   :  { %6809 = vmatpush3.msra.mxu0 %v10739_v20  ;;  %v13128_v20 = vld [vmem:[#allocation78_spill] sm:$0xff] }
 0xd0e   :  { %6810 = vmatprep.subr.mxu0 %v10744_v8  ;;  %v13129_v8 = vld [vmem:[#allocation79_spill] sm:$0xff] }
 0xd0f   :  { %6811 = vmatpush3.msra.mxu0 %v10750_v23  ;;  %v13130_v23 = vld [vmem:[#allocation81_spill] sm:$0xff] }
 0xd10   :  { %6812 = vmatprep.subr.mxu0 %v10756_v61  ;;  %v13131_v61 = vld [vmem:[#allocation82_spill] sm:$0xff] }
 0xd11   :  { %6813 = vmatpush3.msra.mxu0 %v10762_v38  ;;  %v13132_v38 = vld [vmem:[#allocation84_spill] sm:$0xff] }
 0xd12   :  { %6814 = vmatprep.subr.mxu0 %v10768_v37  ;;  %v13133_v37 = vld [vmem:[#allocation85_spill] sm:$0xff] }
 0xd13   :  { %6815 = vmatpush3.msra.mxu0 %v10774_v48  ;;  %v13134_v48 = vld [vmem:[#allocation35_spill] sm:$0xff] }
 0xd14   :  { %6816 = vmatprep.subr.mxu0 %v10780_v2  ;;  %v13135_v2 = vld [vmem:[#allocation24_spill] sm:$0xff] }
 0xd15   :  { %6817 = vmatpush3.msra.mxu0 %v10786_v60  ;;  %v13136_v60 = vld [vmem:[#allocation23_spill] sm:$0xff] }
 0xd16   :  { %6818 = vmatprep.subr.mxu0 %v10792_v56  ;;  %v13137_v56 = vld [vmem:[#allocation34_spill] sm:$0xff] }
 0xd17   :  { %6819 = vmatpush3.msra.mxu0 %v10798_v43  ;;  %v13138_v43 = vld [vmem:[#allocation22_spill] sm:$0xff] }
 0xd18   :  { %6820 = vmatprep.subr.mxu0 %v10804_v19  ;;  %v13139_v19 = vld [vmem:[#allocation21_spill] sm:$0xff] }
 0xd19   :  { %6821 = vmatpush3.msra.mxu0 %v10810_v27  ;;  %v13140_v27 = vld [vmem:[#allocation16_spill] sm:$0xff] }
 0xd1a   :  { %6822 = vmatprep.subr.mxu0 %v10816_v11  ;;  %v13141_v11 = vld [vmem:[#allocation71_spill] sm:$0xff] }
 0xd1b   :  { %6823 = vmatpush3.msra.mxu0 %v10822_v14 }
 0xd1c   :  { %6824 = vmatprep.subr.mxu0 %v10828_v34  ;;  %v11077_v34 = vld [vmem:[#allocation6 + $0x178] sm:$0xff] }
 0xd1d   :  { %6825 = vmatpush3.msra.mxu0 %v10834_v1 }
 0xd1e   :  { %6826 = vmatprep.subr.mxu0 %v10840_v45  ;;  %v11080_v45 = vld [vmem:[#allocation6 + $0x160] sm:$0xff] }
 0xd1f   :  { %6827 = vmatpush3.msra.mxu0 %v10846_v46  ;;  %v13125_v46 = vld [vmem:[#allocation73_spill] sm:$0xff] }
 0xd20   :  { %6828 = vmatprep.subr.mxu0 %v10852_v44  ;;  %v13124_v44 = vld [vmem:[#allocation72_spill] sm:$0xff] }
 0xd21   :  { %6829 = vmatpush3.msra.mxu0 %v10858_v41  ;;  %v13114_v41 = vld [vmem:[#allocation27_spill] sm:$0xff] }
 0xd22   :  { %6830 = vmatprep.subr.mxu0 %v10864_v39 }
 0xd23   :  { %6831 = vmatpush3.msra.mxu0 %v10870_v36 }
 0xd24   :  { %6832 = vmatprep.subr.mxu0 %v10876_v35 }
 0xd25   :  { %6833 = vmatpush3.msra.mxu0 %v10882_v31 }
 0xd26   :  { %6834 = vmatprep.subr.mxu0 %v10888_v30 }
 0xd27   :  { %6835 = vmatpush3.msra.mxu0 %v10894_v12 }
 0xd28   :  { %6836 = vmatprep.subr.mxu0 %v10900_v29 }
 0xd29   :  { %6837 = vmatpush3.msra.mxu0 %v10906_v42 }
 0xd2a   :  { %6838 = vmatprep.subr.mxu0 %v10912_v62 }
 0xd2b   :  { %6839 = vmatpush3.msra.mxu0 %v10920_v63 }
 0xd2c   :  { %7801 = vmatprep.subr.mxu0 %v12989_v5 }
 0xdcc   :  { %v3221_v28 = vpop.f32.mrf.mxu0 }
 0xdcd   :  { %v3222_v21 = vadd.f32 %v3221_v28, %v10728_v49  ;;  %v11138_v28 = vld [vmem:[#allocation6 + $0x10] sm:$0xff] }
 0xdce   :  { %v7781_v35 = vpop.f32.mrf.mxu0 }
 0xdcf   :  { %v3225_v31 = vsel %vm2753_vm1, %v3222_v21, -inf  ;;  %v13142_v35 = vld [vmem:[#allocation36_spill] sm:$0xff] }
 0xdd0   :  { %3226 = vmax.xlane.f32.xlu1 %v3225_v31 }
 0xe59   :  { %v3227_v30 = vpop.xlane.xlu1 %3226 }
 0xe5a   :  { %v3228_v36 = vsub.f32 %v3222_v21, %v3227_v30  ;;  %v13143_v30 = vld [vmem:[#allocation43_spill] sm:$0xff] }
 0xe5c   :  { %v3229_v12 = vmul.f32 1.442695, %v3228_v36 }
 0xe5e   :  { %8395 = vpow2.f32 %v3229_v12 }
 0xe6b   :  { %v8396_v29 = vpop.eup %8395 }
 0xe6c   :  { %v3231_v42 = vsel %vm2753_vm1, %v8396_v29, 0.0 }
 0xe6d   :  { %3232 = vadd.xlane.f32.xlu1 %v3231_v42 }
 0xef6   :  { %v3233_v62 = vpop.xlane.xlu1 %3232 }
 0xef7   :  { %8397 = vrcp.f32 %v3233_v62 }
 0xf04   :  { %v8398_v63 = vpop.eup %8397 }
 0xf05   :  { %v3235_v39 = vmul.f32 %v8398_v63, %v8396_v29 }
 0xf07   :  { %7799 = vmatmul.mubr.msk.f32.vlgmr.msra.gmra.mxu1 %vm2753_vm1, %v3235_v39 }
 0xf08   :  { %3462 = vmatpush1.msra.mxu1 %v10445_v15  ;;  %3525 = vmatprep.mubr.f32.mxu1 %v12989_v5  ;;  %v13113_v15 = vld [vmem:[#allocation50_spill] sm:$0xff] }
 0xf09   :  { %3463 = vmatprep.subr.mxu1 %v10451_v51  ;;  %v13115_v51 = vld [vmem:[#allocation28_spill] sm:$0xff] }
 0xf0a   :  { %3464 = vmatpush1.msra.mxu1 %v10455_v59  ;;  %v13116_v59 = vld [vmem:[#allocation13_spill] sm:$0xff] }
 0xf0b   :  { %3465 = vmatprep.subr.mxu1 %v10461_v13  ;;  %v13117_v13 = vld [vmem:[#allocation17_spill] sm:$0xff] }
 0xf0c   :  { %3466 = vmatpush1.msra.mxu1 %v10465_v57  ;;  %v13118_v57 = vld [vmem:[#allocation15_spill] sm:$0xff] }
 0xf0d   :  { %3467 = vmatprep.subr.mxu1 %v10471_v58  ;;  %v13119_v58 = vld [vmem:[#allocation18_spill] sm:$0xff] }
 0xf0e   :  { %3468 = vmatpush1.msra.mxu1 %v10475_v3  ;;  %v13120_v3 = vld [vmem:[#allocation30_spill] sm:$0xff] }
 0xf0f   :  { %3469 = vmatprep.subr.mxu1 %v10481_v9  ;;  %v13121_v9 = vld [vmem:[#allocation31_spill] sm:$0xff] }
 0xf10   :  { %3470 = vmatpush1.msra.mxu1 %v10485_v4  ;;  %v13122_v4 = vld [vmem:[#allocation32_spill] sm:$0xff] }
 0xf11   :  { %3471 = vmatprep.subr.mxu1 %v10491_v10  ;;  %v13123_v10 = vld [vmem:[#allocation33_spill] sm:$0xff] }
 0xf12   :  { %3472 = vmatpush1.msra.mxu1 %v13113_v15  ;;  %v13145_v15 = vld [vmem:[#allocation44_spill] sm:$0xff] }
 0xf13   :  { %3473 = vmatprep.subr.mxu1 %v13114_v41 }
 0xf14   :  { %3474 = vmatpush1.msra.mxu1 %v13115_v51 }
 0xf15   :  { %3475 = vmatprep.subr.mxu1 %v13116_v59 }
 0xf16   :  { %3476 = vmatpush1.msra.mxu1 %v13117_v13 }
 0xf17   :  { %3477 = vmatprep.subr.mxu1 %v13118_v57 }
 0xf18   :  { %3478 = vmatpush1.msra.mxu1 %v13119_v58 }
 0xf19   :  { %3479 = vmatprep.subr.mxu1 %v13120_v3 }
 0xf1a   :  { %3480 = vmatpush1.msra.mxu1 %v13121_v9 }
 0xf1b   :  { %3481 = vmatprep.subr.mxu1 %v13122_v4 }
 0xf1c   :  { %3482 = vmatpush1.msra.mxu1 %v13123_v10 }
 0xf1d   :  { %3483 = vmatprep.subr.mxu1 %v13124_v44 }
 0xf1e   :  { %3484 = vmatpush1.msra.mxu1 %v13125_v46  ;;  %v13146_v46 = vld [vmem:[#allocation66_spill] sm:$0xff] }
 0xf1f   :  { %3485 = vmatprep.subr.mxu1 %v13126_v6 }
 0xf20   :  { %3486 = vmatpush1.msra.mxu1 %v13127_v33 }
 0xf21   :  { %3487 = vmatprep.subr.mxu1 %v13128_v20 }
 0xf22   :  { %3488 = vmatpush1.msra.mxu1 %v13129_v8 }
 0xf23   :  { %3489 = vmatprep.subr.mxu1 %v13130_v23 }
 0xf24   :  { %3490 = vmatpush1.msra.mxu1 %v13131_v61 }
 0xf25   :  { %3491 = vmatprep.subr.mxu1 %v13132_v38 }
 0xf26   :  { %3492 = vmatpush1.msra.mxu1 %v13133_v37 }
 0xf27   :  { %3526 = vmatmul.mubr.f32.vlgmr.msra.gmra.mxu1 %v10987_v26  ;;  %7836 = vmatprep.subr.mxu1 %v12989_v5 }
 0xf28   :  { %7837 = vmatpush3.xpose.msra.mxu1 %v13134_v48  ;;  %7852 = vmatprep.mubr.msk.f32.mxu1 %vm8584_vm0, %v12989_v5 }
 0xf29   :  { %7838 = vmatprep.subr.mxu1 %v12989_v5 }
 0xf2c   :  { %7839 = vmatpush3.xpose.msra.mxu1 %v13135_v2 }
 0xf2d   :  { %7840 = vmatprep.subr.mxu1 %v12989_v5 }
 0xf30   :  { %7841 = vmatpush3.xpose.msra.mxu1 %v13136_v60 }
 0xf31   :  { %7842 = vmatprep.subr.mxu1 %v12989_v5 }
 0xf34   :  { %7843 = vmatpush3.xpose.msra.mxu1 %v13137_v56 }
 0xf35   :  { %7844 = vmatprep.subr.mxu1 %v12989_v5 }
 0xf38   :  { %7845 = vmatpush3.xpose.msra.mxu1 %v13138_v43 }
 0xf39   :  { %7846 = vmatprep.subr.mxu1 %v12989_v5 }
 0xf3c   :  { %7847 = vmatpush3.xpose.msra.mxu1 %v13139_v19 }
 0xf3d   :  { %7848 = vmatprep.subr.mxu1 %v12989_v5 }
 0xf40   :  { %7849 = vmatpush3.xpose.msra.mxu1 %v13140_v27 }
 0xf41   :  { %7850 = vmatprep.subr.mxu1 %v12989_v5 }
 0xf44   :  { %7851 = vmatpush3.xpose.msra.mxu1 %v13141_v11 }
 0xfc7   :  { %v3305_v14 = vpop.f32.mrf.mxu1 }
 0xfc8   :  { %3405 = vmatprep.mubr.f32.mxu0 %v3305_v14 }
 0xfc9   :  { %v7800_v1 = vpop.f32.mrf.mxu1  ;;  %3406 = vmatmul.mubr.f32.vlgmr.msra.gmra.mxu0 %v10987_v26 }
 0xfca   :  { %7802 = vmatpush3.msra.mxu0 %v11077_v34  ;;  %7833 = vmatprep.mubr.msk.f32.mxu0 %vm8584_vm0, %v12989_v5 }
 0xfcb   :  { %7803 = vmatprep.subr.mxu0 %v12989_v5 }
 0xfcc   :  { %7804 = vmatpush3.msra.mxu0 %v11080_v45 }
 0xfcd   :  { %7805 = vmatprep.subr.mxu0 %v12989_v5 }
 0xfce   :  { %7806 = vmatpush3.msra.mxu0 %v11086_v54 }
 0xfcf   :  { %7807 = vmatprep.subr.mxu0 %v12989_v5 }
 0xfd0   :  { %7808 = vmatpush3.msra.mxu0 %v11090_v47 }
 0xfd1   :  { %7809 = vmatprep.subr.mxu0 %v12989_v5 }
 0xfd2   :  { %7810 = vmatpush3.msra.mxu0 %v11094_v17 }
 0xfd3   :  { %7811 = vmatprep.subr.mxu0 %v12989_v5 }
 0xfd4   :  { %7812 = vmatpush3.msra.mxu0 %v11098_v7 }
 0xfd5   :  { %7813 = vmatprep.subr.mxu0 %v12989_v5 }
 0xfd6   :  { %7814 = vmatpush3.msra.mxu0 %v11102_v55 }
 0xfd7   :  { %7815 = vmatprep.subr.mxu0 %v12989_v5 }
 0xfd8   :  { %7816 = vmatpush3.msra.mxu0 %v11106_v52 }
 0xfd9   :  { %7817 = vmatprep.subr.mxu0 %v12989_v5 }
 0xfda   :  { %7818 = vmatpush3.msra.mxu0 %v11110_v18 }
 0xfdb   :  { %7819 = vmatprep.subr.mxu0 %v12989_v5 }
 0xfdc   :  { %7820 = vmatpush3.msra.mxu0 %v11114_v53 }
 0xfdd   :  { %7821 = vmatprep.subr.mxu0 %v12989_v5 }
 0xfde   :  { %7822 = vmatpush3.msra.mxu0 %v11118_v50 }
 0xfdf   :  { %7823 = vmatprep.subr.mxu0 %v12989_v5 }
 0xfe0   :  { %7824 = vmatpush3.msra.mxu0 %v11122_v40 }
 0xfe1   :  { %7825 = vmatprep.subr.mxu0 %v12989_v5 }
 0xfe2   :  { %7826 = vmatpush3.msra.mxu0 %v11126_v16 }
 0xfe3   :  { %7827 = vmatprep.subr.mxu0 %v12989_v5 }
 0xfe4   :  { %7828 = vmatpush3.msra.mxu0 %v11130_v24 }
 0xfe5   :  { %7829 = vmatprep.subr.mxu0 %v12989_v5 }
 0xfe6   :  { %7830 = vmatpush3.msra.mxu0 %v11134_v22 }
 0xfe7   :  { %7831 = vmatprep.subr.mxu0 %v12989_v5  ;;  %v3527_v21 = vpop.f32.mrf.mxu1 }
 0xfe8   :  { %7832 = vmatpush3.msra.mxu0 %v11138_v28  ;;  %v3528_v31 = vadd.f32 %v3527_v21, %v13142_v35 }
 0xfe9   :  { %7834 = vmatmul.mubr.f32.vlgmr.msra.gmra.mxu0 %v10987_v26  ;;  %7855 = vmatprep.subr.mxu0 %v12989_v5  ;;  %v3529_v29 = vpop.f32.mrf.mxu1 }
 0xfea   :  { %7856 = vmatpush3.msra.mxu0 %v13134_v48  ;;  %7871 = vmatprep.mubr.msk.f32.mxu0 %vm8584_vm0, %v12989_v5  ;;  %v3605_v36 = vadd.f32 %v3528_v31, %v13143_v30  ;;  %v3530_v63 = vadd.f32 %v3529_v29, %v13109_v0  ;;  %v11180_v29 = vld [vmem:[#allocation6 + $0x170] sm:$0xff] }
 0xfeb   :  { %7857 = vmatprep.subr.mxu0 %v12989_v5 }
 0xfec   :  { %7858 = vmatpush3.msra.mxu0 %v13135_v2  ;;  %v6500_v12 = vmul.f32 -1.442695, %v3605_v36  ;;  %v3612_v41 = vadd.f32 %v3530_v63, %v13145_v15  ;;  %v11202_v63 = vld [vmem:[%s12765_s11 + $0x70] sm:$0xff]  ;;  %v11208_v15 = vld [vmem:[%s12765_s11 + $0xe8] sm:$0xff] }
 0xfed   :  { %7859 = vmatprep.subr.mxu0 %v12989_v5 }
 0xfee   :  { %7860 = vmatpush3.msra.mxu0 %v13136_v60  ;;  %8399 = vpow2.f32 %v6500_v12  ;;  %v6501_v51 = vmul.f32 -1.442695, %v3612_v41  ;;  %v11214_v41 = vld [vmem:[%s12765_s11 + $0x68] sm:$0xff] }
 0xfef   :  { %7861 = vmatprep.subr.mxu0 %v12989_v5 }
 0xff0   :  { %7862 = vmatpush3.msra.mxu0 %v13137_v56  ;;  %8401 = vpow2.f32 %v6501_v51  ;;  %v11220_v51 = vld [vmem:[%s12765_s11 + $0xe0] sm:$0xff] }
 0xff1   :  { %7863 = vmatprep.subr.mxu0 %v12989_v5 }
 0xff2   :  { %7864 = vmatpush3.msra.mxu0 %v13138_v43 }
 0xff3   :  { %7865 = vmatprep.subr.mxu0 %v12989_v5 }
 0xff4   :  { %7866 = vmatpush3.msra.mxu0 %v13139_v19 }
 0xff5   :  { %7867 = vmatprep.subr.mxu0 %v12989_v5 }
 0xff6   :  { %7868 = vmatpush3.msra.mxu0 %v13140_v27 }
 0xff7   :  { %7869 = vmatprep.subr.mxu0 %v12989_v5 }
 0xff8   :  { %7870 = vmatpush3.msra.mxu0 %v13141_v11 }
 0xff9   :  { %3932 = vmatprep.subr.mxu0 %v11180_v29 }
 0xffb   :  { %v8400_v59 = vpop.eup %8399 }
 0xffc   :  { %v3609_v13 = vadd.f32 1.0, %v8400_v59  ;;  %v11226_v59 = vld [vmem:[%s12765_s11 + $0x60] sm:$0xff] }
 0xffd   :  { %v8402_v57 = vpop.eup %8401 }
 0xffe   :  { %8403 = vrcp.f32 %v3609_v13  ;;  %v3616_v58 = vadd.f32 1.0, %v8402_v57  ;;  %v11232_v13 = vld [vmem:[%s12765_s11 + $0xd8] sm:$0xff] }
 0xfff   :  { %v11238_v57 = vld [vmem:[%s12765_s11 + $0x58] sm:$0xff] }
0x1000   :  { %8405 = vrcp.f32 %v3616_v58  ;;  %v11244_v58 = vld [vmem:[%s12765_s11 + $0xd0] sm:$0xff] }
0x100b   :  { %v8404_v4 = vpop.eup %8403 }
0x100d   :  { %v8406_v33 = vpop.eup %8405 }
0x100e   :  { %v3622_v20 = vsub.f32 1.0, %v8406_v33  ;;  %v3624_v61 = vmul.f32 %v8406_v33, %v10987_v26  ;;  %v11292_v33 = vld [vmem:[%s12765_s11 + $0xb0] sm:$0xff] }
0x1089   :  { %v6840_v42 = vpop.f32.mrf.mxu0 }
0x108b   :  { %v6841_v62 = vpop.f32.mrf.mxu0 }
0x108c   :  { %v11165_v39 = vadd.f32 %v6841_v62, %v6840_v42  ;;  %v11191_v42 = vld [vmem:[%s12765_s11 + $0x78] sm:$0xff]  ;;  %v11196_v62 = vld [vmem:[%s12765_s11 + $0xf0] sm:$0xff] }
0x108e   :  { %13144 = vst [vmem:[#allocation39_spill] sm:$0xff] %v11165_v39 }
0x10a9   :  { %v3598_v3 = vpop.f32.mrf.mxu0 }
0x10aa   :  { %v3599_v9 = vadd.f32 %v3598_v3, %v10665_v32  ;;  %v11250_v3 = vld [vmem:[%s12765_s11 + $0x50] sm:$0xff] }
0x10ab   :  { %v7835_v10 = vpop.f32.mrf.mxu0 }
0x10ac   :  { %v3619_v44 = vmul.f32 %v8404_v4, %v3599_v9  ;;  %v11256_v9 = vld [vmem:[%s12765_s11 + $0xc8] sm:$0xff]  ;;  %v11268_v10 = vld [vmem:[%s12765_s11 + $0xc0] sm:$0xff] }
0x10ad   :  { %v11262_v4 = vld [vmem:[%s12765_s11 + $0x48] sm:$0xff] }
0x10ae   :  { %v3620_v6 = vadd.f32 %v3619_v44, %v13146_v46  ;;  %v11274_v44 = vld [vmem:[%s12765_s11 + $0x40] sm:$0xff]  ;;  %v11280_v46 = vld [vmem:[%s12765_s11 + $0xb8] sm:$0xff] }
0x10b0   :  { %8407 = vtanh.f32 %v3620_v6  ;;  %v11286_v6 = vld [vmem:[%s12765_s11 + $0x38] sm:$0xff] }
0x10bd   :  { %v8408_v8 = vpop.eup %8407 }
0x10be   :  { %v3623_v23 = vmul.f32 %v8408_v8, %v3622_v20  ;;  %v11298_v20 = vld [vmem:[%s12765_s11 + $0x30] sm:$0xff]  ;;  %v11304_v8 = vld [vmem:[%s12765_s11 + $0xa8] sm:$0xff] }
0x10c0   :  { %v11171_v38 = vadd.f32 %v3624_v61, %v3623_v23  ;;  %v11310_v23 = vld [vmem:[%s12765_s11 + $0x28] sm:$0xff]  ;;  %v11316_v61 = vld [vmem:[%s12765_s11 + $0xa0] sm:$0xff] }
0x10c2   :  { %7853 = vmatmul.mubr.f32.vlgmr.msra.gmra.mxu1 %v11171_v38 }
0x1182   :  { %v3692_v37 = vpop.f32.mrf.mxu1 }
0x1183   :  { %v3693_v14 = vadd.f32 %v3692_v37, %v10728_v49  ;;  %v11186_v49 = vld [vmem:[%s12765_s11 + $0xf8] sm:$0xff]  ;;  %v11322_v37 = vld [vmem:[%s12765_s11 + $0x20] sm:$0xff] }
0x1184   :  { %v7854_v1 = vpop.f32.mrf.mxu1  ;;  %6878 = vmatprep.subr.mxu1 %v11186_v49 }
0x1185   :  { %v3696_v21 = vsel %vm2753_vm1, %v3693_v14, -inf  ;;  %6879 = vmatpush3.msra.mxu1 %v11191_v42  ;;  %v11334_v1 = vld [vmem:[%s12765_s11 + $0x18] sm:$0xff] }
0x1186   :  { %3697 = vmax.xlane.f32.xlu0 %v3696_v21  ;;  %6880 = vmatprep.subr.mxu1 %v11196_v62  ;;  %13148 = vst [vmem:[#allocation20_spill] sm:$0xff] %v11334_v1  ;;  %v11340_v21 = vld [vmem:[%s12765_s11 + $0x90] sm:$0xff] }
0x1187   :  { %6881 = vmatpush3.msra.mxu1 %v11202_v63  ;;  %13149 = vst [vmem:[#allocation40_spill] sm:$0xff] %v11340_v21 }
0x1188   :  { %6882 = vmatprep.subr.mxu1 %v11208_v15 }
0x1189   :  { %6883 = vmatpush3.msra.mxu1 %v11214_v41 }
0x118a   :  { %6884 = vmatprep.subr.mxu1 %v11220_v51 }
0x118b   :  { %6885 = vmatpush3.msra.mxu1 %v11226_v59 }
0x118c   :  { %6886 = vmatprep.subr.mxu1 %v11232_v13 }
0x118d   :  { %6887 = vmatpush3.msra.mxu1 %v11238_v57 }
0x118e   :  { %6888 = vmatprep.subr.mxu1 %v11244_v58 }
0x118f   :  { %6889 = vmatpush3.msra.mxu1 %v11250_v3 }
0x1190   :  { %6890 = vmatprep.subr.mxu1 %v11256_v9 }
0x1191   :  { %6891 = vmatpush3.msra.mxu1 %v11262_v4 }
0x1192   :  { %6892 = vmatprep.subr.mxu1 %v11268_v10 }
0x1193   :  { %6893 = vmatpush3.msra.mxu1 %v11274_v44 }
0x1194   :  { %6894 = vmatprep.subr.mxu1 %v11280_v46 }
0x1195   :  { %6895 = vmatpush3.msra.mxu1 %v11286_v6 }
0x1196   :  { %6896 = vmatprep.subr.mxu1 %v11292_v33 }
0x1197   :  { %6897 = vmatpush3.msra.mxu1 %v11298_v20 }
0x1198   :  { %6898 = vmatprep.subr.mxu1 %v11304_v8 }
0x1199   :  { %6899 = vmatpush3.msra.mxu1 %v11310_v23 }
0x119a   :  { %6900 = vmatprep.subr.mxu1 %v11316_v61 }
0x119b   :  { %6901 = vmatpush3.msra.mxu1 %v11322_v37 }
0x120f   :  { %v3698_v31 = vpop.xlane.xlu0 %3697 }
0x1210   :  { %v3699_v30 = vsub.f32 %v3693_v14, %v3698_v31  ;;  %v11328_v14 = vld [vmem:[%s12765_s11 + $0x98] sm:$0xff]  ;;  %v11346_v31 = vld [vmem:[%s12765_s11 + $0x10] sm:$0xff] }
0x1211   :  { %13147 = vst [vmem:[#allocation37_spill] sm:$0xff] %v11328_v14  ;;  %6902 = vmatprep.subr.mxu1 %v11328_v14  ;;  %13150 = vst [vmem:[#allocation38_spill] sm:$0xff] %v11346_v31  ;;  %v11372_v14 = vld [vmem:[#allocation6 + $0x158] sm:$0xff] }
0x1212   :  { %v3700_v36 = vmul.f32 1.442695, %v3699_v30  ;;  %6903 = vmatpush3.msra.mxu1 %v11334_v1  ;;  %v11352_v30 = vld [vmem:[%s12765_s11 + $0x88] sm:$0xff]  ;;  %13153 = vst [vmem:[#allocation64_spill] sm:$0xff] %v11372_v14 }
0x1213   :  { %13151 = vst [vmem:[#allocation29_spill] sm:$0xff] %v11352_v30  ;;  %6904 = vmatprep.subr.mxu1 %v11340_v21  ;;  %v11370_v1 = vld [vmem:[#allocation6 + $0x168] sm:$0xff] }
0x1214   :  { %8409 = vpow2.f32 %v3700_v36  ;;  %v11358_v36 = vld [vmem:[%s12765_s11 + $0x8] sm:$0xff]  ;;  %6905 = vmatpush3.msra.mxu1 %v11346_v31  ;;  %13152 = vst [vmem:[#allocation61_spill] sm:$0xff] %v11370_v1  ;;  %v11375_v31 = vld [vmem:[#allocation6 + $0x150] sm:$0xff] }
0x1215   :  { %6906 = vmatprep.subr.mxu1 %v11352_v30  ;;  %13154 = vst [vmem:[#allocation25_spill] sm:$0xff] %v11375_v31  ;;  %v11378_v30 = vld [vmem:[#allocation6 + $0x140] sm:$0xff] }
0x1216   :  { %6907 = vmatpush3.msra.mxu1 %v11358_v36  ;;  %13155 = vst [vmem:[#allocation26_spill] sm:$0xff] %v11378_v30 }
0x1221   :  { %v11176_v12 = vpop.eup %8409 }
0x1222   :  { %v3702_v26 = vsel %vm2753_vm1, %v11176_v12, 0.0 }
0x1223   :  { %3703 = vadd.xlane.f32.xlu1 %v3702_v26  ;;  %v11364_v26 = vld [vmem:[%s12765_s11 + $0x80] sm:$0xff] }
0x1224   :  { %6908 = vmatprep.subr.mxu1 %v11364_v26 }
0x12ac   :  { %v3704_v39 = vpop.xlane.xlu1 %3703 }
0x12ad   :  { %8411 = vrcp.f32 %v3704_v39  ;;  %v11382_v39 = vld [vmem:[#allocation6 + $0x138] sm:$0xff] }
0x12ae   :  { %13156 = vst [vmem:[#allocation12_spill] sm:$0xff] %v11382_v39 }
0x12ba   :  { %v8412_v25 = vpop.eup %8411 }
0x12bb   :  { %v3706_v21 = vmul.f32 %v8412_v25, %v11176_v12  ;;  %v11385_v25 = vld [vmem:[#allocation6 + $0x128] sm:$0xff]  ;;  %v11388_v12 = vld [vmem:[#allocation6 + $0x120] sm:$0xff] }
0x12bc   :  { %13157 = vst [vmem:[#allocation56_spill] sm:$0xff] %v11385_v25  ;;  %13158 = vst [vmem:[#allocation14_spill] sm:$0xff] %v11388_v12 }
0x12bd   :  { %7872 = vmatmul.mubr.msk.f32.vlgmr.msra.gmra.mxu0 %vm2753_vm1, %v3706_v21  ;;  %v11391_v21 = vld [vmem:[#allocation6 + $0x110] sm:$0xff] }
0x12be   :  { %3933 = vmatpush1.msra.mxu0 %v11370_v1  ;;  %3996 = vmatprep.mubr.f32.mxu0 %v12989_v5  ;;  %13159 = vst [vmem:[#allocation60_spill] sm:$0xff] %v11391_v21  ;;  %v11394_v1 = vld [vmem:[#allocation6 + $0x108] sm:$0xff] }
0x12bf   :  { %3934 = vmatprep.subr.mxu0 %v11372_v14  ;;  %13160 = vst [vmem:[#allocation54_spill] sm:$0xff] %v11394_v1  ;;  %v11397_v14 = vld [vmem:[#allocation6 + $0xf8] sm:$0xff] }
0x12c0   :  { %3935 = vmatpush1.msra.mxu0 %v11375_v31  ;;  %13161 = vst [vmem:[#allocation62_spill] sm:$0xff] %v11397_v14  ;;  %v11400_v31 = vld [vmem:[#allocation6 + $0xf0] sm:$0xff] }
0x12c1   :  { %3936 = vmatprep.subr.mxu0 %v11378_v30  ;;  %13162 = vst [vmem:[#allocation74_spill] sm:$0xff] %v11400_v31  ;;  %v11403_v30 = vld [vmem:[#allocation6 + $0xe0] sm:$0xff] }
0x12c2   :  { %3937 = vmatpush1.msra.mxu0 %v11382_v39  ;;  %13163 = vst [vmem:[#allocation77_spill] sm:$0xff] %v11403_v30  ;;  %v11406_v39 = vld [vmem:[#allocation6 + $0xd8] sm:$0xff] }
0x12c3   :  { %3938 = vmatprep.subr.mxu0 %v11385_v25  ;;  %13164 = vst [vmem:[#allocation80_spill] sm:$0xff] %v11406_v39  ;;  %v11409_v25 = vld [vmem:[#allocation6 + $0xc8] sm:$0xff] }
0x12c4   :  { %3939 = vmatpush1.msra.mxu0 %v11388_v12  ;;  %13165 = vst [vmem:[#allocation83_spill] sm:$0xff] %v11409_v25  ;;  %v11412_v12 = vld [vmem:[#allocation6 + $0xc0] sm:$0xff] }
0x12c5   :  { %3940 = vmatprep.subr.mxu0 %v11391_v21  ;;  %13166 = vst [vmem:[#allocation86_spill] sm:$0xff] %v11412_v12  ;;  %v11415_v21 = vld [vmem:[#allocation6 + $0xb0] sm:$0xff] }
0x12c6   :  { %3941 = vmatpush1.msra.mxu0 %v11394_v1  ;;  %13167 = vst [vmem:[#allocation52_spill] sm:$0xff] %v11415_v21  ;;  %v11418_v1 = vld [vmem:[#allocation6 + $0xa8] sm:$0xff] }
0x12c7   :  { %3942 = vmatprep.subr.mxu0 %v11397_v14  ;;  %13168 = vst [vmem:[#allocation41_spill] sm:$0xff] %v11418_v1  ;;  %v11421_v14 = vld [vmem:[#allocation6 + $0x98] sm:$0xff] }
0x12c8   :  { %3943 = vmatpush1.msra.mxu0 %v11400_v31  ;;  %13169 = vst [vmem:[#allocation58_spill] sm:$0xff] %v11421_v14  ;;  %v11424_v31 = vld [vmem:[#allocation6 + $0x90] sm:$0xff] }
0x12c9   :  { %3944 = vmatprep.subr.mxu0 %v11403_v30  ;;  %13170 = vst [vmem:[#allocation42_spill] sm:$0xff] %v11424_v31  ;;  %v11427_v30 = vld [vmem:[#allocation6 + $0x80] sm:$0xff] }
0x12ca   :  { %3945 = vmatpush1.msra.mxu0 %v11406_v39  ;;  %13171 = vst [vmem:[#allocation63_spill] sm:$0xff] %v11427_v30  ;;  %v11430_v39 = vld [vmem:[#allocation6 + $0x78] sm:$0xff] }
0x12cb   :  { %3946 = vmatprep.subr.mxu0 %v11409_v25  ;;  %13172 = vst [vmem:[#allocation50_spill] sm:$0xff] %v11430_v39  ;;  %v11433_v25 = vld [vmem:[#allocation6 + $0x68] sm:$0xff] }
0x12cc   :  { %3947 = vmatpush1.msra.mxu0 %v11412_v12  ;;  %13173 = vst [vmem:[#allocation27_spill] sm:$0xff] %v11433_v25  ;;  %v11436_v12 = vld [vmem:[#allocation6 + $0x60] sm:$0xff] }
0x12cd   :  { %3948 = vmatprep.subr.mxu0 %v11415_v21  ;;  %13174 = vst [vmem:[#allocation28_spill] sm:$0xff] %v11436_v12  ;;  %v11439_v21 = vld [vmem:[#allocation6 + $0x50] sm:$0xff] }
0x12ce   :  { %3949 = vmatpush1.msra.mxu0 %v11418_v1  ;;  %v11442_v1 = vld [vmem:[#allocation6 + $0x48] sm:$0xff] }
0x12cf   :  { %3950 = vmatprep.subr.mxu0 %v11421_v14  ;;  %v11445_v14 = vld [vmem:[#allocation6 + $0x38] sm:$0xff] }
0x12d0   :  { %3951 = vmatpush1.msra.mxu0 %v11424_v31  ;;  %v11448_v31 = vld [vmem:[#allocation6 + $0x30] sm:$0xff] }
0x12d1   :  { %3952 = vmatprep.subr.mxu0 %v11427_v30  ;;  %v11451_v30 = vld [vmem:[#allocation6 + $0x20] sm:$0xff] }
0x12d2   :  { %3953 = vmatpush1.msra.mxu0 %v11430_v39  ;;  %v11454_v39 = vld [vmem:[#allocation6 + $0x18] sm:$0xff] }
0x12d3   :  { %3954 = vmatprep.subr.mxu0 %v11433_v25  ;;  %13175 = vst [vmem:[#allocation13_spill] sm:$0xff] %v11454_v39  ;;  %v11457_v25 = vld [vmem:[#allocation6 + $0x8] sm:$0xff] }
0x12d4   :  { %3955 = vmatpush1.msra.mxu0 %v11436_v12  ;;  %13176 = vst [vmem:[#allocation17_spill] sm:$0xff] %v11457_v25  ;;  %v11460_v12 = vld [vmem:[#allocation6] sm:$0xff] }
0x12d5   :  { %3956 = vmatprep.subr.mxu0 %v11439_v21  ;;  %13177 = vst [vmem:[#allocation15_spill] sm:$0xff] %v11460_v12 }
0x12d6   :  { %3957 = vmatpush1.msra.mxu0 %v11442_v1 }
0x12d7   :  { %3958 = vmatprep.subr.mxu0 %v11445_v14 }
0x12d8   :  { %3959 = vmatpush1.msra.mxu0 %v11448_v31 }
0x12d9   :  { %3960 = vmatprep.subr.mxu0 %v11451_v30 }
0x12da   :  { %3961 = vmatpush1.msra.mxu0 %v11454_v39 }
0x12db   :  { %3962 = vmatprep.subr.mxu0 %v11457_v25 }
0x12dc   :  { %3963 = vmatpush1.msra.mxu0 %v11460_v12  ;;  %v11488_v12 = vld [vmem:[%s12765_s11] sm:$0xff] }
0x12dd   :  { %3997 = vmatmul.mubr.f32.vlgmr.msra.gmra.mxu0 %v11171_v38  ;;  %7909 = vmatprep.subr.mxu0 %v12989_v5 }
0x12de   :  { %7910 = vmatpush3.xpose.msra.mxu0 %v13134_v48  ;;  %7925 = vmatprep.mubr.msk.f32.mxu0 %vm8584_vm0, %v12989_v5 }
0x12df   :  { %7911 = vmatprep.subr.mxu0 %v12989_v5  ;;  %6909 = vmatpush3.msra.mxu1 %v11488_v12 }
0x12e0   :  { %7874 = vmatprep.subr.mxu1 %v12989_v5 }
0x12e2   :  { %7912 = vmatpush3.xpose.msra.mxu0 %v13135_v2 }
0x12e3   :  { %7913 = vmatprep.subr.mxu0 %v12989_v5 }
0x12e6   :  { %7914 = vmatpush3.xpose.msra.mxu0 %v13136_v60 }
0x12e7   :  { %7915 = vmatprep.subr.mxu0 %v12989_v5 }
0x12ea   :  { %7916 = vmatpush3.xpose.msra.mxu0 %v13137_v56 }
0x12eb   :  { %7917 = vmatprep.subr.mxu0 %v12989_v5 }
0x12ee   :  { %7918 = vmatpush3.xpose.msra.mxu0 %v13138_v43 }
0x12ef   :  { %7919 = vmatprep.subr.mxu0 %v12989_v5 }
0x12f2   :  { %7920 = vmatpush3.xpose.msra.mxu0 %v13139_v19 }
0x12f3   :  { %7921 = vmatprep.subr.mxu0 %v12989_v5 }
0x12f6   :  { %7922 = vmatpush3.xpose.msra.mxu0 %v13140_v27 }
0x12f7   :  { %7923 = vmatprep.subr.mxu0 %v12989_v5 }
0x12fa   :  { %7924 = vmatpush3.xpose.msra.mxu0 %v13141_v11 }
0x12fb   :  { %6948 = vmatprep.subr.mxu0 %v11186_v49 }
0x137d   :  { %v3776_v25 = vpop.f32.mrf.mxu0 }
0x137e   :  { %3876 = vmatprep.mubr.f32.mxu1 %v3776_v25 }
0x137f   :  { %v7873_v39 = vpop.f32.mrf.mxu0  ;;  %3877 = vmatmul.mubr.f32.vlgmr.msra.gmra.mxu1 %v11171_v38 }
0x1380   :  { %7875 = vmatpush3.msra.mxu1 %v11077_v34  ;;  %7906 = vmatprep.mubr.msk.f32.mxu1 %vm8584_vm0, %v12989_v5 }
0x1381   :  { %7876 = vmatprep.subr.mxu1 %v12989_v5 }
0x1382   :  { %7877 = vmatpush3.msra.mxu1 %v11080_v45 }
0x1383   :  { %7878 = vmatprep.subr.mxu1 %v12989_v5 }
0x1384   :  { %7879 = vmatpush3.msra.mxu1 %v11086_v54  ;;  %v13178_v54 = vld [vmem:[#allocation45_spill] sm:$0xff] }
0x1385   :  { %7880 = vmatprep.subr.mxu1 %v12989_v5 }
0x1386   :  { %7881 = vmatpush3.msra.mxu1 %v11090_v47 }
0x1387   :  { %7882 = vmatprep.subr.mxu1 %v12989_v5 }
0x1388   :  { %7883 = vmatpush3.msra.mxu1 %v11094_v17 }
0x1389   :  { %7884 = vmatprep.subr.mxu1 %v12989_v5 }
0x138a   :  { %7885 = vmatpush3.msra.mxu1 %v11098_v7 }
0x138b   :  { %7886 = vmatprep.subr.mxu1 %v12989_v5 }
0x138c   :  { %7887 = vmatpush3.msra.mxu1 %v11102_v55 }
0x138d   :  { %7888 = vmatprep.subr.mxu1 %v12989_v5 }
0x138e   :  { %7889 = vmatpush3.msra.mxu1 %v11106_v52 }
0x138f   :  { %7890 = vmatprep.subr.mxu1 %v12989_v5 }
0x1390   :  { %7891 = vmatpush3.msra.mxu1 %v11110_v18 }
0x1391   :  { %7892 = vmatprep.subr.mxu1 %v12989_v5 }
0x1392   :  { %7893 = vmatpush3.msra.mxu1 %v11114_v53 }
0x1393   :  { %7894 = vmatprep.subr.mxu1 %v12989_v5 }
0x1394   :  { %7895 = vmatpush3.msra.mxu1 %v11118_v50  ;;  %v13180_v50 = vld [vmem:[#allocation46_spill] sm:$0xff] }
0x1395   :  { %7896 = vmatprep.subr.mxu1 %v12989_v5 }
0x1396   :  { %7897 = vmatpush3.msra.mxu1 %v11122_v40 }
0x1397   :  { %7898 = vmatprep.subr.mxu1 %v12989_v5 }
0x1398   :  { %7899 = vmatpush3.msra.mxu1 %v11126_v16 }
0x1399   :  { %7900 = vmatprep.subr.mxu1 %v12989_v5 }
0x139a   :  { %7901 = vmatpush3.msra.mxu1 %v11130_v24 }
0x139b   :  { %7902 = vmatprep.subr.mxu1 %v12989_v5 }
0x139c   :  { %7903 = vmatpush3.msra.mxu1 %v11134_v22 }
0x139d   :  { %7904 = vmatprep.subr.mxu1 %v12989_v5  ;;  %v3998_v34 = vpop.f32.mrf.mxu0 }
0x139e   :  { %7905 = vmatpush3.msra.mxu1 %v11138_v28  ;;  %v3999_v45 = vadd.f32 %v3998_v34, %v13142_v35 }
0x139f   :  { %7907 = vmatmul.mubr.f32.vlgmr.msra.gmra.mxu1 %v11171_v38  ;;  %7928 = vmatprep.subr.mxu1 %v12989_v5  ;;  %v4000_v7 = vpop.f32.mrf.mxu0 }
0x13a0   :  { %7929 = vmatpush3.msra.mxu1 %v13134_v48  ;;  %7944 = vmatprep.mubr.msk.f32.mxu1 %vm8584_vm0, %v12989_v5  ;;  %v4076_v47 = vadd.f32 %v3999_v45, %v13178_v54  ;;  %v4001_v18 = vadd.f32 %v4000_v7, %v13109_v0  ;;  %v13181_v54 = vld [vmem:[#allocation65_spill] sm:$0xff] }
0x13a1   :  { %7930 = vmatprep.subr.mxu1 %v12989_v5 }
0x13a2   :  { %7931 = vmatpush3.msra.mxu1 %v13135_v2  ;;  %v6503_v17 = vmul.f32 -1.442695, %v4076_v47  ;;  %v4083_v40 = vadd.f32 %v4001_v18, %v13180_v50 }
0x13a3   :  { %7932 = vmatprep.subr.mxu1 %v12989_v5 }
0x13a4   :  { %7933 = vmatpush3.msra.mxu1 %v13136_v60  ;;  %8413 = vpow2.f32 %v6503_v17  ;;  %v6504_v16 = vmul.f32 -1.442695, %v4083_v40  ;;  %v13197_v40 = vld [vmem:[#allocation62_spill] sm:$0xff] }
0x13a5   :  { %7934 = vmatprep.subr.mxu1 %v12989_v5 }
0x13a6   :  { %7935 = vmatpush3.msra.mxu1 %v13137_v56  ;;  %8415 = vpow2.f32 %v6504_v16  ;;  %v13198_v16 = vld [vmem:[#allocation74_spill] sm:$0xff] }
0x13a7   :  { %7936 = vmatprep.subr.mxu1 %v12989_v5 }
0x13a8   :  { %7937 = vmatpush3.msra.mxu1 %v13138_v43 }
0x13a9   :  { %7938 = vmatprep.subr.mxu1 %v12989_v5 }
0x13aa   :  { %7939 = vmatpush3.msra.mxu1 %v13139_v19 }
0x13ab   :  { %7940 = vmatprep.subr.mxu1 %v12989_v5 }
0x13ac   :  { %7941 = vmatpush3.msra.mxu1 %v13140_v27 }
0x13ad   :  { %7942 = vmatprep.subr.mxu1 %v12989_v5 }
0x13ae   :  { %7943 = vmatpush3.msra.mxu1 %v13141_v11 }
0x13af   :  { %4403 = vmatprep.subr.mxu1 %v11180_v29 }
0x13b1   :  { %v8414_v24 = vpop.eup %8413 }
0x13b2   :  { %v4080_v22 = vadd.f32 1.0, %v8414_v24  ;;  %v13199_v24 = vld [vmem:[#allocation77_spill] sm:$0xff] }
0x13b3   :  { %v8416_v28 = vpop.eup %8415 }
0x13b4   :  { %8417 = vrcp.f32 %v4080_v22  ;;  %v4087_v29 = vadd.f32 1.0, %v8416_v28  ;;  %v13200_v22 = vld [vmem:[#allocation80_spill] sm:$0xff]  ;;  %v13201_v28 = vld [vmem:[#allocation83_spill] sm:$0xff] }
0x13b6   :  { %8419 = vrcp.f32 %v4087_v29  ;;  %v13202_v29 = vld [vmem:[#allocation86_spill] sm:$0xff] }
0x13c1   :  { %v8418_v25 = vpop.eup %8417 }
0x13c3   :  { %v8420_v17 = vpop.eup %8419 }
0x13c4   :  { %v4093_v7 = vsub.f32 1.0, %v8420_v17  ;;  %v4095_v18 = vmul.f32 %v8420_v17, %v11171_v38  ;;  %v13182_v38 = vld [vmem:[#allocation37_spill] sm:$0xff]  ;;  %v13210_v17 = vld [vmem:[#allocation28_spill] sm:$0xff] }
0x143f   :  { %v6910_v55 = vpop.f32.mrf.mxu1 }
0x1441   :  { %v6911_v52 = vpop.f32.mrf.mxu1 }
0x1442   :  { %v11549_v53 = vadd.f32 %v6911_v52, %v6910_v55 }
0x1444   :  { %13179 = vst [vmem:[#allocation18_spill] sm:$0xff] %v11549_v53 }
0x145f   :  { %v4069_v49 = vpop.f32.mrf.mxu1 }
0x1460   :  { %v4070_v39 = vadd.f32 %v4069_v49, %v10665_v32  ;;  %v13203_v49 = vld [vmem:[#allocation52_spill] sm:$0xff] }
0x1461   :  { %v7908_v34 = vpop.f32.mrf.mxu1 }
0x1462   :  { %v4090_v45 = vmul.f32 %v8418_v25, %v4070_v39  ;;  %v13204_v39 = vld [vmem:[#allocation41_spill] sm:$0xff]  ;;  %v13205_v25 = vld [vmem:[#allocation58_spill] sm:$0xff] }
0x1463   :  { %v13206_v34 = vld [vmem:[#allocation42_spill] sm:$0xff] }
0x1464   :  { %v4091_v47 = vadd.f32 %v4090_v45, %v13181_v54  ;;  %v13207_v45 = vld [vmem:[#allocation63_spill] sm:$0xff]  ;;  %v13208_v54 = vld [vmem:[#allocation50_spill] sm:$0xff] }
0x1466   :  { %8421 = vtanh.f32 %v4091_v47  ;;  %v13209_v47 = vld [vmem:[#allocation27_spill] sm:$0xff] }
0x1473   :  { %v8422_v55 = vpop.eup %8421 }
0x1474   :  { %v4094_v52 = vmul.f32 %v8422_v55, %v4093_v7  ;;  %v13211_v7 = vld [vmem:[#allocation13_spill] sm:$0xff] }
0x1475   :  { %v13212_v55 = vld [vmem:[#allocation17_spill] sm:$0xff] }
0x1476   :  { %v11555_v50 = vadd.f32 %v4095_v18, %v4094_v52  ;;  %v13213_v52 = vld [vmem:[#allocation15_spill] sm:$0xff]  ;;  %v11663_v18 = vld [vmem:[#allocation6 + $0x130] sm:$0xff] }
0x1478   :  { %7926 = vmatmul.mubr.f32.vlgmr.msra.gmra.mxu0 %v11555_v50 }
0x1479   :  { %6949 = vmatpush3.msra.mxu0 %v11191_v42  ;;  %v13183_v42 = vld [vmem:[#allocation20_spill] sm:$0xff] }
0x147a   :  { %6950 = vmatprep.subr.mxu0 %v11196_v62  ;;  %v13184_v62 = vld [vmem:[#allocation40_spill] sm:$0xff] }
0x147b   :  { %6951 = vmatpush3.msra.mxu0 %v11202_v63  ;;  %v13185_v63 = vld [vmem:[#allocation38_spill] sm:$0xff] }
0x147c   :  { %6952 = vmatprep.subr.mxu0 %v11208_v15  ;;  %v13186_v15 = vld [vmem:[#allocation29_spill] sm:$0xff] }
0x147d   :  { %6953 = vmatpush3.msra.mxu0 %v11214_v41 }
0x147e   :  { %6954 = vmatprep.subr.mxu0 %v11220_v51  ;;  %v11593_v51 = vld [vmem:[%s12756_s2] sm:$0xff] }
0x147f   :  { %6955 = vmatpush3.msra.mxu0 %v11226_v59  ;;  %13187 = vst [vmem:[#allocation30_spill] sm:$0xff] %v11593_v51 }
0x1480   :  { %6956 = vmatprep.subr.mxu0 %v11232_v13 }
0x1481   :  { %6957 = vmatpush3.msra.mxu0 %v11238_v57 }
0x1482   :  { %6958 = vmatprep.subr.mxu0 %v11244_v58 }
0x1483   :  { %6959 = vmatpush3.msra.mxu0 %v11250_v3 }
0x1484   :  { %6960 = vmatprep.subr.mxu0 %v11256_v9 }
0x1485   :  { %6961 = vmatpush3.msra.mxu0 %v11262_v4 }
0x1486   :  { %6962 = vmatprep.subr.mxu0 %v11268_v10 }
0x1487   :  { %6963 = vmatpush3.msra.mxu0 %v11274_v44 }
0x1488   :  { %6964 = vmatprep.subr.mxu0 %v11280_v46 }
0x1489   :  { %6965 = vmatpush3.msra.mxu0 %v11286_v6 }
0x148a   :  { %6966 = vmatprep.subr.mxu0 %v11292_v33  ;;  %v13188_v33 = vld [vmem:[#allocation61_spill] sm:$0xff] }
0x148b   :  { %6967 = vmatpush3.msra.mxu0 %v11298_v20  ;;  %v13189_v20 = vld [vmem:[#allocation64_spill] sm:$0xff] }
0x148c   :  { %6968 = vmatprep.subr.mxu0 %v11304_v8  ;;  %v13190_v8 = vld [vmem:[#allocation25_spill] sm:$0xff] }
0x148d   :  { %6969 = vmatpush3.msra.mxu0 %v11310_v23  ;;  %v13191_v23 = vld [vmem:[#allocation26_spill] sm:$0xff] }
0x148e   :  { %6970 = vmatprep.subr.mxu0 %v11316_v61  ;;  %v13192_v61 = vld [vmem:[#allocation12_spill] sm:$0xff] }
0x148f   :  { %6971 = vmatpush3.msra.mxu0 %v11322_v37  ;;  %v13193_v37 = vld [vmem:[#allocation56_spill] sm:$0xff] }
0x1490   :  { %6972 = vmatprep.subr.mxu0 %v13182_v38  ;;  %v11667_v38 = vld [vmem:[#allocation6 + $0x118] sm:$0xff] }
0x1491   :  { %6973 = vmatpush3.msra.mxu0 %v13183_v42  ;;  %v11671_v42 = vld [vmem:[#allocation6 + $0x100] sm:$0xff] }
0x1492   :  { %6974 = vmatprep.subr.mxu0 %v13184_v62  ;;  %v11675_v62 = vld [vmem:[#allocation6 + $0xe8] sm:$0xff] }
0x1493   :  { %6975 = vmatpush3.msra.mxu0 %v13185_v63  ;;  %v11679_v63 = vld [vmem:[#allocation6 + $0xd0] sm:$0xff] }
0x1494   :  { %6976 = vmatprep.subr.mxu0 %v13186_v15  ;;  %v11683_v15 = vld [vmem:[#allocation6 + $0xb8] sm:$0xff] }
0x1495   :  { %6977 = vmatpush3.msra.mxu0 %v11358_v36  ;;  %v13194_v36 = vld [vmem:[#allocation14_spill] sm:$0xff] }
0x1496   :  { %6978 = vmatprep.subr.mxu0 %v11364_v26  ;;  %v13195_v26 = vld [vmem:[#allocation60_spill] sm:$0xff] }
0x1497   :  { %6979 = vmatpush3.msra.mxu0 %v11488_v12  ;;  %v13196_v12 = vld [vmem:[#allocation54_spill] sm:$0xff] }
0x1498   :  { %7947 = vmatprep.subr.mxu0 %v12989_v5 }
0x1538   :  { %v4163_v41 = vpop.f32.mrf.mxu0 }
0x1539   :  { %v4164_v59 = vadd.f32 %v11593_v51, %v4163_v41  ;;  %v11687_v41 = vld [vmem:[#allocation6 + $0xa0] sm:$0xff] }
0x153a   :  { %v7927_v13 = vpop.f32.mrf.mxu0 }
0x153b   :  { %v4167_v57 = vsel %vm2753_vm1, %v4164_v59, -inf  ;;  %v11695_v13 = vld [vmem:[#allocation6 + $0x70] sm:$0xff] }
0x153c   :  { %4168 = vmax.xlane.f32.xlu0 %v4167_v57  ;;  %v11699_v57 = vld [vmem:[#allocation6 + $0x58] sm:$0xff] }
0x15c5   :  { %v4169_v58 = vpop.xlane.xlu0 %4168 }
0x15c6   :  { %v4170_v3 = vsub.f32 %v4164_v59, %v4169_v58  ;;  %v11691_v59 = vld [vmem:[#allocation6 + $0x88] sm:$0xff]  ;;  %v11703_v58 = vld [vmem:[#allocation6 + $0x40] sm:$0xff] }
0x15c8   :  { %v4171_v9 = vmul.f32 1.442695, %v4170_v3  ;;  %v11707_v3 = vld [vmem:[#allocation6 + $0x28] sm:$0xff] }
0x15ca   :  { %8423 = vpow2.f32 %v4171_v9  ;;  %v11711_v9 = vld [vmem:[#allocation6 + $0x10] sm:$0xff] }
0x15d7   :  { %v8424_v4 = vpop.eup %8423 }
0x15d8   :  { %v4173_v10 = vsel %vm2753_vm1, %v8424_v4, 0.0 }
0x15d9   :  { %4174 = vadd.xlane.f32.xlu1 %v4173_v10 }
0x1662   :  { %v4175_v44 = vpop.xlane.xlu1 %4174 }
0x1663   :  { %8425 = vrcp.f32 %v4175_v44  ;;  %v13214_v44 = vld [vmem:[#allocation47_spill] sm:$0xff] }
0x1670   :  { %v8426_v46 = vpop.eup %8425 }
0x1671   :  { %v4177_v6 = vmul.f32 %v8426_v46, %v8424_v4 }
0x1673   :  { %7945 = vmatmul.mubr.msk.f32.vlgmr.msra.gmra.mxu1 %vm2753_vm1, %v4177_v6 }
0x1674   :  { %4404 = vmatpush1.msra.mxu1 %v13188_v33  ;;  %4467 = vmatprep.mubr.f32.mxu1 %v12989_v5 }
0x1675   :  { %4405 = vmatprep.subr.mxu1 %v13189_v20 }
0x1676   :  { %4406 = vmatpush1.msra.mxu1 %v13190_v8 }
0x1677   :  { %4407 = vmatprep.subr.mxu1 %v13191_v23 }
0x1678   :  { %4408 = vmatpush1.msra.mxu1 %v13192_v61 }
0x1679   :  { %4409 = vmatprep.subr.mxu1 %v13193_v37  ;;  %v13216_v37 = vld [vmem:[#allocation48_spill] sm:$0xff] }
0x167a   :  { %4410 = vmatpush1.msra.mxu1 %v13194_v36 }
0x167b   :  { %4411 = vmatprep.subr.mxu1 %v13195_v26 }
0x167c   :  { %4412 = vmatpush1.msra.mxu1 %v13196_v12 }
0x167d   :  { %4413 = vmatprep.subr.mxu1 %v13197_v40 }
0x167e   :  { %4414 = vmatpush1.msra.mxu1 %v13198_v16 }
0x167f   :  { %4415 = vmatprep.subr.mxu1 %v13199_v24 }
0x1680   :  { %4416 = vmatpush1.msra.mxu1 %v13200_v22 }
0x1681   :  { %4417 = vmatprep.subr.mxu1 %v13201_v28 }
0x1682   :  { %4418 = vmatpush1.msra.mxu1 %v13202_v29 }
0x1683   :  { %4419 = vmatprep.subr.mxu1 %v13203_v49 }
0x1684   :  { %4420 = vmatpush1.msra.mxu1 %v13204_v39 }
0x1685   :  { %4421 = vmatprep.subr.mxu1 %v13205_v25  ;;  %v13217_v25 = vld [vmem:[#allocation68_spill] sm:$0xff] }
0x1686   :  { %4422 = vmatpush1.msra.mxu1 %v13206_v34 }
0x1687   :  { %4423 = vmatprep.subr.mxu1 %v13207_v45 }
0x1688   :  { %4424 = vmatpush1.msra.mxu1 %v13208_v54 }
0x1689   :  { %4425 = vmatprep.subr.mxu1 %v13209_v47 }
0x168a   :  { %4426 = vmatpush1.msra.mxu1 %v13210_v17 }
0x168b   :  { %4427 = vmatprep.subr.mxu1 %v11439_v21  ;;  %v11659_v21 = vld [vmem:[#allocation6 + $0x148] sm:$0xff] }
0x168c   :  { %4428 = vmatpush1.msra.mxu1 %v11442_v1  ;;  %v11650_v1 = vld [vmem:[#allocation6 + $0x178] sm:$0xff] }
0x168d   :  { %4429 = vmatprep.subr.mxu1 %v11445_v14 }
0x168e   :  { %4430 = vmatpush1.msra.mxu1 %v11448_v31 }
0x168f   :  { %4431 = vmatprep.subr.mxu1 %v11451_v30  ;;  %v11653_v30 = vld [vmem:[#allocation6 + $0x160] sm:$0xff] }
0x1690   :  { %4432 = vmatpush1.msra.mxu1 %v13211_v7 }
0x1691   :  { %4433 = vmatprep.subr.mxu1 %v13212_v55 }
0x1692   :  { %4434 = vmatpush1.msra.mxu1 %v13213_v52 }
0x1693   :  { %4468 = vmatmul.mubr.f32.vlgmr.msra.gmra.mxu1 %v11555_v50  ;;  %7982 = vmatprep.subr.mxu1 %v12989_v5 }
0x1694   :  { %7983 = vmatpush3.xpose.msra.mxu1 %v13134_v48  ;;  %7998 = vmatprep.mubr.msk.f32.mxu1 %vm8584_vm0, %v12989_v5 }
0x1695   :  { %7984 = vmatprep.subr.mxu1 %v12989_v5 }
0x1698   :  { %7985 = vmatpush3.xpose.msra.mxu1 %v13135_v2 }
0x1699   :  { %7986 = vmatprep.subr.mxu1 %v12989_v5 }
0x169c   :  { %7987 = vmatpush3.xpose.msra.mxu1 %v13136_v60 }
0x169d   :  { %7988 = vmatprep.subr.mxu1 %v12989_v5 }
0x16a0   :  { %7989 = vmatpush3.xpose.msra.mxu1 %v13137_v56 }
0x16a1   :  { %7990 = vmatprep.subr.mxu1 %v12989_v5 }
0x16a4   :  { %7991 = vmatpush3.xpose.msra.mxu1 %v13138_v43 }
0x16a5   :  { %7992 = vmatprep.subr.mxu1 %v12989_v5 }
0x16a8   :  { %7993 = vmatpush3.xpose.msra.mxu1 %v13139_v19 }
0x16a9   :  { %7994 = vmatprep.subr.mxu1 %v12989_v5 }
0x16ac   :  { %7995 = vmatpush3.xpose.msra.mxu1 %v13140_v27 }
0x16ad   :  { %7996 = vmatprep.subr.mxu1 %v12989_v5 }
0x16b0   :  { %7997 = vmatpush3.xpose.msra.mxu1 %v13141_v11 }
0x1733   :  { %v4247_v14 = vpop.f32.mrf.mxu1 }
0x1734   :  { %4347 = vmatprep.mubr.f32.mxu0 %v4247_v14 }
0x1735   :  { %v7946_v31 = vpop.f32.mrf.mxu1  ;;  %4348 = vmatmul.mubr.f32.vlgmr.msra.gmra.mxu0 %v11555_v50 }
0x1736   :  { %7948 = vmatpush3.msra.mxu0 %v11650_v1  ;;  %7979 = vmatprep.mubr.msk.f32.mxu0 %vm8584_vm0, %v12989_v5 }
0x1737   :  { %7949 = vmatprep.subr.mxu0 %v12989_v5 }
0x1738   :  { %7950 = vmatpush3.msra.mxu0 %v11653_v30 }
0x1739   :  { %7951 = vmatprep.subr.mxu0 %v12989_v5 }
0x173a   :  { %7952 = vmatpush3.msra.mxu0 %v11659_v21 }
0x173b   :  { %7953 = vmatprep.subr.mxu0 %v12989_v5 }
0x173c   :  { %7954 = vmatpush3.msra.mxu0 %v11663_v18 }
0x173d   :  { %7955 = vmatprep.subr.mxu0 %v12989_v5 }
0x173e   :  { %7956 = vmatpush3.msra.mxu0 %v11667_v38 }
0x173f   :  { %7957 = vmatprep.subr.mxu0 %v12989_v5 }
0x1740   :  { %7958 = vmatpush3.msra.mxu0 %v11671_v42 }
0x1741   :  { %7959 = vmatprep.subr.mxu0 %v12989_v5 }
0x1742   :  { %7960 = vmatpush3.msra.mxu0 %v11675_v62 }
0x1743   :  { %7961 = vmatprep.subr.mxu0 %v12989_v5 }
0x1744   :  { %7962 = vmatpush3.msra.mxu0 %v11679_v63 }
0x1745   :  { %7963 = vmatprep.subr.mxu0 %v12989_v5 }
0x1746   :  { %7964 = vmatpush3.msra.mxu0 %v11683_v15 }
0x1747   :  { %7965 = vmatprep.subr.mxu0 %v12989_v5 }
0x1748   :  { %7966 = vmatpush3.msra.mxu0 %v11687_v41 }
0x1749   :  { %7967 = vmatprep.subr.mxu0 %v12989_v5 }
0x174a   :  { %7968 = vmatpush3.msra.mxu0 %v11691_v59 }
0x174b   :  { %7969 = vmatprep.subr.mxu0 %v12989_v5 }
0x174c   :  { %7970 = vmatpush3.msra.mxu0 %v11695_v13 }
0x174d   :  { %7971 = vmatprep.subr.mxu0 %v12989_v5 }
0x174e   :  { %7972 = vmatpush3.msra.mxu0 %v11699_v57 }
0x174f   :  { %7973 = vmatprep.subr.mxu0 %v12989_v5 }
0x1750   :  { %7974 = vmatpush3.msra.mxu0 %v11703_v58 }
0x1751   :  { %7975 = vmatprep.subr.mxu0 %v12989_v5 }
0x1752   :  { %7976 = vmatpush3.msra.mxu0 %v11707_v3 }
0x1753   :  { %7977 = vmatprep.subr.mxu0 %v12989_v5  ;;  %v4469_v4 = vpop.f32.mrf.mxu1 }
0x1754   :  { %7978 = vmatpush3.msra.mxu0 %v11711_v9  ;;  %v4470_v10 = vadd.f32 %v4469_v4, %v13142_v35 }
0x1755   :  { %7980 = vmatmul.mubr.f32.vlgmr.msra.gmra.mxu0 %v11555_v50  ;;  %8001 = vmatprep.subr.mxu0 %v12989_v5  ;;  %v4471_v33 = vpop.f32.mrf.mxu1 }
0x1756   :  { %8002 = vmatpush3.msra.mxu0 %v13134_v48  ;;  %8017 = vmatprep.mubr.msk.f32.mxu0 %vm8584_vm0, %v12989_v5  ;;  %v4547_v46 = vadd.f32 %v4470_v10, %v13214_v44  ;;  %v4472_v23 = vadd.f32 %v4471_v33, %v13109_v0  ;;  %v11753_v33 = vld [vmem:[#allocation6 + $0x170] sm:$0xff] }
0x1757   :  { %8003 = vmatprep.subr.mxu0 %v12989_v5 }
0x1758   :  { %8004 = vmatpush3.msra.mxu0 %v13135_v2  ;;  %v6506_v6 = vmul.f32 -1.442695, %v4547_v46  ;;  %v4554_v36 = vadd.f32 %v4472_v23, %v13216_v37  ;;  %v11769_v23 = vld [vmem:[%s12765_s11 + $0xf0] sm:$0xff] }
0x1759   :  { %8005 = vmatprep.subr.mxu0 %v12989_v5  ;;  %v11775_v37 = vld [vmem:[%s12765_s11 + $0x70] sm:$0xff] }
0x175a   :  { %8006 = vmatpush3.msra.mxu0 %v13136_v60  ;;  %8427 = vpow2.f32 %v6506_v6  ;;  %v6507_v26 = vmul.f32 -1.442695, %v4554_v36  ;;  %v11781_v36 = vld [vmem:[%s12765_s11 + $0xe8] sm:$0xff] }
0x175b   :  { %8007 = vmatprep.subr.mxu0 %v12989_v5 }
0x175c   :  { %8008 = vmatpush3.msra.mxu0 %v13137_v56  ;;  %8429 = vpow2.f32 %v6507_v26  ;;  %v11787_v26 = vld [vmem:[%s12765_s11 + $0x68] sm:$0xff] }
0x175d   :  { %8009 = vmatprep.subr.mxu0 %v12989_v5 }
0x175e   :  { %8010 = vmatpush3.msra.mxu0 %v13138_v43 }
0x175f   :  { %8011 = vmatprep.subr.mxu0 %v12989_v5 }
0x1760   :  { %8012 = vmatpush3.msra.mxu0 %v13139_v19 }
0x1761   :  { %8013 = vmatprep.subr.mxu0 %v12989_v5 }
0x1762   :  { %8014 = vmatpush3.msra.mxu0 %v13140_v27 }
0x1763   :  { %8015 = vmatprep.subr.mxu0 %v12989_v5 }
0x1764   :  { %8016 = vmatpush3.msra.mxu0 %v13141_v11 }
0x1765   :  { %4874 = vmatprep.subr.mxu0 %v11753_v33 }
0x1767   :  { %v8428_v12 = vpop.eup %8427 }
0x1768   :  { %v4551_v40 = vadd.f32 1.0, %v8428_v12  ;;  %v11793_v12 = vld [vmem:[%s12765_s11 + $0xe0] sm:$0xff] }
0x1769   :  { %v8430_v16 = vpop.eup %8429 }
0x176a   :  { %8431 = vrcp.f32 %v4551_v40  ;;  %v4558_v24 = vadd.f32 1.0, %v8430_v16  ;;  %v11799_v40 = vld [vmem:[%s12765_s11 + $0x60] sm:$0xff]  ;;  %v11805_v16 = vld [vmem:[%s12765_s11 + $0xd8] sm:$0xff] }
0x176c   :  { %8433 = vrcp.f32 %v4558_v24  ;;  %v11811_v24 = vld [vmem:[%s12765_s11 + $0x58] sm:$0xff] }
0x1777   :  { %v8432_v29 = vpop.eup %8431 }
0x1779   :  { %v8434_v45 = vpop.eup %8433 }
0x177a   :  { %v4564_v54 = vsub.f32 1.0, %v8434_v45  ;;  %v4566_v7 = vmul.f32 %v8434_v45, %v11555_v50  ;;  %v11859_v45 = vld [vmem:[%s12765_s11 + $0x38] sm:$0xff] }
0x17f5   :  { %v6980_v20 = vpop.f32.mrf.mxu0 }
0x17f7   :  { %v6981_v8 = vpop.f32.mrf.mxu0 }
0x17f8   :  { %v11738_v61 = vadd.f32 %v6981_v8, %v6980_v20  ;;  %v11759_v20 = vld [vmem:[%s12765_s11 + $0xf8] sm:$0xff] }
0x17f9   :  { %v11764_v8 = vld [vmem:[%s12765_s11 + $0x78] sm:$0xff]  ;;  %7018 = vmatprep.subr.mxu1 %v11759_v20 }
0x17fa   :  { %13215 = vst [vmem:[#allocation31_spill] sm:$0xff] %v11738_v61  ;;  %v11937_v61 = vld [vmem:[%s12765_s11 + $0x80] sm:$0xff] }
0x1815   :  { %v4540_v22 = vpop.f32.mrf.mxu0 }
0x1816   :  { %v4541_v28 = vadd.f32 %v4540_v22, %v10665_v32  ;;  %v11817_v22 = vld [vmem:[%s12765_s11 + $0xd0] sm:$0xff] }
0x1817   :  { %v7981_v49 = vpop.f32.mrf.mxu0 }
0x1818   :  { %v4561_v39 = vmul.f32 %v8432_v29, %v4541_v28  ;;  %v11823_v28 = vld [vmem:[%s12765_s11 + $0x50] sm:$0xff]  ;;  %v11829_v29 = vld [vmem:[%s12765_s11 + $0xc8] sm:$0xff] }
0x1819   :  { %v11835_v49 = vld [vmem:[%s12765_s11 + $0x48] sm:$0xff] }
0x181a   :  { %v4562_v34 = vadd.f32 %v4561_v39, %v13217_v25  ;;  %v11841_v39 = vld [vmem:[%s12765_s11 + $0xc0] sm:$0xff] }
0x181b   :  { %v11847_v25 = vld [vmem:[%s12765_s11 + $0x40] sm:$0xff] }
0x181c   :  { %8435 = vtanh.f32 %v4562_v34  ;;  %v11853_v34 = vld [vmem:[%s12765_s11 + $0xb8] sm:$0xff] }
0x1829   :  { %v8436_v47 = vpop.eup %8435 }
0x182a   :  { %v4565_v17 = vmul.f32 %v8436_v47, %v4564_v54  ;;  %v11865_v54 = vld [vmem:[%s12765_s11 + $0xb0] sm:$0xff] }
0x182b   :  { %v11871_v47 = vld [vmem:[%s12765_s11 + $0x30] sm:$0xff] }
0x182c   :  { %v11744_v55 = vadd.f32 %v4566_v7, %v4565_v17  ;;  %v11877_v17 = vld [vmem:[%s12765_s11 + $0xa8] sm:$0xff] }
0x182d   :  { %v11883_v7 = vld [vmem:[%s12765_s11 + $0x28] sm:$0xff] }
0x182e   :  { %7999 = vmatmul.mubr.f32.vlgmr.msra.gmra.mxu1 %v11744_v55 }
0x182f   :  { %7019 = vmatpush3.msra.mxu1 %v11764_v8 }
0x1830   :  { %7020 = vmatprep.subr.mxu1 %v11769_v23 }
0x1831   :  { %7021 = vmatpush3.msra.mxu1 %v11775_v37 }
0x1832   :  { %7022 = vmatprep.subr.mxu1 %v11781_v36 }
0x1833   :  { %7023 = vmatpush3.msra.mxu1 %v11787_v26 }
0x1834   :  { %7024 = vmatprep.subr.mxu1 %v11793_v12 }
0x1835   :  { %7025 = vmatpush3.msra.mxu1 %v11799_v40 }
0x1836   :  { %7026 = vmatprep.subr.mxu1 %v11805_v16 }
0x1837   :  { %7027 = vmatpush3.msra.mxu1 %v11811_v24 }
0x1838   :  { %7028 = vmatprep.subr.mxu1 %v11817_v22 }
0x1839   :  { %7029 = vmatpush3.msra.mxu1 %v11823_v28 }
0x183a   :  { %7030 = vmatprep.subr.mxu1 %v11829_v29 }
0x183b   :  { %7031 = vmatpush3.msra.mxu1 %v11835_v49 }
0x183c   :  { %7032 = vmatprep.subr.mxu1 %v11841_v39 }
0x183d   :  { %7033 = vmatpush3.msra.mxu1 %v11847_v25 }
0x183e   :  { %7034 = vmatprep.subr.mxu1 %v11853_v34 }
0x183f   :  { %7035 = vmatpush3.msra.mxu1 %v11859_v45 }
0x1840   :  { %7036 = vmatprep.subr.mxu1 %v11865_v54 }
0x1841   :  { %7037 = vmatpush3.msra.mxu1 %v11871_v47 }
0x1842   :  { %7038 = vmatprep.subr.mxu1 %v11877_v17 }
0x1843   :  { %7039 = vmatpush3.msra.mxu1 %v11883_v7 }
0x18ee   :  { %v4634_v52 = vpop.f32.mrf.mxu1 }
0x18ef   :  { %v4635_v14 = vadd.f32 %v11593_v51, %v4634_v52  ;;  %v11889_v52 = vld [vmem:[%s12765_s11 + $0xa0] sm:$0xff] }
0x18f0   :  { %v8000_v31 = vpop.f32.mrf.mxu1  ;;  %7040 = vmatprep.subr.mxu1 %v11889_v52 }
0x18f1   :  { %v4638_v4 = vsel %vm2753_vm1, %v4635_v14, -inf  ;;  %v11901_v31 = vld [vmem:[%s12765_s11 + $0x98] sm:$0xff] }
0x18f2   :  { %4639 = vmax.xlane.f32.xlu0 %v4638_v4  ;;  %13218 = vst [vmem:[#allocation32_spill] sm:$0xff] %v11901_v31  ;;  %v11907_v4 = vld [vmem:[%s12765_s11 + $0x18] sm:$0xff] }
0x18f3   :  { %13219 = vst [vmem:[#allocation33_spill] sm:$0xff] %v11907_v4 }
0x197b   :  { %v4640_v10 = vpop.xlane.xlu0 %4639 }
0x197c   :  { %v4641_v44 = vsub.f32 %v4635_v14, %v4640_v10  ;;  %v11895_v14 = vld [vmem:[%s12765_s11 + $0x20] sm:$0xff]  ;;  %v11913_v10 = vld [vmem:[%s12765_s11 + $0x90] sm:$0xff] }
0x197d   :  { %7041 = vmatpush3.msra.mxu1 %v11895_v14  ;;  %13220 = vst [vmem:[#allocation72_spill] sm:$0xff] %v11913_v10 }
0x197e   :  { %v4642_v46 = vmul.f32 1.442695, %v4641_v44  ;;  %7042 = vmatprep.subr.mxu1 %v11901_v31  ;;  %v11919_v44 = vld [vmem:[%s12765_s11 + $0x10] sm:$0xff]  ;;  %v11945_v31 = vld [vmem:[#allocation6 + $0x158] sm:$0xff] }
0x197f   :  { %13221 = vst [vmem:[#allocation73_spill] sm:$0xff] %v11919_v44  ;;  %7043 = vmatpush3.msra.mxu1 %v11907_v4  ;;  %v11943_v4 = vld [vmem:[#allocation6 + $0x168] sm:$0xff]  ;;  %13224 = vst [vmem:[#allocation78_spill] sm:$0xff] %v11945_v31 }
0x1980   :  { %8437 = vpow2.f32 %v4642_v46  ;;  %v11925_v46 = vld [vmem:[%s12765_s11 + $0x88] sm:$0xff]  ;;  %7044 = vmatprep.subr.mxu1 %v11913_v10  ;;  %13223 = vst [vmem:[#allocation76_spill] sm:$0xff] %v11943_v4 }
0x1981   :  { %13222 = vst [vmem:[#allocation75_spill] sm:$0xff] %v11925_v46  ;;  %7045 = vmatpush3.msra.mxu1 %v11919_v44  ;;  %v11948_v44 = vld [vmem:[#allocation6 + $0x150] sm:$0xff] }
0x1982   :  { %7046 = vmatprep.subr.mxu1 %v11925_v46  ;;  %13225 = vst [vmem:[#allocation79_spill] sm:$0xff] %v11948_v44  ;;  %v11951_v46 = vld [vmem:[#allocation6 + $0x140] sm:$0xff] }
0x1983   :  { %13226 = vst [vmem:[#allocation81_spill] sm:$0xff] %v11951_v46 }
0x198d   :  { %v11749_v6 = vpop.eup %8437 }
0x198e   :  { %v4644_v50 = vsel %vm2753_vm1, %v11749_v6, 0.0 }
0x198f   :  { %4645 = vadd.xlane.f32.xlu1 %v4644_v50  ;;  %v11931_v50 = vld [vmem:[%s12765_s11 + $0x8] sm:$0xff] }
0x1990   :  { %7047 = vmatpush3.msra.mxu1 %v11931_v50 }
0x1991   :  { %7048 = vmatprep.subr.mxu1 %v11937_v61 }
0x1a18   :  { %v4646_v53 = vpop.xlane.xlu1 %4645 }
0x1a19   :  { %8439 = vrcp.f32 %v4646_v53  ;;  %v11955_v53 = vld [vmem:[#allocation6 + $0x138] sm:$0xff] }
0x1a1a   :  { %13227 = vst [vmem:[#allocation82_spill] sm:$0xff] %v11955_v53 }
0x1a26   :  { %v8440_v51 = vpop.eup %8439 }
0x1a27   :  { %v4648_v10 = vmul.f32 %v8440_v51, %v11749_v6  ;;  %v11958_v51 = vld [vmem:[#allocation6 + $0x128] sm:$0xff]  ;;  %v11961_v6 = vld [vmem:[#allocation6 + $0x120] sm:$0xff] }
0x1a28   :  { %13228 = vst [vmem:[#allocation84_spill] sm:$0xff] %v11958_v51  ;;  %13229 = vst [vmem:[#allocation85_spill] sm:$0xff] %v11961_v6 }
0x1a29   :  { %8018 = vmatmul.mubr.msk.f32.vlgmr.msra.gmra.mxu0 %vm2753_vm1, %v4648_v10  ;;  %v11964_v10 = vld [vmem:[#allocation6 + $0x110] sm:$0xff] }
0x1a2a   :  { %4875 = vmatpush1.msra.mxu0 %v11943_v4  ;;  %4938 = vmatprep.mubr.f32.mxu0 %v12989_v5  ;;  %13230 = vst [vmem:[#allocation35_spill] sm:$0xff] %v11964_v10  ;;  %v11967_v4 = vld [vmem:[#allocation6 + $0x108] sm:$0xff] }
0x1a2b   :  { %4876 = vmatprep.subr.mxu0 %v11945_v31  ;;  %13231 = vst [vmem:[#allocation24_spill] sm:$0xff] %v11967_v4  ;;  %v11970_v31 = vld [vmem:[#allocation6 + $0xf8] sm:$0xff] }
0x1a2c   :  { %4877 = vmatpush1.msra.mxu0 %v11948_v44  ;;  %13232 = vst [vmem:[#allocation23_spill] sm:$0xff] %v11970_v31  ;;  %v11973_v44 = vld [vmem:[#allocation6 + $0xf0] sm:$0xff] }
0x1a2d   :  { %4878 = vmatprep.subr.mxu0 %v11951_v46  ;;  %13233 = vst [vmem:[#allocation34_spill] sm:$0xff] %v11973_v44  ;;  %v11976_v46 = vld [vmem:[#allocation6 + $0xe0] sm:$0xff] }
0x1a2e   :  { %4879 = vmatpush1.msra.mxu0 %v11955_v53  ;;  %13234 = vst [vmem:[#allocation22_spill] sm:$0xff] %v11976_v46  ;;  %v11979_v53 = vld [vmem:[#allocation6 + $0xd8] sm:$0xff] }
0x1a2f   :  { %4880 = vmatprep.subr.mxu0 %v11958_v51  ;;  %13235 = vst [vmem:[#allocation21_spill] sm:$0xff] %v11979_v53  ;;  %v11982_v51 = vld [vmem:[#allocation6 + $0xc8] sm:$0xff] }
0x1a30   :  { %4881 = vmatpush1.msra.mxu0 %v11961_v6  ;;  %13236 = vst [vmem:[#allocation16_spill] sm:$0xff] %v11982_v51  ;;  %v11985_v6 = vld [vmem:[#allocation6 + $0xc0] sm:$0xff] }
0x1a31   :  { %4882 = vmatprep.subr.mxu0 %v11964_v10  ;;  %13237 = vst [vmem:[#allocation71_spill] sm:$0xff] %v11985_v6  ;;  %v11988_v10 = vld [vmem:[#allocation6 + $0xb0] sm:$0xff] }
0x1a32   :  { %4883 = vmatpush1.msra.mxu0 %v11967_v4  ;;  %13238 = vst [vmem:[#allocation36_spill] sm:$0xff] %v11988_v10  ;;  %v11991_v4 = vld [vmem:[#allocation6 + $0xa8] sm:$0xff] }
0x1a33   :  { %4884 = vmatprep.subr.mxu0 %v11970_v31  ;;  %13239 = vst [vmem:[#allocation43_spill] sm:$0xff] %v11991_v4  ;;  %v11994_v31 = vld [vmem:[#allocation6 + $0x98] sm:$0xff] }
0x1a34   :  { %4885 = vmatpush1.msra.mxu0 %v11973_v44  ;;  %13240 = vst [vmem:[#allocation44_spill] sm:$0xff] %v11994_v31  ;;  %v11997_v44 = vld [vmem:[#allocation6 + $0x90] sm:$0xff] }
0x1a35   :  { %4886 = vmatprep.subr.mxu0 %v11976_v46  ;;  %13241 = vst [vmem:[#allocation66_spill] sm:$0xff] %v11997_v44  ;;  %v12000_v46 = vld [vmem:[#allocation6 + $0x80] sm:$0xff] }
0x1a36   :  { %4887 = vmatpush1.msra.mxu0 %v11979_v53  ;;  %13242 = vst [vmem:[#allocation45_spill] sm:$0xff] %v12000_v46  ;;  %v12003_v53 = vld [vmem:[#allocation6 + $0x78] sm:$0xff] }
0x1a37   :  { %4888 = vmatprep.subr.mxu0 %v11982_v51  ;;  %13243 = vst [vmem:[#allocation46_spill] sm:$0xff] %v12003_v53  ;;  %v12006_v51 = vld [vmem:[#allocation6 + $0x68] sm:$0xff] }
0x1a38   :  { %4889 = vmatpush1.msra.mxu0 %v11985_v6  ;;  %13244 = vst [vmem:[#allocation65_spill] sm:$0xff] %v12006_v51  ;;  %v12009_v6 = vld [vmem:[#allocation6 + $0x60] sm:$0xff] }
0x1a39   :  { %4890 = vmatprep.subr.mxu0 %v11988_v10  ;;  %13245 = vst [vmem:[#allocation37_spill] sm:$0xff] %v12009_v6  ;;  %v12012_v10 = vld [vmem:[#allocation6 + $0x50] sm:$0xff] }
0x1a3a   :  { %4891 = vmatpush1.msra.mxu0 %v11991_v4  ;;  %v12015_v4 = vld [vmem:[#allocation6 + $0x48] sm:$0xff] }
0x1a3b   :  { %4892 = vmatprep.subr.mxu0 %v11994_v31  ;;  %v12018_v31 = vld [vmem:[#allocation6 + $0x38] sm:$0xff] }
0x1a3c   :  { %4893 = vmatpush1.msra.mxu0 %v11997_v44  ;;  %v12021_v44 = vld [vmem:[#allocation6 + $0x30] sm:$0xff] }
0x1a3d   :  { %4894 = vmatprep.subr.mxu0 %v12000_v46  ;;  %v12024_v46 = vld [vmem:[#allocation6 + $0x20] sm:$0xff] }
0x1a3e   :  { %4895 = vmatpush1.msra.mxu0 %v12003_v53  ;;  %v12027_v53 = vld [vmem:[#allocation6 + $0x18] sm:$0xff] }
0x1a3f   :  { %4896 = vmatprep.subr.mxu0 %v12006_v51  ;;  %13246 = vst [vmem:[#allocation20_spill] sm:$0xff] %v12027_v53  ;;  %v12030_v51 = vld [vmem:[#allocation6 + $0x8] sm:$0xff] }
0x1a40   :  { %4897 = vmatpush1.msra.mxu0 %v12009_v6  ;;  %13247 = vst [vmem:[#allocation40_spill] sm:$0xff] %v12030_v51  ;;  %v12033_v6 = vld [vmem:[#allocation6] sm:$0xff] }
0x1a41   :  { %4898 = vmatprep.subr.mxu0 %v12012_v10  ;;  %13248 = vst [vmem:[#allocation38_spill] sm:$0xff] %v12033_v6 }
0x1a42   :  { %4899 = vmatpush1.msra.mxu0 %v12015_v4 }
0x1a43   :  { %4900 = vmatprep.subr.mxu0 %v12018_v31 }
0x1a44   :  { %4901 = vmatpush1.msra.mxu0 %v12021_v44 }
0x1a45   :  { %4902 = vmatprep.subr.mxu0 %v12024_v46 }
0x1a46   :  { %4903 = vmatpush1.msra.mxu0 %v12027_v53 }
0x1a47   :  { %4904 = vmatprep.subr.mxu0 %v12030_v51 }
0x1a48   :  { %4905 = vmatpush1.msra.mxu0 %v12033_v6  ;;  %v12061_v6 = vld [vmem:[%s12765_s11] sm:$0xff] }
0x1a49   :  { %4939 = vmatmul.mubr.f32.vlgmr.msra.gmra.mxu0 %v11744_v55  ;;  %8055 = vmatprep.subr.mxu0 %v12989_v5 }
0x1a4a   :  { %8056 = vmatpush3.xpose.msra.mxu0 %v13134_v48  ;;  %8071 = vmatprep.mubr.msk.f32.mxu0 %vm8584_vm0, %v12989_v5 }
0x1a4b   :  { %8057 = vmatprep.subr.mxu0 %v12989_v5  ;;  %7049 = vmatpush3.msra.mxu1 %v12061_v6 }
0x1a4c   :  { %8020 = vmatprep.subr.mxu1 %v12989_v5 }
0x1a4e   :  { %8058 = vmatpush3.xpose.msra.mxu0 %v13135_v2 }
0x1a4f   :  { %8059 = vmatprep.subr.mxu0 %v12989_v5 }
0x1a52   :  { %8060 = vmatpush3.xpose.msra.mxu0 %v13136_v60 }
0x1a53   :  { %8061 = vmatprep.subr.mxu0 %v12989_v5 }
0x1a56   :  { %8062 = vmatpush3.xpose.msra.mxu0 %v13137_v56 }
0x1a57   :  { %8063 = vmatprep.subr.mxu0 %v12989_v5 }
0x1a5a   :  { %8064 = vmatpush3.xpose.msra.mxu0 %v13138_v43 }
0x1a5b   :  { %8065 = vmatprep.subr.mxu0 %v12989_v5 }
0x1a5e   :  { %8066 = vmatpush3.xpose.msra.mxu0 %v13139_v19 }
0x1a5f   :  { %8067 = vmatprep.subr.mxu0 %v12989_v5 }
0x1a62   :  { %8068 = vmatpush3.xpose.msra.mxu0 %v13140_v27 }
0x1a63   :  { %8069 = vmatprep.subr.mxu0 %v12989_v5 }
0x1a66   :  { %8070 = vmatpush3.xpose.msra.mxu0 %v13141_v11 }
0x1a67   :  { %7088 = vmatprep.subr.mxu0 %v11759_v20 }
0x1ae9   :  { %v4718_v51 = vpop.f32.mrf.mxu0 }
0x1aea   :  { %4818 = vmatprep.mubr.f32.mxu1 %v4718_v51 }
0x1aeb   :  { %v8019_v53 = vpop.f32.mrf.mxu0  ;;  %4819 = vmatmul.mubr.f32.vlgmr.msra.gmra.mxu1 %v11744_v55 }
0x1aec   :  { %8021 = vmatpush3.msra.mxu1 %v11650_v1  ;;  %8052 = vmatprep.mubr.msk.f32.mxu1 %vm8584_vm0, %v12989_v5 }
0x1aed   :  { %8022 = vmatprep.subr.mxu1 %v12989_v5 }
0x1aee   :  { %8023 = vmatpush3.msra.mxu1 %v11653_v30 }
0x1aef   :  { %8024 = vmatprep.subr.mxu1 %v12989_v5 }
0x1af0   :  { %8025 = vmatpush3.msra.mxu1 %v11659_v21  ;;  %v13249_v21 = vld [vmem:[#allocation49_spill] sm:$0xff] }
0x1af1   :  { %8026 = vmatprep.subr.mxu1 %v12989_v5 }
0x1af2   :  { %8027 = vmatpush3.msra.mxu1 %v11663_v18 }
0x1af3   :  { %8028 = vmatprep.subr.mxu1 %v12989_v5 }
0x1af4   :  { %8029 = vmatpush3.msra.mxu1 %v11667_v38 }
0x1af5   :  { %8030 = vmatprep.subr.mxu1 %v12989_v5 }
0x1af6   :  { %8031 = vmatpush3.msra.mxu1 %v11671_v42 }
0x1af7   :  { %8032 = vmatprep.subr.mxu1 %v12989_v5 }
0x1af8   :  { %8033 = vmatpush3.msra.mxu1 %v11675_v62 }
0x1af9   :  { %8034 = vmatprep.subr.mxu1 %v12989_v5 }
0x1afa   :  { %8035 = vmatpush3.msra.mxu1 %v11679_v63 }
0x1afb   :  { %8036 = vmatprep.subr.mxu1 %v12989_v5 }
0x1afc   :  { %8037 = vmatpush3.msra.mxu1 %v11683_v15 }
0x1afd   :  { %8038 = vmatprep.subr.mxu1 %v12989_v5 }
0x1afe   :  { %8039 = vmatpush3.msra.mxu1 %v11687_v41 }
0x1aff   :  { %8040 = vmatprep.subr.mxu1 %v12989_v5 }
0x1b00   :  { %8041 = vmatpush3.msra.mxu1 %v11691_v59  ;;  %v13251_v59 = vld [vmem:[#allocation51_spill] sm:$0xff] }
0x1b01   :  { %8042 = vmatprep.subr.mxu1 %v12989_v5 }
0x1b02   :  { %8043 = vmatpush3.msra.mxu1 %v11695_v13 }
0x1b03   :  { %8044 = vmatprep.subr.mxu1 %v12989_v5 }
0x1b04   :  { %8045 = vmatpush3.msra.mxu1 %v11699_v57 }
0x1b05   :  { %8046 = vmatprep.subr.mxu1 %v12989_v5 }
0x1b06   :  { %8047 = vmatpush3.msra.mxu1 %v11703_v58 }
0x1b07   :  { %8048 = vmatprep.subr.mxu1 %v12989_v5 }
0x1b08   :  { %8049 = vmatpush3.msra.mxu1 %v11707_v3 }
0x1b09   :  { %8050 = vmatprep.subr.mxu1 %v12989_v5  ;;  %v4940_v1 = vpop.f32.mrf.mxu0 }
0x1b0a   :  { %8051 = vmatpush3.msra.mxu1 %v11711_v9  ;;  %v4941_v30 = vadd.f32 %v4940_v1, %v13142_v35 }
0x1b0b   :  { %8053 = vmatmul.mubr.f32.vlgmr.msra.gmra.mxu1 %v11744_v55  ;;  %8074 = vmatprep.subr.mxu1 %v12989_v5  ;;  %v4942_v42 = vpop.f32.mrf.mxu0 }
0x1b0c   :  { %8075 = vmatpush3.msra.mxu1 %v13134_v48  ;;  %8090 = vmatprep.mubr.msk.f32.mxu1 %vm8584_vm0, %v12989_v5  ;;  %v5018_v18 = vadd.f32 %v4941_v30, %v13249_v21  ;;  %v4943_v15 = vadd.f32 %v4942_v42, %v13109_v0  ;;  %v13252_v21 = vld [vmem:[#allocation67_spill] sm:$0xff] }
0x1b0d   :  { %8076 = vmatprep.subr.mxu1 %v12989_v5 }
0x1b0e   :  { %8077 = vmatpush3.msra.mxu1 %v13135_v2  ;;  %v6509_v38 = vmul.f32 -1.442695, %v5018_v18  ;;  %v5025_v13 = vadd.f32 %v4943_v15, %v13251_v59 }
0x1b0f   :  { %8078 = vmatprep.subr.mxu1 %v12989_v5 }
0x1b10   :  { %8079 = vmatpush3.msra.mxu1 %v13136_v60  ;;  %8441 = vpow2.f32 %v6509_v38  ;;  %v6510_v57 = vmul.f32 -1.442695, %v5025_v13  ;;  %v13268_v13 = vld [vmem:[#allocation23_spill] sm:$0xff] }
0x1b11   :  { %8080 = vmatprep.subr.mxu1 %v12989_v5 }
0x1b12   :  { %8081 = vmatpush3.msra.mxu1 %v13137_v56  ;;  %8443 = vpow2.f32 %v6510_v57  ;;  %v13269_v57 = vld [vmem:[#allocation34_spill] sm:$0xff] }
0x1b13   :  { %8082 = vmatprep.subr.mxu1 %v12989_v5 }
0x1b14   :  { %8083 = vmatpush3.msra.mxu1 %v13138_v43 }
0x1b15   :  { %8084 = vmatprep.subr.mxu1 %v12989_v5 }
0x1b16   :  { %8085 = vmatpush3.msra.mxu1 %v13139_v19 }
0x1b17   :  { %8086 = vmatprep.subr.mxu1 %v12989_v5 }
0x1b18   :  { %8087 = vmatpush3.msra.mxu1 %v13140_v27 }
0x1b19   :  { %8088 = vmatprep.subr.mxu1 %v12989_v5 }
0x1b1a   :  { %8089 = vmatpush3.msra.mxu1 %v13141_v11 }
0x1b1b   :  { %5345 = vmatprep.subr.mxu1 %v11753_v33 }
0x1b1d   :  { %v8442_v58 = vpop.eup %8441 }
0x1b1e   :  { %v5022_v3 = vadd.f32 1.0, %v8442_v58  ;;  %v13270_v58 = vld [vmem:[#allocation22_spill] sm:$0xff] }
0x1b1f   :  { %v8444_v9 = vpop.eup %8443 }
0x1b20   :  { %8445 = vrcp.f32 %v5022_v3  ;;  %v5029_v33 = vadd.f32 1.0, %v8444_v9  ;;  %v13271_v3 = vld [vmem:[#allocation21_spill] sm:$0xff]  ;;  %v13272_v9 = vld [vmem:[#allocation16_spill] sm:$0xff] }
0x1b22   :  { %8447 = vrcp.f32 %v5029_v33  ;;  %v13273_v33 = vld [vmem:[#allocation71_spill] sm:$0xff] }
0x1b2d   :  { %v8446_v51 = vpop.eup %8445 }
0x1b2f   :  { %v8448_v38 = vpop.eup %8447 }
0x1b30   :  { %v5035_v42 = vsub.f32 1.0, %v8448_v38  ;;  %v5037_v15 = vmul.f32 %v8448_v38, %v11744_v55  ;;  %v13253_v55 = vld [vmem:[#allocation32_spill] sm:$0xff]  ;;  %v13281_v38 = vld [vmem:[#allocation37_spill] sm:$0xff] }
0x1bab   :  { %v7050_v62 = vpop.f32.mrf.mxu1 }
0x1bad   :  { %v7051_v63 = vpop.f32.mrf.mxu1 }
0x1bae   :  { %v12122_v41 = vadd.f32 %v7051_v63, %v7050_v62 }
0x1bb0   :  { %13250 = vst [vmem:[#allocation29_spill] sm:$0xff] %v12122_v41 }
0x1bcb   :  { %v5011_v20 = vpop.f32.mrf.mxu1 }
0x1bcc   :  { %v5012_v53 = vadd.f32 %v5011_v20, %v10665_v32  ;;  %v13274_v20 = vld [vmem:[#allocation36_spill] sm:$0xff] }
0x1bcd   :  { %v8054_v1 = vpop.f32.mrf.mxu1 }
0x1bce   :  { %v5032_v30 = vmul.f32 %v8446_v51, %v5012_v53  ;;  %v13275_v53 = vld [vmem:[#allocation43_spill] sm:$0xff]  ;;  %v13276_v51 = vld [vmem:[#allocation44_spill] sm:$0xff]  ;;  %v13277_v1 = vld [vmem:[#allocation66_spill] sm:$0xff] }
0x1bd0   :  { %v5033_v18 = vadd.f32 %v5032_v30, %v13252_v21  ;;  %v13278_v30 = vld [vmem:[#allocation45_spill] sm:$0xff]  ;;  %v13279_v21 = vld [vmem:[#allocation46_spill] sm:$0xff] }
0x1bd2   :  { %8449 = vtanh.f32 %v5033_v18  ;;  %v13280_v18 = vld [vmem:[#allocation65_spill] sm:$0xff] }
0x1bdf   :  { %v8450_v62 = vpop.eup %8449 }
0x1be0   :  { %v5036_v63 = vmul.f32 %v8450_v62, %v5035_v42  ;;  %v13282_v42 = vld [vmem:[#allocation20_spill] sm:$0xff] }
0x1be1   :  { %v13283_v62 = vld [vmem:[#allocation40_spill] sm:$0xff] }
0x1be2   :  { %v12128_v59 = vadd.f32 %v5037_v15, %v5036_v63  ;;  %v13284_v63 = vld [vmem:[#allocation38_spill] sm:$0xff] }
0x1be3   :  { %v12231_v15 = vld [vmem:[#allocation6 + $0x130] sm:$0xff] }
0x1be4   :  { %8072 = vmatmul.mubr.f32.vlgmr.msra.gmra.mxu0 %v12128_v59 }
0x1be5   :  { %7089 = vmatpush3.msra.mxu0 %v11764_v8  ;;  %v13254_v8 = vld [vmem:[#allocation33_spill] sm:$0xff] }
0x1be6   :  { %7090 = vmatprep.subr.mxu0 %v11769_v23  ;;  %v13255_v23 = vld [vmem:[#allocation72_spill] sm:$0xff] }
0x1be7   :  { %7091 = vmatpush3.msra.mxu0 %v11775_v37  ;;  %v13256_v37 = vld [vmem:[#allocation73_spill] sm:$0xff] }
0x1be8   :  { %7092 = vmatprep.subr.mxu0 %v11781_v36  ;;  %v13257_v36 = vld [vmem:[#allocation75_spill] sm:$0xff] }
0x1be9   :  { %7093 = vmatpush3.msra.mxu0 %v11787_v26 }
0x1bea   :  { %7094 = vmatprep.subr.mxu0 %v11793_v12  ;;  %v13258_v12 = vld [vmem:[#allocation30_spill] sm:$0xff] }
0x1beb   :  { %7095 = vmatpush3.msra.mxu0 %v11799_v40 }
0x1bec   :  { %7096 = vmatprep.subr.mxu0 %v11805_v16 }
0x1bed   :  { %7097 = vmatpush3.msra.mxu0 %v11811_v24 }
0x1bee   :  { %7098 = vmatprep.subr.mxu0 %v11817_v22 }
0x1bef   :  { %7099 = vmatpush3.msra.mxu0 %v11823_v28 }
0x1bf0   :  { %7100 = vmatprep.subr.mxu0 %v11829_v29 }
0x1bf1   :  { %7101 = vmatpush3.msra.mxu0 %v11835_v49 }
0x1bf2   :  { %7102 = vmatprep.subr.mxu0 %v11841_v39 }
0x1bf3   :  { %7103 = vmatpush3.msra.mxu0 %v11847_v25 }
0x1bf4   :  { %7104 = vmatprep.subr.mxu0 %v11853_v34 }
0x1bf5   :  { %7105 = vmatpush3.msra.mxu0 %v11859_v45  ;;  %v13259_v45 = vld [vmem:[#allocation76_spill] sm:$0xff] }
0x1bf6   :  { %7106 = vmatprep.subr.mxu0 %v11865_v54  ;;  %v13260_v54 = vld [vmem:[#allocation78_spill] sm:$0xff] }
0x1bf7   :  { %7107 = vmatpush3.msra.mxu0 %v11871_v47  ;;  %v13261_v47 = vld [vmem:[#allocation79_spill] sm:$0xff] }
0x1bf8   :  { %7108 = vmatprep.subr.mxu0 %v11877_v17  ;;  %v13262_v17 = vld [vmem:[#allocation81_spill] sm:$0xff] }
0x1bf9   :  { %7109 = vmatpush3.msra.mxu0 %v11883_v7  ;;  %v13263_v7 = vld [vmem:[#allocation82_spill] sm:$0xff] }
0x1bfa   :  { %7110 = vmatprep.subr.mxu0 %v11889_v52  ;;  %v13264_v52 = vld [vmem:[#allocation84_spill] sm:$0xff] }
0x1bfb   :  { %7111 = vmatpush3.msra.mxu0 %v11895_v14  ;;  %v13265_v14 = vld [vmem:[#allocation85_spill] sm:$0xff] }
0x1bfc   :  { %7112 = vmatprep.subr.mxu0 %v13253_v55  ;;  %v12235_v55 = vld [vmem:[#allocation6 + $0x118] sm:$0xff] }
0x1bfd   :  { %7113 = vmatpush3.msra.mxu0 %v13254_v8  ;;  %v12239_v8 = vld [vmem:[#allocation6 + $0x100] sm:$0xff] }
0x1bfe   :  { %7114 = vmatprep.subr.mxu0 %v13255_v23  ;;  %v12243_v23 = vld [vmem:[#allocation6 + $0xe8] sm:$0xff] }
0x1bff   :  { %7115 = vmatpush3.msra.mxu0 %v13256_v37  ;;  %v12247_v37 = vld [vmem:[#allocation6 + $0xd0] sm:$0xff] }
0x1c00   :  { %7116 = vmatprep.subr.mxu0 %v13257_v36  ;;  %v12251_v36 = vld [vmem:[#allocation6 + $0xb8] sm:$0xff] }
0x1c01   :  { %7117 = vmatpush3.msra.mxu0 %v11931_v50  ;;  %v13266_v50 = vld [vmem:[#allocation35_spill] sm:$0xff] }
0x1c02   :  { %7118 = vmatprep.subr.mxu0 %v11937_v61 }
0x1c03   :  { %7119 = vmatpush3.msra.mxu0 %v12061_v6  ;;  %v13267_v6 = vld [vmem:[#allocation24_spill] sm:$0xff] }
0x1c04   :  { %8093 = vmatprep.subr.mxu0 %v12989_v5 }
0x1ca4   :  { %v5105_v26 = vpop.f32.mrf.mxu0 }
0x1ca5   :  { %v5106_v40 = vadd.f32 %v13258_v12, %v5105_v26  ;;  %v12255_v26 = vld [vmem:[#allocation6 + $0xa0] sm:$0xff]  ;;  %v12259_v12 = vld [vmem:[#allocation6 + $0x88] sm:$0xff] }
0x1ca6   :  { %v8073_v16 = vpop.f32.mrf.mxu0 }
0x1ca7   :  { %v5109_v24 = vsel %vm2753_vm1, %v5106_v40, -inf  ;;  %v12267_v16 = vld [vmem:[#allocation6 + $0x58] sm:$0xff] }
0x1ca8   :  { %5110 = vmax.xlane.f32.xlu0 %v5109_v24  ;;  %v12271_v24 = vld [vmem:[#allocation6 + $0x40] sm:$0xff] }
0x1d31   :  { %v5111_v22 = vpop.xlane.xlu0 %5110 }
0x1d32   :  { %v5112_v28 = vsub.f32 %v5106_v40, %v5111_v22  ;;  %v12263_v40 = vld [vmem:[#allocation6 + $0x70] sm:$0xff]  ;;  %v12275_v22 = vld [vmem:[#allocation6 + $0x28] sm:$0xff] }
0x1d34   :  { %v5113_v29 = vmul.f32 1.442695, %v5112_v28  ;;  %v12279_v28 = vld [vmem:[#allocation6 + $0x10] sm:$0xff] }
0x1d36   :  { %8451 = vpow2.f32 %v5113_v29 }
0x1d43   :  { %v8452_v49 = vpop.eup %8451 }
0x1d44   :  { %v5115_v39 = vsel %vm2753_vm1, %v8452_v49, 0.0 }
0x1d45   :  { %5116 = vadd.xlane.f32.xlu1 %v5115_v39  ;;  %v13285_v39 = vld [vmem:[#allocation53_spill] sm:$0xff] }
0x1dce   :  { %v5117_v61 = vpop.xlane.xlu1 %5116 }
0x1dcf   :  { %8453 = vrcp.f32 %v5117_v61 }
0x1ddc   :  { %v8454_v25 = vpop.eup %8453 }
0x1ddd   :  { %v5119_v34 = vmul.f32 %v8454_v25, %v8452_v49 }
0x1ddf   :  { %8091 = vmatmul.mubr.msk.f32.vlgmr.msra.gmra.mxu1 %vm2753_vm1, %v5119_v34 }
0x1de0   :  { %5346 = vmatpush1.msra.mxu1 %v13259_v45  ;;  %5409 = vmatprep.mubr.f32.mxu1 %v12989_v5 }
0x1de1   :  { %5347 = vmatprep.subr.mxu1 %v13260_v54 }
0x1de2   :  { %5348 = vmatpush1.msra.mxu1 %v13261_v47 }
0x1de3   :  { %5349 = vmatprep.subr.mxu1 %v13262_v17 }
0x1de4   :  { %5350 = vmatpush1.msra.mxu1 %v13263_v7  ;;  %v13287_v7 = vld [vmem:[#allocation55_spill] sm:$0xff] }
0x1de5   :  { %5351 = vmatprep.subr.mxu1 %v13264_v52 }
0x1de6   :  { %5352 = vmatpush1.msra.mxu1 %v13265_v14 }
0x1de7   :  { %5353 = vmatprep.subr.mxu1 %v13266_v50 }
0x1de8   :  { %5354 = vmatpush1.msra.mxu1 %v13267_v6 }
0x1de9   :  { %5355 = vmatprep.subr.mxu1 %v13268_v13 }
0x1dea   :  { %5356 = vmatpush1.msra.mxu1 %v13269_v57 }
0x1deb   :  { %5357 = vmatprep.subr.mxu1 %v13270_v58 }
0x1dec   :  { %5358 = vmatpush1.msra.mxu1 %v13271_v3 }
0x1ded   :  { %5359 = vmatprep.subr.mxu1 %v13272_v9 }
0x1dee   :  { %5360 = vmatpush1.msra.mxu1 %v13273_v33 }
0x1def   :  { %5361 = vmatprep.subr.mxu1 %v13274_v20 }
0x1df0   :  { %5362 = vmatpush1.msra.mxu1 %v13275_v53  ;;  %v13288_v53 = vld [vmem:[#allocation70_spill] sm:$0xff] }
0x1df1   :  { %5363 = vmatprep.subr.mxu1 %v13276_v51 }
0x1df2   :  { %5364 = vmatpush1.msra.mxu1 %v13277_v1 }
0x1df3   :  { %5365 = vmatprep.subr.mxu1 %v13278_v30 }
0x1df4   :  { %5366 = vmatpush1.msra.mxu1 %v13279_v21 }
0x1df5   :  { %5367 = vmatprep.subr.mxu1 %v13280_v18 }
0x1df6   :  { %5368 = vmatpush1.msra.mxu1 %v13281_v38 }
0x1df7   :  { %5369 = vmatprep.subr.mxu1 %v12012_v10  ;;  %v12227_v10 = vld [vmem:[#allocation6 + $0x148] sm:$0xff] }
0x1df8   :  { %5370 = vmatpush1.msra.mxu1 %v12015_v4  ;;  %v12218_v4 = vld [vmem:[#allocation6 + $0x178] sm:$0xff] }
0x1df9   :  { %5371 = vmatprep.subr.mxu1 %v12018_v31 }
0x1dfa   :  { %5372 = vmatpush1.msra.mxu1 %v12021_v44 }
0x1dfb   :  { %5373 = vmatprep.subr.mxu1 %v12024_v46  ;;  %v12221_v46 = vld [vmem:[#allocation6 + $0x160] sm:$0xff] }
0x1dfc   :  { %5374 = vmatpush1.msra.mxu1 %v13282_v42 }
0x1dfd   :  { %5375 = vmatprep.subr.mxu1 %v13283_v62 }
0x1dfe   :  { %5376 = vmatpush1.msra.mxu1 %v13284_v63  ;;  %v12318_v63 = vld [vmem:[%s12756_s2] sm:$0xff] }
0x1dff   :  { %5410 = vmatmul.mubr.f32.vlgmr.msra.gmra.mxu1 %v12128_v59  ;;  %8128 = vmatprep.subr.mxu1 %v12989_v5  ;;  %13289 = vst [vmem:[#allocation64_spill] sm:$0xff] %v12318_v63 }
0x1e00   :  { %8129 = vmatpush3.xpose.msra.mxu1 %v13134_v48  ;;  %8144 = vmatprep.mubr.msk.f32.mxu1 %vm8584_vm0, %v12989_v5 }
0x1e01   :  { %8130 = vmatprep.subr.mxu1 %v12989_v5 }
0x1e04   :  { %8131 = vmatpush3.xpose.msra.mxu1 %v13135_v2 }
0x1e05   :  { %8132 = vmatprep.subr.mxu1 %v12989_v5 }
0x1e08   :  { %8133 = vmatpush3.xpose.msra.mxu1 %v13136_v60 }
0x1e09   :  { %8134 = vmatprep.subr.mxu1 %v12989_v5 }
0x1e0c   :  { %8135 = vmatpush3.xpose.msra.mxu1 %v13137_v56 }
0x1e0d   :  { %8136 = vmatprep.subr.mxu1 %v12989_v5 }
0x1e10   :  { %8137 = vmatpush3.xpose.msra.mxu1 %v13138_v43 }
0x1e11   :  { %8138 = vmatprep.subr.mxu1 %v12989_v5 }
0x1e14   :  { %8139 = vmatpush3.xpose.msra.mxu1 %v13139_v19 }
0x1e15   :  { %8140 = vmatprep.subr.mxu1 %v12989_v5 }
0x1e18   :  { %8141 = vmatpush3.xpose.msra.mxu1 %v13140_v27 }
0x1e19   :  { %8142 = vmatprep.subr.mxu1 %v12989_v5 }
0x1e1c   :  { %8143 = vmatpush3.xpose.msra.mxu1 %v13141_v11 }
0x1e9f   :  { %v5189_v31 = vpop.f32.mrf.mxu1 }
0x1ea0   :  { %5289 = vmatprep.mubr.f32.mxu0 %v5189_v31 }
0x1ea1   :  { %v8092_v44 = vpop.f32.mrf.mxu1  ;;  %5290 = vmatmul.mubr.f32.vlgmr.msra.gmra.mxu0 %v12128_v59 }
0x1ea2   :  { %8094 = vmatpush3.msra.mxu0 %v12218_v4  ;;  %8125 = vmatprep.mubr.msk.f32.mxu0 %vm8584_vm0, %v12989_v5 }
0x1ea3   :  { %8095 = vmatprep.subr.mxu0 %v12989_v5 }
0x1ea4   :  { %8096 = vmatpush3.msra.mxu0 %v12221_v46 }
0x1ea5   :  { %8097 = vmatprep.subr.mxu0 %v12989_v5 }
0x1ea6   :  { %8098 = vmatpush3.msra.mxu0 %v12227_v10 }
0x1ea7   :  { %8099 = vmatprep.subr.mxu0 %v12989_v5 }
0x1ea8   :  { %8100 = vmatpush3.msra.mxu0 %v12231_v15 }
0x1ea9   :  { %8101 = vmatprep.subr.mxu0 %v12989_v5 }
0x1eaa   :  { %8102 = vmatpush3.msra.mxu0 %v12235_v55 }
0x1eab   :  { %8103 = vmatprep.subr.mxu0 %v12989_v5 }
0x1eac   :  { %8104 = vmatpush3.msra.mxu0 %v12239_v8 }
0x1ead   :  { %8105 = vmatprep.subr.mxu0 %v12989_v5 }
0x1eae   :  { %8106 = vmatpush3.msra.mxu0 %v12243_v23 }
0x1eaf   :  { %8107 = vmatprep.subr.mxu0 %v12989_v5 }
0x1eb0   :  { %8108 = vmatpush3.msra.mxu0 %v12247_v37 }
0x1eb1   :  { %8109 = vmatprep.subr.mxu0 %v12989_v5 }
0x1eb2   :  { %8110 = vmatpush3.msra.mxu0 %v12251_v36 }
0x1eb3   :  { %8111 = vmatprep.subr.mxu0 %v12989_v5 }
0x1eb4   :  { %8112 = vmatpush3.msra.mxu0 %v12255_v26 }
0x1eb5   :  { %8113 = vmatprep.subr.mxu0 %v12989_v5 }
0x1eb6   :  { %8114 = vmatpush3.msra.mxu0 %v12259_v12 }
0x1eb7   :  { %8115 = vmatprep.subr.mxu0 %v12989_v5 }
0x1eb8   :  { %8116 = vmatpush3.msra.mxu0 %v12263_v40 }
0x1eb9   :  { %8117 = vmatprep.subr.mxu0 %v12989_v5 }
0x1eba   :  { %8118 = vmatpush3.msra.mxu0 %v12267_v16 }
0x1ebb   :  { %8119 = vmatprep.subr.mxu0 %v12989_v5 }
0x1ebc   :  { %8120 = vmatpush3.msra.mxu0 %v12271_v24 }
0x1ebd   :  { %8121 = vmatprep.subr.mxu0 %v12989_v5 }
0x1ebe   :  { %8122 = vmatpush3.msra.mxu0 %v12275_v22 }
0x1ebf   :  { %8123 = vmatprep.subr.mxu0 %v12989_v5  ;;  %v5411_v29 = vpop.f32.mrf.mxu1 }
0x1ec0   :  { %8124 = vmatpush3.msra.mxu0 %v12279_v28  ;;  %v5412_v49 = vadd.f32 %v5411_v29, %v13142_v35 }
0x1ec1   :  { %8126 = vmatmul.mubr.f32.vlgmr.msra.gmra.mxu0 %v12128_v59  ;;  %8147 = vmatprep.subr.mxu0 %v12989_v5  ;;  %v5413_v34 = vpop.f32.mrf.mxu1 }
0x1ec2   :  { %8148 = vmatpush3.msra.mxu0 %v13134_v48  ;;  %8163 = vmatprep.mubr.msk.f32.mxu0 %vm8584_vm0, %v12989_v5  ;;  %v5489_v61 = vadd.f32 %v5412_v49, %v13285_v39  ;;  %v5414_v47 = vadd.f32 %v5413_v34, %v13109_v0  ;;  %v5814_v34 = vld [vmem:[#allocation6 + $0x170] sm:$0xff] }
0x1ec3   :  { %8149 = vmatprep.subr.mxu0 %v12989_v5 }
0x1ec4   :  { %8150 = vmatpush3.msra.mxu0 %v13135_v2  ;;  %v6512_v25 = vmul.f32 -1.442695, %v5489_v61  ;;  %v5496_v52 = vadd.f32 %v5414_v47, %v13287_v7  ;;  %v12339_v47 = vld [vmem:[%s12765_s11 + $0xf0] sm:$0xff] }
0x1ec5   :  { %8151 = vmatprep.subr.mxu0 %v12989_v5  ;;  %v12345_v7 = vld [vmem:[%s12765_s11 + $0x70] sm:$0xff] }
0x1ec6   :  { %8152 = vmatpush3.msra.mxu0 %v13136_v60  ;;  %8455 = vpow2.f32 %v6512_v25  ;;  %v6513_v14 = vmul.f32 -1.442695, %v5496_v52  ;;  %v12351_v52 = vld [vmem:[%s12765_s11 + $0xe8] sm:$0xff] }
0x1ec7   :  { %8153 = vmatprep.subr.mxu0 %v12989_v5 }
0x1ec8   :  { %8154 = vmatpush3.msra.mxu0 %v13137_v56  ;;  %8457 = vpow2.f32 %v6513_v14  ;;  %v12357_v14 = vld [vmem:[%s12765_s11 + $0x68] sm:$0xff] }
0x1ec9   :  { %8155 = vmatprep.subr.mxu0 %v12989_v5 }
0x1eca   :  { %8156 = vmatpush3.msra.mxu0 %v13138_v43 }
0x1ecb   :  { %8157 = vmatprep.subr.mxu0 %v12989_v5 }
0x1ecc   :  { %8158 = vmatpush3.msra.mxu0 %v13139_v19 }
0x1ecd   :  { %8159 = vmatprep.subr.mxu0 %v12989_v5 }
0x1ece   :  { %8160 = vmatpush3.msra.mxu0 %v13140_v27 }
0x1ecf   :  { %8161 = vmatprep.subr.mxu0 %v12989_v5 }
0x1ed0   :  { %8162 = vmatpush3.msra.mxu0 %v13141_v11 }
0x1ed1   :  { %5816 = vmatprep.subr.mxu0 %v5814_v34  ;;  %v12507_v34 = vld [vmem:[%s12765_s11 + $0x80] sm:$0xff] }
0x1ed2   :  { %13298 = vst [vmem:[#allocation74_spill] sm:$0xff] %v12507_v34 }
0x1ed3   :  { %v8456_v50 = vpop.eup %8455 }
0x1ed4   :  { %v5493_v6 = vadd.f32 1.0, %v8456_v50  ;;  %v12363_v50 = vld [vmem:[%s12765_s11 + $0xe0] sm:$0xff] }
0x1ed5   :  { %v8458_v13 = vpop.eup %8457 }
0x1ed6   :  { %8459 = vrcp.f32 %v5493_v6  ;;  %v5500_v57 = vadd.f32 1.0, %v8458_v13  ;;  %v12369_v6 = vld [vmem:[%s12765_s11 + $0x60] sm:$0xff]  ;;  %v12375_v13 = vld [vmem:[%s12765_s11 + $0xd8] sm:$0xff] }
0x1ed8   :  { %8461 = vrcp.f32 %v5500_v57  ;;  %v12381_v57 = vld [vmem:[%s12765_s11 + $0x58] sm:$0xff] }
0x1ee3   :  { %v8460_v9 = vpop.eup %8459 }
0x1ee5   :  { %v8462_v1 = vpop.eup %8461 }
0x1ee6   :  { %v5506_v30 = vsub.f32 1.0, %v8462_v1  ;;  %v5508_v38 = vmul.f32 %v8462_v1, %v12128_v59  ;;  %v12429_v1 = vld [vmem:[%s12765_s11 + $0x38] sm:$0xff] }
0x1f61   :  { %v7120_v45 = vpop.f32.mrf.mxu0 }
0x1f63   :  { %v7121_v54 = vpop.f32.mrf.mxu0 }
0x1f64   :  { %v12306_v17 = vadd.f32 %v7121_v54, %v7120_v45  ;;  %v12329_v45 = vld [vmem:[%s12765_s11 + $0xf8] sm:$0xff] }
0x1f65   :  { %v12334_v54 = vld [vmem:[%s12765_s11 + $0x78] sm:$0xff]  ;;  %7158 = vmatprep.subr.mxu1 %v12329_v45 }
0x1f66   :  { %13286 = vst [vmem:[#allocation61_spill] sm:$0xff] %v12306_v17 }
0x1f81   :  { %v5482_v58 = vpop.f32.mrf.mxu0 }
0x1f82   :  { %v5483_v3 = vadd.f32 %v5482_v58, %v10665_v32  ;;  %v12387_v58 = vld [vmem:[%s12765_s11 + $0xd0] sm:$0xff] }
0x1f83   :  { %v8127_v33 = vpop.f32.mrf.mxu0 }
0x1f84   :  { %v5503_v20 = vmul.f32 %v8460_v9, %v5483_v3  ;;  %v12393_v3 = vld [vmem:[%s12765_s11 + $0x50] sm:$0xff]  ;;  %v12399_v9 = vld [vmem:[%s12765_s11 + $0xc8] sm:$0xff] }
0x1f85   :  { %v12405_v33 = vld [vmem:[%s12765_s11 + $0x48] sm:$0xff] }
0x1f86   :  { %v5504_v51 = vadd.f32 %v5503_v20, %v13288_v53  ;;  %v12411_v20 = vld [vmem:[%s12765_s11 + $0xc0] sm:$0xff] }
0x1f87   :  { %v12417_v53 = vld [vmem:[%s12765_s11 + $0x40] sm:$0xff] }
0x1f88   :  { %8463 = vtanh.f32 %v5504_v51  ;;  %v12423_v51 = vld [vmem:[%s12765_s11 + $0xb8] sm:$0xff] }
0x1f95   :  { %v8464_v21 = vpop.eup %8463 }
0x1f96   :  { %v5507_v18 = vmul.f32 %v8464_v21, %v5506_v30  ;;  %v12435_v30 = vld [vmem:[%s12765_s11 + $0xb0] sm:$0xff] }
0x1f97   :  { %v12441_v21 = vld [vmem:[%s12765_s11 + $0x30] sm:$0xff] }
0x1f98   :  { %v12312_v42 = vadd.f32 %v5508_v38, %v5507_v18  ;;  %v12447_v18 = vld [vmem:[%s12765_s11 + $0xa8] sm:$0xff] }
0x1f99   :  { %v12453_v38 = vld [vmem:[%s12765_s11 + $0x28] sm:$0xff] }
0x1f9a   :  { %8145 = vmatmul.mubr.f32.vlgmr.msra.gmra.mxu1 %v12312_v42 }
0x1f9b   :  { %7159 = vmatpush3.msra.mxu1 %v12334_v54 }
0x1f9c   :  { %7160 = vmatprep.subr.mxu1 %v12339_v47 }
0x1f9d   :  { %7161 = vmatpush3.msra.mxu1 %v12345_v7 }
0x1f9e   :  { %7162 = vmatprep.subr.mxu1 %v12351_v52 }
0x1f9f   :  { %7163 = vmatpush3.msra.mxu1 %v12357_v14 }
0x1fa0   :  { %7164 = vmatprep.subr.mxu1 %v12363_v50 }
0x1fa1   :  { %7165 = vmatpush3.msra.mxu1 %v12369_v6 }
0x1fa2   :  { %7166 = vmatprep.subr.mxu1 %v12375_v13 }
0x1fa3   :  { %7167 = vmatpush3.msra.mxu1 %v12381_v57 }
0x1fa4   :  { %7168 = vmatprep.subr.mxu1 %v12387_v58 }
0x1fa5   :  { %7169 = vmatpush3.msra.mxu1 %v12393_v3 }
0x1fa6   :  { %7170 = vmatprep.subr.mxu1 %v12399_v9 }
0x1fa7   :  { %7171 = vmatpush3.msra.mxu1 %v12405_v33 }
0x1fa8   :  { %7172 = vmatprep.subr.mxu1 %v12411_v20 }
0x1fa9   :  { %7173 = vmatpush3.msra.mxu1 %v12417_v53 }
0x1faa   :  { %7174 = vmatprep.subr.mxu1 %v12423_v51 }
0x1fab   :  { %7175 = vmatpush3.msra.mxu1 %v12429_v1 }
0x1fac   :  { %7176 = vmatprep.subr.mxu1 %v12435_v30 }
0x1fad   :  { %7177 = vmatpush3.msra.mxu1 %v12441_v21 }
0x1fae   :  { %7178 = vmatprep.subr.mxu1 %v12447_v18 }
0x1faf   :  { %7179 = vmatpush3.msra.mxu1 %v12453_v38 }
0x205a   :  { %v5576_v62 = vpop.f32.mrf.mxu1 }
0x205b   :  { %v5577_v31 = vadd.f32 %v12318_v63, %v5576_v62  ;;  %v12459_v62 = vld [vmem:[%s12765_s11 + $0xa0] sm:$0xff] }
0x205c   :  { %v8146_v44 = vpop.f32.mrf.mxu1  ;;  %13290 = vst [vmem:[#allocation25_spill] sm:$0xff] %v12459_v62  ;;  %7180 = vmatprep.subr.mxu1 %v12459_v62  ;;  %v5793_v62 = vld [vmem:[#allocation6 + $0xc8] sm:$0xff] }
0x205d   :  { %v5580_v29 = vsel %vm2753_vm1, %v5577_v31, -inf  ;;  %v12471_v44 = vld [vmem:[%s12765_s11 + $0x98] sm:$0xff] }
0x205e   :  { %5581 = vmax.xlane.f32.xlu0 %v5580_v29  ;;  %13292 = vst [vmem:[#allocation12_spill] sm:$0xff] %v12471_v44  ;;  %v12477_v29 = vld [vmem:[%s12765_s11 + $0x18] sm:$0xff] }
0x205f   :  { %13293 = vst [vmem:[#allocation56_spill] sm:$0xff] %v12477_v29 }
0x20e7   :  { %v5582_v49 = vpop.xlane.xlu0 %5581 }
0x20e8   :  { %v5583_v39 = vsub.f32 %v5577_v31, %v5582_v49  ;;  %v12465_v31 = vld [vmem:[%s12765_s11 + $0x20] sm:$0xff]  ;;  %v12483_v49 = vld [vmem:[%s12765_s11 + $0x90] sm:$0xff] }
0x20e9   :  { %13291 = vst [vmem:[#allocation26_spill] sm:$0xff] %v12465_v31  ;;  %7181 = vmatpush3.msra.mxu1 %v12465_v31  ;;  %13294 = vst [vmem:[#allocation14_spill] sm:$0xff] %v12483_v49  ;;  %v5801_v31 = vld [vmem:[#allocation6 + $0x108] sm:$0xff] }
0x20ea   :  { %v5584_v61 = vmul.f32 1.442695, %v5583_v39  ;;  %7182 = vmatprep.subr.mxu1 %v12471_v44  ;;  %v12489_v39 = vld [vmem:[%s12765_s11 + $0x10] sm:$0xff]  ;;  %v5808_v44 = vld [vmem:[#allocation6 + $0x140] sm:$0xff] }
0x20eb   :  { %13295 = vst [vmem:[#allocation60_spill] sm:$0xff] %v12489_v39  ;;  %7183 = vmatpush3.msra.mxu1 %v12477_v29  ;;  %v5811_v29 = vld [vmem:[#allocation6 + $0x158] sm:$0xff] }
0x20ec   :  { %8465 = vpow2.f32 %v5584_v61  ;;  %v12495_v61 = vld [vmem:[%s12765_s11 + $0x88] sm:$0xff]  ;;  %7184 = vmatprep.subr.mxu1 %v12483_v49 }
0x20ed   :  { %13296 = vst [vmem:[#allocation54_spill] sm:$0xff] %v12495_v61  ;;  %7185 = vmatpush3.msra.mxu1 %v12489_v39  ;;  %v5813_v49 = vld [vmem:[#allocation6 + $0x168] sm:$0xff]  ;;  %v5810_v39 = vld [vmem:[#allocation6 + $0x150] sm:$0xff] }
0x20ee   :  { %7186 = vmatprep.subr.mxu1 %v12495_v61  ;;  %v5807_v61 = vld [vmem:[#allocation6 + $0x138] sm:$0xff] }
0x20f9   :  { %v12322_v59 = vpop.eup %8465 }
0x20fa   :  { %v5586_v25 = vsel %vm2753_vm1, %v12322_v59, 0.0 }
0x20fb   :  { %5587 = vadd.xlane.f32.xlu1 %v5586_v25  ;;  %v12501_v25 = vld [vmem:[%s12765_s11 + $0x8] sm:$0xff] }
0x20fc   :  { %13297 = vst [vmem:[#allocation62_spill] sm:$0xff] %v12501_v25  ;;  %7187 = vmatpush3.msra.mxu1 %v12501_v25  ;;  %v5805_v25 = vld [vmem:[#allocation6 + $0x128] sm:$0xff] }
0x20fd   :  { %7188 = vmatprep.subr.mxu1 %v12507_v34  ;;  %v5804_v34 = vld [vmem:[#allocation6 + $0x120] sm:$0xff] }
0x2184   :  { %v5588_v17 = vpop.xlane.xlu1 %5587 }
0x2185   :  { %8467 = vrcp.f32 %v5588_v17  ;;  %v5802_v17 = vld [vmem:[#allocation6 + $0x110] sm:$0xff] }
0x2192   :  { %v8468_v41 = vpop.eup %8467 }
0x2193   :  { %v5590_v63 = vmul.f32 %v8468_v41, %v12322_v59  ;;  %v5799_v41 = vld [vmem:[#allocation6 + $0xf8] sm:$0xff]  ;;  %v5798_v59 = vld [vmem:[#allocation6 + $0xf0] sm:$0xff] }
0x2195   :  { %8164 = vmatmul.mubr.msk.f32.vlgmr.msra.gmra.mxu0 %vm2753_vm1, %v5590_v63  ;;  %v5796_v63 = vld [vmem:[#allocation6 + $0xe0] sm:$0xff] }
0x2196   :  { %5817 = vmatpush1.msra.mxu0 %v5813_v49  ;;  %5880 = vmatprep.mubr.f32.mxu0 %v12989_v5  ;;  %v5795_v49 = vld [vmem:[#allocation6 + $0xd8] sm:$0xff] }
0x2197   :  { %5818 = vmatprep.subr.mxu0 %v5811_v29  ;;  %v5792_v29 = vld [vmem:[#allocation6 + $0xc0] sm:$0xff] }
0x2198   :  { %5819 = vmatpush1.msra.mxu0 %v5810_v39  ;;  %v5790_v39 = vld [vmem:[#allocation6 + $0xb0] sm:$0xff] }
0x2199   :  { %5820 = vmatprep.subr.mxu0 %v5808_v44  ;;  %v5789_v44 = vld [vmem:[#allocation6 + $0xa8] sm:$0xff] }
0x219a   :  { %5821 = vmatpush1.msra.mxu0 %v5807_v61  ;;  %v5787_v61 = vld [vmem:[#allocation6 + $0x98] sm:$0xff] }
0x219b   :  { %5822 = vmatprep.subr.mxu0 %v5805_v25  ;;  %v5786_v25 = vld [vmem:[#allocation6 + $0x90] sm:$0xff] }
0x219c   :  { %5823 = vmatpush1.msra.mxu0 %v5804_v34  ;;  %v5784_v34 = vld [vmem:[#allocation6 + $0x80] sm:$0xff] }
0x219d   :  { %5824 = vmatprep.subr.mxu0 %v5802_v17  ;;  %v5783_v17 = vld [vmem:[#allocation6 + $0x78] sm:$0xff] }
0x219e   :  { %5825 = vmatpush1.msra.mxu0 %v5801_v31  ;;  %v5781_v31 = vld [vmem:[#allocation6 + $0x68] sm:$0xff] }
0x219f   :  { %5826 = vmatprep.subr.mxu0 %v5799_v41  ;;  %v5780_v41 = vld [vmem:[#allocation6 + $0x60] sm:$0xff] }
0x21a0   :  { %5827 = vmatpush1.msra.mxu0 %v5798_v59  ;;  %v5778_v59 = vld [vmem:[#allocation6 + $0x50] sm:$0xff] }
0x21a1   :  { %5828 = vmatprep.subr.mxu0 %v5796_v63  ;;  %v5777_v63 = vld [vmem:[#allocation6 + $0x48] sm:$0xff] }
0x21a2   :  { %5829 = vmatpush1.msra.mxu0 %v5795_v49  ;;  %v5775_v49 = vld [vmem:[#allocation6 + $0x38] sm:$0xff] }
0x21a3   :  { %5830 = vmatprep.subr.mxu0 %v5793_v62  ;;  %v5774_v62 = vld [vmem:[#allocation6 + $0x30] sm:$0xff] }
0x21a4   :  { %5831 = vmatpush1.msra.mxu0 %v5792_v29  ;;  %v5772_v29 = vld [vmem:[#allocation6 + $0x20] sm:$0xff] }
0x21a5   :  { %5832 = vmatprep.subr.mxu0 %v5790_v39  ;;  %v5771_v39 = vld [vmem:[#allocation6 + $0x18] sm:$0xff] }
0x21a6   :  { %5833 = vmatpush1.msra.mxu0 %v5789_v44  ;;  %v5769_v44 = vld [vmem:[#allocation6 + $0x8] sm:$0xff] }
0x21a7   :  { %5834 = vmatprep.subr.mxu0 %v5787_v61  ;;  %v5768_v61 = vld [vmem:[#allocation6] sm:$0xff] }
0x21a8   :  { %5835 = vmatpush1.msra.mxu0 %v5786_v25  ;;  %v12538_v25 = vld [vmem:[%s12765_s11] sm:$0xff] }
0x21a9   :  { %5836 = vmatprep.subr.mxu0 %v5784_v34  ;;  %7189 = vmatpush3.msra.mxu1 %v12538_v25 }
0x21aa   :  { %5837 = vmatpush1.msra.mxu0 %v5783_v17  ;;  %8166 = vmatprep.subr.mxu1 %v12989_v5 }
0x21ab   :  { %5838 = vmatprep.subr.mxu0 %v5781_v31 }
0x21ac   :  { %5839 = vmatpush1.msra.mxu0 %v5780_v41 }
0x21ad   :  { %5840 = vmatprep.subr.mxu0 %v5778_v59 }
0x21ae   :  { %5841 = vmatpush1.msra.mxu0 %v5777_v63 }
0x21af   :  { %5842 = vmatprep.subr.mxu0 %v5775_v49 }
0x21b0   :  { %5843 = vmatpush1.msra.mxu0 %v5774_v62  ;;  %v6261_v62 = vld [vmem:[#allocation8 + $0x70] sm:$0xff] }
0x21b1   :  { %5844 = vmatprep.subr.mxu0 %v5772_v29 }
0x21b2   :  { %5845 = vmatpush1.msra.mxu0 %v5771_v39  ;;  %v6260_v39 = vld [vmem:[#allocation8 + $0x68] sm:$0xff] }
0x21b3   :  { %5846 = vmatprep.subr.mxu0 %v5769_v44  ;;  %v6259_v44 = vld [vmem:[#allocation8 + $0x60] sm:$0xff] }
0x21b4   :  { %5847 = vmatpush1.msra.mxu0 %v5768_v61  ;;  %v6258_v61 = vld [vmem:[#allocation8 + $0x58] sm:$0xff] }
0x21b5   :  { %5881 = vmatmul.mubr.f32.vlgmr.msra.gmra.mxu0 %v12312_v42  ;;  %8201 = vmatprep.subr.mxu0 %v12989_v5 }
0x21b6   :  { %8202 = vmatpush3.xpose.msra.mxu0 %v13134_v48  ;;  %8217 = vmatprep.mubr.msk.f32.mxu0 %vm8584_vm0, %v12989_v5 }
0x21b7   :  { %8203 = vmatprep.subr.mxu0 %v12989_v5 }
0x21ba   :  { %8204 = vmatpush3.xpose.msra.mxu0 %v13135_v2 }
0x21bb   :  { %8205 = vmatprep.subr.mxu0 %v12989_v5 }
0x21be   :  { %8206 = vmatpush3.xpose.msra.mxu0 %v13136_v60 }
0x21bf   :  { %8207 = vmatprep.subr.mxu0 %v12989_v5 }
0x21c2   :  { %8208 = vmatpush3.xpose.msra.mxu0 %v13137_v56 }
0x21c3   :  { %8209 = vmatprep.subr.mxu0 %v12989_v5 }
0x21c6   :  { %8210 = vmatpush3.xpose.msra.mxu0 %v13138_v43 }
0x21c7   :  { %8211 = vmatprep.subr.mxu0 %v12989_v5 }
0x21ca   :  { %8212 = vmatpush3.xpose.msra.mxu0 %v13139_v19 }
0x21cb   :  { %8213 = vmatprep.subr.mxu0 %v12989_v5 }
0x21ce   :  { %8214 = vmatpush3.xpose.msra.mxu0 %v13140_v27 }
0x21cf   :  { %8215 = vmatprep.subr.mxu0 %v12989_v5 }
0x21d2   :  { %8216 = vmatpush3.xpose.msra.mxu0 %v13141_v11 }
0x21d3   :  { %7228 = vmatprep.subr.mxu0 %v12329_v45 }
0x2255   :  { %v5660_v34 = vpop.f32.mrf.mxu0 }
0x2256   :  { %5760 = vmatprep.mubr.f32.mxu1 %v5660_v34  ;;  %v6256_v34 = vld [vmem:[#allocation8 + $0x48] sm:$0xff] }
0x2257   :  { %v8165_v17 = vpop.f32.mrf.mxu0  ;;  %5761 = vmatmul.mubr.f32.vlgmr.msra.gmra.mxu1 %v12312_v42 }
0x2258   :  { %8167 = vmatpush3.msra.mxu1 %v12218_v4  ;;  %8198 = vmatprep.mubr.msk.f32.mxu1 %vm8584_vm0, %v12989_v5  ;;  %v6255_v17 = vld [vmem:[#allocation8 + $0x40] sm:$0xff] }
0x2259   :  { %8168 = vmatprep.subr.mxu1 %v12989_v5 }
0x225a   :  { %8169 = vmatpush3.msra.mxu1 %v12221_v46 }
0x225b   :  { %8170 = vmatprep.subr.mxu1 %v12989_v5 }
0x225c   :  { %8171 = vmatpush3.msra.mxu1 %v12227_v10 }
0x225d   :  { %8172 = vmatprep.subr.mxu1 %v12989_v5 }
0x225e   :  { %8173 = vmatpush3.msra.mxu1 %v12231_v15 }
0x225f   :  { %8174 = vmatprep.subr.mxu1 %v12989_v5 }
0x2260   :  { %8175 = vmatpush3.msra.mxu1 %v12235_v55  ;;  %v13300_v55 = vld [vmem:[#allocation59_spill] sm:$0xff] }
0x2261   :  { %8176 = vmatprep.subr.mxu1 %v12989_v5 }
0x2262   :  { %8177 = vmatpush3.msra.mxu1 %v12239_v8 }
0x2263   :  { %8178 = vmatprep.subr.mxu1 %v12989_v5 }
0x2264   :  { %8179 = vmatpush3.msra.mxu1 %v12243_v23 }
0x2265   :  { %8180 = vmatprep.subr.mxu1 %v12989_v5 }
0x2266   :  { %8181 = vmatpush3.msra.mxu1 %v12247_v37 }
0x2267   :  { %8182 = vmatprep.subr.mxu1 %v12989_v5 }
0x2268   :  { %8183 = vmatpush3.msra.mxu1 %v12251_v36 }
0x2269   :  { %8184 = vmatprep.subr.mxu1 %v12989_v5 }
0x226a   :  { %8185 = vmatpush3.msra.mxu1 %v12255_v26 }
0x226b   :  { %8186 = vmatprep.subr.mxu1 %v12989_v5 }
0x226c   :  { %8187 = vmatpush3.msra.mxu1 %v12259_v12 }
0x226d   :  { %8188 = vmatprep.subr.mxu1 %v12989_v5 }
0x226e   :  { %8189 = vmatpush3.msra.mxu1 %v12263_v40 }
0x226f   :  { %8190 = vmatprep.subr.mxu1 %v12989_v5 }
0x2270   :  { %8191 = vmatpush3.msra.mxu1 %v12267_v16  ;;  %v13301_v16 = vld [vmem:[#allocation69_spill] sm:$0xff] }
0x2271   :  { %8192 = vmatprep.subr.mxu1 %v12989_v5 }
0x2272   :  { %8193 = vmatpush3.msra.mxu1 %v12271_v24 }
0x2273   :  { %8194 = vmatprep.subr.mxu1 %v12989_v5 }
0x2274   :  { %8195 = vmatpush3.msra.mxu1 %v12275_v22 }
0x2275   :  { %8196 = vmatprep.subr.mxu1 %v12989_v5 }
0x2276   :  { %8197 = vmatpush3.msra.mxu1 %v12279_v28 }
0x2277   :  { %8199 = vmatmul.mubr.f32.vlgmr.msra.gmra.mxu1 %v12312_v42  ;;  %8220 = vmatprep.subr.mxu1 %v12989_v5 }
0x2278   :  { %8221 = vmatpush3.msra.mxu1 %v13134_v48  ;;  %8236 = vmatprep.mubr.msk.f32.mxu1 %vm8584_vm0, %v12989_v5  ;;  %v5882_v48 = vpop.f32.mrf.mxu0 }
0x2279   :  { %8222 = vmatprep.subr.mxu1 %v12989_v5 }
0x227a   :  { %8223 = vmatpush3.msra.mxu1 %v13135_v2  ;;  %v5883_v2 = vadd.f32 %v5882_v48, %v13142_v35  ;;  %v5884_v46 = vpop.f32.mrf.mxu0  ;;  %v6254_v48 = vld [vmem:[#allocation8 + $0x38] sm:$0xff] }
0x227b   :  { %8224 = vmatprep.subr.mxu1 %v12989_v5 }
0x227c   :  { %8225 = vmatpush3.msra.mxu1 %v13136_v60  ;;  %v13299_v60 = vld [vmem:[#allocation57_spill] sm:$0xff] }
0x227d   :  { %8226 = vmatprep.subr.mxu1 %v12989_v5 }
0x227e   :  { %8227 = vmatpush3.msra.mxu1 %v13137_v56  ;;  %v5960_v56 = vadd.f32 %v5883_v2, %v13299_v60  ;;  %v13313_v2 = vld [vmem:[#allocation39_spill] sm:$0xff] }
0x227f   :  { %8228 = vmatprep.subr.mxu1 %v12989_v5 }
0x2280   :  { %8229 = vmatpush3.msra.mxu1 %v13138_v43  ;;  %v6515_v4 = vmul.f32 -1.442695, %v5960_v56  ;;  %v13314_v56 = vld [vmem:[#allocation18_spill] sm:$0xff] }
0x2281   :  { %8230 = vmatprep.subr.mxu1 %v12989_v5 }
0x2282   :  { %8231 = vmatpush3.msra.mxu1 %v13139_v19  ;;  %8469 = vpow2.f32 %v6515_v4  ;;  %v5885_v19 = vadd.f32 %v5884_v46, %v13109_v0  ;;  %v6253_v46 = vld [vmem:[#allocation8 + $0x30] sm:$0xff] }
0x2283   :  { %8232 = vmatprep.subr.mxu1 %v12989_v5 }
0x2284   :  { %8233 = vmatpush3.msra.mxu1 %v13140_v27  ;;  %v5967_v27 = vadd.f32 %v5885_v19, %v13300_v55  ;;  %v13316_v55 = vld [vmem:[#allocation29_spill] sm:$0xff] }
0x2285   :  { %8234 = vmatprep.subr.mxu1 %v12989_v5 }
0x2286   :  { %8235 = vmatpush3.msra.mxu1 %v13141_v11  ;;  %v6516_v8 = vmul.f32 -1.442695, %v5967_v27 }
0x2288   :  { %8471 = vpow2.f32 %v6516_v8  ;;  %v6251_v8 = vld [vmem:[#allocation8 + $0x20] sm:$0xff] }
0x228f   :  { %v8470_v5 = vpop.eup %8469 }
0x2290   :  { %v5964_v11 = vadd.f32 1.0, %v8470_v5  ;;  %v6250_v5 = vld [vmem:[#allocation8 + $0x18] sm:$0xff] }
0x2292   :  { %8473 = vrcp.f32 %v5964_v11  ;;  %v13317_v11 = vld [vmem:[#allocation61_spill] sm:$0xff] }
0x2295   :  { %v8472_v23 = vpop.eup %8471 }
0x2296   :  { %v5971_v35 = vadd.f32 1.0, %v8472_v23 }
0x2298   :  { %8475 = vrcp.f32 %v5971_v35 }
0x229f   :  { %v8474_v26 = vpop.eup %8473 }
0x22a5   :  { %v8476_v24 = vpop.eup %8475 }
0x22a6   :  { %v5977_v22 = vsub.f32 1.0, %v8476_v24  ;;  %v5979_v31 = vmul.f32 %v8476_v24, %v12312_v42  ;;  %v13303_v42 = vld [vmem:[#allocation26_spill] sm:$0xff] }
0x2317   :  { %v7190_v43 = vpop.f32.mrf.mxu1 }
0x2319   :  { %v7191_v10 = vpop.f32.mrf.mxu1 }
0x231a   :  { %v12598_v15 = vadd.f32 %v7191_v10, %v7190_v43  ;;  %v6252_v43 = vld [vmem:[#allocation8 + $0x28] sm:$0xff]  ;;  %v13315_v10 = vld [vmem:[#allocation31_spill] sm:$0xff] }
0x2337   :  { %v5953_v37 = vpop.f32.mrf.mxu1 }
0x2338   :  { %v5954_v36 = vadd.f32 %v5953_v37, %v10665_v32  ;;  %v13302_v32 = vld [vmem:[#allocation25_spill] sm:$0xff]  ;;  %v6249_v37 = vld [vmem:[#allocation8 + $0x10] sm:$0xff] }
0x2339   :  { %v8200_v12 = vpop.f32.mrf.mxu1 }
0x233a   :  { %v5974_v40 = vmul.f32 %v8474_v26, %v5954_v36  ;;  %v6248_v36 = vld [vmem:[#allocation8 + $0x8] sm:$0xff]  ;;  %v6247_v26 = vld [vmem:[#allocation8] sm:$0xff] }
0x233c   :  { %v5975_v0 = vadd.f32 %v5974_v40, %v13301_v16 }
0x233e   :  { %8477 = vtanh.f32 %v5975_v0 }
0x234b   :  { %v8478_v28 = vpop.eup %8477 }
0x234c   :  { %v5978_v45 = vmul.f32 %v8478_v28, %v5977_v22 }
0x234e   :  { %v12604_v41 = vadd.f32 %v5979_v31, %v5978_v45  ;;  %v6518_v45 = vld [vmem:[%s12768_s14] ss:$0 sm:$0xff] }
0x2350   :  { %8218 = vmatmul.mubr.f32.vlgmr.msra.gmra.mxu0 %v12604_v41 }
0x2351   :  { %7229 = vmatpush3.msra.mxu0 %v12334_v54  ;;  %v13304_v54 = vld [vmem:[#allocation12_spill] sm:$0xff] }
0x2352   :  { %7230 = vmatprep.subr.mxu0 %v12339_v47  ;;  %v13305_v47 = vld [vmem:[#allocation56_spill] sm:$0xff] }
0x2353   :  { %7231 = vmatpush3.msra.mxu0 %v12345_v7  ;;  %v13306_v7 = vld [vmem:[#allocation14_spill] sm:$0xff] }
0x2354   :  { %7232 = vmatprep.subr.mxu0 %v12351_v52  ;;  %v13307_v52 = vld [vmem:[#allocation60_spill] sm:$0xff] }
0x2355   :  { %7233 = vmatpush3.msra.mxu0 %v12357_v14  ;;  %v13308_v14 = vld [vmem:[#allocation54_spill] sm:$0xff] }
0x2356   :  { %7234 = vmatprep.subr.mxu0 %v12363_v50  ;;  %v13309_v50 = vld [vmem:[#allocation62_spill] sm:$0xff] }
0x2357   :  { %7235 = vmatpush3.msra.mxu0 %v12369_v6  ;;  %v13310_v6 = vld [vmem:[#allocation74_spill] sm:$0xff] }
0x2358   :  { %7236 = vmatprep.subr.mxu0 %v12375_v13 }
0x2359   :  { %7237 = vmatpush3.msra.mxu0 %v12381_v57  ;;  %v13311_v57 = vld [vmem:[#allocation64_spill] sm:$0xff] }
0x235a   :  { %7238 = vmatprep.subr.mxu0 %v12387_v58 }
0x235b   :  { %7239 = vmatpush3.msra.mxu0 %v12393_v3 }
0x235c   :  { %7240 = vmatprep.subr.mxu0 %v12399_v9 }
0x235d   :  { %7241 = vmatpush3.msra.mxu0 %v12405_v33 }
0x235e   :  { %7242 = vmatprep.subr.mxu0 %v12411_v20 }
0x235f   :  { %7243 = vmatpush3.msra.mxu0 %v12417_v53 }
0x2360   :  { %7244 = vmatprep.subr.mxu0 %v12423_v51 }
0x2361   :  { %7245 = vmatpush3.msra.mxu0 %v12429_v1 }
0x2362   :  { %7246 = vmatprep.subr.mxu0 %v12435_v30  ;;  %v6262_v30 = vld [vmem:[#allocation8 + $0x78] sm:$0xff] }
0x2363   :  { %7247 = vmatpush3.msra.mxu0 %v12441_v21  ;;  %8239 = vmatprep.subr.mxu1 %v6262_v30  ;;  %v12644_v21 = vld [vmem:[%s12766_s12] ss:$0 sm:$0xff] }
0x2364   :  { %7248 = vmatprep.subr.mxu0 %v12447_v18  ;;  %v13312_v18 = vld [vmem:[#allocation19_spill] sm:$0xff]  ;;  %v3408_v60 = vadd.f32 %v13313_v2, %v12644_v21  ;;  %v3879_v4 = vadd.f32 %v13314_v56, %v12644_v21  ;;  %v4350_v19 = vadd.f32 %v13315_v10, %v12644_v21  ;;  %v4821_v27 = vadd.f32 %v13316_v55, %v12644_v21 }
0x2365   :  { %7249 = vmatpush3.msra.mxu0 %v12453_v38  ;;  %v2937_v38 = vadd.f32 %v13312_v18, %v12644_v21  ;;  %v5292_v23 = vadd.f32 %v13317_v11, %v12644_v21  ;;  %v5763_v35 = vadd.f32 %v12598_v15, %v12644_v21 }
0x2366   :  { %7250 = vmatprep.subr.mxu0 %v13302_v32 }
0x2367   :  { %7251 = vmatpush3.msra.mxu0 %v13303_v42 }
0x2368   :  { %7252 = vmatprep.subr.mxu0 %v13304_v54 }
0x2369   :  { %7253 = vmatpush3.msra.mxu0 %v13305_v47 }
0x236a   :  { %7254 = vmatprep.subr.mxu0 %v13306_v7 }
0x236b   :  { %7255 = vmatpush3.msra.mxu0 %v13307_v52 }
0x236c   :  { %7256 = vmatprep.subr.mxu0 %v13308_v14 }
0x236d   :  { %7257 = vmatpush3.msra.mxu0 %v13309_v50 }
0x236e   :  { %7258 = vmatprep.subr.mxu0 %v13310_v6 }
0x236f   :  { %7259 = vmatpush3.msra.mxu0 %v12538_v25  ;;  %v6257_v25 = vld [vmem:[#allocation8 + $0x50] sm:$0xff] }
0x2410   :  { %v6047_v13 = vpop.f32.mrf.mxu0 }
0x2411   :  { %v6048_v58 = vadd.f32 %v13311_v57, %v6047_v13 }
0x2412   :  { %v8219_v3 = vpop.f32.mrf.mxu0 }
0x2413   :  { %v6051_v9 = vsel %vm2753_vm1, %v6048_v58, -inf }
0x2414   :  { %6052 = vmax.xlane.f32.xlu0 %v6051_v9 }
0x249d   :  { %v6053_v33 = vpop.xlane.xlu0 %6052 }
0x249e   :  { %v6054_v20 = vsub.f32 %v6048_v58, %v6053_v33 }
0x24a0   :  { %v6055_v53 = vmul.f32 1.442695, %v6054_v20 }
0x24a2   :  { %8479 = vpow2.f32 %v6055_v53 }
0x24af   :  { %v8480_v51 = vpop.eup %8479 }
0x24b0   :  { %v6057_v1 = vsel %vm2753_vm1, %v8480_v51, 0.0 }
0x24b1   :  { %6058 = vadd.xlane.f32.xlu1 %v6057_v1 }
0x253a   :  { %v6059_v59 = vpop.xlane.xlu1 %6058 }
0x253b   :  { %8481 = vrcp.f32 %v6059_v59 }
0x253c   :  { %8483 = vtanh.f32 %v2937_v38 }
0x253d   :  { %8485 = vtanh.f32 %v3408_v60 }
0x253e   :  { %8487 = vtanh.f32 %v3879_v4 }
0x253f   :  { %8489 = vtanh.f32 %v4350_v19 }
0x2540   :  { %8491 = vtanh.f32 %v4821_v27 }
0x2541   :  { %8493 = vtanh.f32 %v5292_v23 }
0x2542   :  { %8495 = vtanh.f32 %v5763_v35 }
0x2548   :  { %v8482_v63 = vpop.eup %8481 }
0x2549   :  { %v6061_v49 = vmul.f32 %v8482_v63, %v8480_v51  ;;  %v8484_v29 = vpop.eup %8483 }
0x254a   :  { %v8486_v12 = vpop.eup %8485 }
0x254b   :  { %8237 = vmatmul.mubr.msk.f32.vlgmr.msra.gmra.mxu1 %vm2753_vm1, %v6061_v49  ;;  %v8488_v40 = vpop.eup %8487 }
0x254c   :  { %8240 = vmatpush3.msra.mxu1 %v6262_v30  ;;  %8271 = vmatprep.mubr.f32.mxu1 %v8484_v29  ;;  %v8490_v16 = vpop.eup %8489 }
0x254d   :  { %8241 = vmatprep.subr.mxu1 %v6261_v62  ;;  %v8492_v15 = vpop.eup %8491 }
0x254e   :  { %8242 = vmatpush3.msra.mxu1 %v6261_v62  ;;  %v8494_v0 = vpop.eup %8493 }
0x254f   :  { %8243 = vmatprep.subr.mxu1 %v6260_v39  ;;  %v8496_v24 = vpop.eup %8495 }
0x2550   :  { %8244 = vmatpush3.msra.mxu1 %v6260_v39 }
0x2551   :  { %8245 = vmatprep.subr.mxu1 %v6259_v44 }
0x2552   :  { %8246 = vmatpush3.msra.mxu1 %v6259_v44 }
0x2553   :  { %8247 = vmatprep.subr.mxu1 %v6258_v61 }
0x2554   :  { %8248 = vmatpush3.msra.mxu1 %v6258_v61 }
0x2555   :  { %8249 = vmatprep.subr.mxu1 %v6257_v25 }
0x2556   :  { %8250 = vmatpush3.msra.mxu1 %v6257_v25 }
0x2557   :  { %8251 = vmatprep.subr.mxu1 %v6256_v34 }
0x2558   :  { %8252 = vmatpush3.msra.mxu1 %v6256_v34 }
0x2559   :  { %8253 = vmatprep.subr.mxu1 %v6255_v17 }
0x255a   :  { %8254 = vmatpush3.msra.mxu1 %v6255_v17 }
0x255b   :  { %8255 = vmatprep.subr.mxu1 %v6254_v48 }
0x255c   :  { %8256 = vmatpush3.msra.mxu1 %v6254_v48 }
0x255d   :  { %8257 = vmatprep.subr.mxu1 %v6253_v46 }
0x255e   :  { %8258 = vmatpush3.msra.mxu1 %v6253_v46 }
0x255f   :  { %8259 = vmatprep.subr.mxu1 %v6252_v43 }
0x2560   :  { %8260 = vmatpush3.msra.mxu1 %v6252_v43 }
0x2561   :  { %8261 = vmatprep.subr.mxu1 %v6251_v8 }
0x2562   :  { %8262 = vmatpush3.msra.mxu1 %v6251_v8 }
0x2563   :  { %8263 = vmatprep.subr.mxu1 %v6250_v5 }
0x2564   :  { %8264 = vmatpush3.msra.mxu1 %v6250_v5 }
0x2565   :  { %8265 = vmatprep.subr.mxu1 %v6249_v37 }
0x2566   :  { %8266 = vmatpush3.msra.mxu1 %v6249_v37 }
0x2567   :  { %8267 = vmatprep.subr.mxu1 %v6248_v36 }
0x2568   :  { %8268 = vmatpush3.msra.mxu1 %v6248_v36 }
0x2569   :  { %8269 = vmatprep.subr.mxu1 %v6247_v26 }
0x256a   :  { %8270 = vmatpush3.msra.mxu1 %v6247_v26 }
0x256b   :  { %8272 = vmatmul.mubr.f32.vlgmr.msra.gmra.mxu1 %v8486_v12 }
0x256c   :  { %8274 = vmatprep.mubr.f32.mxu1 %v8488_v40 }
0x256f   :  { %8275 = vmatmul.mubr.f32.gmra.mxu1 %v8490_v16 }
0x2570   :  { %8277 = vmatprep.mubr.f32.mxu1 %v8492_v15 }
0x2573   :  { %8278 = vmatmul.mubr.f32.gmra.mxu1 %v8494_v0 }
0x2574   :  { %8280 = vmatprep.mubr.f32.mxu1 %v8496_v24 }
0x260b   :  { %v6131_v22 = vpop.f32.mrf.mxu1 }
0x260c   :  { %6231 = vmatprep.mubr.f32.mxu0 %v6131_v22 }
0x260d   :  { %v8238_v28 = vpop.f32.mrf.mxu1  ;;  %6232 = vmatmul.mubr.f32.vlgmr.msra.gmra.mxu0 %v12604_v41 }
0x262b   :  { %v8273_v31 = vpop.f32.mrf.mxu1 }
0x262c   :  { %v12665_v32 = vadd.f32 %v8273_v31, %v6518_v45 }
0x262d   :  { %v6336_v42 = vpop.f32.mrf.mxu1 }
0x262e   :  { %v12667_v54 = vadd.f32 %v6518_v45, %v6336_v42  ;;  %6377 = vmax.xlane.f32.xlu1 %v12665_v32 }
0x262f   :  { %v8276_v47 = vpop.f32.mrf.mxu1 }
0x2630   :  { %v12670_v7 = vadd.f32 %v8276_v47, %v6518_v45  ;;  %6375 = vmax.xlane.f32.xlu0 %v12667_v54 }
0x2631   :  { %v6346_v52 = vpop.f32.mrf.mxu1 }
0x2632   :  { %v12673_v14 = vadd.f32 %v6518_v45, %v6346_v52  ;;  %6381 = vmax.xlane.f32.xlu1 %v12670_v7 }
0x2633   :  { %v8279_v41 = vpop.f32.mrf.mxu1 }
0x2634   :  { %v12676_v50 = vadd.f32 %v8279_v41, %v6518_v45  ;;  %6379 = vmax.xlane.f32.xlu0 %v12673_v14 }
0x2635   :  { %v6356_v6 = vpop.f32.mrf.mxu1 }
0x2636   :  { %v12679_v13 = vadd.f32 %v6518_v45, %v6356_v6  ;;  %6385 = vmax.xlane.f32.xlu1 %v12676_v50 }
0x2638   :  { %6383 = vmax.xlane.f32.xlu0 %v12679_v13 }
0x26b7   :  { %v12684_v20 = vpop.xlane.xlu1 %6377 }
0x26b8   :  { %v6392_v1 = vsub.f32 %v12665_v32, %v12684_v20 }
0x26b9   :  { %v12686_v53 = vpop.xlane.xlu0 %6375 }
0x26ba   :  { %v6391_v18 = vsub.f32 %v12667_v54, %v12686_v53  ;;  %v6401_v38 = vmul.f32 1.442695, %v6392_v1 }
0x26bb   :  { %v12688_v51 = vpop.xlane.xlu1 %6381 }
0x26bc   :  { %v6399_v63 = vmul.f32 1.442695, %v6391_v18 }
0x26bd   :  { %v12692_v30 = vpop.xlane.xlu0 %6379 }
0x26be   :  { %v6393_v49 = vsub.f32 %v12673_v14, %v12692_v30 }
0x26bf   :  { %v12698_v59 = vpop.xlane.xlu1 %6385 }
0x26c0   :  { %v6396_v39 = vsub.f32 %v12676_v50, %v12698_v59  ;;  %v6403_v44 = vmul.f32 1.442695, %v6393_v49 }
0x26c1   :  { %v12702_v62 = vpop.xlane.xlu0 %6383 }
0x26c2   :  { %v6395_v61 = vsub.f32 %v12679_v13, %v12702_v62  ;;  %v6409_v25 = vmul.f32 1.442695, %v6396_v39 }
0x26c4   :  { %v6407_v34 = vmul.f32 1.442695, %v6395_v61 }
0x26cd   :  { %v7260_v57 = vpop.f32.mrf.mxu0 }
0x26cf   :  { %v7261_v58 = vpop.f32.mrf.mxu0 }
0x26d0   :  { %v7262_v3 = vadd.f32 %v7261_v58, %v7260_v57 }
0x26d2   :  { %v6234_v9 = vadd.f32 %v7262_v3, %v12644_v21  ;;  %v6394_v21 = vsub.f32 %v12670_v7, %v12688_v51 }
0x26d4   :  { %8497 = vtanh.f32 %v6234_v9  ;;  %v6405_v29 = vmul.f32 1.442695, %v6394_v21 }
0x26d5   :  { %8499 = vpow2.f32 %v6401_v38 }
0x26d6   :  { %8501 = vpow2.f32 %v6399_v63 }
0x26d7   :  { %8503 = vpow2.f32 %v6405_v29 }
0x26d8   :  { %8505 = vpow2.f32 %v6403_v44 }
0x26d9   :  { %8507 = vpow2.f32 %v6409_v25 }
0x26da   :  { %8509 = vpow2.f32 %v6407_v34 }
0x26e1   :  { %v8498_v33 = vpop.eup %8497 }
0x26e2   :  { %8281 = vmatmul.mubr.f32.gmra.mxu1 %v8498_v33  ;;  %v8500_v56 = vpop.eup %8499 }
0x26e3   :  { %v8502_v4 = vpop.eup %8501 }
0x26e4   :  { %v8504_v46 = vpop.eup %8503 }
0x26e5   :  { %v8506_v43 = vpop.eup %8505 }
0x26e6   :  { %v8508_v10 = vpop.eup %8507 }
0x26e7   :  { %v8510_v19 = vpop.eup %8509 }
0x27a2   :  { %v8282_v17 = vpop.f32.mrf.mxu1 }
0x27a3   :  { %v12708_v48 = vadd.f32 %v8282_v17, %v6518_v45 }
0x27a4   :  { %v6366_v2 = vpop.f32.mrf.mxu1 }
0x27a5   :  { %v12710_v60 = vadd.f32 %v6518_v45, %v6366_v2  ;;  %6389 = vmax.xlane.f32.xlu1 %v12708_v48 }
0x27a7   :  { %6387 = vmax.xlane.f32.xlu0 %v12710_v60 }
0x27a9   :  { %6417 = vadd.xlane.f32.xlu1 %v8500_v56 }
0x27ab   :  { %6415 = vadd.xlane.f32.xlu0 %v8502_v4 }
0x27ad   :  { %6421 = vadd.xlane.f32.xlu1 %v8504_v46 }
0x27af   :  { %6419 = vadd.xlane.f32.xlu0 %v8506_v43 }
0x27b1   :  { %6425 = vadd.xlane.f32.xlu1 %v8508_v10 }
0x27b3   :  { %6423 = vadd.xlane.f32.xlu0 %v8510_v19 }
0x282e   :  { %v6390_v55 = vpop.xlane.xlu1 %6389 }
0x282f   :  { %v6398_v27 = vsub.f32 %v12708_v48, %v6390_v55 }
0x2830   :  { %v6388_v8 = vpop.xlane.xlu0 %6387 }
0x2831   :  { %v6413_v5 = vmul.f32 1.442695, %v6398_v27  ;;  %v6397_v11 = vsub.f32 %v12710_v60, %v6388_v8 }
0x2832   :  { %v6418_v23 = vpop.xlane.xlu1 %6417 }
0x2833   :  { %8511 = vpow2.f32 %v6413_v5  ;;  %v6411_v35 = vmul.f32 1.442695, %v6397_v11 }
0x2834   :  { %8513 = vlog2.f32 %v6418_v23  ;;  %v6416_v37 = vpop.xlane.xlu0 %6415 }
0x2835   :  { %8515 = vpow2.f32 %v6411_v35 }
0x2836   :  { %8517 = vlog2.f32 %v6416_v37  ;;  %v6422_v36 = vpop.xlane.xlu1 %6421 }
0x2837   :  { %8519 = vlog2.f32 %v6422_v36 }
0x2838   :  { %v6420_v26 = vpop.xlane.xlu0 %6419 }
0x2839   :  { %8521 = vlog2.f32 %v6420_v26 }
0x283a   :  { %v6426_v12 = vpop.xlane.xlu1 %6425 }
0x283b   :  { %8523 = vlog2.f32 %v6426_v12 }
0x283c   :  { %v6424_v40 = vpop.xlane.xlu0 %6423 }
0x283d   :  { %8525 = vlog2.f32 %v6424_v40 }
0x2840   :  { %v8512_v16 = vpop.eup %8511 }
0x2841   :  { %v8514_v15 = vpop.eup %8513  ;;  %6429 = vadd.xlane.f32.xlu1 %v8512_v16 }
0x2842   :  { %v8516_v0 = vpop.eup %8515  ;;  %v6434_v24 = vmul.f32 0.6931472, %v8514_v15 }
0x2843   :  { %v8518_v22 = vpop.eup %8517  ;;  %6427 = vadd.xlane.f32.xlu0 %v8516_v0 }
0x2844   :  { %v8520_v28 = vpop.eup %8519  ;;  %v6448_v45 = vadd.f32 %v6434_v24, %v12684_v20  ;;  %v6432_v31 = vmul.f32 0.6931472, %v8518_v22 }
0x2845   :  { %v6438_v42 = vmul.f32 0.6931472, %v8520_v28 }
0x2846   :  { %v8522_v47 = vpop.eup %8521  ;;  %v6456_v52 = vsub.f32 %v12665_v32, %v6448_v45  ;;  %v6447_v41 = vadd.f32 %v6432_v31, %v12686_v53 }
0x2847   :  { %v6450_v6 = vadd.f32 %v6438_v42, %v12688_v51  ;;  %v6436_v57 = vmul.f32 0.6931472, %v8522_v47 }
0x2848   :  { %v8524_v58 = vpop.eup %8523  ;;  %6464 = vst [vmem:[%s12769_s15 + $0x8] sm:$0xff] %v6456_v52  ;;  %v6455_v3 = vsub.f32 %v12667_v54, %v6447_v41 }
0x2849   :  { %v6458_v9 = vsub.f32 %v12670_v7, %v6450_v6  ;;  %v6449_v33 = vadd.f32 %v6436_v57, %v12692_v30  ;;  %v6442_v20 = vmul.f32 0.6931472, %v8524_v58 }
0x284a   :  { %v8526_v1 = vpop.eup %8525  ;;  %6463 = vst [vmem:[%s12769_s15] sm:$0xff] %v6455_v3 }
0x284b   :  { %6466 = vst [vmem:[%s12769_s15 + $0x18] sm:$0xff] %v6458_v9  ;;  %v6457_v32 = vsub.f32 %v12673_v14, %v6449_v33  ;;  %v6452_v53 = vadd.f32 %v6442_v20, %v12698_v59  ;;  %v6440_v51 = vmul.f32 0.6931472, %v8526_v1 }
0x284d   :  { %6465 = vst [vmem:[%s12769_s15 + $0x10] sm:$0xff] %v6457_v32  ;;  %v6460_v54 = vsub.f32 %v12676_v50, %v6452_v53  ;;  %v6451_v7 = vadd.f32 %v6440_v51, %v12702_v62 }
0x284f   :  { %6468 = vst [vmem:[%s12769_s15 + $0x28] sm:$0xff] %v6460_v54  ;;  %v6459_v30 = vsub.f32 %v12679_v13, %v6451_v7 }
0x2851   :  { %6467 = vst [vmem:[%s12769_s15 + $0x20] sm:$0xff] %v6459_v30 }
0x28ca   :  { %v6430_v14 = vpop.xlane.xlu1 %6429 }
0x28cb   :  { %8527 = vlog2.f32 %v6430_v14 }
0x28cc   :  { %v6428_v18 = vpop.xlane.xlu0 %6427 }
0x28cd   :  { %8529 = vlog2.f32 %v6428_v18 }
0x28d8   :  { %v8528_v38 = vpop.eup %8527 }
0x28d9   :  { %v6446_v21 = vmul.f32 0.6931472, %v8528_v38 }
0x28da   :  { %v8530_v59 = vpop.eup %8529 }
0x28db   :  { %v6454_v50 = vadd.f32 %v6446_v21, %v6390_v55  ;;  %v6444_v63 = vmul.f32 0.6931472, %v8530_v59 }
0x28dd   :  { %v6462_v49 = vsub.f32 %v12708_v48, %v6454_v50  ;;  %v6453_v62 = vadd.f32 %v6444_v63, %v6388_v8 }
0x28df   :  { %6470 = vst [vmem:[%s12769_s15 + $0x38] sm:$0xff] %v6462_v49  ;;  %v6461_v13 = vsub.f32 %v12710_v60, %v6453_v62 }
0x28e1   :  { %6469 = vst [vmem:[%s12769_s15 + $0x30] sm:$0xff] %v6461_v13 }
0x28e2   :  { %6475 = vsyncpa [#allocation7], 1 }
0x28e3   :  { %6476 = vsyncpa [#allocation9], 1 }

</bundles_post_ra>
